<compile_context>
chip_gen: v7x
topology: tpu7x:2x2x1
jax: 0.10.0
libtpu: 0.0.40
codegen_flags: <defaults>
</compile_context>

<pallas_src>
import jax
import jax.numpy as jnp
from jax.experimental import pallas as pl
from jax.experimental.pallas import tpu as pltpu

EMB = 768          # embedding_size
SEQ = 16           # max_seq_len (d_frames)
K = 4              # k  -> AdaptiveMaxPool2d((4, 768))
N_HIDDEN = 200
N_CLASSES = 2

HP = 256           # padded hidden dim (lane / MXU exact)
CP = 128           # padded class dim  (lane exact)


def _round_up(x, m):
    return (x + m - 1) // m * m


def _relu(x):
    return jnp.maximum(x, 0.0)


def _dot(a, b):
    return jnp.dot(a, b, preferred_element_type=jnp.float32)


def rbm_kernel(xd_ref, xt_ref,
               w2_0, b2_0, w2_1, b2_1,
               w1_0d, w1_0t, b1_0, w1_1, b1_1,
               w5, b5, w9, b9,
               out_ref):
    # ---- hoisted weight / bias loads (outside the unrolled K-loop) --------
    w1_0d_m = w1_0d[...]
    w1_1_m = w1_1[...]
    b1_1_v = b1_1[...]
    w9_m = w9[...]
    b9_v = b9[...]

    # ---- target branch (self.layers2): Linear -> ReLU -> Linear -> ReLU ---
    # TODO(synk): nn.Dropout(p=0.5) between layers is identity in eval mode;
    # stochastic dropout is intentionally not emulated.
    xt = xt_ref[...]
    xt = _relu(_dot(xt, w2_0[...]) + b2_0[...])
    xt = _relu(_dot(xt, w2_1[...]) + b2_1[...])

    # Loop-invariant target-side contribution to layers1[0], computed ONCE.
    xt_part = _dot(xt, w1_0t[...]) + b1_0[...]            # [TB, HP]

    xs = []
    for ii in range(K):
        # AdaptiveMaxPool2d((4, 768)) on [TB, 16, 768]: max over 4-row window.
        feats = jnp.max(xd_ref[:, 4 * ii:4 * (ii + 1), :], axis=1)   # [TB, EMB]
        # layers1[0]: Linear(768 + 200, 200) on cat(feats, xt)
        #   == feats @ W_drug_part + (xt @ W_target_part + b)   (hoisted)
        x = _relu(_dot(feats, w1_0d_m) + xt_part)
        # layers1[1]: Linear(200, 200) + ReLU   (dropout = identity)
        x = _relu(_dot(x, w1_1_m) + b1_1_v)
        xs.append(x)
        # per-branch head fc9 -> lane-aligned 128-wide column slab of out.
        out_ref[:, ii * CP:(ii + 1) * CP] = _dot(x, w9_m) + b9_v

    # fc5(cat(x_0..x_3)): lane-dim concat (256-aligned blocks) + one matmul
    # against the padded, block-aligned w5 [K*HP, HP].
    bbb = jnp.concatenate(xs, axis=1)                     # [TB, K*HP]
    bbb = _relu(_dot(bbb, w5[...]) + b5[...])
    out_ref[:, K * CP:(K + 1) * CP] = _dot(bbb, w9_m) + b9_v


def init_params(key, in_t_feats):
    """Deterministic synthetic LOGICAL parameters (weights stored as [in, out])."""
    ks = jax.random.split(key, 13)

    def w(k, shape, fan_in):
        return (jax.random.normal(k, shape, jnp.float32) / jnp.sqrt(fan_in)).astype(jnp.float32)

    w2_0 = w(ks[0], (in_t_feats, N_HIDDEN), in_t_feats)
    b2_0 = w(ks[1], (1, N_HIDDEN), in_t_feats)
    w2_1 = w(ks[2], (N_HIDDEN, N_HIDDEN), N_HIDDEN)
    b2_1 = w(ks[3], (1, N_HIDDEN), N_HIDDEN)
    # layers1[0] weight [768 + 200, 200], split into drug part and target part
    w1_0d = w(ks[4], (EMB, N_HIDDEN), EMB + N_HIDDEN)
    w1_0t = w(ks[5], (N_HIDDEN, N_HIDDEN), EMB + N_HIDDEN)
    b1_0 = w(ks[6], (1, N_HIDDEN), EMB + N_HIDDEN)
    w1_1 = w(ks[7], (N_HIDDEN, N_HIDDEN), N_HIDDEN)
    b1_1 = w(ks[8], (1, N_HIDDEN), N_HIDDEN)
    w5 = w(ks[9], (N_HIDDEN * K, N_HIDDEN), N_HIDDEN * K)
    b5 = w(ks[10], (1, N_HIDDEN), N_HIDDEN * K)
    w9 = w(ks[11], (N_HIDDEN, N_CLASSES), N_HIDDEN)
    b9 = w(ks[12], (1, N_CLASSES), N_HIDDEN)
    return (w2_0, b2_0, w2_1, b2_1, w1_0d, w1_0t, b1_0, w1_1, b1_1, w5, b5, w9, b9)


def pad_params(params, itp):
    """Zero-pad logical params to lane/MXU-exact shapes (200->256, 2->128)."""
    (w2_0, b2_0, w2_1, b2_1, w1_0d, w1_0t, b1_0, w1_1, b1_1, w5, b5, w9, b9) = params

    def p2(a, r, c):
        out = jnp.zeros((r, c), jnp.float32)
        return out.at[:a.shape[0], :a.shape[1]].set(a)

    # w5 rows correspond to the per-branch hidden blocks; pad each 200-row
    # block out to 256 rows so the concat layout inside the kernel matches.
    w5_p = jnp.zeros((K, HP, HP), jnp.float32)
    w5_p = w5_p.at[:, :N_HIDDEN, :N_HIDDEN].set(w5.reshape(K, N_HIDDEN, N_HIDDEN))
    w5_p = w5_p.reshape(K * HP, HP)

    return (p2(w2_0, itp, HP), p2(b2_0, 1, HP),
            p2(w2_1, HP, HP), p2(b2_1, 1, HP),
            p2(w1_0d, EMB, HP), p2(w1_0t, HP, HP), p2(b1_0, 1, HP),
            p2(w1_1, HP, HP), p2(b1_1, 1, HP),
            w5_p, p2(b5, 1, HP),
            p2(w9, HP, CP), p2(b9, 1, CP))


def rbm_forward(fea, params):
    B = fea.shape[0]
    drug_dim = SEQ * EMB
    in_t = fea.shape[1] - drug_dim
    itp = _round_up(in_t, 128)

    # Batch tile: 128 rows/step (fits v7x's 64 MiB VMEM with headroom; v5e/v6e
    # could use 256-512).  Tiny batches round up to a multiple of 8 sublanes.
    tb = min(128, _round_up(B, 8))
    b_pad = _round_up(B, tb)

    xd = jnp.zeros((b_pad, SEQ, EMB), jnp.float32)
    xd = xd.at[:B].set(fea[:, :drug_dim].reshape(B, SEQ, EMB))
    xt = jnp.zeros((b_pad, itp), jnp.float32)
    xt = xt.at[:B, :in_t].set(fea[:, drug_dim:])

    pp = pad_params(params, itp)

    def resident(arr):
        nd = arr.ndim
        return pl.BlockSpec(arr.shape, lambda i, _n=nd: (0,) * _n)

    in_specs = [
        pl.BlockSpec((tb, SEQ, EMB), lambda i: (i, 0, 0)),
        pl.BlockSpec((tb, itp), lambda i: (i, 0)),
    ] + [resident(p) for p in pp]
    out_specs = pl.BlockSpec((tb, (K + 1) * CP), lambda i: (i, 0))

    flops_per_row = 2 * (itp * HP + HP * HP              # layers2
                         + HP * HP                       # xt @ w1_0t (hoisted)
                         + K * (EMB * HP + HP * HP + HP * CP)
                         + K * HP * HP                   # fc5
                         + HP * CP)                      # final head
    weight_bytes = sum(int(p.size) * 4 for p in pp)
    io_bytes = 4 * b_pad * (SEQ * EMB + itp + (K + 1) * CP)
    cost = pl.CostEstimate(flops=int(flops_per_row) * int(b_pad),
                           transcendentals=0,
                           bytes_accessed=int(io_bytes + weight_bytes))

    out = pl.pallas_call(
        rbm_kernel,
        out_shape=jax.ShapeDtypeStruct((b_pad, (K + 1) * CP), jnp.float32),
        grid_spec=pltpu.PrefetchScalarGridSpec(
            num_scalar_prefetch=0,
            grid=(b_pad // tb,),
            in_specs=in_specs,
            out_specs=out_specs,
        ),
        compiler_params=pltpu.CompilerParams(
            dimension_semantics=("parallel",),
            vmem_limit_bytes=48 * 1024 * 1024),
        cost_estimate=cost,
    )(xd, xt, *pp)

    # Slice the 5 logical (B, 2) heads out of the lane-dense slab.
    return [out[:B, ii * CP: ii * CP + N_CLASSES] for ii in range(K + 1)]


def rbm_forward_ref(fea, params):
    """Plain-JAX reference (eval-mode dropout) using the LOGICAL params."""
    (w2_0, b2_0, w2_1, b2_1, w1_0d, w1_0t, b1_0, w1_1, b1_1, w5, b5, w9, b9) = params
    B = fea.shape[0]
    drug_dim = SEQ * EMB
    xd = fea[:, :drug_dim].reshape(B, SEQ, EMB)
    xt = fea[:, drug_dim:]
    xd = jnp.max(xd.reshape(B, K, SEQ // K, EMB), axis=2)   # AdaptiveMaxPool2d((4,768))
    xd = jnp.transpose(xd, (1, 0, 2))                        # [K, B, 768]
    xt = jax.nn.relu(xt @ w2_0 + b2_0)
    xt = jax.nn.relu(xt @ w2_1 + b2_1)
    w1_0 = jnp.concatenate([w1_0d, w1_0t], axis=0)
    outputs, bbb = [], None
    for ii in range(K):
        x = jnp.concatenate([xd[ii], xt], axis=1)
        x = jax.nn.relu(x @ w1_0 + b1_0)
        x = jax.nn.relu(x @ w1_1 + b1_1)
        outputs.append(x @ w9 + b9)
        bbb = x if ii == 0 else jnp.concatenate([bbb, x], axis=1)
    bbb = jax.nn.relu(bbb @ w5 + b5)
    outputs.append(bbb @ w9 + b9)
    return outputs


if __name__ == "__main__":
    B = 2
    IN_T_FEATS = 768                       # constructor arg in_t_feats

    key = jax.random.PRNGKey(0)
    k_fea, k_par = jax.random.split(key)
    fea = jax.random.normal(k_fea, (B, SEQ * EMB + IN_T_FEATS), jnp.float32)
    params = init_params(k_par, IN_T_FEATS)

    outs = rbm_forward(fea, params)
    outs = jax.block_until_ready(outs)

    refs = rbm_forward_ref(fea, params)
    for o, r in zip(outs, refs):
        assert o.shape == (B, N_CLASSES)
        assert jnp.allclose(o, r, atol=2e-4, rtol=2e-4)

    print("KERNEL_OK")
</pallas_src>

<mosaic_0001>
module attributes {stable_mosaic.version = 11 : i64} {
  func.func @rbm_kernel(%arg0: i32, %arg1: memref<8x16x768xf32, #tpu.memory_space<vmem>>, %arg2: memref<8x768xf32, #tpu.memory_space<vmem>>, %arg3: memref<768x256xf32, #tpu.memory_space<vmem>>, %arg4: memref<1x256xf32, #tpu.memory_space<vmem>>, %arg5: memref<256x256xf32, #tpu.memory_space<vmem>>, %arg6: memref<1x256xf32, #tpu.memory_space<vmem>>, %arg7: memref<768x256xf32, #tpu.memory_space<vmem>>, %arg8: memref<256x256xf32, #tpu.memory_space<vmem>>, %arg9: memref<1x256xf32, #tpu.memory_space<vmem>>, %arg10: memref<256x256xf32, #tpu.memory_space<vmem>>, %arg11: memref<1x256xf32, #tpu.memory_space<vmem>>, %arg12: memref<1024x256xf32, #tpu.memory_space<vmem>>, %arg13: memref<1x256xf32, #tpu.memory_space<vmem>>, %arg14: memref<256x128xf32, #tpu.memory_space<vmem>>, %arg15: memref<1x128xf32, #tpu.memory_space<vmem>>, %arg16: memref<8x640xf32, #tpu.memory_space<vmem>>) attributes {dimension_semantics = [#tpu.dimension_semantics<parallel>], iteration_bounds = array<i64: 1>, scalar_prefetch = 0 : i64, scratch_operands = 0 : i64, tpu.core_type = #tpu.core_type<tc>, window_params = [{transform_indices = @transform_0, window_bounds = array<i64: 8, 16, 768>}, {transform_indices = @transform_1, window_bounds = array<i64: 8, 768>}, {pipeline_mode = #tpu.pipeline_mode<synchronous>, transform_indices = @transform_2, window_bounds = array<i64: 768, 256>}, {pipeline_mode = #tpu.pipeline_mode<synchronous>, transform_indices = @transform_3, window_bounds = array<i64: 1, 256>}, {pipeline_mode = #tpu.pipeline_mode<synchronous>, transform_indices = @transform_4, window_bounds = array<i64: 256, 256>}, {pipeline_mode = #tpu.pipeline_mode<synchronous>, transform_indices = @transform_5, window_bounds = array<i64: 1, 256>}, {pipeline_mode = #tpu.pipeline_mode<synchronous>, transform_indices = @transform_6, window_bounds = array<i64: 768, 256>}, {pipeline_mode = #tpu.pipeline_mode<synchronous>, transform_indices = @transform_7, window_bounds = array<i64: 256, 256>}, {pipeline_mode = #tpu.pipeline_mode<synchronous>, transform_indices = @transform_8, window_bounds = array<i64: 1, 256>}, {pipeline_mode = #tpu.pipeline_mode<synchronous>, transform_indices = @transform_9, window_bounds = array<i64: 256, 256>}, {pipeline_mode = #tpu.pipeline_mode<synchronous>, transform_indices = @transform_10, window_bounds = array<i64: 1, 256>}, {pipeline_mode = #tpu.pipeline_mode<synchronous>, transform_indices = @transform_11, window_bounds = array<i64: 1024, 256>}, {pipeline_mode = #tpu.pipeline_mode<synchronous>, transform_indices = @transform_12, window_bounds = array<i64: 1, 256>}, {pipeline_mode = #tpu.pipeline_mode<synchronous>, transform_indices = @transform_13, window_bounds = array<i64: 256, 128>}, {pipeline_mode = #tpu.pipeline_mode<synchronous>, transform_indices = @transform_14, window_bounds = array<i64: 1, 128>}, {transform_indices = @transform_15, window_bounds = array<i64: 8, 640>}]} {
    %c0 = arith.constant 0 : index
    %c0_0 = arith.constant 0 : index
    %0 = vector.load %arg7[%c0, %c0_0] : memref<768x256xf32, #tpu.memory_space<vmem>>, vector<768x256xf32>
    %c0_1 = arith.constant 0 : index
    %c0_2 = arith.constant 0 : index
    %1 = vector.load %arg10[%c0_1, %c0_2] : memref<256x256xf32, #tpu.memory_space<vmem>>, vector<256x256xf32>
    %c0_3 = arith.constant 0 : index
    %c0_4 = arith.constant 0 : index
    %2 = vector.load %arg11[%c0_3, %c0_4] : memref<1x256xf32, #tpu.memory_space<vmem>>, vector<1x256xf32>
    %c0_5 = arith.constant 0 : index
    %c0_6 = arith.constant 0 : index
    %3 = vector.load %arg14[%c0_5, %c0_6] : memref<256x128xf32, #tpu.memory_space<vmem>>, vector<256x128xf32>
    %c0_7 = arith.constant 0 : index
    %c0_8 = arith.constant 0 : index
    %4 = vector.load %arg15[%c0_7, %c0_8] : memref<1x128xf32, #tpu.memory_space<vmem>>, vector<1x128xf32>
    %c0_9 = arith.constant 0 : index
    %c0_10 = arith.constant 0 : index
    %5 = vector.load %arg2[%c0_9, %c0_10] : memref<8x768xf32, #tpu.memory_space<vmem>>, vector<8x768xf32>
    %c0_11 = arith.constant 0 : index
    %c0_12 = arith.constant 0 : index
    %6 = vector.load %arg3[%c0_11, %c0_12] : memref<768x256xf32, #tpu.memory_space<vmem>>, vector<768x256xf32>
    %cst = arith.constant dense<0.000000e+00> : vector<8x256xf32>
    %7 = tpu.matmul %5, %6, %cst {dimension_numbers = #tpu.dot_dimension_numbers<[1], [0], [0], [1], [0, 0, 1, 1], [], []>} : vector<8x768xf32>, vector<768x256xf32>, vector<8x256xf32> -> vector<8x256xf32>
    %c0_13 = arith.constant 0 : index
    %c0_14 = arith.constant 0 : index
    %8 = vector.load %arg4[%c0_13, %c0_14] : memref<1x256xf32, #tpu.memory_space<vmem>>, vector<1x256xf32>
    %9 = vector.broadcast %8 : vector<1x256xf32> to vector<8x256xf32>
    %10 = arith.addf %7, %9 : vector<8x256xf32>
    %cst_15 = arith.constant 0.000000e+00 : f32
    %11 = vector.broadcast %cst_15 : f32 to vector<8x256xf32>
    %12 = arith.maximumf %10, %11 : vector<8x256xf32>
    %c0_16 = arith.constant 0 : index
    %c0_17 = arith.constant 0 : index
    %13 = vector.load %arg5[%c0_16, %c0_17] : memref<256x256xf32, #tpu.memory_space<vmem>>, vector<256x256xf32>
    %cst_18 = arith.constant dense<0.000000e+00> : vector<8x256xf32>
    %14 = tpu.matmul %12, %13, %cst_18 {dimension_numbers = #tpu.dot_dimension_numbers<[1], [0], [0], [1], [0, 0, 1, 1], [], []>} : vector<8x256xf32>, vector<256x256xf32>, vector<8x256xf32> -> vector<8x256xf32>
    %c0_19 = arith.constant 0 : index
    %c0_20 = arith.constant 0 : index
    %15 = vector.load %arg6[%c0_19, %c0_20] : memref<1x256xf32, #tpu.memory_space<vmem>>, vector<1x256xf32>
    %16 = vector.broadcast %15 : vector<1x256xf32> to vector<8x256xf32>
    %17 = arith.addf %14, %16 : vector<8x256xf32>
    %cst_21 = arith.constant 0.000000e+00 : f32
    %18 = vector.broadcast %cst_21 : f32 to vector<8x256xf32>
    %19 = arith.maximumf %17, %18 : vector<8x256xf32>
    %c0_22 = arith.constant 0 : index
    %c0_23 = arith.constant 0 : index
    %20 = vector.load %arg8[%c0_22, %c0_23] : memref<256x256xf32, #tpu.memory_space<vmem>>, vector<256x256xf32>
    %cst_24 = arith.constant dense<0.000000e+00> : vector<8x256xf32>
    %21 = tpu.matmul %19, %20, %cst_24 {dimension_numbers = #tpu.dot_dimension_numbers<[1], [0], [0], [1], [0, 0, 1, 1], [], []>} : vector<8x256xf32>, vector<256x256xf32>, vector<8x256xf32> -> vector<8x256xf32>
    %c0_25 = arith.constant 0 : index
    %c0_26 = arith.constant 0 : index
    %22 = vector.load %arg9[%c0_25, %c0_26] : memref<1x256xf32, #tpu.memory_space<vmem>>, vector<1x256xf32>
    %23 = vector.broadcast %22 : vector<1x256xf32> to vector<8x256xf32>
    %24 = arith.addf %21, %23 : vector<8x256xf32>
    %c0_27 = arith.constant 0 : index
    %c0_28 = arith.constant 0 : index
    %c0_29 = arith.constant 0 : index
    %25 = vector.load %arg1[%c0_27, %c0_28, %c0_29] : memref<8x16x768xf32, #tpu.memory_space<vmem>>, vector<8x4x768xf32>
    %cst_30 = arith.constant dense<0xFF800000> : vector<8x768xf32>
    %26 = vector.multi_reduction <maximumf>, %25, %cst_30 [1] : vector<8x4x768xf32> to vector<8x768xf32>
    %cst_31 = arith.constant dense<0.000000e+00> : vector<8x256xf32>
    %27 = tpu.matmul %26, %0, %cst_31 {dimension_numbers = #tpu.dot_dimension_numbers<[1], [0], [0], [1], [0, 0, 1, 1], [], []>} : vector<8x768xf32>, vector<768x256xf32>, vector<8x256xf32> -> vector<8x256xf32>
    %28 = arith.addf %27, %24 : vector<8x256xf32>
    %cst_32 = arith.constant 0.000000e+00 : f32
    %29 = vector.broadcast %cst_32 : f32 to vector<8x256xf32>
    %30 = arith.maximumf %28, %29 : vector<8x256xf32>
    %cst_33 = arith.constant dense<0.000000e+00> : vector<8x256xf32>
    %31 = tpu.matmul %30, %1, %cst_33 {dimension_numbers = #tpu.dot_dimension_numbers<[1], [0], [0], [1], [0, 0, 1, 1], [], []>} : vector<8x256xf32>, vector<256x256xf32>, vector<8x256xf32> -> vector<8x256xf32>
    %32 = vector.broadcast %2 : vector<1x256xf32> to vector<8x256xf32>
    %33 = arith.addf %31, %32 : vector<8x256xf32>
    %cst_34 = arith.constant 0.000000e+00 : f32
    %34 = vector.broadcast %cst_34 : f32 to vector<8x256xf32>
    %35 = arith.maximumf %33, %34 : vector<8x256xf32>
    %cst_35 = arith.constant dense<0.000000e+00> : vector<8x128xf32>
    %36 = tpu.matmul %35, %3, %cst_35 {dimension_numbers = #tpu.dot_dimension_numbers<[1], [0], [0], [1], [0, 0, 1, 1], [], []>} : vector<8x256xf32>, vector<256x128xf32>, vector<8x128xf32> -> vector<8x128xf32>
    %37 = vector.broadcast %4 : vector<1x128xf32> to vector<8x128xf32>
    %38 = arith.addf %36, %37 : vector<8x128xf32>
    %c0_36 = arith.constant 0 : index
    %c0_37 = arith.constant 0 : index
    %39 = vector.load %arg16[%c0_36, %c0_37] : memref<8x640xf32, #tpu.memory_space<vmem>>, vector<8x128xf32>
    tpu.vector_store %arg16[%c0_36, %c0_37], %38 {strides = array<i32>} : memref<8x640xf32, #tpu.memory_space<vmem>>, vector<8x128xf32>,
    %c0_38 = arith.constant 0 : index
    %c4 = arith.constant 4 : index
    %c0_39 = arith.constant 0 : index
    %40 = vector.load %arg1[%c0_38, %c4, %c0_39] : memref<8x16x768xf32, #tpu.memory_space<vmem>>, vector<8x4x768xf32>
    %cst_40 = arith.constant dense<0xFF800000> : vector<8x768xf32>
    %41 = vector.multi_reduction <maximumf>, %40, %cst_40 [1] : vector<8x4x768xf32> to vector<8x768xf32>
    %cst_41 = arith.constant dense<0.000000e+00> : vector<8x256xf32>
    %42 = tpu.matmul %41, %0, %cst_41 {dimension_numbers = #tpu.dot_dimension_numbers<[1], [0], [0], [1], [0, 0, 1, 1], [], []>} : vector<8x768xf32>, vector<768x256xf32>, vector<8x256xf32> -> vector<8x256xf32>
    %43 = arith.addf %42, %24 : vector<8x256xf32>
    %cst_42 = arith.constant 0.000000e+00 : f32
    %44 = vector.broadcast %cst_42 : f32 to vector<8x256xf32>
    %45 = arith.maximumf %43, %44 : vector<8x256xf32>
    %cst_43 = arith.constant dense<0.000000e+00> : vector<8x256xf32>
    %46 = tpu.matmul %45, %1, %cst_43 {dimension_numbers = #tpu.dot_dimension_numbers<[1], [0], [0], [1], [0, 0, 1, 1], [], []>} : vector<8x256xf32>, vector<256x256xf32>, vector<8x256xf32> -> vector<8x256xf32>
    %47 = vector.broadcast %2 : vector<1x256xf32> to vector<8x256xf32>
    %48 = arith.addf %46, %47 : vector<8x256xf32>
    %cst_44 = arith.constant 0.000000e+00 : f32
    %49 = vector.broadcast %cst_44 : f32 to vector<8x256xf32>
    %50 = arith.maximumf %48, %49 : vector<8x256xf32>
    %cst_45 = arith.constant dense<0.000000e+00> : vector<8x128xf32>
    %51 = tpu.matmul %50, %3, %cst_45 {dimension_numbers = #tpu.dot_dimension_numbers<[1], [0], [0], [1], [0, 0, 1, 1], [], []>} : vector<8x256xf32>, vector<256x128xf32>, vector<8x128xf32> -> vector<8x128xf32>
    %52 = vector.broadcast %4 : vector<1x128xf32> to vector<8x128xf32>
    %53 = arith.addf %51, %52 : vector<8x128xf32>
    %c0_46 = arith.constant 0 : index
    %c128 = arith.constant 128 : index
    %54 = vector.load %arg16[%c0_46, %c128] : memref<8x640xf32, #tpu.memory_space<vmem>>, vector<8x128xf32>
    tpu.vector_store %arg16[%c0_46, %c128], %53 {strides = array<i32>} : memref<8x640xf32, #tpu.memory_space<vmem>>, vector<8x128xf32>,
    %c0_47 = arith.constant 0 : index
    %c8 = arith.constant 8 : index
    %c0_48 = arith.constant 0 : index
    %55 = vector.load %arg1[%c0_47, %c8, %c0_48] : memref<8x16x768xf32, #tpu.memory_space<vmem>>, vector<8x4x768xf32>
    %cst_49 = arith.constant dense<0xFF800000> : vector<8x768xf32>
    %56 = vector.multi_reduction <maximumf>, %55, %cst_49 [1] : vector<8x4x768xf32> to vector<8x768xf32>
    %cst_50 = arith.constant dense<0.000000e+00> : vector<8x256xf32>
    %57 = tpu.matmul %56, %0, %cst_50 {dimension_numbers = #tpu.dot_dimension_numbers<[1], [0], [0], [1], [0, 0, 1, 1], [], []>} : vector<8x768xf32>, vector<768x256xf32>, vector<8x256xf32> -> vector<8x256xf32>
    %58 = arith.addf %57, %24 : vector<8x256xf32>
    %cst_51 = arith.constant 0.000000e+00 : f32
    %59 = vector.broadcast %cst_51 : f32 to vector<8x256xf32>
    %60 = arith.maximumf %58, %59 : vector<8x256xf32>
    %cst_52 = arith.constant dense<0.000000e+00> : vector<8x256xf32>
    %61 = tpu.matmul %60, %1, %cst_52 {dimension_numbers = #tpu.dot_dimension_numbers<[1], [0], [0], [1], [0, 0, 1, 1], [], []>} : vector<8x256xf32>, vector<256x256xf32>, vector<8x256xf32> -> vector<8x256xf32>
    %62 = vector.broadcast %2 : vector<1x256xf32> to vector<8x256xf32>
    %63 = arith.addf %61, %62 : vector<8x256xf32>
    %cst_53 = arith.constant 0.000000e+00 : f32
    %64 = vector.broadcast %cst_53 : f32 to vector<8x256xf32>
    %65 = arith.maximumf %63, %64 : vector<8x256xf32>
    %cst_54 = arith.constant dense<0.000000e+00> : vector<8x128xf32>
    %66 = tpu.matmul %65, %3, %cst_54 {dimension_numbers = #tpu.dot_dimension_numbers<[1], [0], [0], [1], [0, 0, 1, 1], [], []>} : vector<8x256xf32>, vector<256x128xf32>, vector<8x128xf32> -> vector<8x128xf32>
    %67 = vector.broadcast %4 : vector<1x128xf32> to vector<8x128xf32>
    %68 = arith.addf %66, %67 : vector<8x128xf32>
    %c0_55 = arith.constant 0 : index
    %c256 = arith.constant 256 : index
    %69 = vector.load %arg16[%c0_55, %c256] : memref<8x640xf32, #tpu.memory_space<vmem>>, vector<8x128xf32>
    tpu.vector_store %arg16[%c0_55, %c256], %68 {strides = array<i32>} : memref<8x640xf32, #tpu.memory_space<vmem>>, vector<8x128xf32>,
    %c0_56 = arith.constant 0 : index
    %c12 = arith.constant 12 : index
    %c0_57 = arith.constant 0 : index
    %70 = vector.load %arg1[%c0_56, %c12, %c0_57] : memref<8x16x768xf32, #tpu.memory_space<vmem>>, vector<8x4x768xf32>
    %cst_58 = arith.constant dense<0xFF800000> : vector<8x768xf32>
    %71 = vector.multi_reduction <maximumf>, %70, %cst_58 [1] : vector<8x4x768xf32> to vector<8x768xf32>
    %cst_59 = arith.constant dense<0.000000e+00> : vector<8x256xf32>
    %72 = tpu.matmul %71, %0, %cst_59 {dimension_numbers = #tpu.dot_dimension_numbers<[1], [0], [0], [1], [0, 0, 1, 1], [], []>} : vector<8x768xf32>, vector<768x256xf32>, vector<8x256xf32> -> vector<8x256xf32>
    %73 = arith.addf %72, %24 : vector<8x256xf32>
    %cst_60 = arith.constant 0.000000e+00 : f32
    %74 = vector.broadcast %cst_60 : f32 to vector<8x256xf32>
    %75 = arith.maximumf %73, %74 : vector<8x256xf32>
    %cst_61 = arith.constant dense<0.000000e+00> : vector<8x256xf32>
    %76 = tpu.matmul %75, %1, %cst_61 {dimension_numbers = #tpu.dot_dimension_numbers<[1], [0], [0], [1], [0, 0, 1, 1], [], []>} : vector<8x256xf32>, vector<256x256xf32>, vector<8x256xf32> -> vector<8x256xf32>
    %77 = vector.broadcast %2 : vector<1x256xf32> to vector<8x256xf32>
    %78 = arith.addf %76, %77 : vector<8x256xf32>
    %cst_62 = arith.constant 0.000000e+00 : f32
    %79 = vector.broadcast %cst_62 : f32 to vector<8x256xf32>
    %80 = arith.maximumf %78, %79 : vector<8x256xf32>
    %cst_63 = arith.constant dense<0.000000e+00> : vector<8x128xf32>
    %81 = tpu.matmul %80, %3, %cst_63 {dimension_numbers = #tpu.dot_dimension_numbers<[1], [0], [0], [1], [0, 0, 1, 1], [], []>} : vector<8x256xf32>, vector<256x128xf32>, vector<8x128xf32> -> vector<8x128xf32>
    %82 = vector.broadcast %4 : vector<1x128xf32> to vector<8x128xf32>
    %83 = arith.addf %81, %82 : vector<8x128xf32>
    %c0_64 = arith.constant 0 : index
    %c384 = arith.constant 384 : index
    %84 = vector.load %arg16[%c0_64, %c384] : memref<8x640xf32, #tpu.memory_space<vmem>>, vector<8x128xf32>
    tpu.vector_store %arg16[%c0_64, %c384], %83 {strides = array<i32>} : memref<8x640xf32, #tpu.memory_space<vmem>>, vector<8x128xf32>,
    %85 = tpu.concatenate %35, %50, %65, %80 in 1 : vector<8x256xf32>, vector<8x256xf32>, vector<8x256xf32>, vector<8x256xf32> -> vector<8x1024xf32>
    %c0_65 = arith.constant 0 : index
    %c0_66 = arith.constant 0 : index
    %86 = vector.load %arg12[%c0_65, %c0_66] : memref<1024x256xf32, #tpu.memory_space<vmem>>, vector<1024x256xf32>
    %cst_67 = arith.constant dense<0.000000e+00> : vector<8x256xf32>
    %87 = tpu.matmul %85, %86, %cst_67 {dimension_numbers = #tpu.dot_dimension_numbers<[1], [0], [0], [1], [0, 0, 1, 1], [], []>} : vector<8x1024xf32>, vector<1024x256xf32>, vector<8x256xf32> -> vector<8x256xf32>
    %c0_68 = arith.constant 0 : index
    %c0_69 = arith.constant 0 : index
    %88 = vector.load %arg13[%c0_68, %c0_69] : memref<1x256xf32, #tpu.memory_space<vmem>>, vector<1x256xf32>
    %89 = vector.broadcast %88 : vector<1x256xf32> to vector<8x256xf32>
    %90 = arith.addf %87, %89 : vector<8x256xf32>
    %cst_70 = arith.constant 0.000000e+00 : f32
    %91 = vector.broadcast %cst_70 : f32 to vector<8x256xf32>
    %92 = arith.maximumf %90, %91 : vector<8x256xf32>
    %cst_71 = arith.constant dense<0.000000e+00> : vector<8x128xf32>
    %93 = tpu.matmul %92, %3, %cst_71 {dimension_numbers = #tpu.dot_dimension_numbers<[1], [0], [0], [1], [0, 0, 1, 1], [], []>} : vector<8x256xf32>, vector<256x128xf32>, vector<8x128xf32> -> vector<8x128xf32>
    %94 = vector.broadcast %4 : vector<1x128xf32> to vector<8x128xf32>
    %95 = arith.addf %93, %94 : vector<8x128xf32>
    %c0_72 = arith.constant 0 : index
    %c512 = arith.constant 512 : index
    %96 = vector.load %arg16[%c0_72, %c512] : memref<8x640xf32, #tpu.memory_space<vmem>>, vector<8x128xf32>
    tpu.vector_store %arg16[%c0_72, %c512], %95 {strides = array<i32>} : memref<8x640xf32, #tpu.memory_space<vmem>>, vector<8x128xf32>,
    return
  }
  func.func @transform_0(%arg0: i32) -> (i32, i32, i32) {
    %c0_i32 = arith.constant 0 : i32
    %c0_i32_0 = arith.constant 0 : i32
    %c0_i32_1 = arith.constant 0 : i32
    return %arg0, %c0_i32, %c0_i32_0 : i32, i32, i32
  }
  func.func @transform_1(%arg0: i32) -> (i32, i32) {
    %c0_i32 = arith.constant 0 : i32
    %c0_i32_0 = arith.constant 0 : i32
    return %arg0, %c0_i32 : i32, i32
  }
  func.func @transform_2(%arg0: i32) -> (i32, i32) {
    %c0_i32 = arith.constant 0 : i32
    %c0_i32_0 = arith.constant 0 : i32
    %c0_i32_1 = arith.constant 0 : i32
    return %c0_i32, %c0_i32_0 : i32, i32
  }
  func.func @transform_3(%arg0: i32) -> (i32, i32) {
    %c0_i32 = arith.constant 0 : i32
    %c0_i32_0 = arith.constant 0 : i32
    %c0_i32_1 = arith.constant 0 : i32
    return %c0_i32, %c0_i32_0 : i32, i32
  }
  func.func @transform_4(%arg0: i32) -> (i32, i32) {
    %c0_i32 = arith.constant 0 : i32
    %c0_i32_0 = arith.constant 0 : i32
    %c0_i32_1 = arith.constant 0 : i32
    return %c0_i32, %c0_i32_0 : i32, i32
  }
  func.func @transform_5(%arg0: i32) -> (i32, i32) {
    %c0_i32 = arith.constant 0 : i32
    %c0_i32_0 = arith.constant 0 : i32
    %c0_i32_1 = arith.constant 0 : i32
    return %c0_i32, %c0_i32_0 : i32, i32
  }
  func.func @transform_6(%arg0: i32) -> (i32, i32) {
    %c0_i32 = arith.constant 0 : i32
    %c0_i32_0 = arith.constant 0 : i32
    %c0_i32_1 = arith.constant 0 : i32
    return %c0_i32, %c0_i32_0 : i32, i32
  }
  func.func @transform_7(%arg0: i32) -> (i32, i32) {
    %c0_i32 = arith.constant 0 : i32
    %c0_i32_0 = arith.constant 0 : i32
    %c0_i32_1 = arith.constant 0 : i32
    return %c0_i32, %c0_i32_0 : i32, i32
  }
  func.func @transform_8(%arg0: i32) -> (i32, i32) {
    %c0_i32 = arith.constant 0 : i32
    %c0_i32_0 = arith.constant 0 : i32
    %c0_i32_1 = arith.constant 0 : i32
    return %c0_i32, %c0_i32_0 : i32, i32
  }
  func.func @transform_9(%arg0: i32) -> (i32, i32) {
    %c0_i32 = arith.constant 0 : i32
    %c0_i32_0 = arith.constant 0 : i32
    %c0_i32_1 = arith.constant 0 : i32
    return %c0_i32, %c0_i32_0 : i32, i32
  }
  func.func @transform_10(%arg0: i32) -> (i32, i32) {
    %c0_i32 = arith.constant 0 : i32
    %c0_i32_0 = arith.constant 0 : i32
    %c0_i32_1 = arith.constant 0 : i32
    return %c0_i32, %c0_i32_0 : i32, i32
  }
  func.func @transform_11(%arg0: i32) -> (i32, i32) {
    %c0_i32 = arith.constant 0 : i32
    %c0_i32_0 = arith.constant 0 : i32
    %c0_i32_1 = arith.constant 0 : i32
    return %c0_i32, %c0_i32_0 : i32, i32
  }
  func.func @transform_12(%arg0: i32) -> (i32, i32) {
    %c0_i32 = arith.constant 0 : i32
    %c0_i32_0 = arith.constant 0 : i32
    %c0_i32_1 = arith.constant 0 : i32
    return %c0_i32, %c0_i32_0 : i32, i32
  }
  func.func @transform_13(%arg0: i32) -> (i32, i32) {
    %c0_i32 = arith.constant 0 : i32
    %c0_i32_0 = arith.constant 0 : i32
    %c0_i32_1 = arith.constant 0 : i32
    return %c0_i32, %c0_i32_0 : i32, i32
  }
  func.func @transform_14(%arg0: i32) -> (i32, i32) {
    %c0_i32 = arith.constant 0 : i32
    %c0_i32_0 = arith.constant 0 : i32
    %c0_i32_1 = arith.constant 0 : i32
    return %c0_i32, %c0_i32_0 : i32, i32
  }
  func.func @transform_15(%arg0: i32) -> (i32, i32) {
    %c0_i32 = arith.constant 0 : i32
    %c0_i32_0 = arith.constant 0 : i32
    return %arg0, %c0_i32 : i32, i32
  }
}

</mosaic_0001>

<bundles_post_ra>
// kernel: tpu_custom_call.1
= control target key start
LH: loop header
LB: loop body
LE: loop exit
PB: predicated region body
PF: predicated region fallthrough
CT: control target
= control target key end

     0   :  { %20 = vsyncpa [#allocation3], 0  ;;  %s9053_s0 = inlined_call_operand.hbm [shape: f32[8,16,768], index: 0, kind: input, shape index: {}]   ;;  %s9054_s1 = inlined_call_operand.hbm [shape: f32[8,768], index: 1, kind: input, shape index: {}]   ;;  %s9055_s2 = inlined_call_operand.hbm [shape: f32[768,256], index: 2, kind: input, shape index: {}]   ;;  %s9056_s3 = inlined_call_operand.vmem [shape: f32[1,256], index: 3, kind: input, shape index: {}]   ;;  %s9057_s4 = inlined_call_operand.hbm [shape: f32[256,256], index: 4, kind: input, shape index: {}]   ;;  %s9058_s5 = inlined_call_operand.vmem [shape: f32[1,256], index: 5, kind: input, shape index: {}]   ;;  %s9059_s6 = inlined_call_operand.hbm [shape: f32[768,256], index: 6, kind: input, shape index: {}]   ;;  %s9060_s7 = inlined_call_operand.hbm [shape: f32[256,256], index: 7, kind: input, shape index: {}]   ;;  %s9061_s8 = inlined_call_operand.vmem [shape: f32[1,256], index: 8, kind: input, shape index: {}]   ;;  %s9062_s9 = inlined_call_operand.hbm [shape: f32[256,256], index: 9, kind: input, shape index: {}]   ;;  %s9063_s10 = inlined_call_operand.vmem [shape: f32[1,256], index: 10, kind: input, shape index: {}]   ;;  %s9064_s11 = inlined_call_operand.hbm [shape: f32[1024,256], index: 11, kind: input, shape index: {}]   ;;  %s9065_s12 = inlined_call_operand.vmem [shape: f32[1,256], index: 12, kind: input, shape index: {}]   ;;  %s9066_s13 = inlined_call_operand.hbm [shape: f32[256,128], index: 13, kind: input, shape index: {}]   ;;  %s9067_s14 = inlined_call_operand.vmem [shape: f32[1,128], index: 14, kind: input, shape index: {}]   ;;  %s9068_s15 = inlined_call_operand.hbm [shape: f32[8,640], index: 15, kind: output, shape index: {}]  }
   0x1   :  { %21 = vsyncpa [#allocation6], 0 }
   0x2   :  { %22 = vsyncpa [#allocation9], 0 }
   0x3   :  { %23 = vsyncpa [#allocation12], 0 }
   0x4   :  { %24 = vsyncpa [#allocation15], 0 }
   0x5   :  { %25 = vsyncpa [#allocation4], 0  ;;  %s7433_s18 = smov [#allocation5]   ;;  %s7201_s22 = scalar_lea.hbm %s9054_s1, 768 }
   0x6   :  { %s44_s19 = sshll.u32 %s7433_s18, 4  ;;  %p7202_p0 = scmp.ne.s32.totalorder %s9054_s1, %s7201_s22  ;;  %s45_s19 = int_to_ptr.vmem [resolvable:$true] %s44_s19 }
   0x7   :  { %p7205_p1 = scmp.lt.u32.totalorder %s7201_s22, %s9054_s1 }
   0x9   :  { %p7207_p2 = pnand %p7205_p1, %p7202_p0 }
   0xb   :  { %7210 = shalt.err (!%p7207_p2)
}
   0xc   :  { %s7211_s27 = scalar_lea.vmem %s45_s19, 768  ;;  %p7216_p4 = scmp.lt.s32.totalorder %s45_s19, %s45_s19 }
   0xd   :  { %p7212_p3 = scmp.ne.s32.totalorder %s45_s19, %s7211_s27  ;;  %p7217_p5 = scmp.lt.s32.totalorder %s7211_s27, %s7211_s27 }
   0xf   :  { %p7218_p6 = por %p7217_p5, %p7216_p4 }
  0x11   :  { %p7219_p7 = pnand %p7218_p6, %p7212_p3 }
  0x13   :  { %7222 = shalt.err (!%p7219_p7)
}
  0x14   :  { %47 = dma.hbm_to_vmem [thread:$0]  %s9054_s1, 768, %s45_s19, [#allocation6]  }
  0x15   :  { %s7434_s30 = smov [#allocation8]   ;;  %s7435_s17 = smov [#allocation11]  }
  0x16   :  { %s67_s16 = sshll.u32 %s7434_s30, 4  ;;  %s93_s18 = sshll.u32 %s7435_s17, 4  ;;  %s68_s16 = int_to_ptr.vmem [resolvable:$true] %s67_s16  ;;  %s94_s18 = int_to_ptr.vmem [resolvable:$true] %s93_s18 }
  0x17   :  { %s7223_s22 = scalar_lea.hbm %s9057_s4, 8192 }
  0x18   :  { %p7224_p8 = scmp.ne.s32.totalorder %s9057_s4, %s7223_s22  ;;  %p7227_p9 = scmp.lt.u32.totalorder %s7223_s22, %s9057_s4 }
  0x1a   :  { %p7229_p10 = pnand %p7227_p9, %p7224_p8 }
  0x1c   :  { %7232 = shalt.err (!%p7229_p10)
}
  0x1d   :  { %s7233_s1 = scalar_lea.vmem %s68_s16, 8192  ;;  %p7238_p12 = scmp.lt.s32.totalorder %s68_s16, %s68_s16 }
  0x1e   :  { %p7234_p11 = scmp.ne.s32.totalorder %s68_s16, %s7233_s1  ;;  %p7239_p13 = scmp.lt.s32.totalorder %s7233_s1, %s7233_s1 }
  0x20   :  { %p7240_p0 = por %p7239_p13, %p7238_p12 }
  0x22   :  { %p7241_p1 = pnand %p7240_p0, %p7234_p11 }
  0x24   :  { %7244 = shalt.err (!%p7241_p1)
}
  0x25   :  { %s7436_s19 = smov 256   ;;  %s7437_s27 = smov 16  }
  0x26   :  { %73 = dma.hbm_to_vmem [thread:$0]  %s9057_s4, 8192, %s68_s16, [#allocation9], %s7436_s19, %s7436_s19, %s7437_s27  }
  0x27   :  { %s7245_s20 = scalar_lea.hbm %s9060_s7, 8192 }
  0x28   :  { %p7246_p2 = scmp.ne.s32.totalorder %s9060_s7, %s7245_s20  ;;  %p7249_p3 = scmp.lt.u32.totalorder %s7245_s20, %s9060_s7 }
  0x2a   :  { %p7251_p4 = pnand %p7249_p3, %p7246_p2 }
  0x2c   :  { %7254 = shalt.err (!%p7251_p4)
}
  0x2d   :  { %s7255_s25 = scalar_lea.vmem %s94_s18, 8192  ;;  %p7260_p6 = scmp.lt.s32.totalorder %s94_s18, %s94_s18 }
  0x2e   :  { %p7256_p5 = scmp.ne.s32.totalorder %s94_s18, %s7255_s25  ;;  %p7261_p7 = scmp.lt.s32.totalorder %s7255_s25, %s7255_s25 }
  0x30   :  { %p7262_p8 = por %p7261_p7, %p7260_p6 }
  0x32   :  { %p7263_p9 = pnand %p7262_p8, %p7256_p5 }
  0x34   :  { %7266 = shalt.err (!%p7263_p9)
}
  0x35   :  { %99 = dma.hbm_to_vmem [thread:$0]  %s9060_s7, 8192, %s94_s18, [#allocation12], %s7436_s19, %s7436_s19, %s7437_s27  }
  0x36   :  { %s7438_s26 = smov [#allocation14]   ;;  %s7439_s28 = smov [#allocation2]  }
  0x37   :  { %s121_s1 = sshll.u32 %s7438_s26, 4  ;;  %s31_s29 = sshll.u32 %s7439_s28, 4  ;;  %s122_s1 = int_to_ptr.vmem [resolvable:$true] %s121_s1  ;;  %s32_s29 = int_to_ptr.vmem [resolvable:$true] %s31_s29 }
  0x38   :  { %s7267_s20 = scalar_lea.hbm %s9064_s11, 32768 }
  0x39   :  { %p7268_p10 = scmp.ne.s32.totalorder %s9064_s11, %s7267_s20  ;;  %p7271_p11 = scmp.lt.u32.totalorder %s7267_s20, %s9064_s11 }
  0x3b   :  { %p7273_p12 = pnand %p7271_p11, %p7268_p10 }
  0x3d   :  { %7276 = shalt.err (!%p7273_p12)
}
  0x3e   :  { %s7277_s7 = scalar_lea.vmem %s122_s1, 32768  ;;  %p7282_p0 = scmp.lt.s32.totalorder %s122_s1, %s122_s1 }
  0x3f   :  { %p7278_p13 = scmp.ne.s32.totalorder %s122_s1, %s7277_s7  ;;  %p7283_p1 = scmp.lt.s32.totalorder %s7277_s7, %s7277_s7 }
  0x41   :  { %p7284_p2 = por %p7283_p1, %p7282_p0 }
  0x43   :  { %p7285_p3 = pnand %p7284_p2, %p7278_p13 }
  0x45   :  { %7288 = shalt.err (!%p7285_p3)
}
  0x46   :  { %127 = dma.hbm_to_vmem [thread:$0]  %s9064_s11, 32768, %s122_s1, [#allocation15], %s7436_s19, %s7436_s19, %s7437_s27  }
  0x47   :  { %s7289_s26 = scalar_lea.hbm %s9053_s0, 12288 }
  0x48   :  { %p7290_p4 = scmp.ne.s32.totalorder %s9053_s0, %s7289_s26  ;;  %p7293_p5 = scmp.lt.u32.totalorder %s7289_s26, %s9053_s0 }
  0x4a   :  { %p7295_p6 = pnand %p7293_p5, %p7290_p4 }
  0x4c   :  { %7298 = shalt.err (!%p7295_p6)
}
  0x4d   :  { %s7299_s21 = scalar_lea.vmem %s32_s29, 12288  ;;  %p7304_p8 = scmp.lt.s32.totalorder %s32_s29, %s32_s29 }
  0x4e   :  { %p7300_p7 = scmp.ne.s32.totalorder %s32_s29, %s7299_s21  ;;  %p7305_p9 = scmp.lt.s32.totalorder %s7299_s21, %s7299_s21 }
  0x50   :  { %p7306_p10 = por %p7305_p9, %p7304_p8 }
  0x52   :  { %p7307_p11 = pnand %p7306_p10, %p7300_p7 }
  0x54   :  { %7310 = shalt.err (!%p7307_p11)
}
  0x55   :  { %s7440_s11 = smov 768   ;;  %s7441_s1 = smov 48  }
  0x56   :  { %37 = dma.hbm_to_vmem [thread:$0]  %s9053_s0, 12288, %s32_s29, [#allocation3], %s7440_s11, %s7440_s11, %s7441_s1  }
  0x57   :  { %s7442_s24 = smov [#allocation7]   ;;  %s7443_s18 = smov [#allocation10]  }
  0x58   :  { %s53_s7 = sshll.u32 %s7442_s24, 4  ;;  %s81_s25 = sshll.u32 %s7443_s18, 4  ;;  %s54_s7 = int_to_ptr.vmem [resolvable:$true] %s53_s7  ;;  %s82_s25 = int_to_ptr.vmem [resolvable:$true] %s81_s25 }
  0x59   :  { %s7311_s26 = scalar_lea.hbm %s9055_s2, 24576 }
  0x5a   :  { %p7312_p12 = scmp.ne.s32.totalorder %s9055_s2, %s7311_s26  ;;  %p7315_p13 = scmp.lt.u32.totalorder %s7311_s26, %s9055_s2 }
  0x5c   :  { %p7317_p0 = pnand %p7315_p13, %p7312_p12 }
  0x5e   :  { %7320 = shalt.err (!%p7317_p0)
}
  0x5f   :  { %s7321_s0 = scalar_lea.vmem %s54_s7, 24576  ;;  %p7326_p2 = scmp.lt.s32.totalorder %s54_s7, %s54_s7 }
  0x60   :  { %p7322_p1 = scmp.ne.s32.totalorder %s54_s7, %s7321_s0  ;;  %p7327_p3 = scmp.lt.s32.totalorder %s7321_s0, %s7321_s0 }
  0x62   :  { %p7328_p4 = por %p7327_p3, %p7326_p2 }
  0x64   :  { %p7329_p5 = pnand %p7328_p4, %p7322_p1 }
  0x66   :  { %7332 = shalt.err (!%p7329_p5)
}
  0x67   :  { %59 = dma.hbm_to_vmem [thread:$0]  %s9055_s2, 24576, %s54_s7, [#allocation6], %s7436_s19, %s7436_s19, %s7437_s27  }
  0x68   :  { %s7333_s22 = scalar_lea.hbm %s9059_s6, 24576 }
  0x69   :  { %p7334_p6 = scmp.ne.s32.totalorder %s9059_s6, %s7333_s22  ;;  %p7337_p7 = scmp.lt.u32.totalorder %s7333_s22, %s9059_s6 }
  0x6b   :  { %p7339_p8 = pnand %p7337_p7, %p7334_p6 }
  0x6d   :  { %7342 = shalt.err (!%p7339_p8)
}
  0x6e   :  { %s7343_s16 = scalar_lea.vmem %s82_s25, 24576  ;;  %p7348_p10 = scmp.lt.s32.totalorder %s82_s25, %s82_s25 }
  0x6f   :  { %p7344_p9 = scmp.ne.s32.totalorder %s82_s25, %s7343_s16  ;;  %p7349_p11 = scmp.lt.s32.totalorder %s7343_s16, %s7343_s16 }
  0x71   :  { %p7350_p12 = por %p7349_p11, %p7348_p10 }
  0x73   :  { %p7351_p13 = pnand %p7350_p12, %p7344_p9 }
  0x75   :  { %7354 = shalt.err (!%p7351_p13)
}
  0x76   :  { %87 = dma.hbm_to_vmem [thread:$0]  %s9059_s6, 24576, %s82_s25, [#allocation9], %s7436_s19, %s7436_s19, %s7437_s27  }
  0x77   :  { %s7444_s26 = smov [#allocation13]   ;;  %s7445_s30 = smov [#allocation16]  }
  0x78   :  { %s107_s28 = sshll.u32 %s7444_s26, 4  ;;  %s135_s17 = sshll.u32 %s7445_s30, 4  ;;  %s108_s28 = int_to_ptr.vmem [resolvable:$true] %s107_s28  ;;  %s136_s17 = int_to_ptr.vmem [resolvable:$true] %s135_s17 }
  0x79   :  { %s7355_s29 = scalar_lea.hbm %s9062_s9, 8192 }
  0x7a   :  { %p7356_p0 = scmp.ne.s32.totalorder %s9062_s9, %s7355_s29  ;;  %p7359_p1 = scmp.lt.u32.totalorder %s7355_s29, %s9062_s9 }
  0x7c   :  { %p7361_p2 = pnand %p7359_p1, %p7356_p0 }
  0x7e   :  { %7364 = shalt.err (!%p7361_p2)
}
  0x7f   :  { %s7365_s6 = scalar_lea.vmem %s108_s28, 8192  ;;  %p7370_p4 = scmp.lt.s32.totalorder %s108_s28, %s108_s28 }
  0x80   :  { %p7366_p3 = scmp.ne.s32.totalorder %s108_s28, %s7365_s6  ;;  %p7371_p5 = scmp.lt.s32.totalorder %s7365_s6, %s7365_s6 }
  0x82   :  { %p7372_p6 = por %p7371_p5, %p7370_p4 }
  0x84   :  { %p7373_p7 = pnand %p7372_p6, %p7366_p3 }
  0x86   :  { %7376 = shalt.err (!%p7373_p7)
}
  0x87   :  { %113 = dma.hbm_to_vmem [thread:$0]  %s9062_s9, 8192, %s108_s28, [#allocation12], %s7436_s19, %s7436_s19, %s7437_s27  }
  0x88   :  { %s7377_s4 = scalar_lea.hbm %s9066_s13, 4096 }
  0x89   :  { %p7378_p8 = scmp.ne.s32.totalorder %s9066_s13, %s7377_s4  ;;  %p7381_p9 = scmp.lt.u32.totalorder %s7377_s4, %s9066_s13 }
  0x8b   :  { %p7383_p10 = pnand %p7381_p9, %p7378_p8 }
  0x8d   :  { %7386 = shalt.err (!%p7383_p10)
}
  0x8e   :  { %s7387_s30 = scalar_lea.vmem %s136_s17, 4096  ;;  %p7392_p12 = scmp.lt.s32.totalorder %s136_s17, %s136_s17 }
  0x8f   :  { %p7388_p11 = scmp.ne.s32.totalorder %s136_s17, %s7387_s30  ;;  %p7393_p13 = scmp.lt.s32.totalorder %s7387_s30, %s7387_s30 }
  0x91   :  { %p7394_p0 = por %p7393_p13, %p7392_p12 }
  0x93   :  { %p7395_p1 = pnand %p7394_p0, %p7388_p11 }
  0x95   :  { %7398 = shalt.err (!%p7395_p1)
}
  0x96   :  { %s7446_s9 = smov 128   ;;  %s7447_s19 = smov 8  }
  0x97   :  { %141 = dma.hbm_to_vmem [thread:$0]  %s9066_s13, 4096, %s136_s17, [#allocation15], %s7446_s9, %s7446_s9, %s7447_s19  }
  0x98   :  { %7421 = dma.done.wait [#allocation3], 12288  }
  0x99   :  { %7422 = vsyncadd [#allocation3], 4294955008 }
  0x9a   :  { %7423 = dma.done.wait [#allocation6], 25344  }
  0x9b   :  { %7424 = vsyncadd [#allocation6], 4294941952 }
  0x9c   :  { %7425 = dma.done.wait [#allocation9], 32768  }
  0x9d   :  { %7426 = vsyncadd [#allocation9], 4294934528 }
  0x9e   :  { %7427 = dma.done.wait [#allocation12], 16384  }
  0x9f   :  { %7428 = vsyncadd [#allocation12], 4294950912 }
  0xa0   :  { %7429 = dma.done.wait [#allocation15], 36864  }
  0xa1   :  { %7430 = vsyncadd [#allocation15], 4294930432  ;;  %v468_v0 = vld [vmem:[#allocation7 + $0x8] sm:$0xff]  ;;  %v470_v1 = vld [vmem:[#allocation7 + $0x18] sm:$0xff]  ;;  %vm1230_vm0 = vcmask 1043456   ;;  %vm1615_vm1 = vcmask 1041409  }
  0xa2   :  { %v467_v2 = vld [vmem:[#allocation7] sm:$0xff]  ;;  %v5384_v3 = vpack.c.bf16 %v470_v1, %v468_v0  ;;  %v469_v4 = vld [vmem:[#allocation7 + $0x10] sm:$0xff]  ;;  %v472_v5 = vld [vmem:[#allocation7 + $0x28] sm:$0xff]  ;;  %vm1617_vm2 = vcmask 1042434   ;;  %vm1619_vm3 = vcmask 1043459   ;;  %vm1621_vm4 = vcmask 1044484  }
  0xa3   :  { %v474_v6 = vld [vmem:[#allocation7 + $0x38] sm:$0xff]  ;;  %v5386_v7 = vpack.c.bf16 %v469_v4, %v467_v2  ;;  %v471_v9 = vld [vmem:[#allocation7 + $0x20] sm:$0xff]  ;;  %v473_v10 = vld [vmem:[#allocation7 + $0x30] sm:$0xff]  ;;  %vm1623_vm5 = vcmask 1045509   ;;  %vm1625_vm6 = vcmask 1046534   ;;  %vm1627_vm7 = vcmask 1047559  }
  0xa4   :  { %v5388_v8 = vpack.c.bf16 %v474_v6, %v472_v5  ;;  %v476_v11 = vld [vmem:[#allocation7 + $0x48] sm:$0xff]  ;;  %5385 = vmatprep.subr.bf16.mxu0 %v5384_v3  ;;  %v478_v12 = vld [vmem:[#allocation7 + $0x58] sm:$0xff]  ;;  %v5390_v13 = vpack.c.bf16 %v473_v10, %v471_v9  ;;  %v475_v15 = vld [vmem:[#allocation7 + $0x40] sm:$0xff]  ;;  %vm2094_vm8 = vcmask 1047556   ;;  %s7448_s24 = smov [#allocation17]  }
  0xa5   :  { %5387 = vmatpush1.bf16.msra.mxu0 %v5386_v7  ;;  %v5392_v14 = vpack.c.bf16 %v478_v12, %v476_v11  ;;  %v477_v16 = vld [vmem:[#allocation7 + $0x50] sm:$0xff]  ;;  %v480_v17 = vld [vmem:[#allocation7 + $0x68] sm:$0xff]  ;;  %v482_v18 = vld [vmem:[#allocation7 + $0x78] sm:$0xff]  ;;  %s5195_s18 = sshll.u32 %s7448_s24, 4  ;;  %s5196_s18 = int_to_ptr.vmem [resolvable:$true] %s5195_s18 }
  0xa6   :  { %5389 = vmatprep.subr.bf16.mxu0 %v5388_v8  ;;  %v5394_v19 = vpack.c.bf16 %v477_v16, %v475_v15  ;;  %v5396_v20 = vpack.c.bf16 %v482_v18, %v480_v17  ;;  %v479_v21 = vld [vmem:[#allocation7 + $0x60] sm:$0xff]  ;;  %v481_v22 = vld [vmem:[#allocation7 + $0x70] sm:$0xff]  ;;  %v484_v23 = vld [vmem:[#allocation7 + $0x88] sm:$0xff]  ;;  %p7404_p3 = scmp.lt.s32.totalorder %s5196_s18, %s5196_s18 }
  0xa7   :  { %v486_v24 = vld [vmem:[#allocation7 + $0x98] sm:$0xff]  ;;  %v5398_v25 = vpack.c.bf16 %v481_v22, %v479_v21  ;;  %v483_v27 = vld [vmem:[#allocation7 + $0x80] sm:$0xff]  ;;  %v485_v28 = vld [vmem:[#allocation7 + $0x90] sm:$0xff] }
  0xa8   :  { %v5400_v26 = vpack.c.bf16 %v486_v24, %v484_v23  ;;  %v488_v29 = vld [vmem:[#allocation7 + $0xa8] sm:$0xff]  ;;  %v490_v30 = vld [vmem:[#allocation7 + $0xb8] sm:$0xff]  ;;  %v5402_v31 = vpack.c.bf16 %v485_v28, %v483_v27  ;;  %v487_v33 = vld [vmem:[#allocation7 + $0xa0] sm:$0xff] }
  0xa9   :  { %5391 = vmatpush1.bf16.msra.mxu0 %v5390_v13  ;;  %v5404_v32 = vpack.c.bf16 %v490_v30, %v488_v29  ;;  %v489_v34 = vld [vmem:[#allocation7 + $0xb0] sm:$0xff]  ;;  %v492_v35 = vld [vmem:[#allocation7 + $0xc8] sm:$0xff]  ;;  %v494_v36 = vld [vmem:[#allocation7 + $0xd8] sm:$0xff] }
  0xaa   :  { %5393 = vmatprep.subr.bf16.mxu0 %v5392_v14  ;;  %v5406_v37 = vpack.c.bf16 %v489_v34, %v487_v33  ;;  %v5408_v38 = vpack.c.bf16 %v494_v36, %v492_v35  ;;  %v491_v39 = vld [vmem:[#allocation7 + $0xc0] sm:$0xff]  ;;  %v493_v40 = vld [vmem:[#allocation7 + $0xd0] sm:$0xff]  ;;  %v462_v41 = vld [vmem:[#allocation5 + $0x8] sm:$0xff] }
  0xab   :  { %v496_v42 = vld [vmem:[#allocation7 + $0xe8] sm:$0xff]  ;;  %v498_v43 = vld [vmem:[#allocation7 + $0xf8] sm:$0xff]  ;;  %735 = vmatprep.mubr.f32.mxu0 %v462_v41  ;;  %v5410_v44 = vpack.c.bf16 %v493_v40, %v491_v39  ;;  %v495_v46 = vld [vmem:[#allocation7 + $0xe0] sm:$0xff] }
  0xac   :  { %v5412_v45 = vpack.c.bf16 %v498_v43, %v496_v42  ;;  %v497_v47 = vld [vmem:[#allocation7 + $0xf0] sm:$0xff]  ;;  %v500_v48 = vld [vmem:[#allocation7 + $0x108] sm:$0xff]  ;;  %v502_v49 = vld [vmem:[#allocation7 + $0x118] sm:$0xff] }
  0xad   :  { %5395 = vmatpush1.bf16.msra.mxu0 %v5394_v19  ;;  %v5414_v50 = vpack.c.bf16 %v497_v47, %v495_v46  ;;  %v5416_v51 = vpack.c.bf16 %v502_v49, %v500_v48  ;;  %v499_v52 = vld [vmem:[#allocation7 + $0x100] sm:$0xff]  ;;  %v501_v53 = vld [vmem:[#allocation7 + $0x110] sm:$0xff]  ;;  %v504_v54 = vld [vmem:[#allocation7 + $0x128] sm:$0xff] }
  0xae   :  { %5397 = vmatprep.subr.bf16.mxu0 %v5396_v20  ;;  %v506_v55 = vld [vmem:[#allocation7 + $0x138] sm:$0xff]  ;;  %v5418_v56 = vpack.c.bf16 %v501_v53, %v499_v52  ;;  %v503_v58 = vld [vmem:[#allocation7 + $0x120] sm:$0xff]  ;;  %v505_v59 = vld [vmem:[#allocation7 + $0x130] sm:$0xff] }
  0xaf   :  { %v5420_v57 = vpack.c.bf16 %v506_v55, %v504_v54  ;;  %v508_v60 = vld [vmem:[#allocation7 + $0x148] sm:$0xff]  ;;  %v510_v61 = vld [vmem:[#allocation7 + $0x158] sm:$0xff]  ;;  %v5422_v62 = vpack.c.bf16 %v505_v59, %v503_v58  ;;  %v507_v0 = vld [vmem:[#allocation7 + $0x140] sm:$0xff] }
  0xb0   :  { %v5424_v63 = vpack.c.bf16 %v510_v61, %v508_v60  ;;  %v509_v1 = vld [vmem:[#allocation7 + $0x150] sm:$0xff]  ;;  %v512_v2 = vld [vmem:[#allocation7 + $0x168] sm:$0xff]  ;;  %v514_v3 = vld [vmem:[#allocation7 + $0x178] sm:$0xff] }
  0xb1   :  { %5399 = vmatpush1.bf16.msra.mxu0 %v5398_v25  ;;  %v5426_v4 = vpack.c.bf16 %v509_v1, %v507_v0  ;;  %v5428_v5 = vpack.c.bf16 %v514_v3, %v512_v2  ;;  %v511_v6 = vld [vmem:[#allocation7 + $0x160] sm:$0xff]  ;;  %v513_v7 = vld [vmem:[#allocation7 + $0x170] sm:$0xff]  ;;  %v516_v8 = vld [vmem:[#allocation7 + $0x188] sm:$0xff] }
  0xb2   :  { %5401 = vmatprep.subr.bf16.mxu0 %v5400_v26  ;;  %v518_v9 = vld [vmem:[#allocation7 + $0x198] sm:$0xff]  ;;  %v5430_v10 = vpack.c.bf16 %v513_v7, %v511_v6  ;;  %v515_v12 = vld [vmem:[#allocation7 + $0x180] sm:$0xff]  ;;  %v517_v13 = vld [vmem:[#allocation7 + $0x190] sm:$0xff] }
  0xb3   :  { %v5432_v11 = vpack.c.bf16 %v518_v9, %v516_v8  ;;  %v520_v14 = vld [vmem:[#allocation7 + $0x1a8] sm:$0xff]  ;;  %v522_v15 = vld [vmem:[#allocation7 + $0x1b8] sm:$0xff]  ;;  %v5434_v16 = vpack.c.bf16 %v517_v13, %v515_v12  ;;  %v519_v18 = vld [vmem:[#allocation7 + $0x1a0] sm:$0xff] }
  0xb4   :  { %v5436_v17 = vpack.c.bf16 %v522_v15, %v520_v14  ;;  %v521_v19 = vld [vmem:[#allocation7 + $0x1b0] sm:$0xff]  ;;  %v524_v20 = vld [vmem:[#allocation7 + $0x1c8] sm:$0xff]  ;;  %v526_v21 = vld [vmem:[#allocation7 + $0x1d8] sm:$0xff] }
  0xb5   :  { %5403 = vmatpush1.bf16.msra.mxu0 %v5402_v31  ;;  %v5438_v22 = vpack.c.bf16 %v521_v19, %v519_v18  ;;  %v5440_v23 = vpack.c.bf16 %v526_v21, %v524_v20  ;;  %v523_v24 = vld [vmem:[#allocation7 + $0x1c0] sm:$0xff]  ;;  %v525_v25 = vld [vmem:[#allocation7 + $0x1d0] sm:$0xff]  ;;  %v528_v26 = vld [vmem:[#allocation7 + $0x1e8] sm:$0xff] }
  0xb6   :  { %5405 = vmatprep.subr.bf16.mxu0 %v5404_v32  ;;  %v530_v27 = vld [vmem:[#allocation7 + $0x1f8] sm:$0xff]  ;;  %v5442_v28 = vpack.c.bf16 %v525_v25, %v523_v24  ;;  %v527_v30 = vld [vmem:[#allocation7 + $0x1e0] sm:$0xff]  ;;  %v529_v31 = vld [vmem:[#allocation7 + $0x1f0] sm:$0xff] }
  0xb7   :  { %v5444_v29 = vpack.c.bf16 %v530_v27, %v528_v26  ;;  %v532_v32 = vld [vmem:[#allocation7 + $0x208] sm:$0xff]  ;;  %v534_v33 = vld [vmem:[#allocation7 + $0x218] sm:$0xff]  ;;  %v5446_v34 = vpack.c.bf16 %v529_v31, %v527_v30  ;;  %v531_v36 = vld [vmem:[#allocation7 + $0x200] sm:$0xff] }
  0xb8   :  { %v5448_v35 = vpack.c.bf16 %v534_v33, %v532_v32  ;;  %v538_v39 = vld [vmem:[#allocation7 + $0x238] sm:$0xff]  ;;  %v461_v40 = vld [vmem:[#allocation5] sm:$0xff]  ;;  %v535_v43 = vld [vmem:[#allocation7 + $0x220] sm:$0xff] }
  0xb9   :  { %5407 = vmatpush1.bf16.msra.mxu0 %v5406_v37  ;;  %v533_v37 = vld [vmem:[#allocation7 + $0x210] sm:$0xff]  ;;  %v540_v46 = vld [vmem:[#allocation7 + $0x248] sm:$0xff]  ;;  %v542_v47 = vld [vmem:[#allocation7 + $0x258] sm:$0xff] }
  0xba   :  { %5409 = vmatprep.subr.bf16.mxu0 %v5408_v38  ;;  %v536_v38 = vld [vmem:[#allocation7 + $0x228] sm:$0xff]  ;;  %v5450_v41 = vpack.c.bf16 %v533_v37, %v531_v36  ;;  %v5456_v49 = vpack.c.bf16 %v542_v47, %v540_v46  ;;  %v546_v53 = vld [vmem:[#allocation7 + $0x278] sm:$0xff]  ;;  %v579_v46 = vld [vmem:[#allocation7 + $0x380] sm:$0xff] }
  0xbb   :  { %v5452_v42 = vpack.c.bf16 %v538_v39, %v536_v38  ;;  %v544_v52 = vld [vmem:[#allocation7 + $0x268] sm:$0xff]  ;;  %v550_v59 = vld [vmem:[#allocation7 + $0x298] sm:$0xff]  ;;  %v581_v47 = vld [vmem:[#allocation7 + $0x390] sm:$0xff] }
  0xbc   :  { %v5460_v55 = vpack.c.bf16 %v546_v53, %v544_v52  ;;  %v548_v58 = vld [vmem:[#allocation7 + $0x288] sm:$0xff]  ;;  %v554_v1 = vld [vmem:[#allocation7 + $0x2b8] sm:$0xff]  ;;  %v583_v52 = vld [vmem:[#allocation7 + $0x3a0] sm:$0xff] }
  0xbd   :  { %5411 = vmatpush1.bf16.msra.mxu0 %v5410_v44  ;;  %v537_v44 = vld [vmem:[#allocation7 + $0x230] sm:$0xff]  ;;  %v5464_v61 = vpack.c.bf16 %v550_v59, %v548_v58  ;;  %v552_v0 = vld [vmem:[#allocation7 + $0x2a8] sm:$0xff]  ;;  %v558_v7 = vld [vmem:[#allocation7 + $0x2d8] sm:$0xff] }
  0xbe   :  { %5413 = vmatprep.subr.bf16.mxu0 %v5412_v45  ;;  %v464_v45 = vld [vmem:[#allocation5 + $0x18] sm:$0xff]  ;;  %v5454_v48 = vpack.c.bf16 %v537_v44, %v535_v43  ;;  %v5468_v3 = vpack.c.bf16 %v554_v1, %v552_v0  ;;  %v562_v13 = vld [vmem:[#allocation7 + $0x2f8] sm:$0xff]  ;;  %v585_v53 = vld [vmem:[#allocation7 + $0x3b0] sm:$0xff] }
  0xbf   :  { %v556_v6 = vld [vmem:[#allocation7 + $0x2c8] sm:$0xff]  ;;  %v566_v19 = vld [vmem:[#allocation7 + $0x318] sm:$0xff]  ;;  %v587_v58 = vld [vmem:[#allocation7 + $0x3c0] sm:$0xff] }
  0xc0   :  { %v5472_v9 = vpack.c.bf16 %v558_v7, %v556_v6  ;;  %v560_v12 = vld [vmem:[#allocation7 + $0x2e8] sm:$0xff]  ;;  %v570_v25 = vld [vmem:[#allocation7 + $0x338] sm:$0xff]  ;;  %v589_v59 = vld [vmem:[#allocation7 + $0x3d0] sm:$0xff] }
  0xc1   :  { %5415 = vmatpush1.bf16.msra.mxu0 %v5414_v50  ;;  %v539_v50 = vld [vmem:[#allocation7 + $0x240] sm:$0xff]  ;;  %v5476_v15 = vpack.c.bf16 %v562_v13, %v560_v12  ;;  %v564_v18 = vld [vmem:[#allocation7 + $0x308] sm:$0xff]  ;;  %v574_v31 = vld [vmem:[#allocation7 + $0x358] sm:$0xff] }
  0xc2   :  { %5417 = vmatprep.subr.bf16.mxu0 %v5416_v51  ;;  %v541_v51 = vld [vmem:[#allocation7 + $0x250] sm:$0xff]  ;;  %v5480_v21 = vpack.c.bf16 %v566_v19, %v564_v18  ;;  %v568_v24 = vld [vmem:[#allocation7 + $0x328] sm:$0xff]  ;;  %v578_v37 = vld [vmem:[#allocation7 + $0x378] sm:$0xff] }
  0xc3   :  { %v5458_v54 = vpack.c.bf16 %v541_v51, %v539_v50  ;;  %v5484_v27 = vpack.c.bf16 %v570_v25, %v568_v24  ;;  %v572_v30 = vld [vmem:[#allocation7 + $0x348] sm:$0xff]  ;;  %v582_v43 = vld [vmem:[#allocation7 + $0x398] sm:$0xff]  ;;  %v5498_v50 = vpack.c.bf16 %v581_v47, %v579_v46  ;;  %v591_v0 = vld [vmem:[#allocation7 + $0x3e0] sm:$0xff] }
  0xc4   :  { %v5488_v33 = vpack.c.bf16 %v574_v31, %v572_v30  ;;  %v576_v36 = vld [vmem:[#allocation7 + $0x368] sm:$0xff]  ;;  %v593_v1 = vld [vmem:[#allocation7 + $0x3f0] sm:$0xff]  ;;  %v595_v6 = vld [vmem:[#allocation7 + $0x400] sm:$0xff] }
  0xc5   :  { %5419 = vmatpush1.bf16.msra.mxu0 %v5418_v56  ;;  %v543_v56 = vld [vmem:[#allocation7 + $0x260] sm:$0xff]  ;;  %v5492_v39 = vpack.c.bf16 %v578_v37, %v576_v36  ;;  %v597_v7 = vld [vmem:[#allocation7 + $0x410] sm:$0xff]  ;;  %v624_v46 = vld [vmem:[#allocation7 + $0x4e8] sm:$0xff] }
  0xc6   :  { %5421 = vmatprep.subr.bf16.mxu0 %v5420_v57  ;;  %v545_v57 = vld [vmem:[#allocation7 + $0x270] sm:$0xff]  ;;  %v599_v13 = vld [vmem:[#allocation7 + $0x420] sm:$0xff]  ;;  %v626_v47 = vld [vmem:[#allocation7 + $0x4f8] sm:$0xff] }
  0xc7   :  { %v5462_v60 = vpack.c.bf16 %v545_v57, %v543_v56  ;;  %v5502_v56 = vpack.c.bf16 %v585_v53, %v583_v52  ;;  %v628_v52 = vld [vmem:[#allocation7 + $0x508] sm:$0xff]  ;;  %v630_v53 = vld [vmem:[#allocation7 + $0x518] sm:$0xff] }
  0xc9   :  { %5423 = vmatpush1.bf16.msra.mxu0 %v5422_v62  ;;  %v547_v62 = vld [vmem:[#allocation7 + $0x280] sm:$0xff] }
  0xca   :  { %5425 = vmatprep.subr.bf16.mxu0 %v5424_v63  ;;  %v549_v63 = vld [vmem:[#allocation7 + $0x290] sm:$0xff] }
  0xcb   :  { %v5466_v2 = vpack.c.bf16 %v549_v63, %v547_v62  ;;  %v5506_v62 = vpack.c.bf16 %v589_v59, %v587_v58  ;;  %v632_v58 = vld [vmem:[#allocation7 + $0x528] sm:$0xff]  ;;  %v634_v59 = vld [vmem:[#allocation7 + $0x538] sm:$0xff] }
  0xcd   :  { %5427 = vmatpush1.bf16.msra.mxu0 %v5426_v4  ;;  %v551_v4 = vld [vmem:[#allocation7 + $0x2a0] sm:$0xff] }
  0xce   :  { %5429 = vmatprep.subr.bf16.mxu0 %v5428_v5  ;;  %v553_v5 = vld [vmem:[#allocation7 + $0x2b0] sm:$0xff] }
  0xcf   :  { %v5470_v8 = vpack.c.bf16 %v553_v5, %v551_v4  ;;  %v5510_v4 = vpack.c.bf16 %v593_v1, %v591_v0  ;;  %v636_v0 = vld [vmem:[#allocation7 + $0x548] sm:$0xff]  ;;  %v638_v1 = vld [vmem:[#allocation7 + $0x558] sm:$0xff] }
  0xd1   :  { %5431 = vmatpush1.bf16.msra.mxu0 %v5430_v10  ;;  %v555_v10 = vld [vmem:[#allocation7 + $0x2c0] sm:$0xff] }
  0xd2   :  { %5433 = vmatprep.subr.bf16.mxu0 %v5432_v11  ;;  %v557_v11 = vld [vmem:[#allocation7 + $0x2d0] sm:$0xff] }
  0xd3   :  { %v5474_v14 = vpack.c.bf16 %v557_v11, %v555_v10  ;;  %v463_v10 = vld [vmem:[#allocation5 + $0x10] sm:$0xff]  ;;  %v5514_v11 = vpack.c.bf16 %v597_v7, %v595_v6  ;;  %v640_v6 = vld [vmem:[#allocation7 + $0x568] sm:$0xff]  ;;  %v642_v7 = vld [vmem:[#allocation7 + $0x578] sm:$0xff] }
  0xd5   :  { %5435 = vmatpush1.bf16.msra.mxu0 %v5434_v16  ;;  %v559_v16 = vld [vmem:[#allocation7 + $0x2e0] sm:$0xff] }
  0xd6   :  { %5437 = vmatprep.subr.bf16.mxu0 %v5436_v17  ;;  %v561_v17 = vld [vmem:[#allocation7 + $0x2f0] sm:$0xff] }
  0xd7   :  { %v5478_v20 = vpack.c.bf16 %v561_v17, %v559_v16  ;;  %v604_v16 = vld [vmem:[#allocation7 + $0x448] sm:$0xff]  ;;  %v606_v17 = vld [vmem:[#allocation7 + $0x458] sm:$0xff] }
  0xd8   :  { %v5520_v19 = vpack.c.bf16 %v606_v17, %v604_v16  ;;  %v643_v16 = vld [vmem:[#allocation7 + $0x580] sm:$0xff]  ;;  %v645_v17 = vld [vmem:[#allocation7 + $0x590] sm:$0xff] }
  0xd9   :  { %5439 = vmatpush1.bf16.msra.mxu0 %v5438_v22  ;;  %v563_v22 = vld [vmem:[#allocation7 + $0x300] sm:$0xff] }
  0xda   :  { %5441 = vmatprep.subr.bf16.mxu0 %v5440_v23  ;;  %v565_v23 = vld [vmem:[#allocation7 + $0x310] sm:$0xff] }
  0xdb   :  { %v5482_v26 = vpack.c.bf16 %v565_v23, %v563_v22  ;;  %v608_v22 = vld [vmem:[#allocation7 + $0x468] sm:$0xff]  ;;  %v610_v23 = vld [vmem:[#allocation7 + $0x478] sm:$0xff] }
  0xdc   :  { %v5524_v25 = vpack.c.bf16 %v610_v23, %v608_v22  ;;  %v647_v22 = vld [vmem:[#allocation7 + $0x5a0] sm:$0xff]  ;;  %v649_v23 = vld [vmem:[#allocation7 + $0x5b0] sm:$0xff] }
  0xdd   :  { %5443 = vmatpush1.bf16.msra.mxu0 %v5442_v28  ;;  %v567_v28 = vld [vmem:[#allocation7 + $0x320] sm:$0xff] }
  0xde   :  { %5445 = vmatprep.subr.bf16.mxu0 %v5444_v29  ;;  %v569_v29 = vld [vmem:[#allocation7 + $0x330] sm:$0xff] }
  0xdf   :  { %v5486_v32 = vpack.c.bf16 %v569_v29, %v567_v28  ;;  %v612_v28 = vld [vmem:[#allocation7 + $0x488] sm:$0xff]  ;;  %v614_v29 = vld [vmem:[#allocation7 + $0x498] sm:$0xff] }
  0xe0   :  { %v5528_v31 = vpack.c.bf16 %v614_v29, %v612_v28  ;;  %v651_v28 = vld [vmem:[#allocation7 + $0x5c0] sm:$0xff]  ;;  %v653_v29 = vld [vmem:[#allocation7 + $0x5d0] sm:$0xff] }
  0xe1   :  { %5447 = vmatpush1.bf16.msra.mxu0 %v5446_v34  ;;  %v571_v34 = vld [vmem:[#allocation7 + $0x340] sm:$0xff] }
  0xe2   :  { %5449 = vmatprep.subr.bf16.mxu0 %v5448_v35  ;;  %v573_v35 = vld [vmem:[#allocation7 + $0x350] sm:$0xff] }
  0xe3   :  { %v5490_v38 = vpack.c.bf16 %v573_v35, %v571_v34  ;;  %v616_v34 = vld [vmem:[#allocation7 + $0x4a8] sm:$0xff]  ;;  %v618_v35 = vld [vmem:[#allocation7 + $0x4b8] sm:$0xff] }
  0xe4   :  { %736 = vmatmul.mubr.f32.vlgmr.msra.gmra.mrb[0].mxu0 %v461_v40  ;;  %v575_v40 = vld [vmem:[#allocation7 + $0x360] sm:$0xff]  ;;  %v5532_v37 = vpack.c.bf16 %v618_v35, %v616_v34  ;;  %v657_v35 = vld [vmem:[#allocation7 + $0x5f0] sm:$0xff] }
  0xe5   :  { %5451 = vmatpush1.bf16.msra.mxu0 %v5450_v41  ;;  %806 = vmatprep.mubr.f32.mxu0 %v464_v45  ;;  %v577_v41 = vld [vmem:[#allocation7 + $0x370] sm:$0xff]  ;;  %v655_v34 = vld [vmem:[#allocation7 + $0x5e0] sm:$0xff] }
  0xe6   :  { %5453 = vmatprep.subr.bf16.mxu0 %v5452_v42  ;;  %v580_v42 = vld [vmem:[#allocation7 + $0x388] sm:$0xff]  ;;  %v5494_v44 = vpack.c.bf16 %v577_v41, %v575_v40  ;;  %v622_v41 = vld [vmem:[#allocation7 + $0x4d8] sm:$0xff] }
  0xe7   :  { %v5496_v45 = vpack.c.bf16 %v582_v43, %v580_v42  ;;  %v620_v40 = vld [vmem:[#allocation7 + $0x4c8] sm:$0xff] }
  0xe8   :  { %v5536_v43 = vpack.c.bf16 %v622_v41, %v620_v40  ;;  %v886_v40 = vld [vmem:[#allocation8] sm:$0xff]  ;;  %v888_v41 = vld [vmem:[#allocation8 + $0x10] sm:$0xff] }
  0xe9   :  { %5455 = vmatpush1.bf16.msra.mxu0 %v5454_v48  ;;  %v584_v48 = vld [vmem:[#allocation7 + $0x3a8] sm:$0xff] }
  0xea   :  { %5457 = vmatprep.subr.bf16.mxu0 %v5456_v49  ;;  %v586_v49 = vld [vmem:[#allocation7 + $0x3b8] sm:$0xff] }
  0xeb   :  { %v5500_v51 = vpack.c.bf16 %v586_v49, %v584_v48  ;;  %v5540_v49 = vpack.c.bf16 %v626_v47, %v624_v46  ;;  %v890_v47 = vld [vmem:[#allocation8 + $0x20] sm:$0xff] }
  0xed   :  { %5459 = vmatpush1.bf16.msra.mxu0 %v5458_v54  ;;  %v588_v54 = vld [vmem:[#allocation7 + $0x3c8] sm:$0xff] }
  0xee   :  { %5461 = vmatprep.subr.bf16.mxu0 %v5460_v55  ;;  %v590_v55 = vld [vmem:[#allocation7 + $0x3d8] sm:$0xff] }
  0xef   :  { %v5504_v57 = vpack.c.bf16 %v590_v55, %v588_v54  ;;  %v5544_v55 = vpack.c.bf16 %v630_v53, %v628_v52  ;;  %v894_v53 = vld [vmem:[#allocation8 + $0x40] sm:$0xff] }
  0xf1   :  { %5463 = vmatpush1.bf16.msra.mxu0 %v5462_v60  ;;  %v592_v60 = vld [vmem:[#allocation7 + $0x3e8] sm:$0xff] }
  0xf2   :  { %5465 = vmatprep.subr.bf16.mxu0 %v5464_v61  ;;  %v594_v61 = vld [vmem:[#allocation7 + $0x3f8] sm:$0xff] }
  0xf3   :  { %v5508_v63 = vpack.c.bf16 %v594_v61, %v592_v60  ;;  %v5548_v61 = vpack.c.bf16 %v634_v59, %v632_v58  ;;  %v898_v59 = vld [vmem:[#allocation8 + $0x60] sm:$0xff] }
  0xf5   :  { %5467 = vmatpush1.bf16.msra.mxu0 %v5466_v2  ;;  %v596_v2 = vld [vmem:[#allocation7 + $0x408] sm:$0xff] }
  0xf6   :  { %5469 = vmatprep.subr.bf16.mxu0 %v5468_v3  ;;  %v598_v3 = vld [vmem:[#allocation7 + $0x418] sm:$0xff] }
  0xf7   :  { %v5512_v5 = vpack.c.bf16 %v598_v3, %v596_v2  ;;  %v5552_v3 = vpack.c.bf16 %v638_v1, %v636_v0  ;;  %v902_v1 = vld [vmem:[#allocation8 + $0x80] sm:$0xff] }
  0xf9   :  { %5471 = vmatpush1.bf16.msra.mxu0 %v5470_v8  ;;  %v600_v8 = vld [vmem:[#allocation7 + $0x428] sm:$0xff] }
  0xfa   :  { %5473 = vmatprep.subr.bf16.mxu0 %v5472_v9  ;;  %v602_v9 = vld [vmem:[#allocation7 + $0x438] sm:$0xff] }
  0xfb   :  { %v5516_v12 = vpack.c.bf16 %v602_v9, %v600_v8  ;;  %v5556_v9 = vpack.c.bf16 %v642_v7, %v640_v6  ;;  %v906_v7 = vld [vmem:[#allocation8 + $0xa0] sm:$0xff] }
  0xfd   :  { %5475 = vmatpush1.bf16.msra.mxu0 %v5474_v14  ;;  %v601_v14 = vld [vmem:[#allocation7 + $0x430] sm:$0xff] }
  0xfe   :  { %5477 = vmatprep.subr.bf16.mxu0 %v5476_v15  ;;  %v466_v15 = vld [vmem:[#allocation5 + $0x28] sm:$0xff]  ;;  %v5518_v18 = vpack.c.bf16 %v601_v14, %v599_v13 }
  0xff   :  { %v646_v13 = vld [vmem:[#allocation7 + $0x598] sm:$0xff] }
 0x101   :  { %5479 = vmatpush1.bf16.msra.mxu0 %v5478_v20  ;;  %v603_v20 = vld [vmem:[#allocation7 + $0x440] sm:$0xff] }
 0x102   :  { %5481 = vmatprep.subr.bf16.mxu0 %v5480_v21  ;;  %v605_v21 = vld [vmem:[#allocation7 + $0x450] sm:$0xff] }
 0x103   :  { %v5522_v24 = vpack.c.bf16 %v605_v21, %v603_v20  ;;  %v5562_v20 = vpack.c.bf16 %v645_v17, %v643_v16  ;;  %v917_v16 = vld [vmem:[#allocation8 + $0xf8] sm:$0xff] }
 0x105   :  { %5483 = vmatpush1.bf16.msra.mxu0 %v5482_v26  ;;  %v607_v26 = vld [vmem:[#allocation7 + $0x460] sm:$0xff] }
 0x106   :  { %5485 = vmatprep.subr.bf16.mxu0 %v5484_v27  ;;  %v609_v27 = vld [vmem:[#allocation7 + $0x470] sm:$0xff] }
 0x107   :  { %v5526_v30 = vpack.c.bf16 %v609_v27, %v607_v26  ;;  %v5566_v26 = vpack.c.bf16 %v649_v23, %v647_v22  ;;  %v921_v22 = vld [vmem:[#allocation8 + $0x118] sm:$0xff] }
 0x109   :  { %5487 = vmatpush1.bf16.msra.mxu0 %v5486_v32  ;;  %v611_v32 = vld [vmem:[#allocation7 + $0x480] sm:$0xff] }
 0x10a   :  { %5489 = vmatprep.subr.bf16.mxu0 %v5488_v33  ;;  %v613_v33 = vld [vmem:[#allocation7 + $0x490] sm:$0xff] }
 0x10b   :  { %v5530_v36 = vpack.c.bf16 %v613_v33, %v611_v32  ;;  %v5570_v32 = vpack.c.bf16 %v653_v29, %v651_v28  ;;  %v925_v28 = vld [vmem:[#allocation8 + $0x138] sm:$0xff] }
 0x10d   :  { %5491 = vmatpush1.bf16.msra.mxu0 %v5490_v38  ;;  %v615_v38 = vld [vmem:[#allocation7 + $0x4a0] sm:$0xff] }
 0x10e   :  { %5493 = vmatprep.subr.bf16.mxu0 %v5492_v39  ;;  %v617_v39 = vld [vmem:[#allocation7 + $0x4b0] sm:$0xff] }
 0x10f   :  { %v5534_v42 = vpack.c.bf16 %v617_v39, %v615_v38  ;;  %v5574_v38 = vpack.c.bf16 %v657_v35, %v655_v34  ;;  %v929_v34 = vld [vmem:[#allocation8 + $0x158] sm:$0xff] }
 0x111   :  { %5495 = vmatpush1.bf16.msra.mxu0 %v5494_v44  ;;  %v619_v44 = vld [vmem:[#allocation7 + $0x4c0] sm:$0xff] }
 0x112   :  { %5497 = vmatprep.subr.bf16.mxu0 %v5496_v45  ;;  %v621_v45 = vld [vmem:[#allocation7 + $0x4d0] sm:$0xff] }
 0x113   :  { %v5538_v48 = vpack.c.bf16 %v621_v45, %v619_v44  ;;  %v465_v44 = vld [vmem:[#allocation5 + $0x20] sm:$0xff]  ;;  %v5578_v45 = vpack.c.bf16 %v888_v41, %v886_v40  ;;  %v933_v40 = vld [vmem:[#allocation8 + $0x178] sm:$0xff] }
 0x115   :  { %5499 = vmatpush1.bf16.msra.mxu0 %v5498_v50  ;;  %v623_v50 = vld [vmem:[#allocation7 + $0x4e0] sm:$0xff] }
 0x116   :  { %5501 = vmatprep.subr.bf16.mxu0 %v5500_v51  ;;  %v625_v51 = vld [vmem:[#allocation7 + $0x4f0] sm:$0xff] }
 0x117   :  { %v5542_v54 = vpack.c.bf16 %v625_v51, %v623_v50  ;;  %v897_v50 = vld [vmem:[#allocation8 + $0x58] sm:$0xff] }
 0x119   :  { %5503 = vmatpush1.bf16.msra.mxu0 %v5502_v56  ;;  %v627_v56 = vld [vmem:[#allocation7 + $0x500] sm:$0xff] }
 0x11a   :  { %5505 = vmatprep.subr.bf16.mxu0 %v5504_v57  ;;  %v629_v57 = vld [vmem:[#allocation7 + $0x510] sm:$0xff] }
 0x11b   :  { %v5546_v60 = vpack.c.bf16 %v629_v57, %v627_v56  ;;  %v901_v56 = vld [vmem:[#allocation8 + $0x78] sm:$0xff] }
 0x11d   :  { %5507 = vmatpush1.bf16.msra.mxu0 %v5506_v62  ;;  %v631_v62 = vld [vmem:[#allocation7 + $0x520] sm:$0xff] }
 0x11e   :  { %5509 = vmatprep.subr.bf16.mxu0 %v5508_v63  ;;  %v633_v63 = vld [vmem:[#allocation7 + $0x530] sm:$0xff] }
 0x11f   :  { %v5550_v2 = vpack.c.bf16 %v633_v63, %v631_v62  ;;  %v905_v62 = vld [vmem:[#allocation8 + $0x98] sm:$0xff] }
 0x121   :  { %5511 = vmatpush1.bf16.msra.mxu0 %v5510_v4  ;;  %v635_v4 = vld [vmem:[#allocation7 + $0x540] sm:$0xff] }
 0x122   :  { %5513 = vmatprep.subr.bf16.mxu0 %v5512_v5  ;;  %v637_v5 = vld [vmem:[#allocation7 + $0x550] sm:$0xff] }
 0x123   :  { %v5554_v8 = vpack.c.bf16 %v637_v5, %v635_v4  ;;  %v909_v4 = vld [vmem:[#allocation8 + $0xb8] sm:$0xff] }
 0x124   :  { %807 = vmatmul.mubr.f32.vlgmr.msra.gmra.mrb[0].mxu0 %v463_v10  ;;  %v639_v10 = vld [vmem:[#allocation7 + $0x560] sm:$0xff] }
 0x125   :  { %5515 = vmatpush1.bf16.msra.mxu0 %v5514_v11  ;;  %877 = vmatprep.mubr.f32.mxu0 %v466_v15  ;;  %v641_v11 = vld [vmem:[#allocation7 + $0x570] sm:$0xff] }
 0x126   :  { %5517 = vmatprep.subr.bf16.mxu0 %v5516_v12  ;;  %v644_v12 = vld [vmem:[#allocation7 + $0x588] sm:$0xff]  ;;  %v5558_v14 = vpack.c.bf16 %v641_v11, %v639_v10  ;;  %v913_v10 = vld [vmem:[#allocation8 + $0xd8] sm:$0xff] }
 0x127   :  { %v5560_v15 = vpack.c.bf16 %v646_v13, %v644_v12  ;;  %v910_v13 = vld [vmem:[#allocation8 + $0xc0] sm:$0xff] }
 0x129   :  { %5519 = vmatpush1.bf16.msra.mxu0 %v5518_v18  ;;  %v648_v18 = vld [vmem:[#allocation7 + $0x5a8] sm:$0xff] }
 0x12a   :  { %5521 = vmatprep.subr.bf16.mxu0 %v5520_v19  ;;  %v650_v19 = vld [vmem:[#allocation7 + $0x5b8] sm:$0xff] }
 0x12b   :  { %v5564_v21 = vpack.c.bf16 %v650_v19, %v648_v18  ;;  %v914_v19 = vld [vmem:[#allocation8 + $0xe0] sm:$0xff] }
 0x12d   :  { %5523 = vmatpush1.bf16.msra.mxu0 %v5522_v24  ;;  %v652_v24 = vld [vmem:[#allocation7 + $0x5c8] sm:$0xff] }
 0x12e   :  { %5525 = vmatprep.subr.bf16.mxu0 %v5524_v25  ;;  %v654_v25 = vld [vmem:[#allocation7 + $0x5d8] sm:$0xff] }
 0x12f   :  { %v5568_v27 = vpack.c.bf16 %v654_v25, %v652_v24  ;;  %v918_v25 = vld [vmem:[#allocation8 + $0x100] sm:$0xff] }
 0x131   :  { %5527 = vmatpush1.bf16.msra.mxu0 %v5526_v30  ;;  %v656_v30 = vld [vmem:[#allocation7 + $0x5e8] sm:$0xff] }
 0x132   :  { %5529 = vmatprep.subr.bf16.mxu0 %v5528_v31  ;;  %v658_v31 = vld [vmem:[#allocation7 + $0x5f8] sm:$0xff] }
 0x133   :  { %v5572_v33 = vpack.c.bf16 %v658_v31, %v656_v30  ;;  %v922_v31 = vld [vmem:[#allocation8 + $0x120] sm:$0xff] }
 0x135   :  { %5531 = vmatpush1.bf16.msra.mxu0 %v5530_v36  ;;  %v887_v36 = vld [vmem:[#allocation8 + $0x8] sm:$0xff] }
 0x136   :  { %5533 = vmatprep.subr.bf16.mxu0 %v5532_v37  ;;  %v889_v37 = vld [vmem:[#allocation8 + $0x18] sm:$0xff] }
 0x137   :  { %v5576_v39 = vpack.c.bf16 %v889_v37, %v887_v36  ;;  %v926_v37 = vld [vmem:[#allocation8 + $0x140] sm:$0xff] }
 0x139   :  { %5535 = vmatpush1.bf16.msra.mxu0 %v5534_v42  ;;  %v891_v42 = vld [vmem:[#allocation8 + $0x28] sm:$0xff] }
 0x13a   :  { %5537 = vmatprep.subr.bf16.mxu0 %v5536_v43  ;;  %v893_v43 = vld [vmem:[#allocation8 + $0x38] sm:$0xff] }
 0x13b   :  { %v5580_v46 = vpack.c.bf16 %v893_v43, %v891_v42  ;;  %v930_v43 = vld [vmem:[#allocation8 + $0x160] sm:$0xff] }
 0x13d   :  { %5539 = vmatpush1.bf16.msra.mxu0 %v5538_v48  ;;  %v892_v48 = vld [vmem:[#allocation8 + $0x30] sm:$0xff] }
 0x13e   :  { %5541 = vmatprep.subr.bf16.mxu0 %v5540_v49  ;;  %v895_v49 = vld [vmem:[#allocation8 + $0x48] sm:$0xff]  ;;  %v5582_v51 = vpack.c.bf16 %v892_v48, %v890_v47 }
 0x13f   :  { %v5584_v52 = vpack.c.bf16 %v897_v50, %v895_v49  ;;  %v934_v49 = vld [vmem:[#allocation8 + $0x180] sm:$0xff]  ;;  %v936_v50 = vld [vmem:[#allocation8 + $0x190] sm:$0xff] }
 0x141   :  { %5543 = vmatpush1.bf16.msra.mxu0 %v5542_v54  ;;  %v896_v54 = vld [vmem:[#allocation8 + $0x50] sm:$0xff] }
 0x142   :  { %5545 = vmatprep.subr.bf16.mxu0 %v5544_v55  ;;  %v899_v55 = vld [vmem:[#allocation8 + $0x68] sm:$0xff]  ;;  %v5586_v57 = vpack.c.bf16 %v896_v54, %v894_v53  ;;  %v5626_v53 = vpack.c.bf16 %v936_v50, %v934_v49 }
 0x143   :  { %v5588_v58 = vpack.c.bf16 %v901_v56, %v899_v55  ;;  %v938_v55 = vld [vmem:[#allocation8 + $0x1a0] sm:$0xff]  ;;  %v940_v56 = vld [vmem:[#allocation8 + $0x1b0] sm:$0xff] }
 0x145   :  { %5547 = vmatpush1.bf16.msra.mxu0 %v5546_v60  ;;  %v900_v60 = vld [vmem:[#allocation8 + $0x70] sm:$0xff] }
 0x146   :  { %5549 = vmatprep.subr.bf16.mxu0 %v5548_v61  ;;  %v903_v61 = vld [vmem:[#allocation8 + $0x88] sm:$0xff]  ;;  %v5590_v63 = vpack.c.bf16 %v900_v60, %v898_v59  ;;  %v5630_v59 = vpack.c.bf16 %v940_v56, %v938_v55 }
 0x147   :  { %v5592_v0 = vpack.c.bf16 %v905_v62, %v903_v61  ;;  %v942_v61 = vld [vmem:[#allocation8 + $0x1c0] sm:$0xff]  ;;  %v944_v62 = vld [vmem:[#allocation8 + $0x1d0] sm:$0xff] }
 0x149   :  { %5551 = vmatpush1.bf16.msra.mxu0 %v5550_v2  ;;  %v904_v2 = vld [vmem:[#allocation8 + $0x90] sm:$0xff] }
 0x14a   :  { %5553 = vmatprep.subr.bf16.mxu0 %v5552_v3  ;;  %v907_v3 = vld [vmem:[#allocation8 + $0xa8] sm:$0xff]  ;;  %v5594_v5 = vpack.c.bf16 %v904_v2, %v902_v1  ;;  %v949_v1 = vld [vmem:[#allocation8 + $0x1f8] sm:$0xff] }
 0x14b   :  { %v5596_v6 = vpack.c.bf16 %v909_v4, %v907_v3  ;;  %v946_v3 = vld [vmem:[#allocation8 + $0x1e0] sm:$0xff]  ;;  %v948_v4 = vld [vmem:[#allocation8 + $0x1f0] sm:$0xff] }
 0x14d   :  { %5555 = vmatpush1.bf16.msra.mxu0 %v5554_v8  ;;  %v908_v8 = vld [vmem:[#allocation8 + $0xb0] sm:$0xff] }
 0x14e   :  { %5557 = vmatprep.subr.bf16.mxu0 %v5556_v9  ;;  %v911_v9 = vld [vmem:[#allocation8 + $0xc8] sm:$0xff]  ;;  %v5598_v11 = vpack.c.bf16 %v908_v8, %v906_v7  ;;  %v1038_v7 = vld [vmem:[#allocation11 + $0x18] sm:$0xff]  ;;  %v1035_v8 = vld [vmem:[#allocation11] sm:$0xff] }
 0x14f   :  { %v5600_v12 = vpack.c.bf16 %v913_v10, %v911_v9  ;;  %v1037_v10 = vld [vmem:[#allocation11 + $0x10] sm:$0xff] }
 0x151   :  { %5559 = vmatpush1.bf16.msra.mxu0 %v5558_v14  ;;  %v912_v14 = vld [vmem:[#allocation8 + $0xd0] sm:$0xff] }
 0x152   :  { %5561 = vmatprep.subr.bf16.mxu0 %v5560_v15  ;;  %v915_v15 = vld [vmem:[#allocation8 + $0xe8] sm:$0xff]  ;;  %v5602_v17 = vpack.c.bf16 %v912_v14, %v910_v13  ;;  %v5642_v13 = vpack.c.bf16 %v1037_v10, %v1035_v8  ;;  %v1082_v8 = vld [vmem:[#allocation11 + $0x178] sm:$0xff] }
 0x153   :  { %v5604_v18 = vpack.c.bf16 %v917_v16, %v915_v15  ;;  %v1039_v15 = vld [vmem:[#allocation11 + $0x20] sm:$0xff]  ;;  %v1041_v16 = vld [vmem:[#allocation11 + $0x30] sm:$0xff] }
 0x155   :  { %5563 = vmatpush1.bf16.msra.mxu0 %v5562_v20  ;;  %v916_v20 = vld [vmem:[#allocation8 + $0xf0] sm:$0xff] }
 0x156   :  { %5565 = vmatprep.subr.bf16.mxu0 %v5564_v21  ;;  %v919_v21 = vld [vmem:[#allocation8 + $0x108] sm:$0xff]  ;;  %v5606_v23 = vpack.c.bf16 %v916_v20, %v914_v19  ;;  %v5646_v19 = vpack.c.bf16 %v1041_v16, %v1039_v15 }
 0x157   :  { %v5608_v24 = vpack.c.bf16 %v921_v22, %v919_v21  ;;  %v1043_v21 = vld [vmem:[#allocation11 + $0x40] sm:$0xff]  ;;  %v1045_v22 = vld [vmem:[#allocation11 + $0x50] sm:$0xff] }
 0x159   :  { %5567 = vmatpush1.bf16.msra.mxu0 %v5566_v26  ;;  %v920_v26 = vld [vmem:[#allocation8 + $0x110] sm:$0xff] }
 0x15a   :  { %5569 = vmatprep.subr.bf16.mxu0 %v5568_v27  ;;  %v923_v27 = vld [vmem:[#allocation8 + $0x128] sm:$0xff]  ;;  %v5610_v29 = vpack.c.bf16 %v920_v26, %v918_v25  ;;  %v5650_v25 = vpack.c.bf16 %v1045_v22, %v1043_v21 }
 0x15b   :  { %v5612_v30 = vpack.c.bf16 %v925_v28, %v923_v27  ;;  %v1047_v27 = vld [vmem:[#allocation11 + $0x60] sm:$0xff]  ;;  %v1049_v28 = vld [vmem:[#allocation11 + $0x70] sm:$0xff] }
 0x15d   :  { %5571 = vmatpush1.bf16.msra.mxu0 %v5570_v32  ;;  %v924_v32 = vld [vmem:[#allocation8 + $0x130] sm:$0xff] }
 0x15e   :  { %5573 = vmatprep.subr.bf16.mxu0 %v5572_v33  ;;  %v927_v33 = vld [vmem:[#allocation8 + $0x148] sm:$0xff]  ;;  %v5614_v35 = vpack.c.bf16 %v924_v32, %v922_v31  ;;  %v5654_v31 = vpack.c.bf16 %v1049_v28, %v1047_v27 }
 0x15f   :  { %v5616_v36 = vpack.c.bf16 %v929_v34, %v927_v33  ;;  %v1051_v33 = vld [vmem:[#allocation11 + $0x80] sm:$0xff]  ;;  %v1053_v34 = vld [vmem:[#allocation11 + $0x90] sm:$0xff] }
 0x161   :  { %5575 = vmatpush1.bf16.msra.mxu0 %v5574_v38  ;;  %v928_v38 = vld [vmem:[#allocation8 + $0x150] sm:$0xff] }
 0x162   :  { %5577 = vmatprep.subr.bf16.mxu0 %v5576_v39  ;;  %v931_v39 = vld [vmem:[#allocation8 + $0x168] sm:$0xff]  ;;  %v5618_v41 = vpack.c.bf16 %v928_v38, %v926_v37  ;;  %v5658_v37 = vpack.c.bf16 %v1053_v34, %v1051_v33 }
 0x163   :  { %v5620_v42 = vpack.c.bf16 %v933_v40, %v931_v39  ;;  %v1055_v39 = vld [vmem:[#allocation11 + $0xa0] sm:$0xff]  ;;  %v1057_v40 = vld [vmem:[#allocation11 + $0xb0] sm:$0xff] }
 0x164   :  { %878 = vmatmul.mubr.f32.vlgmr.msra.gmra.mrb[0].mxu0 %v465_v44  ;;  %v932_v44 = vld [vmem:[#allocation8 + $0x170] sm:$0xff] }
 0x165   :  { %5579 = vmatpush1.bf16.msra.mxu0 %v5578_v45  ;;  %v935_v45 = vld [vmem:[#allocation8 + $0x188] sm:$0xff]  ;;  %v5622_v47 = vpack.c.bf16 %v932_v44, %v930_v43  ;;  %v5662_v43 = vpack.c.bf16 %v1057_v40, %v1055_v39 }
 0x166   :  { %5581 = vmatprep.subr.bf16.mxu0 %v5580_v46  ;;  %v937_v46 = vld [vmem:[#allocation8 + $0x198] sm:$0xff] }
 0x167   :  { %v5624_v48 = vpack.c.bf16 %v937_v46, %v935_v45  ;;  %v1059_v45 = vld [vmem:[#allocation11 + $0xc0] sm:$0xff]  ;;  %v1061_v46 = vld [vmem:[#allocation11 + $0xd0] sm:$0xff] }
 0x168   :  { %v5666_v49 = vpack.c.bf16 %v1061_v46, %v1059_v45  ;;  %v1096_v45 = vld [vmem:[#allocation11 + $0x1e8] sm:$0xff]  ;;  %v1098_v46 = vld [vmem:[#allocation11 + $0x1f8] sm:$0xff] }
 0x169   :  { %5583 = vmatpush1.bf16.msra.mxu0 %v5582_v51  ;;  %v939_v51 = vld [vmem:[#allocation8 + $0x1a8] sm:$0xff] }
 0x16a   :  { %5585 = vmatprep.subr.bf16.mxu0 %v5584_v52  ;;  %v941_v52 = vld [vmem:[#allocation8 + $0x1b8] sm:$0xff] }
 0x16b   :  { %v5628_v54 = vpack.c.bf16 %v941_v52, %v939_v51  ;;  %v1063_v51 = vld [vmem:[#allocation11 + $0xe0] sm:$0xff]  ;;  %v1065_v52 = vld [vmem:[#allocation11 + $0xf0] sm:$0xff] }
 0x16c   :  { %v5670_v55 = vpack.c.bf16 %v1065_v52, %v1063_v51  ;;  %v172_v51 = vld [vmem:[#allocation10 + $0x8] sm:$0xff]  ;;  %v174_v52 = vld [vmem:[#allocation10 + $0x18] sm:$0xff] }
 0x16d   :  { %5587 = vmatpush1.bf16.msra.mxu0 %v5586_v57  ;;  %v943_v57 = vld [vmem:[#allocation8 + $0x1c8] sm:$0xff] }
 0x16e   :  { %5589 = vmatprep.subr.bf16.mxu0 %v5588_v58  ;;  %v945_v58 = vld [vmem:[#allocation8 + $0x1d8] sm:$0xff] }
 0x16f   :  { %v5632_v60 = vpack.c.bf16 %v945_v58, %v943_v57  ;;  %v1067_v57 = vld [vmem:[#allocation11 + $0x100] sm:$0xff]  ;;  %v1069_v58 = vld [vmem:[#allocation11 + $0x110] sm:$0xff] }
 0x171   :  { %5591 = vmatpush1.bf16.msra.mxu0 %v5590_v63  ;;  %v5634_v63 = vpack.c.bf16 %v944_v62, %v942_v61  ;;  %v5674_v61 = vpack.c.bf16 %v1069_v58, %v1067_v57 }
 0x172   :  { %5593 = vmatprep.subr.bf16.mxu0 %v5592_v0  ;;  %v947_v0 = vld [vmem:[#allocation8 + $0x1e8] sm:$0xff] }
 0x173   :  { %v5636_v2 = vpack.c.bf16 %v949_v1, %v947_v0  ;;  %v1073_v0 = vld [vmem:[#allocation11 + $0x130] sm:$0xff]  ;;  %v1076_v1 = vld [vmem:[#allocation11 + $0x148] sm:$0xff] }
 0x175   :  { %5595 = vmatpush1.bf16.msra.mxu0 %v5594_v5  ;;  %v5638_v5 = vpack.c.bf16 %v948_v4, %v946_v3 }
 0x176   :  { %5597 = vmatprep.subr.bf16.mxu0 %v5596_v6  ;;  %v1036_v6 = vld [vmem:[#allocation11 + $0x8] sm:$0xff] }
 0x177   :  { %v5640_v9 = vpack.c.bf16 %v1038_v7, %v1036_v6  ;;  %v1077_v6 = vld [vmem:[#allocation11 + $0x150] sm:$0xff]  ;;  %v1080_v7 = vld [vmem:[#allocation11 + $0x168] sm:$0xff] }
 0x178   :  { %v5684_v10 = vpack.c.bf16 %v1082_v8, %v1080_v7 }
 0x179   :  { %5599 = vmatpush1.bf16.msra.mxu0 %v5598_v11  ;;  %v1040_v11 = vld [vmem:[#allocation11 + $0x28] sm:$0xff]  ;;  %5641 = vmatprep.subr.bf16.mxu1 %v5640_v9 }
 0x17a   :  { %5601 = vmatprep.subr.bf16.mxu0 %v5600_v12  ;;  %v1042_v12 = vld [vmem:[#allocation11 + $0x38] sm:$0xff]  ;;  %5643 = vmatpush1.bf16.msra.mxu1 %v5642_v13  ;;  %v1084_v13 = vld [vmem:[#allocation11 + $0x188] sm:$0xff] }
 0x17b   :  { %v5644_v14 = vpack.c.bf16 %v1042_v12, %v1040_v11  ;;  %v1079_v11 = vld [vmem:[#allocation11 + $0x160] sm:$0xff]  ;;  %v1081_v12 = vld [vmem:[#allocation11 + $0x170] sm:$0xff] }
 0x17c   :  { %v5686_v15 = vpack.c.bf16 %v1081_v12, %v1079_v11 }
 0x17d   :  { %5603 = vmatpush1.bf16.msra.mxu0 %v5602_v17  ;;  %v1044_v17 = vld [vmem:[#allocation11 + $0x48] sm:$0xff]  ;;  %5645 = vmatprep.subr.bf16.mxu1 %v5644_v14  ;;  %v1086_v14 = vld [vmem:[#allocation11 + $0x198] sm:$0xff] }
 0x17e   :  { %5605 = vmatprep.subr.bf16.mxu0 %v5604_v18  ;;  %v1046_v18 = vld [vmem:[#allocation11 + $0x58] sm:$0xff]  ;;  %5647 = vmatpush1.bf16.msra.mxu1 %v5646_v19  ;;  %v5688_v16 = vpack.c.bf16 %v1086_v14, %v1084_v13  ;;  %v1088_v19 = vld [vmem:[#allocation11 + $0x1a8] sm:$0xff] }
 0x17f   :  { %v5648_v20 = vpack.c.bf16 %v1046_v18, %v1044_v17  ;;  %v1083_v17 = vld [vmem:[#allocation11 + $0x180] sm:$0xff]  ;;  %v1085_v18 = vld [vmem:[#allocation11 + $0x190] sm:$0xff] }
 0x180   :  { %v5690_v21 = vpack.c.bf16 %v1085_v18, %v1083_v17 }
 0x181   :  { %5607 = vmatpush1.bf16.msra.mxu0 %v5606_v23  ;;  %v1048_v23 = vld [vmem:[#allocation11 + $0x68] sm:$0xff]  ;;  %5649 = vmatprep.subr.bf16.mxu1 %v5648_v20  ;;  %v1090_v20 = vld [vmem:[#allocation11 + $0x1b8] sm:$0xff] }
 0x182   :  { %5609 = vmatprep.subr.bf16.mxu0 %v5608_v24  ;;  %v1050_v24 = vld [vmem:[#allocation11 + $0x78] sm:$0xff]  ;;  %5651 = vmatpush1.bf16.msra.mxu1 %v5650_v25  ;;  %v5692_v22 = vpack.c.bf16 %v1090_v20, %v1088_v19  ;;  %v1092_v25 = vld [vmem:[#allocation11 + $0x1c8] sm:$0xff] }
 0x183   :  { %v5652_v26 = vpack.c.bf16 %v1050_v24, %v1048_v23  ;;  %v1087_v23 = vld [vmem:[#allocation11 + $0x1a0] sm:$0xff]  ;;  %v1089_v24 = vld [vmem:[#allocation11 + $0x1b0] sm:$0xff] }
 0x184   :  { %v5694_v27 = vpack.c.bf16 %v1089_v24, %v1087_v23 }
 0x185   :  { %5611 = vmatpush1.bf16.msra.mxu0 %v5610_v29  ;;  %v1052_v29 = vld [vmem:[#allocation11 + $0x88] sm:$0xff]  ;;  %5653 = vmatprep.subr.bf16.mxu1 %v5652_v26  ;;  %v1094_v26 = vld [vmem:[#allocation11 + $0x1d8] sm:$0xff] }
 0x186   :  { %5613 = vmatprep.subr.bf16.mxu0 %v5612_v30  ;;  %v1054_v30 = vld [vmem:[#allocation11 + $0x98] sm:$0xff]  ;;  %5655 = vmatpush1.bf16.msra.mxu1 %v5654_v31  ;;  %v5696_v28 = vpack.c.bf16 %v1094_v26, %v1092_v25 }
 0x187   :  { %v5656_v32 = vpack.c.bf16 %v1054_v30, %v1052_v29  ;;  %v1091_v29 = vld [vmem:[#allocation11 + $0x1c0] sm:$0xff]  ;;  %v1093_v30 = vld [vmem:[#allocation11 + $0x1d0] sm:$0xff] }
 0x188   :  { %v5698_v31 = vpack.c.bf16 %v1093_v30, %v1091_v29 }
 0x189   :  { %5615 = vmatpush1.bf16.msra.mxu0 %v5614_v35  ;;  %v1056_v35 = vld [vmem:[#allocation11 + $0xa8] sm:$0xff]  ;;  %5657 = vmatprep.subr.bf16.mxu1 %v5656_v32  ;;  %v661_v32 = vlaneseq }
 0x18a   :  { %5617 = vmatprep.subr.bf16.mxu0 %v5616_v36  ;;  %v1058_v36 = vld [vmem:[#allocation11 + $0xb8] sm:$0xff]  ;;  %5659 = vmatpush1.bf16.msra.mxu1 %v5658_v37 }
 0x18b   :  { %v5660_v38 = vpack.c.bf16 %v1058_v36, %v1056_v35  ;;  %v662_v33 = vshrl.u32 %v661_v32, 7  ;;  %v659_v35 = vld [vmem:[%s9056_s3] sm:$0x3] }
 0x18d   :  { %5619 = vmatpush1.bf16.msra.mxu0 %v5618_v41  ;;  %v1060_v41 = vld [vmem:[#allocation11 + $0xc8] sm:$0xff]  ;;  %5661 = vmatprep.subr.bf16.mxu1 %v5660_v38  ;;  %v7655_v34 = vsub.s32 0, %v662_v33  ;;  %v7660_v36 = vsub.s32 1, %v662_v33 }
 0x18e   :  { %5621 = vmatprep.subr.bf16.mxu0 %v5620_v42  ;;  %v1062_v42 = vld [vmem:[#allocation11 + $0xd8] sm:$0xff]  ;;  %5663 = vmatpush1.bf16.msra.mxu1 %v5662_v43 }
 0x18f   :  { %v5664_v44 = vpack.c.bf16 %v1062_v42, %v1060_v41  ;;  %9368 = vst [vmem:[#allocation24_spill] sm:$0xff] %v7655_v34  ;;  %9369 = vst [vmem:[#allocation25_spill] sm:$0xff] %v7660_v36  ;;  %v664_v37 = vrot.slane %v659_v35, %v7655_v34  ;;  %v668_v38 = vrot.slane %v659_v35, %v7660_v36 }
 0x191   :  { %5623 = vmatpush1.bf16.msra.mxu0 %v5622_v47  ;;  %v1064_v47 = vld [vmem:[#allocation11 + $0xe8] sm:$0xff]  ;;  %5665 = vmatprep.subr.bf16.mxu1 %v5664_v44 }
 0x192   :  { %5625 = vmatprep.subr.bf16.mxu0 %v5624_v48  ;;  %v1066_v48 = vld [vmem:[#allocation11 + $0xf8] sm:$0xff]  ;;  %5667 = vmatpush1.bf16.msra.mxu1 %v5666_v49  ;;  %v1097_v49 = vld [vmem:[#allocation11 + $0x1f0] sm:$0xff] }
 0x193   :  { %v5668_v50 = vpack.c.bf16 %v1066_v48, %v1064_v47  ;;  %v5700_v47 = vpack.c.bf16 %v1098_v46, %v1096_v45  ;;  %v1095_v48 = vld [vmem:[#allocation11 + $0x1e0] sm:$0xff] }
 0x195   :  { %5627 = vmatpush1.bf16.msra.mxu0 %v5626_v53  ;;  %v1068_v53 = vld [vmem:[#allocation11 + $0x108] sm:$0xff]  ;;  %5669 = vmatprep.subr.bf16.mxu1 %v5668_v50  ;;  %v5702_v50 = vpack.c.bf16 %v1097_v49, %v1095_v48 }
 0x196   :  { %5629 = vmatprep.subr.bf16.mxu0 %v5628_v54  ;;  %v1070_v54 = vld [vmem:[#allocation11 + $0x118] sm:$0xff]  ;;  %5671 = vmatpush1.bf16.msra.mxu1 %v5670_v55 }
 0x197   :  { %v5672_v56 = vpack.c.bf16 %v1070_v54, %v1068_v53  ;;  %v7664_v53 = vpack.c.bf16 %v174_v52, %v172_v51  ;;  %v1183_v54 = vld [vmem:[#allocation2 + $0x8] sm:$0xf] }
 0x198   :  { %v1189_v55 = vld [vmem:[#allocation2 + $0x68] sm:$0xf]  ;;  %v1238_v57 = vsel %vm1230_vm0, %v1183_v54, -inf }
 0x199   :  { %5631 = vmatpush1.bf16.msra.mxu0 %v5630_v59  ;;  %v1072_v59 = vld [vmem:[#allocation11 + $0x128] sm:$0xff]  ;;  %5673 = vmatprep.subr.bf16.mxu1 %v5672_v56  ;;  %9370 = vst [vmem:[#allocation26_spill] sm:$0xff] %v7664_v53  ;;  %v1195_v56 = vld [vmem:[#allocation2 + $0xc8] sm:$0xf]  ;;  %v1280_v58 = vsel %vm1230_vm0, %v1189_v55, -inf }
 0x19a   :  { %5633 = vmatprep.subr.bf16.mxu0 %v5632_v60  ;;  %v1074_v60 = vld [vmem:[#allocation11 + $0x138] sm:$0xff]  ;;  %5675 = vmatpush1.bf16.msra.mxu1 %v5674_v61  ;;  %v1281_v61 = vrot.slane %v1280_v58, 4  ;;  %v950_v55 = vld [vmem:[%s9058_s5] sm:$0x3] }
 0x19b   :  { %v5676_v62 = vpack.c.bf16 %v1074_v60, %v1072_v59  ;;  %v1201_v59 = vld [vmem:[#allocation2 + $0x128] sm:$0xf]  ;;  %v1239_v60 = vrot.slane %v1238_v57, 4 }
 0x19d   :  { %5635 = vmatpush1.bf16.msra.mxu0 %v5634_v63  ;;  %v1071_v63 = vld [vmem:[#allocation11 + $0x120] sm:$0xff]  ;;  %5677 = vmatprep.subr.bf16.mxu1 %v5676_v62  ;;  %v1322_v62 = vsel %vm1230_vm0, %v1195_v56, -inf }
 0x19e   :  { %5637 = vmatprep.subr.bf16.mxu0 %v5636_v2  ;;  %v1078_v2 = vld [vmem:[#allocation11 + $0x158] sm:$0xff]  ;;  %v5678_v3 = vpack.c.bf16 %v1073_v0, %v1071_v63  ;;  %v1323_v0 = vrot.slane %v1322_v62, 4 }
 0x19f   :  { %v5680_v4 = vpack.c.bf16 %v1078_v2, %v1076_v1  ;;  %v1207_v63 = vld [vmem:[#allocation2 + $0x188] sm:$0xf]  ;;  %v1364_v1 = vsel %vm1230_vm0, %v1201_v59, -inf  ;;  %v1240_v2 = vmax.f32 %v1238_v57, %v1239_v60  ;;  %v955_v59 = vrot.slane %v950_v55, %v7655_v34 }
 0x1a0   :  { %5679 = vmatpush1.bf16.msra.mxu1 %v5678_v3  ;;  %v1282_v3 = vmax.f32 %v1280_v58, %v1281_v61  ;;  %v1324_v7 = vmax.f32 %v1322_v62, %v1323_v0  ;;  %v959_v61 = vrot.slane %v950_v55, %v7660_v36 }
 0x1a1   :  { %5639 = vmatpush1.bf16.msra.mxu0 %v5638_v5  ;;  %v1075_v5 = vld [vmem:[#allocation11 + $0x140] sm:$0xff]  ;;  %5681 = vmatprep.subr.bf16.mxu1 %v5680_v4  ;;  %v1213_v4 = vld [vmem:[#allocation2 + $0x1e8] sm:$0xf]  ;;  %v1241_v8 = vrot.slane %v1240_v2, 2 }
 0x1a2   :  { %v5682_v9 = vpack.c.bf16 %v1077_v6, %v1075_v5  ;;  %v1365_v5 = vrot.slane %v1364_v1, 4  ;;  %v1406_v6 = vsel %vm1230_vm0, %v1207_v63, -inf  ;;  %v1448_v12 = vsel %vm1230_vm0, %v1213_v4, -inf  ;;  %v173_v4 = vld [vmem:[#allocation10 + $0x10] sm:$0xff] }
 0x1a3   :  { %v1407_v11 = vrot.slane %v1406_v6, 4  ;;  %v1325_v14 = vrot.slane %v1324_v7, 2  ;;  %v1449_v18 = vrot.slane %v1448_v12, 4 }
 0x1a4   :  { %5683 = vmatpush1.bf16.msra.mxu1 %v5682_v9  ;;  %v1283_v9 = vrot.slane %v1282_v3, 2  ;;  %v1366_v13 = vmax.f32 %v1364_v1, %v1365_v5 }
 0x1a5   :  { %5685 = vmatprep.subr.bf16.mxu1 %v5684_v10  ;;  %v1219_v10 = vld [vmem:[#allocation2 + $0x248] sm:$0xf]  ;;  %v1408_v20 = vmax.f32 %v1406_v6, %v1407_v11 }
 0x1a6   :  { %v1284_v17 = vmax.f32 %v1282_v3, %v1283_v9  ;;  %v1490_v19 = vsel %vm1230_vm0, %v1219_v10, -inf  ;;  %v171_v3 = vld [vmem:[#allocation10] sm:$0xff] }
 0x1a7   :  { %v1491_v23 = vrot.slane %v1490_v19, 4  ;;  %v7686_v11 = vpack.c.bf16 %v173_v4, %v171_v3  ;;  %v1200_v3 = vld [vmem:[#allocation2 + $0x120] sm:$0xf] }
 0x1a8   :  { %5687 = vmatpush1.bf16.msra.mxu1 %v5686_v15  ;;  %v1225_v15 = vld [vmem:[#allocation2 + $0x2a8] sm:$0xf]  ;;  %v1285_v26 = vrot.slane %v1284_v17, 1 }
 0x1a9   :  { %5689 = vmatprep.subr.bf16.mxu1 %v5688_v16  ;;  %v1242_v16 = vmax.f32 %v1240_v2, %v1241_v8  ;;  %v1532_v24 = vsel %vm1230_vm0, %v1225_v15, -inf  ;;  %v1492_v32 = vmax.f32 %v1490_v19, %v1491_v23  ;;  %v178_v8 = vld [vmem:[#allocation10 + $0x38] sm:$0xff]  ;;  %9371 = vst [vmem:[#allocation27_spill] sm:$0xff] %v7686_v11  ;;  %v177_v15 = vld [vmem:[#allocation10 + $0x30] sm:$0xff]  ;;  %v184_v23 = vld [vmem:[#allocation10 + $0x68] sm:$0xff] }
 0x1aa   :  { %v1533_v30 = vrot.slane %v1532_v24, 4  ;;  %v1286_v35 = vmax.f32 %v1284_v17, %v1285_v26  ;;  %v180_v17 = vld [vmem:[#allocation10 + $0x48] sm:$0xff] }
 0x1ab   :  { %v1243_v25 = vrot.slane %v1242_v16, 1 }
 0x1ac   :  { %5691 = vmatpush1.bf16.msra.mxu1 %v5690_v21  ;;  %v1367_v21 = vrot.slane %v1366_v13, 2 }
 0x1ad   :  { %5693 = vmatprep.subr.bf16.mxu1 %v5692_v22  ;;  %v1326_v22 = vmax.f32 %v1324_v7, %v1325_v14  ;;  %v1244_v33 = vmax.f32 %v1242_v16, %v1243_v25  ;;  %v176_v7 = vld [vmem:[#allocation10 + $0x28] sm:$0xff]  ;;  %v175_v14 = vld [vmem:[#allocation10 + $0x20] sm:$0xff] }
 0x1ae   :  { %v1368_v29 = vmax.f32 %v1366_v13, %v1367_v21  ;;  %v7688_v13 = vpack.c.bf16 %v178_v8, %v176_v7  ;;  %v7692_v19 = vpack.c.bf16 %v177_v15, %v175_v14  ;;  %v179_v21 = vld [vmem:[#allocation10 + $0x40] sm:$0xff]  ;;  %v1203_v7 = vld [vmem:[#allocation2 + $0x138] sm:$0xf]  ;;  %v205_v15 = vld [vmem:[#allocation10 + $0x110] sm:$0xff] }
 0x1af   :  { %v203_v14 = vld [vmem:[#allocation10 + $0x100] sm:$0xff] }
 0x1b0   :  { %5695 = vmatpush1.bf16.msra.mxu1 %v5694_v27  ;;  %v1450_v27 = vmax.f32 %v1448_v12, %v1449_v18  ;;  %9372 = vst [vmem:[#allocation28_spill] sm:$0xff] %v7688_v13  ;;  %v182_v18 = vld [vmem:[#allocation10 + $0x58] sm:$0xff]  ;;  %9373 = vst [vmem:[#allocation29_spill] sm:$0xff] %v7692_v19 }
 0x1b1   :  { %5697 = vmatprep.subr.bf16.mxu1 %v5696_v28  ;;  %v1409_v28 = vrot.slane %v1408_v20, 2 }
 0x1b4   :  { %5699 = vmatpush1.bf16.msra.mxu1 %v5698_v31  ;;  %v1327_v31 = vrot.slane %v1326_v22, 1 }
 0x1b5   :  { %5701 = vmatprep.subr.bf16.mxu1 %v5700_v47 }
 0x1b8   :  { %5703 = vmatpush1.bf16.msra.mxu1 %v5702_v50 }
 0x1b9   :  { %5705 = vmatprep.subr.bf16.mxu1 %v7664_v53 }
 0x237   :  { %v879_v39 = vpop.f32.mrb[0].mxu0 }
 0x238   :  { %v7144_v40 = vadd.f32 %v879_v39, %v664_v37  ;;  %v881_v41 = vpop.f32.mrb[1].mxu0  ;;  %v1451_v37 = vrot.slane %v1450_v27, 2  ;;  %v1369_v39 = vrot.slane %v1368_v29, 1 }
 0x239   :  { %v7145_v42 = vadd.f32 %v881_v41, %v668_v38  ;;  %v1410_v38 = vmax.f32 %v1408_v20, %v1409_v28  ;;  %v1328_v41 = vmax.f32 %v1326_v22, %v1327_v31  ;;  %v7695_v20 = vpack.c.bf16 %v182_v18, %v180_v17  ;;  %v181_v22 = vld [vmem:[#allocation10 + $0x50] sm:$0xff] }
 0x23a   :  { %v884_v44 = vmax.f32 %v7144_v40, 0.0  ;;  %v1534_v40 = vmax.f32 %v1532_v24, %v1533_v30  ;;  %v1370_v46 = vmax.f32 %v1368_v29, %v1369_v39  ;;  %v186_v24 = vld [vmem:[#allocation10 + $0x78] sm:$0xff]  ;;  %v7698_v25 = vpack.c.bf16 %v181_v22, %v179_v21  ;;  %v185_v28 = vld [vmem:[#allocation10 + $0x70] sm:$0xff]  ;;  %v188_v29 = vld [vmem:[#allocation10 + $0x88] sm:$0xff] }
 0x23b   :  { %v885_v43 = vmax.f32 %v7145_v42, 0.0  ;;  %v1493_v42 = vrot.slane %v1492_v32, 2  ;;  %v1411_v45 = vrot.slane %v1410_v38, 1  ;;  %9374 = vst [vmem:[#allocation30_spill] sm:$0xff] %v7695_v20  ;;  %v7701_v26 = vpack.c.bf16 %v186_v24, %v184_v23  ;;  %v190_v30 = vld [vmem:[#allocation10 + $0x98] sm:$0xff]  ;;  %v208_v21 = vld [vmem:[#allocation10 + $0x128] sm:$0xff] }
 0x23c   :  { %v1535_v47 = vrot.slane %v1534_v40, 2  ;;  %9375 = vst [vmem:[#allocation31_spill] sm:$0xff] %v7698_v25  ;;  %v194_v39 = vld [vmem:[#allocation10 + $0xb8] sm:$0xff]  ;;  %v207_v23 = vld [vmem:[#allocation10 + $0x120] sm:$0xff] }
 0x23d   :  { %1026 = vmatprep.mubr.f32.mxu0 %v885_v43  ;;  %v1452_v43 = vmax.f32 %v1450_v27, %v1451_v37  ;;  %v1494_v48 = vmax.f32 %v1492_v32, %v1493_v42  ;;  %v1412_v51 = vmax.f32 %v1410_v38, %v1411_v45  ;;  %9376 = vst [vmem:[#allocation32_spill] sm:$0xff] %v7701_v26  ;;  %v183_v27 = vld [vmem:[#allocation10 + $0x60] sm:$0xff]  ;;  %v1182_v37 = vld [vmem:[#allocation2] sm:$0xf]  ;;  %v192_v38 = vld [vmem:[#allocation10 + $0xa8] sm:$0xff] }
 0x23e   :  { %1027 = vmatmul.mubr.f32.vlgmr.msra.gmra.mrb[2].mxu0 %v884_v44  ;;  %v1629_v44 = vsel %vm1615_vm1, %v1286_v35, %v1244_v33  ;;  %v1536_v52 = vmax.f32 %v1534_v40, %v1535_v47  ;;  %v7704_v31 = vpack.c.bf16 %v185_v28, %v183_v27  ;;  %v7707_v32 = vpack.c.bf16 %v190_v30, %v188_v29  ;;  %v187_v33 = vld [vmem:[#allocation10 + $0x80] sm:$0xff]  ;;  %v189_v35 = vld [vmem:[#allocation10 + $0x90] sm:$0xff]  ;;  %v1185_v47 = vld [vmem:[#allocation2 + $0x18] sm:$0xf] }
 0x23f   :  { %v1630_v49 = vsel %vm1617_vm2, %v1328_v41, %v1629_v44  ;;  %v1453_v50 = vrot.slane %v1452_v43, 1  ;;  %v1495_v56 = vrot.slane %v1494_v48, 1  ;;  %v1188_v40 = vld [vmem:[#allocation2 + $0x60] sm:$0xf]  ;;  %v7710_v41 = vpack.c.bf16 %v189_v35, %v187_v33  ;;  %v191_v42 = vld [vmem:[#allocation10 + $0xa0] sm:$0xff]  ;;  %v210_v22 = vld [vmem:[#allocation10 + $0x138] sm:$0xff] }
 0x240   :  { %v1631_v54 = vsel %vm1619_vm3, %v1370_v46, %v1630_v49  ;;  %v1537_v60 = vrot.slane %v1536_v52, 1  ;;  %9377 = vst [vmem:[#allocation33_spill] sm:$0xff] %v7704_v31  ;;  %9378 = vst [vmem:[#allocation34_spill] sm:$0xff] %v7707_v32  ;;  %v7714_v44 = vpack.c.bf16 %v194_v39, %v192_v38  ;;  %v193_v45 = vld [vmem:[#allocation10 + $0xb0] sm:$0xff]  ;;  %v1273_v46 = vsel %vm1230_vm0, %v1188_v40, -inf  ;;  %v196_v49 = vld [vmem:[#allocation10 + $0xc8] sm:$0xff] }
 0x241   :  { %v1454_v57 = vmax.f32 %v1452_v43, %v1453_v50  ;;  %v1632_v58 = vsel %vm1621_vm4, %v1412_v51, %v1631_v54  ;;  %v1496_v62 = vmax.f32 %v1494_v48, %v1495_v56  ;;  %9379 = vst [vmem:[#allocation35_spill] sm:$0xff] %v7710_v41  ;;  %v1231_v43 = vsel %vm1230_vm0, %v1182_v37, -inf  ;;  %v1191_v48 = vld [vmem:[#allocation2 + $0x78] sm:$0xf]  ;;  %v198_v50 = vld [vmem:[#allocation10 + $0xd8] sm:$0xff]  ;;  %v195_v51 = vld [vmem:[#allocation10 + $0xc0] sm:$0xff] }
 0x242   :  { %v1538_v5 = vmax.f32 %v1536_v52, %v1537_v60  ;;  %9380 = vst [vmem:[#allocation36_spill] sm:$0xff] %v7714_v44  ;;  %v1194_v52 = vld [vmem:[#allocation2 + $0xc0] sm:$0xf]  ;;  %v1232_v54 = vrot.slane %v1231_v43, 4  ;;  %v7718_v55 = vpack.c.bf16 %v193_v45, %v191_v42  ;;  %v1294_v60 = vsel %vm1230_vm0, %v1191_v48, -inf  ;;  %v212_v33 = vld [vmem:[#allocation10 + $0x148] sm:$0xff] }
 0x243   :  { %v1633_v63 = vsel %vm1623_vm5, %v1454_v57, %v1632_v58  ;;  %v197_v56 = vld [vmem:[#allocation10 + $0xd0] sm:$0xff]  ;;  %v1274_v57 = vrot.slane %v1273_v46, 4  ;;  %v1197_v58 = vld [vmem:[#allocation2 + $0xd8] sm:$0xf]  ;;  %v1315_v4 = vsel %vm1230_vm0, %v1194_v52, -inf  ;;  %v1357_v27 = vsel %vm1230_vm0, %v1200_v3, -inf }
 0x244   :  { %v1634_v9 = vsel %vm1625_vm6, %v1496_v62, %v1633_v63  ;;  %9381 = vst [vmem:[#allocation37_spill] sm:$0xff] %v7718_v55  ;;  %v200_v62 = vld [vmem:[#allocation10 + $0xe8] sm:$0xff]  ;;  %v202_v63 = vld [vmem:[#allocation10 + $0xf8] sm:$0xff]  ;;  %v1316_v24 = vrot.slane %v1315_v4, 4  ;;  %v209_v30 = vld [vmem:[#allocation10 + $0x130] sm:$0xff]  ;;  %v1378_v38 = vsel %vm1230_vm0, %v1203_v7, -inf  ;;  %v7741_v48 = vpack.c.bf16 %v205_v15, %v203_v14 }
 0x245   :  { %v1635_v16 = vsel %vm1627_vm7, %v1538_v5, %v1634_v9  ;;  %v206_v5 = vld [vmem:[#allocation10 + $0x118] sm:$0xff]  ;;  %v1295_v9 = vrot.slane %v1294_v60, 4  ;;  %v1275_v17 = vmax.f32 %v1273_v46, %v1274_v57  ;;  %v7731_v18 = vpack.c.bf16 %v202_v63, %v200_v62  ;;  %v1209_v35 = vld [vmem:[#allocation2 + $0x198] sm:$0xf]  ;;  %v211_v40 = vld [vmem:[#allocation10 + $0x140] sm:$0xff] }
 0x246   :  { %v214_v39 = vld [vmem:[#allocation10 + $0x158] sm:$0xff]  ;;  %v213_v42 = vld [vmem:[#allocation10 + $0x150] sm:$0xff]  ;;  %9387 = vst [vmem:[#allocation43_spill] sm:$0xff] %v7741_v48  ;;  %v1358_v52 = vrot.slane %v1357_v27, 4  ;;  %v1317_v57 = vmax.f32 %v1315_v4, %v1316_v24  ;;  %v1379_v62 = vrot.slane %v1378_v38, 4 }
 0x247   :  { %9384 = vst [vmem:[#allocation40_spill] sm:$0xff] %v7731_v18  ;;  %v7751_v63 = vpack.c.bf16 %v213_v42, %v211_v40  ;;  %v1218_v7 = vld [vmem:[#allocation2 + $0x240] sm:$0xf] }
 0x249   :  { %9391 = vst [vmem:[#allocation47_spill] sm:$0xff] %v7751_v63 }
 0x311   :  { %v1028_v0 = vpop.f32.mrb[2].mxu0 }
 0x312   :  { %v1029_v1 = vadd.f32 %v1028_v0, %v955_v59  ;;  %v1030_v2 = vpop.f32.mrb[3].mxu0  ;;  %v1252_v59 = vsel %vm1230_vm0, %v1185_v47, -inf  ;;  %v199_v0 = vld [vmem:[#allocation10 + $0xe0] sm:$0xff]  ;;  %v1296_v47 = vmax.f32 %v1294_v60, %v1295_v9  ;;  %v7749_v60 = vpack.c.bf16 %v214_v39, %v212_v33  ;;  %v1224_v33 = vld [vmem:[#allocation2 + $0x2a0] sm:$0xf] }
 0x313   :  { %v1031_v6 = vadd.f32 %v1030_v2, %v959_v61  ;;  %v7723_v61 = vpack.c.bf16 %v198_v50, %v196_v49  ;;  %v204_v2 = vld [vmem:[#allocation10 + $0x108] sm:$0xff]  ;;  %v1253_v8 = vrot.slane %v1252_v59, 4  ;;  %v7743_v49 = vpack.c.bf16 %v210_v22, %v208_v21  ;;  %v1212_v50 = vld [vmem:[#allocation2 + $0x1e0] sm:$0xf] }
 0x314   :  { %v1033_v12 = vmax.f32 %v1029_v1, 0.0  ;;  %v201_v1 = vld [vmem:[#allocation10 + $0xf0] sm:$0xff]  ;;  %v7736_v29 = vpack.c.bf16 %v206_v5, %v204_v2  ;;  %9390 = vst [vmem:[#allocation46_spill] sm:$0xff] %v7749_v60  ;;  %v1441_v9 = vsel %vm1230_vm0, %v1212_v50, -inf  ;;  %v1297_v15 = vrot.slane %v1296_v47, 2 }
 0x315   :  { %v1034_v10 = vmax.f32 %v1031_v6, 0.0  ;;  %9382 = vst [vmem:[#allocation38_spill] sm:$0xff] %v7723_v61  ;;  %v1233_v6 = vmax.f32 %v1231_v43, %v1232_v54  ;;  %v7734_v28 = vpack.c.bf16 %v201_v1, %v199_v0  ;;  %v1254_v46 = vmax.f32 %v1252_v59, %v1253_v8  ;;  %9388 = vst [vmem:[#allocation44_spill] sm:$0xff] %v7743_v49  ;;  %v218_v0 = vld [vmem:[#allocation10 + $0x178] sm:$0xff]  ;;  %v215_v1 = vld [vmem:[#allocation10 + $0x160] sm:$0xff] }
 0x316   :  { %9386 = vst [vmem:[#allocation42_spill] sm:$0xff] %v7736_v29  ;;  %v7746_v54 = vpack.c.bf16 %v209_v30, %v207_v23  ;;  %v1420_v59 = vsel %vm1230_vm0, %v1209_v35, -inf  ;;  %v217_v2 = vld [vmem:[#allocation10 + $0x170] sm:$0xff]  ;;  %v1221_v21 = vld [vmem:[#allocation2 + $0x258] sm:$0xf]  ;;  %v1483_v39 = vsel %vm1230_vm0, %v1218_v7, -inf  ;;  %v1298_v42 = vmax.f32 %v1296_v47, %v1297_v15 }
 0x317   :  { %1175 = vmatprep.mubr.f32.mxu1 %v1034_v10  ;;  %v1336_v10 = vsel %vm1230_vm0, %v1197_v58, -inf  ;;  %9385 = vst [vmem:[#allocation41_spill] sm:$0xff] %v7734_v28  ;;  %v1234_v43 = vrot.slane %v1233_v6, 2  ;;  %v1215_v58 = vld [vmem:[#allocation2 + $0x1f8] sm:$0xf]  ;;  %v1255_v14 = vrot.slane %v1254_v46, 2  ;;  %v7759_v30 = vpack.c.bf16 %v217_v2, %v215_v1 }
 0x318   :  { %1176 = vmatmul.mubr.f32.vlgmr.msra.gmra.mrb[0].mxu1 %v1033_v12  ;;  %v7728_v12 = vpack.c.bf16 %v197_v56, %v195_v51  ;;  %v1337_v37 = vrot.slane %v1336_v10, 4  ;;  %v1276_v51 = vrot.slane %v1275_v17, 2  ;;  %9389 = vst [vmem:[#allocation45_spill] sm:$0xff] %v7746_v54  ;;  %v216_v56 = vld [vmem:[#allocation10 + $0x168] sm:$0xff]  ;;  %v1421_v22 = vrot.slane %v1420_v59, 4 }
 0x319   :  { %5707 = vmatpush1.bf16.msra.mxu1 %v7686_v11  ;;  %1734 = vmatprep.mubr.f32.mxu1 %v1635_v16  ;;  %v1206_v16 = vld [vmem:[#allocation2 + $0x180] sm:$0xf]  ;;  %v1235_v8 = vmax.f32 %v1233_v6, %v1234_v43  ;;  %v1462_v23 = vsel %vm1230_vm0, %v1215_v58, -inf  ;;  %v7757_v24 = vpack.c.bf16 %v218_v0, %v216_v56  ;;  %9393 = vst [vmem:[#allocation49_spill] sm:$0xff] %v7759_v30  ;;  %v1504_v50 = vsel %vm1230_vm0, %v1221_v21, -inf }
 0x31a   :  { %5709 = vmatprep.subr.bf16.mxu1 %v7688_v13  ;;  %9383 = vst [vmem:[#allocation39_spill] sm:$0xff] %v7728_v12  ;;  %v1399_v45 = vsel %vm1230_vm0, %v1206_v16, -inf  ;;  %v1338_v5 = vmax.f32 %v1336_v10, %v1337_v37  ;;  %v1277_v4 = vmax.f32 %v1275_v17, %v1276_v51  ;;  %v1359_v16 = vmax.f32 %v1357_v27, %v1358_v52  ;;  %v1227_v17 = vld [vmem:[#allocation2 + $0x2b8] sm:$0xf] }
 0x31b   :  { %v1400_v3 = vrot.slane %v1399_v45, 4  ;;  %9392 = vst [vmem:[#allocation48_spill] sm:$0xff] %v7757_v24  ;;  %v1318_v10 = vrot.slane %v1317_v57, 2  ;;  %v1380_v6 = vmax.f32 %v1378_v38, %v1379_v62  ;;  %v1442_v37 = vrot.slane %v1441_v9, 4 }
 0x31c   :  { %v1339_v40 = vrot.slane %v1338_v5, 2  ;;  %v1256_v27 = vmax.f32 %v1254_v46, %v1255_v14  ;;  %v1463_v43 = vrot.slane %v1462_v23, 4  ;;  %v1236_v51 = vrot.slane %v1235_v8, 1 }
 0x31d   :  { %5711 = vmatpush1.bf16.msra.mxu1 %v7692_v19  ;;  %v1401_v35 = vmax.f32 %v1399_v45, %v1400_v3  ;;  %v1278_v52 = vrot.slane %v1277_v4, 1  ;;  %v1360_v56 = vrot.slane %v1359_v16, 2  ;;  %v1422_v58 = vmax.f32 %v1420_v59, %v1421_v22 }
 0x31e   :  { %5713 = vmatprep.subr.bf16.mxu1 %v7695_v20  ;;  %v1319_v38 = vmax.f32 %v1317_v57, %v1318_v10  ;;  %v1484_v45 = vrot.slane %v1483_v39, 4  ;;  %v1525_v62 = vsel %vm1230_vm0, %v1224_v33, -inf  ;;  %v1381_v0 = vrot.slane %v1380_v6, 2  ;;  %v220_v57 = vld [vmem:[#allocation10 + $0x188] sm:$0xff]  ;;  %v222_v10 = vld [vmem:[#allocation10 + $0x198] sm:$0xff] }
 0x31f   :  { %v1443_v1 = vmax.f32 %v1441_v9, %v1442_v37  ;;  %v1340_v2 = vmax.f32 %v1338_v5, %v1339_v40  ;;  %v1505_v46 = vrot.slane %v1504_v50, 4  ;;  %v1546_v47 = vsel %vm1230_vm0, %v1227_v17, -inf }
 0x320   :  { %v1402_v3 = vrot.slane %v1401_v35, 2  ;;  %v1257_v7 = vrot.slane %v1256_v27, 1  ;;  %v1299_v14 = vrot.slane %v1298_v42, 1  ;;  %v1464_v15 = vmax.f32 %v1462_v23, %v1463_v43 }
 0x321   :  { %5715 = vmatpush1.bf16.msra.mxu1 %v7698_v25  ;;  %v1237_v21 = vmax.f32 %v1235_v8, %v1236_v51  ;;  %v1361_v59 = vmax.f32 %v1359_v16, %v1360_v56  ;;  %v1526_v22 = vrot.slane %v1525_v62, 4  ;;  %v1320_v33 = vrot.slane %v1319_v38, 1  ;;  %v219_v16 = vld [vmem:[#allocation10 + $0x180] sm:$0xff]  ;;  %v221_v51 = vld [vmem:[#allocation10 + $0x190] sm:$0xff]  ;;  %v390_v25 = vld [vmem:[#allocation13 + $0xd8] sm:$0xff] }
 0x322   :  { %5717 = vmatprep.subr.bf16.mxu1 %v7701_v26  ;;  %v1485_v9 = vmax.f32 %v1483_v39, %v1484_v45  ;;  %v1382_v5 = vmax.f32 %v1380_v6, %v1381_v0  ;;  %v1547_v37 = vrot.slane %v1546_v47, 4  ;;  %v1279_v40 = vmax.f32 %v1277_v4, %v1278_v52  ;;  %v224_v6 = vld [vmem:[#allocation10 + $0x1a8] sm:$0xff]  ;;  %v226_v4 = vld [vmem:[#allocation10 + $0x1b8] sm:$0xff] }
 0x323   :  { %v1444_v17 = vrot.slane %v1443_v1, 2  ;;  %v1258_v23 = vmax.f32 %v1256_v27, %v1257_v7  ;;  %v1300_v43 = vmax.f32 %v1298_v42, %v1299_v14  ;;  %v7770_v8 = vpack.c.bf16 %v222_v10, %v220_v57  ;;  %v228_v57 = vld [vmem:[#allocation10 + $0x1c8] sm:$0xff] }
 0x324   :  { %v1362_v56 = vrot.slane %v1361_v59, 1  ;;  %v1321_v39 = vmax.f32 %v1319_v38, %v1320_v33  ;;  %v1486_v52 = vrot.slane %v1485_v9, 2  ;;  %v1616_v42 = vsel %vm1615_vm1, %v1279_v40, %v1237_v21 }
 0x325   :  { %5719 = vmatpush1.bf16.msra.mxu1 %v7704_v31  ;;  %9394 = vst [vmem:[#allocation50_spill] sm:$0xff] %v7770_v8  ;;  %v1445_v27 = vmax.f32 %v1443_v1, %v1444_v17  ;;  %v223_v1 = vld [vmem:[#allocation10 + $0x1a0] sm:$0xff] }
 0x326   :  { %5721 = vmatprep.subr.bf16.mxu1 %v7707_v32  ;;  %v1487_v21 = vmax.f32 %v1485_v9, %v1486_v52 }
 0x329   :  { %5723 = vmatpush1.bf16.msra.mxu1 %v7710_v41 }
 0x32a   :  { %5725 = vmatprep.subr.bf16.mxu1 %v7714_v44 }
 0x32d   :  { %5727 = vmatpush1.bf16.msra.mxu1 %v7718_v55 }
 0x32e   :  { %5729 = vmatprep.subr.bf16.mxu1 %v7723_v61 }
 0x331   :  { %5731 = vmatpush1.bf16.msra.mxu1 %v7728_v12 }
 0x332   :  { %5733 = vmatprep.subr.bf16.mxu1 %v7731_v18 }
 0x335   :  { %5735 = vmatpush1.bf16.msra.mxu1 %v7734_v28  ;;  %v1403_v28 = vmax.f32 %v1401_v35, %v1402_v3  ;;  %v1548_v35 = vmax.f32 %v1546_v47, %v1547_v37  ;;  %v225_v47 = vld [vmem:[#allocation10 + $0x1b0] sm:$0xff] }
 0x336   :  { %5737 = vmatprep.subr.bf16.mxu1 %v7736_v29  ;;  %v1506_v29 = vmax.f32 %v1504_v50, %v1505_v46  ;;  %v1383_v50 = vrot.slane %v1382_v5, 1  ;;  %v7774_v46 = vpack.c.bf16 %v221_v51, %v219_v16  ;;  %v229_v16 = vld [vmem:[#allocation10 + $0x1d0] sm:$0xff]  ;;  %v1488_v51 = vrot.slane %v1487_v21, 1 }
 0x337   :  { %v1404_v3 = vrot.slane %v1403_v28, 1 }
 0x338   :  { %v1507_v0 = vrot.slane %v1506_v29, 2  ;;  %9395 = vst [vmem:[#allocation51_spill] sm:$0xff] %v7774_v46 }
 0x339   :  { %5739 = vmatpush1.bf16.msra.mxu1 %v7741_v48  ;;  %v1341_v48 = vrot.slane %v1340_v2, 1  ;;  %v1405_v37 = vmax.f32 %v1403_v28, %v1404_v3  ;;  %v232_v28 = vld [vmem:[#allocation10 + $0x1e8] sm:$0xff]  ;;  %v1489_v3 = vmax.f32 %v1487_v21, %v1488_v51  ;;  %v235_v21 = vld [vmem:[#allocation10 + $0x200] sm:$0xff] }
 0x33a   :  { %5741 = vmatprep.subr.bf16.mxu1 %v7743_v49  ;;  %v1423_v49 = vrot.slane %v1422_v58, 2  ;;  %v1508_v10 = vmax.f32 %v1506_v29, %v1507_v0  ;;  %v233_v0 = vld [vmem:[#allocation10 + $0x1f0] sm:$0xff] }
 0x33b   :  { %v1342_v45 = vmax.f32 %v1340_v2, %v1341_v48  ;;  %v1618_v48 = vsel %vm1617_vm2, %v1321_v39, %v1616_v42  ;;  %v1384_v2 = vmax.f32 %v1382_v5, %v1383_v50 }
 0x33c   :  { %v1424_v18 = vmax.f32 %v1422_v58, %v1423_v49  ;;  %v7778_v49 = vpack.c.bf16 %v226_v4, %v224_v6  ;;  %v1363_v58 = vmax.f32 %v1361_v59, %v1362_v56  ;;  %v7784_v59 = vpack.c.bf16 %v225_v47, %v223_v1  ;;  %v234_v6 = vld [vmem:[#allocation10 + $0x1f8] sm:$0xff] }
 0x33d   :  { %5743 = vmatpush1.bf16.msra.mxu1 %v7746_v54  ;;  %v1465_v54 = vrot.slane %v1464_v15, 2  ;;  %v1509_v39 = vrot.slane %v1508_v10, 1 }
 0x33e   :  { %5745 = vmatprep.subr.bf16.mxu1 %v7749_v60  ;;  %v1527_v60 = vmax.f32 %v1525_v62, %v1526_v22  ;;  %v1643_v62 = vsel %vm1615_vm1, %v1300_v43, %v1258_v23  ;;  %9396 = vst [vmem:[#allocation52_spill] sm:$0xff] %v7778_v49  ;;  %v1425_v14 = vrot.slane %v1424_v18, 1  ;;  %v1549_v22 = vrot.slane %v1548_v35, 2  ;;  %9397 = vst [vmem:[#allocation53_spill] sm:$0xff] %v7784_v59  ;;  %v227_v43 = vld [vmem:[#allocation10 + $0x1c0] sm:$0xff] }
 0x33f   :  { %v1466_v7 = vmax.f32 %v1464_v15, %v1465_v54  ;;  %v230_v54 = vld [vmem:[#allocation10 + $0x1d8] sm:$0xff]  ;;  %v1446_v15 = vrot.slane %v1445_v27, 1  ;;  %v1644_v33 = vsel %vm1617_vm2, %v1342_v45, %v1643_v62  ;;  %v1620_v23 = vsel %vm1619_vm3, %v1363_v58, %v1618_v48 }
 0x340   :  { %v1528_v38 = vrot.slane %v1527_v60, 2  ;;  %v1426_v9 = vmax.f32 %v1424_v18, %v1425_v14  ;;  %v7788_v5 = vpack.c.bf16 %v230_v54, %v228_v57  ;;  %v1550_v29 = vmax.f32 %v1548_v35, %v1549_v22  ;;  %v231_v35 = vld [vmem:[#allocation10 + $0x1e0] sm:$0xff]  ;;  %v238_v58 = vld [vmem:[#allocation10 + $0x218] sm:$0xff]  ;;  %v237_v22 = vld [vmem:[#allocation10 + $0x210] sm:$0xff] }
 0x341   :  { %5747 = vmatpush1.bf16.msra.mxu1 %v7751_v63  ;;  %v1467_v40 = vrot.slane %v1466_v7, 1  ;;  %v1645_v56 = vsel %vm1619_vm3, %v1384_v2, %v1644_v33  ;;  %v1447_v4 = vmax.f32 %v1445_v27, %v1446_v15  ;;  %v1622_v52 = vsel %vm1621_vm4, %v1405_v37, %v1620_v23  ;;  %v236_v27 = vld [vmem:[#allocation10 + $0x208] sm:$0xff]  ;;  %v242_v15 = vld [vmem:[#allocation10 + $0x238] sm:$0xff]  ;;  %v241_v23 = vld [vmem:[#allocation10 + $0x230] sm:$0xff] }
 0x342   :  { %5749 = vmatprep.subr.bf16.mxu1 %v7757_v24  ;;  %v1529_v17 = vmax.f32 %v1527_v60, %v1528_v38  ;;  %9398 = vst [vmem:[#allocation54_spill] sm:$0xff] %v7788_v5  ;;  %v7793_v18 = vpack.c.bf16 %v229_v16, %v227_v43  ;;  %v1646_v42 = vsel %vm1621_vm4, %v1426_v9, %v1645_v56  ;;  %v1551_v62 = vrot.slane %v1550_v29, 1  ;;  %v240_v54 = vld [vmem:[#allocation10 + $0x228] sm:$0xff]  ;;  %v246_v16 = vld [vmem:[#allocation10 + $0x258] sm:$0xff]  ;;  %v243_v56 = vld [vmem:[#allocation10 + $0x240] sm:$0xff] }
 0x343   :  { %v1468_v60 = vmax.f32 %v1466_v7, %v1467_v40  ;;  %v7797_v45 = vpack.c.bf16 %v234_v6, %v232_v28  ;;  %v1624_v38 = vsel %vm1623_vm5, %v1447_v4, %v1622_v52  ;;  %v1510_v7 = vmax.f32 %v1508_v10, %v1509_v39  ;;  %v244_v43 = vld [vmem:[#allocation10 + $0x248] sm:$0xff]  ;;  %v245_v28 = vld [vmem:[#allocation10 + $0x250] sm:$0xff]  ;;  %v250_v4 = vld [vmem:[#allocation10 + $0x278] sm:$0xff] }
 0x344   :  { %9399 = vst [vmem:[#allocation55_spill] sm:$0xff] %v7793_v18  ;;  %v1530_v50 = vrot.slane %v1529_v17, 1  ;;  %v7802_v1 = vpack.c.bf16 %v233_v0, %v231_v35  ;;  %v7805_v48 = vpack.c.bf16 %v238_v58, %v236_v27  ;;  %v1626_v2 = vsel %vm1625_vm6, %v1489_v3, %v1624_v38  ;;  %v248_v6 = vld [vmem:[#allocation10 + $0x268] sm:$0xff]  ;;  %v1184_v39 = vld [vmem:[#allocation2 + $0x10] sm:$0xf]  ;;  %v254_v3 = vld [vmem:[#allocation10 + $0x298] sm:$0xff] }
 0x345   :  { %5751 = vmatpush1.bf16.msra.mxu1 %v7759_v30  ;;  %9400 = vst [vmem:[#allocation56_spill] sm:$0xff] %v7797_v45  ;;  %v1647_v14 = vsel %vm1623_vm5, %v1468_v60, %v1646_v42  ;;  %v1552_v57 = vmax.f32 %v1550_v29, %v1551_v62  ;;  %v7811_v37 = vpack.c.bf16 %v237_v22, %v235_v21  ;;  %v249_v42 = vld [vmem:[#allocation10 + $0x270] sm:$0xff]  ;;  %v1245_v35 = vsel %vm1230_vm0, %v1184_v39, -inf  ;;  %v252_v0 = vld [vmem:[#allocation10 + $0x288] sm:$0xff]  ;;  %v251_v27 = vld [vmem:[#allocation10 + $0x280] sm:$0xff] }
 0x346   :  { %5753 = vmatprep.subr.bf16.mxu1 %v7770_v8  ;;  %9401 = vst [vmem:[#allocation57_spill] sm:$0xff] %v7802_v1  ;;  %v1531_v47 = vmax.f32 %v1529_v17, %v1530_v50  ;;  %9402 = vst [vmem:[#allocation58_spill] sm:$0xff] %v7805_v48  ;;  %v1648_v10 = vsel %vm1625_vm6, %v1510_v7, %v1647_v14  ;;  %v7814_v40 = vpack.c.bf16 %v242_v15, %v240_v54  ;;  %v239_v17 = vld [vmem:[#allocation10 + $0x220] sm:$0xff]  ;;  %v253_v7 = vld [vmem:[#allocation10 + $0x290] sm:$0xff] }
 0x347   :  { %9403 = vst [vmem:[#allocation59_spill] sm:$0xff] %v7811_v37  ;;  %v1649_v9 = vsel %vm1627_vm7, %v1552_v57, %v1648_v10  ;;  %v7818_v51 = vpack.c.bf16 %v241_v23, %v239_v17  ;;  %v7821_v29 = vpack.c.bf16 %v246_v16, %v244_v43  ;;  %v7824_v52 = vpack.c.bf16 %v245_v28, %v243_v56  ;;  %v247_v50 = vld [vmem:[#allocation10 + $0x260] sm:$0xff]  ;;  %v256_v14 = vld [vmem:[#allocation10 + $0x2a8] sm:$0xff]  ;;  %v257_v21 = vld [vmem:[#allocation10 + $0x2b0] sm:$0xff] }
 0x348   :  { %v1628_v33 = vsel %vm1627_vm7, %v1531_v47, %v1626_v2  ;;  %9404 = vst [vmem:[#allocation60_spill] sm:$0xff] %v7814_v40  ;;  %v7827_v60 = vpack.c.bf16 %v250_v4, %v248_v6  ;;  %v7831_v62 = vpack.c.bf16 %v249_v42, %v247_v50  ;;  %v1246_v58 = vrot.slane %v1245_v35, 4  ;;  %v258_v47 = vld [vmem:[#allocation10 + $0x2b8] sm:$0xff]  ;;  %v255_v2 = vld [vmem:[#allocation10 + $0x2a0] sm:$0xff]  ;;  %v260_v22 = vld [vmem:[#allocation10 + $0x2c8] sm:$0xff] }
 0x349   :  { %5755 = vmatpush1.bf16.msra.mxu1 %v7774_v46  ;;  %9405 = vst [vmem:[#allocation61_spill] sm:$0xff] %v7818_v51  ;;  %9406 = vst [vmem:[#allocation62_spill] sm:$0xff] %v7821_v29  ;;  %v7834_v38 = vpack.c.bf16 %v254_v3, %v252_v0  ;;  %v262_v57 = vld [vmem:[#allocation10 + $0x2d8] sm:$0xff]  ;;  %v259_v54 = vld [vmem:[#allocation10 + $0x2c0] sm:$0xff]  ;;  %v7840_v50 = vpack.c.bf16 %v258_v47, %v256_v14 }
 0x34a   :  { %5757 = vmatprep.subr.bf16.mxu1 %v7778_v49  ;;  %9407 = vst [vmem:[#allocation63_spill] sm:$0xff] %v7824_v52  ;;  %9408 = vst [vmem:[#allocation64_spill] sm:$0xff] %v7827_v60  ;;  %v261_v15 = vld [vmem:[#allocation10 + $0x2d0] sm:$0xff]  ;;  %v1190_v10 = vld [vmem:[#allocation2 + $0x70] sm:$0xf]  ;;  %v1247_v39 = vmax.f32 %v1245_v35, %v1246_v58 }
 0x34b   :  { %9409 = vst [vmem:[#allocation65_spill] sm:$0xff] %v7831_v62  ;;  %9410 = vst [vmem:[#allocation66_spill] sm:$0xff] %v7834_v38  ;;  %v266_v17 = vld [vmem:[#allocation10 + $0x2f8] sm:$0xff]  ;;  %v1196_v23 = vld [vmem:[#allocation2 + $0xd0] sm:$0xf]  ;;  %v1287_v3 = vsel %vm1230_vm0, %v1190_v10, -inf  ;;  %v7848_v35 = vpack.c.bf16 %v261_v15, %v259_v54 }
 0x34c   :  { %v263_v43 = vld [vmem:[#allocation10 + $0x2e0] sm:$0xff]  ;;  %v265_v16 = vld [vmem:[#allocation10 + $0x2f0] sm:$0xff]  ;;  %v268_v56 = vld [vmem:[#allocation10 + $0x308] sm:$0xff]  ;;  %9412 = vst [vmem:[#allocation68_spill] sm:$0xff] %v7840_v50  ;;  %v1248_v10 = vrot.slane %v1247_v39, 2 }
 0x34d   :  { %5759 = vmatpush1.bf16.msra.mxu1 %v7784_v59  ;;  %v270_v28 = vld [vmem:[#allocation10 + $0x318] sm:$0xff]  ;;  %v267_v6 = vld [vmem:[#allocation10 + $0x300] sm:$0xff]  ;;  %v269_v4 = vld [vmem:[#allocation10 + $0x310] sm:$0xff]  ;;  %9415 = vst [vmem:[#allocation71_spill] sm:$0xff] %v7848_v35 }
 0x34e   :  { %5761 = vmatprep.subr.bf16.mxu1 %v7788_v5  ;;  %v272_v42 = vld [vmem:[#allocation10 + $0x328] sm:$0xff]  ;;  %v274_v0 = vld [vmem:[#allocation10 + $0x338] sm:$0xff]  ;;  %v1202_v47 = vld [vmem:[#allocation2 + $0x130] sm:$0xf] }
 0x34f   :  { %v278_v14 = vld [vmem:[#allocation10 + $0x358] sm:$0xff]  ;;  %v277_v54 = vld [vmem:[#allocation10 + $0x350] sm:$0xff]  ;;  %v1214_v15 = vld [vmem:[#allocation2 + $0x1f0] sm:$0xf] }
 0x350   :  { %v363_v59 = vld [vmem:[#allocation13] sm:$0xff]  ;;  %v370_v8 = vld [vmem:[#allocation13 + $0x38] sm:$0xff]  ;;  %v369_v30 = vld [vmem:[#allocation13 + $0x30] sm:$0xff] }
 0x351   :  { %5763 = vmatpush1.bf16.msra.mxu1 %v7793_v18  ;;  %v372_v24 = vld [vmem:[#allocation13 + $0x48] sm:$0xff] }
 0x352   :  { %5765 = vmatprep.subr.bf16.mxu1 %v7797_v45  ;;  %v280_v45 = vld [vmem:[#allocation10 + $0x368] sm:$0xff] }
 0x355   :  { %5767 = vmatpush1.bf16.msra.mxu1 %v7802_v1 }
 0x356   :  { %5769 = vmatprep.subr.bf16.mxu1 %v7805_v48  ;;  %v1199_v48 = vld [vmem:[#allocation2 + $0xe8] sm:$0xf] }
 0x357   :  { %v1350_v18 = vsel %vm1230_vm0, %v1199_v48, -inf }
 0x358   :  { %1735 = vmatmul.mubr.f32.vlgmr.msra.gmra.mrb[2].mxu1 %v1628_v33  ;;  %v264_v33 = vld [vmem:[#allocation10 + $0x2e8] sm:$0xff] }
 0x359   :  { %5771 = vmatpush1.bf16.msra.mxu1 %v7811_v37  ;;  %1805 = vmatprep.mubr.f32.mxu1 %v1649_v9  ;;  %v7837_v9 = vpack.c.bf16 %v253_v7, %v251_v27  ;;  %v273_v27 = vld [vmem:[#allocation10 + $0x330] sm:$0xff]  ;;  %v276_v7 = vld [vmem:[#allocation10 + $0x348] sm:$0xff]  ;;  %v7850_v58 = vpack.c.bf16 %v266_v17, %v264_v33  ;;  %v1288_v37 = vrot.slane %v1287_v3, 4  ;;  %v7862_v17 = vpack.c.bf16 %v274_v0, %v272_v42  ;;  %v286_v0 = vld [vmem:[#allocation10 + $0x398] sm:$0xff] }
 0x35a   :  { %5773 = vmatprep.subr.bf16.mxu1 %v7814_v40  ;;  %v7846_v40 = vpack.c.bf16 %v262_v57, %v260_v22  ;;  %v7860_v22 = vpack.c.bf16 %v269_v4, %v267_v6  ;;  %v275_v57 = vld [vmem:[#allocation10 + $0x340] sm:$0xff] }
 0x35b   :  { %9411 = vst [vmem:[#allocation67_spill] sm:$0xff] %v7837_v9  ;;  %9416 = vst [vmem:[#allocation72_spill] sm:$0xff] %v7850_v58  ;;  %v7872_v42 = vpack.c.bf16 %v277_v54, %v275_v57  ;;  %v7874_v5 = vmax.f32 %v1287_v3, %v1288_v37  ;;  %v365_v57 = vld [vmem:[#allocation13 + $0x10] sm:$0xff]  ;;  %v368_v54 = vld [vmem:[#allocation13 + $0x28] sm:$0xff] }
 0x35c   :  { %9414 = vst [vmem:[#allocation70_spill] sm:$0xff] %v7846_v40  ;;  %9419 = vst [vmem:[#allocation75_spill] sm:$0xff] %v7860_v22  ;;  %v7883_v3 = vpack.c.bf16 %v365_v57, %v363_v59  ;;  %v285_v59 = vld [vmem:[#allocation10 + $0x390] sm:$0xff] }
 0x35d   :  { %5775 = vmatpush1.bf16.msra.mxu1 %v7818_v51  ;;  %v7844_v51 = vpack.c.bf16 %v257_v21, %v255_v2  ;;  %v7856_v2 = vpack.c.bf16 %v265_v16, %v263_v43  ;;  %v7858_v21 = vpack.c.bf16 %v270_v28, %v268_v56  ;;  %9420 = vst [vmem:[#allocation76_spill] sm:$0xff] %v7862_v17  ;;  %v279_v16 = vld [vmem:[#allocation10 + $0x360] sm:$0xff]  ;;  %v281_v56 = vld [vmem:[#allocation10 + $0x370] sm:$0xff]  ;;  %v1205_v28 = vld [vmem:[#allocation2 + $0x148] sm:$0xf] }
 0x35e   :  { %5777 = vmatprep.subr.bf16.mxu1 %v7821_v29  ;;  %v1329_v29 = vsel %vm1230_vm0, %v1196_v23, -inf  ;;  %v7868_v43 = vpack.c.bf16 %v278_v14, %v276_v7  ;;  %9423 = vst [vmem:[#allocation79_spill] sm:$0xff] %v7872_v42  ;;  %v1211_v7 = vld [vmem:[#allocation2 + $0x1a8] sm:$0xf]  ;;  %v364_v14 = vld [vmem:[#allocation13 + $0x8] sm:$0xff]  ;;  %v1392_v37 = vsel %vm1230_vm0, %v1205_v28, -inf }
 0x35f   :  { %9413 = vst [vmem:[#allocation69_spill] sm:$0xff] %v7844_v51  ;;  %9417 = vst [vmem:[#allocation73_spill] sm:$0xff] %v7856_v2  ;;  %v1330_v33 = vrot.slane %v1329_v29, 4  ;;  %v283_v28 = vld [vmem:[#allocation10 + $0x380] sm:$0xff] }
 0x360   :  { %9418 = vst [vmem:[#allocation74_spill] sm:$0xff] %v7858_v21  ;;  %9422 = vst [vmem:[#allocation78_spill] sm:$0xff] %v7868_v43 }
 0x361   :  { %5779 = vmatpush1.bf16.msra.mxu1 %v7824_v52  ;;  %v1193_v52 = vld [vmem:[#allocation2 + $0x88] sm:$0xf]  ;;  %v7878_v49 = vmax.f32 %v1329_v29, %v1330_v33  ;;  %9425 = vst [vmem:[#allocation81_spill] sm:$0xff] %v7883_v3 }
 0x362   :  { %5781 = vmatprep.subr.bf16.mxu1 %v7827_v60  ;;  %v1187_v60 = vld [vmem:[#allocation2 + $0x28] sm:$0xf]  ;;  %v1308_v23 = vsel %vm1230_vm0, %v1193_v52, -inf  ;;  %v1371_v52 = vsel %vm1230_vm0, %v1202_v47, -inf }
 0x363   :  { %v1266_v1 = vsel %vm1230_vm0, %v1187_v60, -inf  ;;  %v282_v60 = vld [vmem:[#allocation10 + $0x378] sm:$0xff]  ;;  %v1309_v4 = vrot.slane %v1308_v23, 4  ;;  %v1372_v48 = vrot.slane %v1371_v52, 4 }
 0x364   :  { %v1267_v6 = vrot.slane %v1266_v1, 4  ;;  %v366_v47 = vld [vmem:[#allocation13 + $0x18] sm:$0xff] }
 0x365   :  { %5783 = vmatpush1.bf16.msra.mxu1 %v7831_v62  ;;  %v271_v62 = vld [vmem:[#allocation10 + $0x320] sm:$0xff]  ;;  %v1310_v63 = vmax.f32 %v1308_v23, %v1309_v4  ;;  %v1393_v23 = vrot.slane %v1392_v37, 4  ;;  %v1373_v12 = vmax.f32 %v1371_v52, %v1372_v48 }
 0x366   :  { %5785 = vmatprep.subr.bf16.mxu1 %v7834_v38  ;;  %v1208_v38 = vld [vmem:[#allocation2 + $0x190] sm:$0xf]  ;;  %v1268_v33 = vmax.f32 %v1266_v1, %v1267_v6  ;;  %v1217_v1 = vld [vmem:[#allocation2 + $0x208] sm:$0xf]  ;;  %v373_v6 = vld [vmem:[#allocation13 + $0x50] sm:$0xff] }
 0x367   :  { %v1220_v4 = vld [vmem:[#allocation2 + $0x250] sm:$0xf]  ;;  %v1311_v55 = vrot.slane %v1310_v63, 2  ;;  %v1476_v41 = vsel %vm1230_vm0, %v1217_v1, -inf  ;;  %v380_v1 = vld [vmem:[#allocation13 + $0x88] sm:$0xff] }
 0x368   :  { %v1497_v52 = vsel %vm1230_vm0, %v1220_v4, -inf  ;;  %v375_v48 = vld [vmem:[#allocation13 + $0x60] sm:$0xff] }
 0x369   :  { %5787 = vmatpush1.bf16.msra.mxu1 %v7837_v9  ;;  %v7864_v9 = vpack.c.bf16 %v273_v27, %v271_v62  ;;  %v284_v62 = vld [vmem:[#allocation10 + $0x388] sm:$0xff]  ;;  %v1249_v27 = vmax.f32 %v1247_v39, %v1248_v10  ;;  %v1351_v39 = vrot.slane %v1350_v18, 4  ;;  %v7885_v10 = vpack.c.bf16 %v370_v8, %v368_v54 }
 0x36a   :  { %5789 = vmatprep.subr.bf16.mxu1 %v7840_v50  ;;  %v1413_v50 = vsel %vm1230_vm0, %v1208_v38, -inf  ;;  %v1455_v38 = vsel %vm1230_vm0, %v1214_v15, -inf  ;;  %v367_v15 = vld [vmem:[#allocation13 + $0x20] sm:$0xff]  ;;  %v1290_v8 = vrot.slane %v7874_v5, 2 }
 0x36b   :  { %9421 = vst [vmem:[#allocation77_spill] sm:$0xff] %v7864_v9  ;;  %v1414_v46 = vrot.slane %v1413_v50, 4  ;;  %9426 = vst [vmem:[#allocation82_spill] sm:$0xff] %v7885_v10  ;;  %v1456_v29 = vrot.slane %v1455_v38, 4  ;;  %v1250_v57 = vrot.slane %v1249_v27, 1  ;;  %v7895_v54 = vpack.c.bf16 %v369_v30, %v367_v15 }
 0x36c   :  { %v1352_v15 = vmax.f32 %v1350_v18, %v1351_v39  ;;  %v1226_v18 = vld [vmem:[#allocation2 + $0x2b0] sm:$0xf]  ;;  %v377_v39 = vld [vmem:[#allocation13 + $0x70] sm:$0xff] }
 0x36d   :  { %5791 = vmatpush1.bf16.msra.mxu1 %v7844_v51  ;;  %v7880_v51 = vpack.c.bf16 %v366_v47, %v364_v14  ;;  %v374_v14 = vld [vmem:[#allocation13 + $0x58] sm:$0xff]  ;;  %v7891_v47 = vpack.c.bf16 %v281_v56, %v279_v16  ;;  %9429 = vst [vmem:[#allocation85_spill] sm:$0xff] %v7895_v54  ;;  %v371_v56 = vld [vmem:[#allocation13 + $0x40] sm:$0xff]  ;;  %v7905_v30 = vmax.f32 %v1413_v50, %v1414_v46 }
 0x36e   :  { %5793 = vmatprep.subr.bf16.mxu1 %v7846_v40  ;;  %v7887_v40 = vpack.c.bf16 %v282_v60, %v280_v45  ;;  %v7898_v45 = vpack.c.bf16 %v286_v0, %v284_v62  ;;  %v1434_v60 = vsel %vm1230_vm0, %v1211_v7, -inf  ;;  %v7902_v16 = vpack.c.bf16 %v374_v14, %v372_v24  ;;  %v378_v62 = vld [vmem:[#allocation13 + $0x78] sm:$0xff] }
 0x36f   :  { %9424 = vst [vmem:[#allocation80_spill] sm:$0xff] %v7880_v51  ;;  %5897 = vmatprep.subr.bf16.mxu0 %v7880_v51  ;;  %9428 = vst [vmem:[#allocation84_spill] sm:$0xff] %v7891_v47  ;;  %v7907_v0 = vpack.c.bf16 %v285_v59, %v283_v28  ;;  %v7909_v61 = vmax.f32 %v1455_v38, %v1456_v29  ;;  %v1269_v7 = vrot.slane %v1268_v33, 2  ;;  %v1223_v14 = vld [vmem:[#allocation2 + $0x268] sm:$0xf]  ;;  %v1435_v44 = vrot.slane %v1434_v60, 4 }
 0x370   :  { %9427 = vst [vmem:[#allocation83_spill] sm:$0xff] %v7887_v40  ;;  %5899 = vmatpush1.bf16.msra.mxu0 %v7883_v3  ;;  %9430 = vst [vmem:[#allocation86_spill] sm:$0xff] %v7898_v45  ;;  %v7912_v24 = vmax.f32 %v1249_v27, %v1250_v57  ;;  %v7916_v46 = vpack.c.bf16 %v373_v6, %v371_v56  ;;  %v1291_v50 = vmax.f32 %v7874_v5, %v1290_v8  ;;  %v382_v56 = vld [vmem:[#allocation13 + $0x98] sm:$0xff] }
 0x371   :  { %5795 = vmatpush1.bf16.msra.mxu1 %v7848_v35  ;;  %5901 = vmatprep.subr.bf16.mxu0 %v7885_v10  ;;  %9431 = vst [vmem:[#allocation87_spill] sm:$0xff] %v7902_v16  ;;  %v1332_v35 = vrot.slane %v7878_v49, 2  ;;  %9432 = vst [vmem:[#allocation88_spill] sm:$0xff] %v7907_v0  ;;  %v1394_v38 = vmax.f32 %v1392_v37, %v1393_v23  ;;  %v1374_v28 = vrot.slane %v1373_v12, 2  ;;  %v1416_v59 = vrot.slane %v7905_v30, 2 }
 0x372   :  { %5797 = vmatprep.subr.bf16.mxu1 %v7850_v58  ;;  %v376_v58 = vld [vmem:[#allocation13 + $0x68] sm:$0xff]  ;;  %9433 = vst [vmem:[#allocation89_spill] sm:$0xff] %v7916_v46  ;;  %v1353_v57 = vrot.slane %v1352_v15, 2  ;;  %v1229_v6 = vld [vmem:[#allocation2 + $0x2c8] sm:$0xf]  ;;  %v1312_v5 = vmax.f32 %v1310_v63, %v1311_v55  ;;  %v1477_v8 = vrot.slane %v1476_v41, 4  ;;  %v1436_v4 = vmax.f32 %v1434_v60, %v1435_v44 }
 0x373   :  { %v7922_v27 = vpack.c.bf16 %v378_v62, %v376_v58  ;;  %v1333_v29 = vmax.f32 %v7878_v49, %v1332_v35  ;;  %v1518_v37 = vsel %vm1230_vm0, %v1223_v14, -inf  ;;  %v1498_v23 = vrot.slane %v1497_v52, 4  ;;  %v379_v63 = vld [vmem:[#allocation13 + $0x80] sm:$0xff]  ;;  %v384_v60 = vld [vmem:[#allocation13 + $0xa8] sm:$0xff] }
 0x374   :  { %5903 = vmatpush1.bf16.msra.mxu0 %v7895_v54  ;;  %v7930_v49 = vpack.c.bf16 %v377_v39, %v375_v48  ;;  %v1292_v35 = vrot.slane %v1291_v50, 1  ;;  %v1539_v62 = vsel %vm1230_vm0, %v1226_v18, -inf  ;;  %v7935_v55 = vpack.c.bf16 %v382_v56, %v380_v1  ;;  %v386_v48 = vld [vmem:[#allocation13 + $0xb8] sm:$0xff] }
 0x375   :  { %5799 = vmatpush1.bf16.msra.mxu1 %v7856_v2  ;;  %5905 = vmatprep.subr.bf16.mxu0 %v7902_v16  ;;  %9434 = vst [vmem:[#allocation90_spill] sm:$0xff] %v7922_v27  ;;  %v1334_v14 = vrot.slane %v1333_v29, 1  ;;  %v1354_v58 = vmax.f32 %v1352_v15, %v1353_v57  ;;  %v1560_v44 = vsel %vm1230_vm0, %v1229_v6, -inf  ;;  %v1375_v39 = vmax.f32 %v1373_v12, %v1374_v28  ;;  %v383_v28 = vld [vmem:[#allocation13 + $0xa0] sm:$0xff] }
 0x376   :  { %5801 = vmatprep.subr.bf16.mxu1 %v7858_v21  ;;  %v1270_v21 = vmax.f32 %v1268_v33, %v1269_v7  ;;  %9435 = vst [vmem:[#allocation91_spill] sm:$0xff] %v7930_v49  ;;  %v1395_v33 = vrot.slane %v1394_v38, 2  ;;  %9436 = vst [vmem:[#allocation92_spill] sm:$0xff] %v7935_v55  ;;  %v381_v7 = vld [vmem:[#allocation13 + $0x90] sm:$0xff]  ;;  %v1478_v32 = vmax.f32 %v1476_v41, %v1477_v8  ;;  %v1540_v31 = vrot.slane %v1539_v62, 4 }
 0x377   :  { %v1499_v18 = vmax.f32 %v1497_v52, %v1498_v23  ;;  %v1437_v26 = vrot.slane %v1436_v4, 2  ;;  %v7940_v1 = vpack.c.bf16 %v381_v7, %v379_v63  ;;  %v1293_v15 = vmax.f32 %v1291_v50, %v1292_v35  ;;  %v385_v41 = vld [vmem:[#allocation13 + $0xb0] sm:$0xff]  ;;  %v288_v63 = vld [vmem:[#allocation10 + $0x3a8] sm:$0xff]  ;;  %v290_v7 = vld [vmem:[#allocation10 + $0x3b8] sm:$0xff] }
 0x378   :  { %5907 = vmatpush1.bf16.msra.mxu0 %v7916_v46  ;;  %v1271_v2 = vrot.slane %v1270_v21, 1  ;;  %v1396_v57 = vmax.f32 %v1394_v38, %v1395_v33  ;;  %v1561_v56 = vrot.slane %v1560_v44, 4  ;;  %v7944_v12 = vpack.c.bf16 %v386_v48, %v384_v60  ;;  %v287_v48 = vld [vmem:[#allocation10 + $0x3a0] sm:$0xff] }
 0x379   :  { %5803 = vmatpush1.bf16.msra.mxu1 %v7860_v22  ;;  %5909 = vmatprep.subr.bf16.mxu0 %v7922_v27  ;;  %v1519_v22 = vrot.slane %v1518_v37, 4  ;;  %9437 = vst [vmem:[#allocation93_spill] sm:$0xff] %v7940_v1  ;;  %v1335_v6 = vmax.f32 %v1333_v29, %v1334_v14  ;;  %v1417_v52 = vmax.f32 %v7905_v30, %v1416_v59  ;;  %v1355_v8 = vrot.slane %v1354_v58, 1  ;;  %v394_v14 = vld [vmem:[#allocation13 + $0xf8] sm:$0xff] }
 0x37a   :  { %5805 = vmatprep.subr.bf16.mxu1 %v7862_v17  ;;  %v1313_v17 = vrot.slane %v1312_v5, 1  ;;  %9438 = vst [vmem:[#allocation94_spill] sm:$0xff] %v7944_v12  ;;  %v1376_v20 = vrot.slane %v1375_v39, 1  ;;  %v1479_v38 = vrot.slane %v1478_v32, 2  ;;  %v1500_v35 = vrot.slane %v1499_v18, 2 }
 0x37b   :  { %v1520_v23 = vmax.f32 %v1518_v37, %v1519_v22  ;;  %v1541_v33 = vmax.f32 %v1539_v62, %v1540_v31  ;;  %v1438_v60 = vmax.f32 %v1436_v4, %v1437_v26  ;;  %v7949_v29 = vpack.c.bf16 %v385_v41, %v383_v28  ;;  %v392_v62 = vld [vmem:[#allocation13 + $0xe8] sm:$0xff]  ;;  %v294_v28 = vld [vmem:[#allocation10 + $0x3d8] sm:$0xff] }
 0x37c   :  { %5911 = vmatpush1.bf16.msra.mxu0 %v7930_v49  ;;  %v1314_v50 = vmax.f32 %v1312_v5, %v1313_v17  ;;  %v1636_v22 = vsel %vm1615_vm1, %v1293_v15, %v7912_v24  ;;  %v1397_v30 = vrot.slane %v1396_v57, 1  ;;  %v1562_v59 = vmax.f32 %v1560_v44, %v1561_v56  ;;  %v389_v17 = vld [vmem:[#allocation13 + $0xd0] sm:$0xff] }
 0x37d   :  { %5807 = vmatpush1.bf16.msra.mxu1 %v7864_v9  ;;  %5913 = vmatprep.subr.bf16.mxu0 %v7935_v55  ;;  %v388_v9 = vld [vmem:[#allocation13 + $0xc8] sm:$0xff]  ;;  %9439 = vst [vmem:[#allocation95_spill] sm:$0xff] %v7949_v29  ;;  %v7957_v5 = vpack.c.bf16 %v290_v7, %v288_v63  ;;  %v9442_v26 = vrot.slane %v7909_v61, 2  ;;  %v1356_v37 = vmax.f32 %v1354_v58, %v1355_v8  ;;  %v1521_v4 = vrot.slane %v1520_v23, 2  ;;  %v289_v24 = vld [vmem:[#allocation10 + $0x3b0] sm:$0xff] }
 0x37e   :  { %5809 = vmatprep.subr.bf16.mxu1 %v7868_v43  ;;  %v1272_v43 = vmax.f32 %v1270_v21, %v1271_v2  ;;  %v7955_v2 = vpack.c.bf16 %v390_v25, %v388_v9  ;;  %v387_v21 = vld [vmem:[#allocation13 + $0xc0] sm:$0xff]  ;;  %v1377_v15 = vmax.f32 %v1375_v39, %v1376_v20  ;;  %v1418_v44 = vrot.slane %v1417_v52, 1  ;;  %v292_v9 = vld [vmem:[#allocation10 + $0x3c8] sm:$0xff]  ;;  %v393_v8 = vld [vmem:[#allocation13 + $0xf0] sm:$0xff] }
 0x37f   :  { %9441 = vst [vmem:[#allocation97_spill] sm:$0xff] %v7957_v5  ;;  %v1459_v31 = vmax.f32 %v7909_v61, %v9442_v26  ;;  %v1480_v56 = vmax.f32 %v1478_v32, %v1479_v38  ;;  %v1542_v41 = vrot.slane %v1541_v33, 2  ;;  %v1637_v63 = vsel %vm1617_vm2, %v1335_v6, %v1636_v22  ;;  %v396_v26 = vld [vmem:[#allocation13 + $0x108] sm:$0xff] }
 0x380   :  { %5915 = vmatpush1.bf16.msra.mxu0 %v7940_v1  ;;  %9440 = vst [vmem:[#allocation96_spill] sm:$0xff] %v7955_v2  ;;  %v1657_v25 = vsel %vm1615_vm1, %v1314_v50, %v1272_v43  ;;  %v1439_v7 = vrot.slane %v1438_v60, 1  ;;  %v7966_v61 = vpack.c.bf16 %v389_v17, %v387_v21  ;;  %v1501_v58 = vmax.f32 %v1499_v18, %v1500_v35  ;;  %v391_v43 = vld [vmem:[#allocation13 + $0xe0] sm:$0xff]  ;;  %v398_v21 = vld [vmem:[#allocation13 + $0x118] sm:$0xff] }
 0x381   :  { %5811 = vmatpush1.bf16.msra.mxu1 %v7872_v42  ;;  %5917 = vmatprep.subr.bf16.mxu0 %v7944_v12  ;;  %v1398_v20 = vmax.f32 %v1396_v57, %v1397_v30  ;;  %v1563_v39 = vrot.slane %v1562_v59, 2  ;;  %v7970_v32 = vpack.c.bf16 %v394_v14, %v392_v62  ;;  %v7972_v50 = vpack.c.bf16 %v289_v24, %v287_v48  ;;  %v291_v35 = vld [vmem:[#allocation10 + $0x3c0] sm:$0xff]  ;;  %v293_v30 = vld [vmem:[#allocation10 + $0x3d0] sm:$0xff] }
 0x382   :  { %5813 = vmatprep.subr.bf16.mxu1 %v7887_v40  ;;  %9443 = vst [vmem:[#allocation98_spill] sm:$0xff] %v7966_v61  ;;  %v1460_v38 = vrot.slane %v1459_v31, 1  ;;  %v1522_v6 = vmax.f32 %v1520_v23, %v1521_v4  ;;  %v1658_v22 = vsel %vm1617_vm2, %v1356_v37, %v1657_v25  ;;  %v7975_v17 = vpack.c.bf16 %v294_v28, %v292_v9  ;;  %v296_v23 = vld [vmem:[#allocation10 + $0x3e8] sm:$0xff]  ;;  %v298_v25 = vld [vmem:[#allocation10 + $0x3f8] sm:$0xff] }
 0x383   :  { %9444 = vst [vmem:[#allocation99_spill] sm:$0xff] %v7970_v32  ;;  %9445 = vst [vmem:[#allocation100_spill] sm:$0xff] %v7972_v50  ;;  %v1638_v18 = vsel %vm1619_vm3, %v1377_v15, %v1637_v63  ;;  %v1481_v57 = vrot.slane %v1480_v56, 1  ;;  %v1543_v62 = vmax.f32 %v1541_v33, %v1542_v41  ;;  %v1440_v14 = vmax.f32 %v1438_v60, %v1439_v7  ;;  %v395_v15 = vld [vmem:[#allocation13 + $0x100] sm:$0xff]  ;;  %v400_v9 = vld [vmem:[#allocation13 + $0x128] sm:$0xff] }
 0x384   :  { %5919 = vmatpush1.bf16.msra.mxu0 %v7949_v29  ;;  %9446 = vst [vmem:[#allocation101_spill] sm:$0xff] %v7975_v17  ;;  %v7980_v48 = vpack.c.bf16 %v393_v8, %v391_v43  ;;  %v1502_v37 = vrot.slane %v1501_v58, 1  ;;  %v1564_v4 = vmax.f32 %v1562_v59, %v1563_v39  ;;  %v7985_v24 = vpack.c.bf16 %v398_v21, %v396_v26  ;;  %v402_v28 = vld [vmem:[#allocation13 + $0x138] sm:$0xff]  ;;  %v295_v59 = vld [vmem:[#allocation10 + $0x3e0] sm:$0xff]  ;;  %v300_v39 = vld [vmem:[#allocation10 + $0x408] sm:$0xff] }
 0x385   :  { %5815 = vmatpush1.bf16.msra.mxu1 %v7891_v47  ;;  %5921 = vmatprep.subr.bf16.mxu0 %v7955_v2  ;;  %v1461_v33 = vmax.f32 %v1459_v31, %v1460_v38  ;;  %v1523_v60 = vrot.slane %v1522_v6, 1  ;;  %v1482_v63 = vmax.f32 %v1480_v56, %v1481_v57  ;;  %v7989_v7 = vpack.c.bf16 %v293_v30, %v291_v35  ;;  %v399_v21 = vld [vmem:[#allocation13 + $0x120] sm:$0xff]  ;;  %v404_v30 = vld [vmem:[#allocation13 + $0x148] sm:$0xff] }
 0x386   :  { %5817 = vmatprep.subr.bf16.mxu1 %v7898_v45  ;;  %v1419_v45 = vmax.f32 %v1417_v52, %v1418_v44  ;;  %9447 = vst [vmem:[#allocation102_spill] sm:$0xff] %v7980_v48  ;;  %v1659_v52 = vsel %vm1619_vm3, %v1398_v20, %v1658_v22  ;;  %9448 = vst [vmem:[#allocation103_spill] sm:$0xff] %v7985_v24  ;;  %v397_v44 = vld [vmem:[#allocation13 + $0x110] sm:$0xff]  ;;  %v1544_v43 = vrot.slane %v1543_v62, 1  ;;  %v1565_v38 = vrot.slane %v1564_v4, 1 }
 0x387   :  { %9449 = vst [vmem:[#allocation104_spill] sm:$0xff] %v7989_v7  ;;  %v297_v20 = vld [vmem:[#allocation10 + $0x3f0] sm:$0xff]  ;;  %v1660_v8 = vsel %vm1621_vm4, %v1440_v14, %v1659_v52  ;;  %v7993_v22 = vpack.c.bf16 %v397_v44, %v395_v15  ;;  %v7996_v31 = vpack.c.bf16 %v298_v25, %v296_v23  ;;  %v1503_v56 = vmax.f32 %v1501_v58, %v1502_v37  ;;  %v406_v14 = vld [vmem:[#allocation13 + $0x158] sm:$0xff] }
 0x388   :  { %5923 = vmatpush1.bf16.msra.mxu0 %v7966_v61  ;;  %v1639_v41 = vsel %vm1621_vm4, %v1419_v45, %v1638_v18  ;;  %v302_v45 = vld [vmem:[#allocation10 + $0x418] sm:$0xff]  ;;  %v7999_v26 = vpack.c.bf16 %v402_v28, %v400_v9  ;;  %v401_v18 = vld [vmem:[#allocation13 + $0x130] sm:$0xff]  ;;  %v1524_v35 = vmax.f32 %v1522_v6, %v1523_v60  ;;  %v8002_v52 = vpack.c.bf16 %v297_v20, %v295_v59  ;;  %v299_v6 = vld [vmem:[#allocation10 + $0x400] sm:$0xff] }
 0x389   :  { %5819 = vmatpush1.bf16.msra.mxu1 %v7907_v0  ;;  %5925 = vmatprep.subr.bf16.mxu0 %v7970_v32  ;;  %9450 = vst [vmem:[#allocation105_spill] sm:$0xff] %v7993_v22  ;;  %9451 = vst [vmem:[#allocation106_spill] sm:$0xff] %v7996_v31  ;;  %v1640_v57 = vsel %vm1623_vm5, %v1461_v33, %v1639_v41  ;;  %v1661_v15 = vsel %vm1623_vm5, %v1482_v63, %v1660_v8  ;;  %v301_v25 = vld [vmem:[#allocation10 + $0x410] sm:$0xff]  ;;  %v304_v33 = vld [vmem:[#allocation10 + $0x428] sm:$0xff] }
 0x38a   :  { %5821 = vmatprep.subr.bf16.mxu1 %v7957_v5  ;;  %9452 = vst [vmem:[#allocation107_spill] sm:$0xff] %v7999_v26  ;;  %9453 = vst [vmem:[#allocation108_spill] sm:$0xff] %v8002_v52  ;;  %v8006_v23 = vpack.c.bf16 %v302_v45, %v300_v39  ;;  %v1545_v58 = vmax.f32 %v1543_v62, %v1544_v43  ;;  %v8009_v37 = vpack.c.bf16 %v401_v18, %v399_v21  ;;  %v306_v28 = vld [vmem:[#allocation10 + $0x438] sm:$0xff]  ;;  %v403_v62 = vld [vmem:[#allocation13 + $0x140] sm:$0xff] }
 0x38b   :  { %v1641_v44 = vsel %vm1625_vm6, %v1503_v56, %v1640_v57  ;;  %v1566_v60 = vmax.f32 %v1564_v4, %v1565_v38  ;;  %v8014_v9 = vpack.c.bf16 %v406_v14, %v404_v30  ;;  %v1662_v41 = vsel %vm1625_vm6, %v1524_v35, %v1661_v15  ;;  %v405_v63 = vld [vmem:[#allocation13 + $0x150] sm:$0xff]  ;;  %v408_v59 = vld [vmem:[#allocation13 + $0x168] sm:$0xff]  ;;  %v410_v20 = vld [vmem:[#allocation13 + $0x178] sm:$0xff] }
 0x38c   :  { %5927 = vmatpush1.bf16.msra.mxu0 %v7980_v48  ;;  %9454 = vst [vmem:[#allocation109_spill] sm:$0xff] %v8006_v23  ;;  %9455 = vst [vmem:[#allocation110_spill] sm:$0xff] %v8009_v37  ;;  %v1642_v39 = vsel %vm1627_vm7, %v1545_v58, %v1641_v44  ;;  %v8019_v43 = vpack.c.bf16 %v301_v25, %v299_v6  ;;  %v8023_v4 = vpack.c.bf16 %v306_v28, %v304_v33  ;;  %v303_v8 = vld [vmem:[#allocation10 + $0x420] sm:$0xff]  ;;  %v305_v45 = vld [vmem:[#allocation10 + $0x430] sm:$0xff] }
 0x38d   :  { %5823 = vmatpush1.bf16.msra.mxu1 %v7972_v50  ;;  %5929 = vmatprep.subr.bf16.mxu0 %v7985_v24  ;;  %9456 = vst [vmem:[#allocation111_spill] sm:$0xff] %v8014_v9  ;;  %v308_v56 = vld [vmem:[#allocation10 + $0x448] sm:$0xff]  ;;  %v1663_v38 = vsel %vm1627_vm7, %v1566_v60, %v1662_v41  ;;  %v8027_v21 = vpack.c.bf16 %v405_v63, %v403_v62  ;;  %v310_v18 = vld [vmem:[#allocation10 + $0x458] sm:$0xff]  ;;  %v407_v35 = vld [vmem:[#allocation13 + $0x160] sm:$0xff] }
 0x38e   :  { %5825 = vmatprep.subr.bf16.mxu1 %v7975_v17  ;;  %9457 = vst [vmem:[#allocation112_spill] sm:$0xff] %v8019_v43  ;;  %9458 = vst [vmem:[#allocation113_spill] sm:$0xff] %v8023_v4  ;;  %v8029_v57 = vpack.c.bf16 %v410_v20, %v408_v59  ;;  %v409_v30 = vld [vmem:[#allocation13 + $0x170] sm:$0xff]  ;;  %v412_v14 = vld [vmem:[#allocation13 + $0x188] sm:$0xff]  ;;  %v8032_v58 = vpack.c.bf16 %v305_v45, %v303_v8  ;;  %v8035_v44 = vpack.c.bf16 %v310_v18, %v308_v56 }
 0x38f   :  { %9459 = vst [vmem:[#allocation114_spill] sm:$0xff] %v8027_v21  ;;  %v414_v15 = vld [vmem:[#allocation13 + $0x198] sm:$0xff]  ;;  %v307_v6 = vld [vmem:[#allocation10 + $0x440] sm:$0xff]  ;;  %v309_v25 = vld [vmem:[#allocation10 + $0x450] sm:$0xff]  ;;  %v8038_v60 = vpack.c.bf16 %v409_v30, %v407_v35 }
 0x390   :  { %5931 = vmatpush1.bf16.msra.mxu0 %v7993_v22  ;;  %9460 = vst [vmem:[#allocation115_spill] sm:$0xff] %v8029_v57  ;;  %9461 = vst [vmem:[#allocation116_spill] sm:$0xff] %v8032_v58  ;;  %v312_v33 = vld [vmem:[#allocation10 + $0x468] sm:$0xff]  ;;  %v314_v28 = vld [vmem:[#allocation10 + $0x478] sm:$0xff]  ;;  %v8041_v41 = vpack.c.bf16 %v414_v15, %v412_v14 }
 0x391   :  { %5827 = vmatpush1.bf16.msra.mxu1 %v7989_v7  ;;  %5933 = vmatprep.subr.bf16.mxu0 %v7999_v26  ;;  %9462 = vst [vmem:[#allocation117_spill] sm:$0xff] %v8035_v44  ;;  %9463 = vst [vmem:[#allocation118_spill] sm:$0xff] %v8038_v60  ;;  %v411_v62 = vld [vmem:[#allocation13 + $0x180] sm:$0xff]  ;;  %v413_v63 = vld [vmem:[#allocation13 + $0x190] sm:$0xff]  ;;  %v8047_v8 = vpack.c.bf16 %v314_v28, %v312_v33 }
 0x392   :  { %5829 = vmatprep.subr.bf16.mxu1 %v7996_v31  ;;  %9464 = vst [vmem:[#allocation119_spill] sm:$0xff] %v8041_v41  ;;  %v416_v59 = vld [vmem:[#allocation13 + $0x1a8] sm:$0xff]  ;;  %v418_v20 = vld [vmem:[#allocation13 + $0x1b8] sm:$0xff]  ;;  %v311_v45 = vld [vmem:[#allocation10 + $0x460] sm:$0xff]  ;;  %v8050_v18 = vpack.c.bf16 %v413_v63, %v411_v62 }
 0x393   :  { %9466 = vst [vmem:[#allocation121_spill] sm:$0xff] %v8047_v8  ;;  %v313_v56 = vld [vmem:[#allocation10 + $0x470] sm:$0xff]  ;;  %v318_v35 = vld [vmem:[#allocation10 + $0x498] sm:$0xff]  ;;  %v8053_v30 = vpack.c.bf16 %v418_v20, %v416_v59  ;;  %v415_v14 = vld [vmem:[#allocation13 + $0x1a0] sm:$0xff] }
 0x394   :  { %5935 = vmatpush1.bf16.msra.mxu0 %v8009_v37  ;;  %9467 = vst [vmem:[#allocation122_spill] sm:$0xff] %v8050_v18  ;;  %v417_v15 = vld [vmem:[#allocation13 + $0x1b0] sm:$0xff]  ;;  %v8056_v33 = vpack.c.bf16 %v313_v56, %v311_v45  ;;  %v320_v59 = vld [vmem:[#allocation10 + $0x4a8] sm:$0xff]  ;;  %v322_v20 = vld [vmem:[#allocation10 + $0x4b8] sm:$0xff] }
 0x395   :  { %5831 = vmatpush1.bf16.msra.mxu1 %v8002_v52  ;;  %5937 = vmatprep.subr.bf16.mxu0 %v8014_v9  ;;  %9468 = vst [vmem:[#allocation123_spill] sm:$0xff] %v8053_v30  ;;  %v317_v62 = vld [vmem:[#allocation10 + $0x490] sm:$0xff]  ;;  %v8062_v63 = vpack.c.bf16 %v417_v15, %v415_v14  ;;  %v324_v14 = vld [vmem:[#allocation10 + $0x4c8] sm:$0xff]  ;;  %v326_v15 = vld [vmem:[#allocation10 + $0x4d8] sm:$0xff] }
 0x396   :  { %5833 = vmatprep.subr.bf16.mxu1 %v8006_v23  ;;  %9469 = vst [vmem:[#allocation124_spill] sm:$0xff] %v8056_v33  ;;  %v1186_v56 = vld [vmem:[#allocation2 + $0x20] sm:$0xf]  ;;  %v334_v7 = vld [vmem:[#allocation10 + $0x518] sm:$0xff] }
 0x397   :  { %9471 = vst [vmem:[#allocation126_spill] sm:$0xff] %v8062_v63  ;;  %v338_v0 = vld [vmem:[#allocation10 + $0x538] sm:$0xff] }
 0x398   :  { %1806 = vmatmul.mubr.f32.vlgmr.msra.gmra.mrb[2].mxu1 %v1642_v39  ;;  %5939 = vmatpush1.bf16.msra.mxu0 %v8027_v21  ;;  %v8044_v39 = vpack.c.bf16 %v309_v25, %v307_v6  ;;  %v420_v6 = vld [vmem:[#allocation13 + $0x1c8] sm:$0xff]  ;;  %v422_v25 = vld [vmem:[#allocation13 + $0x1d8] sm:$0xff] }
 0x399   :  { %5835 = vmatpush1.bf16.msra.mxu1 %v8019_v43  ;;  %1876 = vmatprep.mubr.f32.mxu1 %v1663_v38  ;;  %v316_v38 = vld [vmem:[#allocation10 + $0x488] sm:$0xff]  ;;  %v1204_v43 = vld [vmem:[#allocation2 + $0x140] sm:$0xf] }
 0x39a   :  { %5837 = vmatprep.subr.bf16.mxu1 %v8023_v4  ;;  %5941 = vmatprep.subr.bf16.mxu0 %v8029_v57  ;;  %9465 = vst [vmem:[#allocation120_spill] sm:$0xff] %v8044_v39  ;;  %v8059_v28 = vpack.c.bf16 %v318_v35, %v316_v38  ;;  %v8071_v38 = vpack.c.bf16 %v322_v20, %v320_v59  ;;  %v319_v35 = vld [vmem:[#allocation10 + $0x4a0] sm:$0xff]  ;;  %v330_v4 = vld [vmem:[#allocation10 + $0x4f8] sm:$0xff] }
 0x39b   :  { %v8081_v59 = vpack.c.bf16 %v326_v15, %v324_v14  ;;  %v323_v20 = vld [vmem:[#allocation10 + $0x4c0] sm:$0xff]  ;;  %v1210_v14 = vld [vmem:[#allocation2 + $0x1a0] sm:$0xf] }
 0x39c   :  { %5943 = vmatpush1.bf16.msra.mxu0 %v8038_v60  ;;  %9470 = vst [vmem:[#allocation125_spill] sm:$0xff] %v8059_v28  ;;  %9474 = vst [vmem:[#allocation129_spill] sm:$0xff] %v8071_v38 }
 0x39d   :  { %5839 = vmatpush1.bf16.msra.mxu1 %v8032_v58  ;;  %5945 = vmatprep.subr.bf16.mxu0 %v8041_v41  ;;  %v8065_v58 = vpack.c.bf16 %v422_v25, %v420_v6  ;;  %v1198_v6 = vld [vmem:[#allocation2 + $0xe0] sm:$0xf]  ;;  %v1259_v25 = vsel %vm1230_vm0, %v1186_v56, -inf  ;;  %9476 = vst [vmem:[#allocation131_spill] sm:$0xff] %v8081_v59  ;;  %v327_v56 = vld [vmem:[#allocation10 + $0x4e0] sm:$0xff] }
 0x39e   :  { %5841 = vmatprep.subr.bf16.mxu1 %v8035_v44  ;;  %v315_v44 = vld [vmem:[#allocation10 + $0x480] sm:$0xff]  ;;  %v1260_v23 = vrot.slane %v1259_v25, 4  ;;  %v1343_v31 = vsel %vm1230_vm0, %v1198_v6, -inf }
 0x39f   :  { %9472 = vst [vmem:[#allocation127_spill] sm:$0xff] %v8065_v58  ;;  %v8068_v45 = vpack.c.bf16 %v317_v62, %v315_v44  ;;  %v1344_v15 = vrot.slane %v1343_v31, 4 }
 0x3a0   :  { %5947 = vmatpush1.bf16.msra.mxu0 %v8050_v18  ;;  %v1261_v17 = vmax.f32 %v1259_v25, %v1260_v23 }
 0x3a1   :  { %5843 = vmatpush1.bf16.msra.mxu1 %v8044_v39  ;;  %5949 = vmatprep.subr.bf16.mxu0 %v8053_v30  ;;  %9473 = vst [vmem:[#allocation128_spill] sm:$0xff] %v8068_v45  ;;  %v321_v39 = vld [vmem:[#allocation10 + $0x4b0] sm:$0xff]  ;;  %v1345_v5 = vmax.f32 %v1343_v31, %v1344_v15  ;;  %v340_v15 = vld [vmem:[#allocation10 + $0x548] sm:$0xff] }
 0x3a2   :  { %5845 = vmatprep.subr.bf16.mxu1 %v8047_v8  ;;  %v1192_v8 = vld [vmem:[#allocation2 + $0x80] sm:$0xf]  ;;  %v8078_v62 = vpack.c.bf16 %v321_v39, %v319_v35  ;;  %v1262_v47 = vrot.slane %v1261_v17, 2 }
 0x3a3   :  { %v1301_v44 = vsel %vm1230_vm0, %v1192_v8, -inf  ;;  %v329_v35 = vld [vmem:[#allocation10 + $0x4f0] sm:$0xff]  ;;  %v1346_v31 = vrot.slane %v1345_v5, 2 }
 0x3a4   :  { %5951 = vmatpush1.bf16.msra.mxu0 %v8062_v63  ;;  %9475 = vst [vmem:[#allocation130_spill] sm:$0xff] %v8078_v62  ;;  %v1302_v52 = vrot.slane %v1301_v44, 4  ;;  %v8092_v6 = vpack.c.bf16 %v329_v35, %v327_v56  ;;  %v1263_v40 = vmax.f32 %v1261_v17, %v1262_v47  ;;  %v346_v17 = vld [vmem:[#allocation10 + $0x578] sm:$0xff] }
 0x3a5   :  { %5847 = vmatpush1.bf16.msra.mxu1 %v8056_v33  ;;  %5953 = vmatprep.subr.bf16.mxu0 %v8065_v58  ;;  %v328_v33 = vld [vmem:[#allocation10 + $0x4e8] sm:$0xff] }
 0x3a6   :  { %5849 = vmatprep.subr.bf16.mxu1 %v8059_v28  ;;  %v325_v28 = vld [vmem:[#allocation10 + $0x4d0] sm:$0xff]  ;;  %v8088_v39 = vpack.c.bf16 %v330_v4, %v328_v33  ;;  %v1303_v50 = vmax.f32 %v1301_v44, %v1302_v52  ;;  %9479 = vst [vmem:[#allocation134_spill] sm:$0xff] %v8092_v6  ;;  %v331_v33 = vld [vmem:[#allocation10 + $0x500] sm:$0xff] }
 0x3a7   :  { %v8085_v8 = vpack.c.bf16 %v325_v28, %v323_v20  ;;  %v1216_v28 = vld [vmem:[#allocation2 + $0x200] sm:$0xf] }
 0x3a8   :  { %9478 = vst [vmem:[#allocation133_spill] sm:$0xff] %v8088_v39  ;;  %v1304_v23 = vrot.slane %v1303_v50, 2  ;;  %v1222_v52 = vld [vmem:[#allocation2 + $0x260] sm:$0xf]  ;;  %v1469_v44 = vsel %vm1230_vm0, %v1216_v28, -inf }
 0x3a9   :  { %5851 = vmatpush1.bf16.msra.mxu1 %v8068_v45  ;;  %9477 = vst [vmem:[#allocation132_spill] sm:$0xff] %v8085_v8  ;;  %v332_v45 = vld [vmem:[#allocation10 + $0x508] sm:$0xff]  ;;  %v1470_v19 = vrot.slane %v1469_v44, 4  ;;  %v1511_v28 = vsel %vm1230_vm0, %v1222_v52, -inf }
 0x3aa   :  { %5853 = vmatprep.subr.bf16.mxu1 %v8071_v38  ;;  %v1385_v38 = vsel %vm1230_vm0, %v1204_v43, -inf  ;;  %v8096_v4 = vpack.c.bf16 %v334_v7, %v332_v45  ;;  %v336_v43 = vld [vmem:[#allocation10 + $0x528] sm:$0xff]  ;;  %v335_v45 = vld [vmem:[#allocation10 + $0x520] sm:$0xff]  ;;  %v1305_v42 = vmax.f32 %v1303_v50, %v1304_v23  ;;  %v1264_v23 = vrot.slane %v1263_v40, 1 }
 0x3ab   :  { %v1386_v20 = vrot.slane %v1385_v38, 4  ;;  %v8103_v7 = vpack.c.bf16 %v338_v0, %v336_v43  ;;  %v1347_v43 = vmax.f32 %v1345_v5, %v1346_v31  ;;  %v344_v50 = vld [vmem:[#allocation10 + $0x568] sm:$0xff]  ;;  %v343_v5 = vld [vmem:[#allocation10 + $0x560] sm:$0xff]  ;;  %v345_v31 = vld [vmem:[#allocation10 + $0x570] sm:$0xff] }
 0x3ac   :  { %9480 = vst [vmem:[#allocation135_spill] sm:$0xff] %v8096_v4  ;;  %v1306_v52 = vrot.slane %v1305_v42, 1  ;;  %v1265_v11 = vmax.f32 %v1263_v40, %v1264_v23 }
 0x3ad   :  { %5855 = vmatpush1.bf16.msra.mxu1 %v8078_v62  ;;  %v333_v62 = vld [vmem:[#allocation10 + $0x510] sm:$0xff]  ;;  %v1387_v35 = vmax.f32 %v1385_v38, %v1386_v20  ;;  %9482 = vst [vmem:[#allocation137_spill] sm:$0xff] %v8103_v7  ;;  %v339_v20 = vld [vmem:[#allocation10 + $0x540] sm:$0xff] }
 0x3ae   :  { %5857 = vmatprep.subr.bf16.mxu1 %v8081_v59  ;;  %v1427_v59 = vsel %vm1230_vm0, %v1210_v14, -inf  ;;  %v8100_v56 = vpack.c.bf16 %v333_v62, %v331_v33  ;;  %v337_v14 = vld [vmem:[#allocation10 + $0x530] sm:$0xff]  ;;  %v1307_v53 = vmax.f32 %v1305_v42, %v1306_v52 }
 0x3af   :  { %v1428_v25 = vrot.slane %v1427_v59, 4  ;;  %v8107_v62 = vpack.c.bf16 %v337_v14, %v335_v45  ;;  %v1388_v38 = vrot.slane %v1387_v35, 2  ;;  %v341_v33 = vld [vmem:[#allocation10 + $0x550] sm:$0xff] }
 0x3b0   :  { %9481 = vst [vmem:[#allocation136_spill] sm:$0xff] %v8100_v56  ;;  %v8114_v45 = vpack.c.bf16 %v341_v33, %v339_v20  ;;  %v8120_v20 = vpack.c.bf16 %v345_v31, %v343_v5  ;;  %v1650_v42 = vsel %vm1615_vm1, %v1307_v53, %v1265_v11  ;;  %v356_v5 = vld [vmem:[#allocation10 + $0x5c8] sm:$0xff] }
 0x3b1   :  { %5859 = vmatpush1.bf16.msra.mxu1 %v8085_v8  ;;  %v1228_v8 = vld [vmem:[#allocation2 + $0x2c0] sm:$0xf]  ;;  %v1429_v13 = vmax.f32 %v1427_v59, %v1428_v25  ;;  %9483 = vst [vmem:[#allocation138_spill] sm:$0xff] %v8107_v62  ;;  %v1471_v59 = vmax.f32 %v1469_v44, %v1470_v19  ;;  %v1389_v14 = vmax.f32 %v1387_v35, %v1388_v38 }
 0x3b2   :  { %5861 = vmatprep.subr.bf16.mxu1 %v8088_v39  ;;  %v342_v39 = vld [vmem:[#allocation10 + $0x558] sm:$0xff]  ;;  %v1553_v47 = vsel %vm1230_vm0, %v1228_v8, -inf  ;;  %9485 = vst [vmem:[#allocation140_spill] sm:$0xff] %v8114_v45  ;;  %9487 = vst [vmem:[#allocation142_spill] sm:$0xff] %v8120_v20 }
 0x3b3   :  { %v8110_v0 = vpack.c.bf16 %v342_v39, %v340_v15  ;;  %v1430_v25 = vrot.slane %v1429_v13, 2  ;;  %v8117_v39 = vpack.c.bf16 %v346_v17, %v344_v50  ;;  %v1348_v15 = vrot.slane %v1347_v43, 1  ;;  %v347_v50 = vld [vmem:[#allocation10 + $0x580] sm:$0xff]  ;;  %v349_v17 = vld [vmem:[#allocation10 + $0x590] sm:$0xff] }
 0x3b4   :  { %v1472_v19 = vrot.slane %v1471_v59, 2  ;;  %v1390_v35 = vrot.slane %v1389_v14, 1  ;;  %v8127_v23 = vpack.c.bf16 %v349_v17, %v347_v50  ;;  %v360_v50 = vld [vmem:[#allocation10 + $0x5e8] sm:$0xff] }
 0x3b5   :  { %5863 = vmatpush1.bf16.msra.mxu1 %v8092_v6  ;;  %9484 = vst [vmem:[#allocation139_spill] sm:$0xff] %v8110_v0  ;;  %9486 = vst [vmem:[#allocation141_spill] sm:$0xff] %v8117_v39  ;;  %v350_v6 = vld [vmem:[#allocation10 + $0x598] sm:$0xff]  ;;  %v1431_v44 = vmax.f32 %v1429_v13, %v1430_v25 }
 0x3b6   :  { %5865 = vmatprep.subr.bf16.mxu1 %v8096_v4  ;;  %v1512_v4 = vrot.slane %v1511_v28, 4  ;;  %v1473_v40 = vmax.f32 %v1471_v59, %v1472_v19  ;;  %9489 = vst [vmem:[#allocation144_spill] sm:$0xff] %v8127_v23  ;;  %v1391_v52 = vmax.f32 %v1389_v14, %v1390_v35  ;;  %v358_v59 = vld [vmem:[#allocation10 + $0x5d8] sm:$0xff]  ;;  %v355_v19 = vld [vmem:[#allocation10 + $0x5c0] sm:$0xff]  ;;  %v357_v35 = vld [vmem:[#allocation10 + $0x5d0] sm:$0xff] }
 0x3b7   :  { %v1432_v13 = vrot.slane %v1431_v44, 1 }
 0x3b8   :  { %v1513_v8 = vmax.f32 %v1511_v28, %v1512_v4  ;;  %v352_v28 = vld [vmem:[#allocation10 + $0x5a8] sm:$0xff]  ;;  %v1474_v31 = vrot.slane %v1473_v40, 1 }
 0x3b9   :  { %5867 = vmatpush1.bf16.msra.mxu1 %v8100_v56  ;;  %v348_v56 = vld [vmem:[#allocation10 + $0x588] sm:$0xff]  ;;  %v1433_v53 = vmax.f32 %v1431_v44, %v1432_v13  ;;  %v8142_v44 = vpack.c.bf16 %v357_v35, %v355_v19  ;;  %v361_v13 = vld [vmem:[#allocation10 + $0x5f0] sm:$0xff]  ;;  %v423_v35 = vld [vmem:[#allocation13 + $0x1e0] sm:$0xff] }
 0x3ba   :  { %5869 = vmatprep.subr.bf16.mxu1 %v8103_v7  ;;  %v1554_v7 = vrot.slane %v1553_v47, 4  ;;  %v8123_v33 = vpack.c.bf16 %v350_v6, %v348_v56  ;;  %v1514_v4 = vrot.slane %v1513_v8, 2  ;;  %v351_v56 = vld [vmem:[#allocation10 + $0x5a0] sm:$0xff]  ;;  %v1475_v17 = vmax.f32 %v1473_v40, %v1474_v31  ;;  %v421_v31 = vld [vmem:[#allocation13 + $0x1d0] sm:$0xff] }
 0x3bb   :  { %9493 = vst [vmem:[#allocation148_spill] sm:$0xff] %v8142_v44 }
 0x3bc   :  { %v1555_v38 = vmax.f32 %v1553_v47, %v1554_v7  ;;  %9488 = vst [vmem:[#allocation143_spill] sm:$0xff] %v8123_v33  ;;  %v353_v47 = vld [vmem:[#allocation10 + $0x5b0] sm:$0xff] }
 0x3bd   :  { %5871 = vmatpush1.bf16.msra.mxu1 %v8107_v62  ;;  %v354_v62 = vld [vmem:[#allocation10 + $0x5b8] sm:$0xff]  ;;  %v8134_v11 = vpack.c.bf16 %v353_v47, %v351_v56 }
 0x3be   :  { %5873 = vmatprep.subr.bf16.mxu1 %v8110_v0  ;;  %v1349_v0 = vmax.f32 %v1347_v43, %v1348_v15  ;;  %v1556_v7 = vrot.slane %v1555_v38, 2  ;;  %v8130_v6 = vpack.c.bf16 %v354_v62, %v352_v28  ;;  %v1515_v43 = vmax.f32 %v1513_v8, %v1514_v4 }
 0x3bf   :  { %9491 = vst [vmem:[#allocation146_spill] sm:$0xff] %v8134_v11  ;;  %v8138_v62 = vpack.c.bf16 %v358_v59, %v356_v5  ;;  %v419_v59 = vld [vmem:[#allocation13 + $0x1c0] sm:$0xff] }
 0x3c0   :  { %9490 = vst [vmem:[#allocation145_spill] sm:$0xff] %v8130_v6  ;;  %v1651_v25 = vsel %vm1617_vm2, %v1349_v0, %v1650_v42  ;;  %v1557_v15 = vmax.f32 %v1555_v38, %v1556_v7  ;;  %v1516_v8 = vrot.slane %v1515_v43, 1  ;;  %v362_v0 = vld [vmem:[#allocation10 + $0x5f8] sm:$0xff]  ;;  %v359_v42 = vld [vmem:[#allocation10 + $0x5e0] sm:$0xff] }
 0x3c1   :  { %5875 = vmatpush1.bf16.msra.mxu1 %v8114_v45  ;;  %v1652_v14 = vsel %vm1619_vm3, %v1391_v52, %v1651_v25  ;;  %9492 = vst [vmem:[#allocation147_spill] sm:$0xff] %v8138_v62  ;;  %v8145_v38 = vpack.c.bf16 %v362_v0, %v360_v50  ;;  %v8149_v56 = vpack.c.bf16 %v361_v13, %v359_v42  ;;  %v444_v0 = vld [vmem:[#allocation16 + $0x80] sm:$0xff] }
 0x3c2   :  { %5877 = vmatprep.subr.bf16.mxu1 %v8117_v39  ;;  %v1653_v4 = vsel %vm1621_vm4, %v1433_v53, %v1652_v14  ;;  %v1558_v28 = vrot.slane %v1557_v15, 1  ;;  %v1517_v52 = vmax.f32 %v1515_v43, %v1516_v8  ;;  %v8184_v53 = vpack.c.bf16 %v421_v31, %v419_v59  ;;  %v426_v14 = vld [vmem:[#allocation13 + $0x1f8] sm:$0xff]  ;;  %v425_v8 = vld [vmem:[#allocation13 + $0x1f0] sm:$0xff]  ;;  %v428_v59 = vld [vmem:[#allocation16] sm:$0xff] }
 0x3c3   :  { %9494 = vst [vmem:[#allocation149_spill] sm:$0xff] %v8145_v38  ;;  %v1654_v7 = vsel %vm1623_vm5, %v1475_v17, %v1653_v4  ;;  %9495 = vst [vmem:[#allocation150_spill] sm:$0xff] %v8149_v56  ;;  %v8190_v50 = vpack.c.bf16 %v425_v8, %v423_v35  ;;  %v445_v17 = vld [vmem:[#allocation16 + $0x88] sm:$0xff]  ;;  %v447_v35 = vld [vmem:[#allocation16 + $0x98] sm:$0xff] }
 0x3c4   :  { %v1559_v40 = vmax.f32 %v1557_v15, %v1558_v28  ;;  %v1655_v47 = vsel %vm1625_vm6, %v1517_v52, %v1654_v7  ;;  %9496 = vst [vmem:[#allocation151_spill] sm:$0xff] %v8184_v53  ;;  %5955 = vmatpush1.bf16.msra.mxu0 %v8184_v53  ;;  %v424_v15 = vld [vmem:[#allocation13 + $0x1e8] sm:$0xff]  ;;  %v8196_v4 = vpack.c.bf16 %v445_v17, %v444_v0  ;;  %v1099_v28 = vld [vmem:[%s9061_s8] sm:$0x3] }
 0x3c5   :  { %5879 = vmatpush1.bf16.msra.mxu1 %v8120_v20  ;;  %v8188_v19 = vpack.c.bf16 %v426_v14, %v424_v15  ;;  %9498 = vst [vmem:[#allocation153_spill] sm:$0xff] %v8190_v50  ;;  %v1104_v42 = vrot.slane %v1099_v28, %v7655_v34  ;;  %v1108_v13 = vrot.slane %v1099_v28, %v7660_v36  ;;  %v429_v31 = vld [vmem:[#allocation16 + $0x8] sm:$0xff]  ;;  %v446_v14 = vld [vmem:[#allocation16 + $0x90] sm:$0xff]  ;;  %v431_v28 = vld [vmem:[#allocation16 + $0x18] sm:$0xff] }
 0x3c6   :  { %5881 = vmatprep.subr.bf16.mxu1 %v8123_v33  ;;  %v1656_v25 = vsel %vm1627_vm7, %v1559_v40, %v1655_v47  ;;  %9499 = vst [vmem:[#allocation154_spill] sm:$0xff] %v8196_v4  ;;  %v8211_v0 = vpack.c.bf16 %v429_v31, %v428_v59  ;;  %v433_v59 = vld [vmem:[#allocation16 + $0x28] sm:$0xff]  ;;  %v450_v31 = vld [vmem:[#allocation16 + $0xb0] sm:$0xff] }
 0x3c7   :  { %9497 = vst [vmem:[#allocation152_spill] sm:$0xff] %v8188_v19  ;;  %5957 = vmatprep.subr.bf16.mxu0 %v8188_v19 }
 0x3c8   :  { %5959 = vmatpush1.bf16.msra.mxu0 %v8190_v50  ;;  %9502 = vst [vmem:[#allocation157_spill] sm:$0xff] %v8211_v0 }
 0x3c9   :  { %5883 = vmatpush1.bf16.msra.mxu1 %v8127_v23  ;;  %5961 = vmatprep.subr.bf16.mxu0 %v8196_v4 }
 0x3ca   :  { %5885 = vmatprep.subr.bf16.mxu1 %v8130_v6 }
 0x3cd   :  { %5887 = vmatpush1.bf16.msra.mxu1 %v8134_v11 }
 0x3ce   :  { %5889 = vmatprep.subr.bf16.mxu1 %v8138_v62 }
 0x3d1   :  { %5891 = vmatpush1.bf16.msra.mxu1 %v8142_v44 }
 0x3d2   :  { %5893 = vmatprep.subr.bf16.mxu1 %v8145_v38 }
 0x3d5   :  { %5895 = vmatpush1.bf16.msra.mxu1 %v8149_v56 }
 0x3d6   :  { %6185 = vmatprep.subr.bf16.mxu1 %v7880_v51 }
 0x3d8   :  { %1877 = vmatmul.mubr.f32.vlgmr.msra.gmra.mrb[2].mxu1 %v1656_v25 }
 0x3d9   :  { %6187 = vmatpush1.bf16.msra.mxu1 %v7883_v3 }
 0x3da   :  { %6189 = vmatprep.subr.bf16.mxu1 %v7885_v10 }
 0x3dd   :  { %6191 = vmatpush1.bf16.msra.mxu1 %v7895_v54 }
 0x3de   :  { %6193 = vmatprep.subr.bf16.mxu1 %v7902_v16 }
 0x3e1   :  { %6195 = vmatpush1.bf16.msra.mxu1 %v7916_v46 }
 0x3e2   :  { %6197 = vmatprep.subr.bf16.mxu1 %v7922_v27 }
 0x3e5   :  { %6199 = vmatpush1.bf16.msra.mxu1 %v7930_v49 }
 0x3e6   :  { %6201 = vmatprep.subr.bf16.mxu1 %v7935_v55 }
 0x3e9   :  { %6203 = vmatpush1.bf16.msra.mxu1 %v7940_v1 }
 0x3ea   :  { %6205 = vmatprep.subr.bf16.mxu1 %v7944_v12 }
 0x3eb   :  { %v1177_v43 = vpop.f32.mrb[0].mxu1 }
 0x3ec   :  { %v1179_v5 = vpop.f32.mrb[1].mxu1  ;;  %v8205_v52 = vadd.f32 %v1177_v43, %v1104_v42  ;;  %v430_v43 = vld [vmem:[#allocation16 + $0x10] sm:$0xff]  ;;  %v449_v42 = vld [vmem:[#allocation16 + $0xa8] sm:$0xff] }
 0x3ed   :  { %6207 = vmatpush1.bf16.msra.mxu1 %v7949_v29  ;;  %v8207_v7 = vadd.f32 %v1179_v5, %v1108_v13  ;;  %v448_v5 = vld [vmem:[#allocation16 + $0xa0] sm:$0xff]  ;;  %v8216_v13 = vpack.c.bf16 %v431_v28, %v430_v43  ;;  %v453_v43 = vld [vmem:[#allocation16 + $0xc8] sm:$0xff] }
 0x3ee   :  { %6209 = vmatprep.subr.bf16.mxu1 %v7955_v2  ;;  %9500 = vst [vmem:[#allocation155_spill] sm:$0xff] %v8205_v52 }
 0x3ef   :  { %9501 = vst [vmem:[#allocation156_spill] sm:$0xff] %v8207_v7  ;;  %9504 = vst [vmem:[#allocation159_spill] sm:$0xff] %v8216_v13 }
 0x3f1   :  { %6211 = vmatpush1.bf16.msra.mxu1 %v7966_v61 }
 0x3f2   :  { %6213 = vmatprep.subr.bf16.mxu1 %v7970_v32  ;;  %v9539_v32 = vld [vmem:[#allocation44_spill] sm:$0xff] }
 0x3f5   :  { %6215 = vmatpush1.bf16.msra.mxu1 %v7980_v48 }
 0x3f6   :  { %6217 = vmatprep.subr.bf16.mxu1 %v7985_v24 }
 0x3f9   :  { %6219 = vmatpush1.bf16.msra.mxu1 %v7993_v22 }
 0x3fa   :  { %6221 = vmatprep.subr.bf16.mxu1 %v7999_v26 }
 0x3fd   :  { %6223 = vmatpush1.bf16.msra.mxu1 %v8009_v37 }
 0x3fe   :  { %6225 = vmatprep.subr.bf16.mxu1 %v8014_v9 }
 0x401   :  { %6227 = vmatpush1.bf16.msra.mxu1 %v8027_v21 }
 0x402   :  { %6229 = vmatprep.subr.bf16.mxu1 %v8029_v57 }
 0x405   :  { %6231 = vmatpush1.bf16.msra.mxu1 %v8038_v60 }
 0x406   :  { %6233 = vmatprep.subr.bf16.mxu1 %v8041_v41 }
 0x409   :  { %6235 = vmatpush1.bf16.msra.mxu1 %v8050_v18 }
 0x40a   :  { %6237 = vmatprep.subr.bf16.mxu1 %v8053_v30 }
 0x40d   :  { %6239 = vmatpush1.bf16.msra.mxu1 %v8062_v63 }
 0x40e   :  { %6241 = vmatprep.subr.bf16.mxu1 %v8065_v58 }
 0x411   :  { %6243 = vmatpush1.bf16.msra.mxu1 %v8184_v53 }
 0x412   :  { %6245 = vmatprep.subr.bf16.mxu1 %v8188_v19 }
 0x415   :  { %6247 = vmatpush1.bf16.msra.mxu1 %v8190_v50  ;;  %v2083_v50 = vld [vmem:[#allocation2 + $0x248] sm:$0xf0] }
 0x416   :  { %6249 = vmatprep.subr.bf16.mxu1 %v8196_v4  ;;  %v8213_v4 = vpack.c.bf16 %v447_v35, %v446_v14  ;;  %v434_v35 = vld [vmem:[#allocation16 + $0x30] sm:$0xff] }
 0x418   :  { %9503 = vst [vmem:[#allocation158_spill] sm:$0xff] %v8213_v4 }
 0x4ab   :  { %v1878_v40 = vpop.f32.mrb[2].mxu1 }
 0x4ac   :  { %v7146_v47 = vadd.f32 %v1878_v40, %v8205_v52  ;;  %v1880_v25 = vpop.f32.mrb[3].mxu1  ;;  %v8219_v40 = vpack.c.bf16 %v449_v42, %v448_v5  ;;  %v436_v42 = vld [vmem:[#allocation16 + $0x40] sm:$0xff] }
 0x4ad   :  { %v7147_v15 = vadd.f32 %v1880_v25, %v8207_v7  ;;  %v432_v25 = vld [vmem:[#allocation16 + $0x20] sm:$0xff] }
 0x4ae   :  { %v1883_v17 = vmax.f32 %v7146_v47, 0.0  ;;  %9505 = vst [vmem:[#allocation160_spill] sm:$0xff] %v8219_v40  ;;  %v451_v47 = vld [vmem:[#allocation16 + $0xb8] sm:$0xff] }
 0x4af   :  { %v1884_v8 = vmax.f32 %v7147_v15, 0.0  ;;  %v8222_v15 = vpack.c.bf16 %v433_v59, %v432_v25  ;;  %v8225_v14 = vpack.c.bf16 %v451_v47, %v450_v31  ;;  %v454_v25 = vld [vmem:[#allocation16 + $0xd0] sm:$0xff]  ;;  %v455_v59 = vld [vmem:[#allocation16 + $0xd8] sm:$0xff] }
 0x4b0   :  { %v8237_v47 = vpack.c.bf16 %v455_v59, %v454_v25  ;;  %v459_v25 = vld [vmem:[#allocation16 + $0xf8] sm:$0xff] }
 0x4b1   :  { %1960 = vmatprep.mubr.f32.mxu0 %v1884_v8  ;;  %9506 = vst [vmem:[#allocation161_spill] sm:$0xff] %v8222_v15  ;;  %9507 = vst [vmem:[#allocation162_spill] sm:$0xff] %v8225_v14  ;;  %v435_v8 = vld [vmem:[#allocation16 + $0x38] sm:$0xff] }
 0x4b2   :  { %1961 = vmatmul.mubr.f32.vlgmr.msra.gmra.mrb[4].mxu0 %v1883_v17  ;;  %v452_v17 = vld [vmem:[#allocation16 + $0xc0] sm:$0xff]  ;;  %v8228_v28 = vpack.c.bf16 %v435_v8, %v434_v35  ;;  %9511 = vst [vmem:[#allocation166_spill] sm:$0xff] %v8237_v47  ;;  %v457_v8 = vld [vmem:[#allocation16 + $0xe8] sm:$0xff] }
 0x4b3   :  { %5963 = vmatpush3.bf16.msra.mxu0 %v8211_v0  ;;  %v8231_v5 = vpack.c.bf16 %v453_v43, %v452_v17  ;;  %v456_v35 = vld [vmem:[#allocation16 + $0xe0] sm:$0xff] }
 0x4b4   :  { %5965 = vmatprep.subr.bf16.mxu0 %v8213_v4  ;;  %9508 = vst [vmem:[#allocation163_spill] sm:$0xff] %v8228_v28  ;;  %v8243_v43 = vpack.c.bf16 %v457_v8, %v456_v35  ;;  %v9517_v35 = vld [vmem:[#allocation26_spill] sm:$0xff] }
 0x4b5   :  { %9509 = vst [vmem:[#allocation164_spill] sm:$0xff] %v8231_v5  ;;  %v2059_v8 = vld [vmem:[#allocation2 + $0xc8] sm:$0xf0] }
 0x4b6   :  { %9513 = vst [vmem:[#allocation168_spill] sm:$0xff] %v8243_v43 }
 0x4b7   :  { %5967 = vmatpush3.bf16.msra.mxu0 %v8216_v13  ;;  %v437_v13 = vld [vmem:[#allocation16 + $0x48] sm:$0xff] }
 0x4b8   :  { %5969 = vmatprep.subr.bf16.mxu0 %v8219_v40  ;;  %v8234_v31 = vpack.c.bf16 %v437_v13, %v436_v42  ;;  %v438_v40 = vld [vmem:[#allocation16 + $0x50] sm:$0xff] }
 0x4b9   :  { %v458_v42 = vld [vmem:[#allocation16 + $0xf0] sm:$0xff] }
 0x4ba   :  { %9510 = vst [vmem:[#allocation165_spill] sm:$0xff] %v8234_v31  ;;  %v8250_v59 = vpack.c.bf16 %v459_v25, %v458_v42  ;;  %v2065_v42 = vld [vmem:[#allocation2 + $0x128] sm:$0xf0] }
 0x4bb   :  { %5971 = vmatpush3.bf16.msra.mxu0 %v8222_v15  ;;  %v439_v15 = vld [vmem:[#allocation16 + $0x58] sm:$0xff] }
 0x4bc   :  { %5973 = vmatprep.subr.bf16.mxu0 %v8225_v14  ;;  %v8240_v17 = vpack.c.bf16 %v439_v15, %v438_v40  ;;  %v440_v14 = vld [vmem:[#allocation16 + $0x60] sm:$0xff]  ;;  %9515 = vst [vmem:[#allocation170_spill] sm:$0xff] %v8250_v59  ;;  %v442_v40 = vld [vmem:[#allocation16 + $0x70] sm:$0xff]  ;;  %v443_v15 = vld [vmem:[#allocation16 + $0x78] sm:$0xff] }
 0x4be   :  { %9512 = vst [vmem:[#allocation167_spill] sm:$0xff] %v8240_v17 }
 0x4bf   :  { %5975 = vmatpush3.bf16.msra.mxu0 %v8228_v28  ;;  %v441_v28 = vld [vmem:[#allocation16 + $0x68] sm:$0xff] }
 0x4c0   :  { %5977 = vmatprep.subr.bf16.mxu0 %v8231_v5  ;;  %v8246_v13 = vpack.c.bf16 %v441_v28, %v440_v14  ;;  %v2047_v14 = vld [vmem:[#allocation2 + $0x8] sm:$0xf0] }
 0x4c1   :  { %v2053_v28 = vld [vmem:[#allocation2 + $0x68] sm:$0xf0] }
 0x4c2   :  { %9514 = vst [vmem:[#allocation169_spill] sm:$0xff] %v8246_v13 }
 0x4c3   :  { %5979 = vmatpush3.bf16.msra.mxu0 %v8234_v31  ;;  %v8252_v31 = vpack.c.bf16 %v443_v15, %v442_v40  ;;  %v2186_v40 = vsel %vm2094_vm8, %v2059_v8, -inf  ;;  %v2071_v15 = vld [vmem:[#allocation2 + $0x188] sm:$0xf0] }
 0x4c4   :  { %5981 = vmatprep.subr.bf16.mxu0 %v8237_v47  ;;  %v2187_v47 = vrot.slane %v2186_v40, 4  ;;  %v2270_v0 = vsel %vm2094_vm8, %v2071_v15, -inf  ;;  %v2089_v8 = vld [vmem:[#allocation2 + $0x2a8] sm:$0xf0] }
 0x4c5   :  { %9516 = vst [vmem:[#allocation171_spill] sm:$0xff] %v8252_v31 }
 0x4c6   :  { %v2188_v7 = vmax.f32 %v2186_v40, %v2187_v47  ;;  %v2396_v47 = vsel %vm2094_vm8, %v2089_v8, -inf }
 0x4c7   :  { %5983 = vmatpush3.bf16.msra.mxu0 %v8240_v17 }
 0x4c8   :  { %5985 = vmatprep.subr.bf16.mxu0 %v8243_v43  ;;  %v2144_v43 = vsel %vm2094_vm8, %v2053_v28, -inf  ;;  %v2271_v28 = vrot.slane %v2270_v0, 4  ;;  %v2189_v58 = vrot.slane %v2188_v7, 2 }
 0x4c9   :  { %v2145_v17 = vrot.slane %v2144_v43, 4 }
 0x4cb   :  { %5987 = vmatpush3.bf16.msra.mxu0 %v8246_v13  ;;  %v2102_v13 = vsel %vm2094_vm8, %v2047_v14, -inf  ;;  %v2146_v5 = vmax.f32 %v2144_v43, %v2145_v17  ;;  %v2272_v17 = vmax.f32 %v2270_v0, %v2271_v28 }
 0x4cc   :  { %5989 = vmatprep.subr.bf16.mxu0 %v8250_v59  ;;  %v2103_v25 = vrot.slane %v2102_v13, 4  ;;  %v2228_v59 = vsel %vm2094_vm8, %v2065_v42, -inf  ;;  %v2190_v42 = vmax.f32 %v2188_v7, %v2189_v58 }
 0x4cd   :  { %v2229_v4 = vrot.slane %v2228_v59, 4  ;;  %v2147_v14 = vrot.slane %v2146_v5, 2  ;;  %v2273_v60 = vrot.slane %v2272_v17, 2 }
 0x4cf   :  { %5991 = vmatpush3.bf16.msra.mxu0 %v8252_v31  ;;  %v2104_v31 = vmax.f32 %v2102_v13, %v2103_v25  ;;  %v2230_v53 = vmax.f32 %v2228_v59, %v2229_v4  ;;  %v2148_v30 = vmax.f32 %v2146_v5, %v2147_v14  ;;  %v2354_v13 = vsel %vm2094_vm8, %v2083_v50, -inf }
 0x4d0   :  { %5993 = vmatprep.subr.bf16.mxu0 %v9517_v35  ;;  %v2077_v35 = vld [vmem:[#allocation2 + $0x1e8] sm:$0xf0]  ;;  %v2355_v25 = vrot.slane %v2354_v13, 4  ;;  %v2191_v4 = vrot.slane %v2190_v42, 1 }
 0x4d1   :  { %v2105_v52 = vrot.slane %v2104_v31, 2  ;;  %v2312_v19 = vsel %vm2094_vm8, %v2077_v35, -inf  ;;  %v2231_v43 = vrot.slane %v2230_v53, 2  ;;  %v2149_v15 = vrot.slane %v2148_v30, 1 }
 0x4d2   :  { %v2313_v18 = vrot.slane %v2312_v19, 4  ;;  %v2397_v35 = vrot.slane %v2396_v47, 4  ;;  %v2356_v59 = vmax.f32 %v2354_v13, %v2355_v25  ;;  %v2192_v0 = vmax.f32 %v2190_v42, %v2191_v4 }
 0x4d3   :  { %v2106_v63 = vmax.f32 %v2104_v31, %v2105_v52  ;;  %v2232_v57 = vmax.f32 %v2230_v53, %v2231_v43  ;;  %v2150_v52 = vmax.f32 %v2148_v30, %v2149_v15  ;;  %v2274_v31 = vmax.f32 %v2272_v17, %v2273_v60  ;;  %v427_v60 = vld [vmem:[%s9063_s10] sm:$0x3] }
 0x4d4   :  { %v2314_v41 = vmax.f32 %v2312_v19, %v2313_v18  ;;  %v2398_v50 = vmax.f32 %v2396_v47, %v2397_v35  ;;  %v2357_v28 = vrot.slane %v2356_v59, 2  ;;  %v8276_v42 = vrot.slane %v427_v60, %v7660_v36  ;;  %v2070_v36 = vld [vmem:[#allocation2 + $0x180] sm:$0xf0] }
 0x4d5   :  { %v2107_v40 = vrot.slane %v2106_v63, 1  ;;  %v2233_v14 = vrot.slane %v2232_v57, 1  ;;  %v2275_v8 = vrot.slane %v2274_v31, 1 }
 0x4d6   :  { %v2315_v5 = vrot.slane %v2314_v41, 2  ;;  %v2399_v37 = vrot.slane %v2398_v50, 2  ;;  %v2358_v18 = vmax.f32 %v2356_v59, %v2357_v28  ;;  %9519 = vst [vmem:[#allocation173_spill] sm:$0xff] %v8276_v42  ;;  %v9526_v28 = vld [vmem:[#allocation31_spill] sm:$0xff] }
 0x4d7   :  { %v2108_v21 = vmax.f32 %v2106_v63, %v2107_v40  ;;  %v2234_v9 = vmax.f32 %v2232_v57, %v2233_v14  ;;  %v2276_v43 = vmax.f32 %v2274_v31, %v2275_v8  ;;  %v9522_v31 = vld [vmem:[#allocation27_spill] sm:$0xff]  ;;  %v9523_v14 = vld [vmem:[#allocation28_spill] sm:$0xff]  ;;  %v9528_v8 = vld [vmem:[#allocation33_spill] sm:$0xff] }
 0x4d8   :  { %v2316_v58 = vmax.f32 %v2314_v41, %v2315_v5  ;;  %v2400_v13 = vmax.f32 %v2398_v50, %v2399_v37  ;;  %v2359_v63 = vrot.slane %v2358_v18, 1  ;;  %v9524_v50 = vld [vmem:[#allocation29_spill] sm:$0xff] }
 0x4d9   :  { %v2486_v7 = vsel %vm1615_vm1, %v2150_v52, %v2108_v21  ;;  %v8273_v21 = vrot.slane %v427_v60, %v7655_v34  ;;  %v9533_v34 = vld [vmem:[#allocation38_spill] sm:$0xff] }
 0x4da   :  { %v2487_v53 = vsel %vm1617_vm2, %v2192_v0, %v2486_v7  ;;  %v2317_v19 = vrot.slane %v2316_v58, 1  ;;  %v2401_v57 = vrot.slane %v2400_v13, 1  ;;  %v2360_v25 = vmax.f32 %v2358_v18, %v2359_v63  ;;  %v9525_v0 = vld [vmem:[#allocation30_spill] sm:$0xff]  ;;  %v2046_v7 = vld [vmem:[#allocation2] sm:$0xf0] }
 0x4db   :  { %v2488_v30 = vsel %vm1619_vm3, %v2234_v9, %v2487_v53  ;;  %9518 = vst [vmem:[#allocation172_spill] sm:$0xff] %v8273_v21  ;;  %v2052_v18 = vld [vmem:[#allocation2 + $0x60] sm:$0xf0]  ;;  %v2095_v53 = vsel %vm2094_vm8, %v2046_v7, -inf }
 0x4dc   :  { %v2318_v17 = vmax.f32 %v2316_v58, %v2317_v19  ;;  %v2489_v41 = vsel %vm1621_vm4, %v2276_v43, %v2488_v30  ;;  %v2402_v15 = vmax.f32 %v2400_v13, %v2401_v57  ;;  %v9527_v58 = vld [vmem:[#allocation32_spill] sm:$0xff]  ;;  %v9529_v19 = vld [vmem:[#allocation34_spill] sm:$0xff]  ;;  %v2058_v30 = vld [vmem:[#allocation2 + $0xc0] sm:$0xf0]  ;;  %v2096_v60 = vrot.slane %v2095_v53, 4 }
 0x4dd   :  { %v2049_v43 = vld [vmem:[#allocation2 + $0x18] sm:$0xf0]  ;;  %v2137_v63 = vsel %vm2094_vm8, %v2052_v18, -inf  ;;  %v9532_v18 = vld [vmem:[#allocation37_spill] sm:$0xff] }
 0x4de   :  { %v2490_v37 = vsel %vm1623_vm5, %v2318_v17, %v2489_v41  ;;  %v2055_v13 = vld [vmem:[#allocation2 + $0x78] sm:$0xf0]  ;;  %v9530_v17 = vld [vmem:[#allocation35_spill] sm:$0xff]  ;;  %v2116_v57 = vsel %vm2094_vm8, %v2049_v43, -inf }
 0x4df   :  { %v2491_v4 = vsel %vm1625_vm6, %v2360_v25, %v2490_v37  ;;  %v2061_v41 = vld [vmem:[#allocation2 + $0xd8] sm:$0xf0]  ;;  %v2158_v25 = vsel %vm2094_vm8, %v2055_v13, -inf  ;;  %v2117_v7 = vrot.slane %v2116_v57, 4 }
 0x4e0   :  { %v2492_v5 = vsel %vm1627_vm7, %v2402_v15, %v2491_v4  ;;  %v9531_v37 = vld [vmem:[#allocation36_spill] sm:$0xff]  ;;  %v2179_v15 = vsel %vm2094_vm8, %v2058_v30, -inf  ;;  %v2097_v4 = vmax.f32 %v2095_v53, %v2096_v60  ;;  %v2263_v60 = vsel %vm2094_vm8, %v2070_v36, -inf }
 0x4e1   :  { %v2180_v43 = vrot.slane %v2179_v15, 4 }
 0x4e2   :  { %v2098_v53 = vrot.slane %v2097_v4, 2 }
 0x585   :  { %v1962_v47 = vpop.f32.mrb[4].mxu0 }
 0x586   :  { %v8280_v9 = vadd.f32 %v1962_v47, %v8273_v21  ;;  %v1964_v40 = vpop.f32.mrb[5].mxu0  ;;  %v2064_v47 = vld [vmem:[#allocation2 + $0x120] sm:$0xf0] }
 0x587   :  { %v8283_v35 = vadd.f32 %v1964_v40, %v8276_v42  ;;  %v2138_v40 = vrot.slane %v2137_v63, 4  ;;  %v2221_v13 = vsel %vm2094_vm8, %v2064_v47, -inf  ;;  %v2079_v47 = vld [vmem:[#allocation2 + $0x1f8] sm:$0xf0] }
 0x588   :  { %9520 = vst [vmem:[#allocation174_spill] sm:$0xff] %v8280_v9  ;;  %v9301_v52 = vmax.f32 %v8280_v9, 0.0  ;;  %v2076_v9 = vld [vmem:[#allocation2 + $0x1e0] sm:$0xf0] }
 0x589   :  { %9521 = vst [vmem:[#allocation175_spill] sm:$0xff] %v8283_v35  ;;  %v9302_v59 = vmax.f32 %v8283_v35, 0.0  ;;  %v2139_v35 = vmax.f32 %v2137_v63, %v2138_v40 }
 0x58b   :  { %2039 = vmatprep.mubr.f32.mxu0 %v9302_v59  ;;  %v2200_v59 = vsel %vm2094_vm8, %v2061_v41, -inf  ;;  %v9534_v41 = vld [vmem:[#allocation39_spill] sm:$0xff]  ;;  %v2140_v40 = vrot.slane %v2139_v35, 2 }
 0x58c   :  { %2040 = vmatmul.mubr.f32.vlgmr.msra.gmra.mrb[6].mxu0 %v9301_v52  ;;  %v2159_v52 = vrot.slane %v2158_v25, 4 }
 0x58d   :  { %5995 = vmatpush1.bf16.msra.mxu0 %v9522_v31  ;;  %2591 = vmatprep.mubr.f32.mxu0 %v2492_v5  ;;  %v2067_v5 = vld [vmem:[#allocation2 + $0x138] sm:$0xf0]  ;;  %v2099_v31 = vmax.f32 %v2097_v4, %v2098_v53  ;;  %v2141_v21 = vmax.f32 %v2139_v35, %v2140_v40 }
 0x58e   :  { %5997 = vmatprep.subr.bf16.mxu0 %v9523_v14  ;;  %v2242_v30 = vsel %vm2094_vm8, %v2067_v5, -inf  ;;  %v2082_v14 = vld [vmem:[#allocation2 + $0x240] sm:$0xf0]  ;;  %v2091_v4 = vld [vmem:[#allocation2 + $0x2b8] sm:$0xf0] }
 0x58f   :  { %v2100_v24 = vrot.slane %v2099_v31, 1 }
 0x591   :  { %5999 = vmatpush1.bf16.msra.mxu0 %v9524_v50  ;;  %v2264_v50 = vrot.slane %v2263_v60, 4 }
 0x592   :  { %6001 = vmatprep.subr.bf16.mxu0 %v9525_v0  ;;  %v2243_v0 = vrot.slane %v2242_v30, 4 }
 0x593   :  { %v2265_v26 = vmax.f32 %v2263_v60, %v2264_v50 }
 0x594   :  { %v2244_v42 = vmax.f32 %v2242_v30, %v2243_v0  ;;  %v2142_v30 = vrot.slane %v2141_v21, 1 }
 0x595   :  { %6003 = vmatpush1.bf16.msra.mxu0 %v9526_v28  ;;  %v2305_v28 = vsel %vm2094_vm8, %v2076_v9, -inf  ;;  %v9537_v9 = vld [vmem:[#allocation42_spill] sm:$0xff]  ;;  %v2266_v40 = vrot.slane %v2265_v26, 2 }
 0x596   :  { %6005 = vmatprep.subr.bf16.mxu0 %v9527_v58  ;;  %v9535_v58 = vld [vmem:[#allocation40_spill] sm:$0xff] }
 0x597   :  { %v2267_v29 = vmax.f32 %v2265_v26, %v2266_v40  ;;  %v9545_v40 = vld [vmem:[#allocation50_spill] sm:$0xff] }
 0x599   :  { %6007 = vmatpush1.bf16.msra.mxu0 %v9528_v8  ;;  %v2160_v8 = vmax.f32 %v2158_v25, %v2159_v52  ;;  %v9536_v52 = vld [vmem:[#allocation41_spill] sm:$0xff]  ;;  %v2268_v26 = vrot.slane %v2267_v29, 1 }
 0x59a   :  { %6009 = vmatprep.subr.bf16.mxu0 %v9529_v19  ;;  %v2118_v19 = vmax.f32 %v2116_v57, %v2117_v7  ;;  %v2306_v7 = vrot.slane %v2305_v28, 4 }
 0x59b   :  { %v2161_v57 = vrot.slane %v2160_v8, 2 }
 0x59c   :  { %v2119_v36 = vrot.slane %v2118_v19, 2  ;;  %v2307_v48 = vmax.f32 %v2305_v28, %v2306_v7  ;;  %v2101_v28 = vmax.f32 %v2099_v31, %v2100_v24 }
 0x59d   :  { %6011 = vmatpush1.bf16.msra.mxu0 %v9530_v17  ;;  %v2201_v17 = vrot.slane %v2200_v59, 4  ;;  %v2162_v22 = vmax.f32 %v2160_v8, %v2161_v57  ;;  %v2410_v8 = vsel %vm2094_vm8, %v2091_v4, -inf }
 0x59e   :  { %6013 = vmatprep.subr.bf16.mxu0 %v9531_v37  ;;  %v2073_v37 = vld [vmem:[#allocation2 + $0x198] sm:$0xf0]  ;;  %v2120_v53 = vmax.f32 %v2118_v19, %v2119_v36  ;;  %v2411_v61 = vrot.slane %v2410_v8, 4 }
 0x59f   :  { %v2284_v63 = vsel %vm2094_vm8, %v2073_v37, -inf  ;;  %v2202_v5 = vmax.f32 %v2200_v59, %v2201_v17  ;;  %v2088_v37 = vld [vmem:[#allocation2 + $0x2a0] sm:$0xf0]  ;;  %v2347_v59 = vsel %vm2094_vm8, %v2082_v14, -inf  ;;  %v2245_v14 = vrot.slane %v2244_v42, 2 }
 0x5a0   :  { %v2348_v35 = vrot.slane %v2347_v59, 4  ;;  %v2389_v50 = vsel %vm2094_vm8, %v2088_v37, -inf  ;;  %v2163_v36 = vrot.slane %v2162_v22, 1 }
 0x5a1   :  { %6015 = vmatpush1.bf16.msra.mxu0 %v9532_v18  ;;  %v2222_v18 = vrot.slane %v2221_v13, 4  ;;  %v2203_v17 = vrot.slane %v2202_v5, 2 }
 0x5a2   :  { %6017 = vmatprep.subr.bf16.mxu0 %v9533_v34  ;;  %v2181_v34 = vmax.f32 %v2179_v15, %v2180_v43  ;;  %v2326_v15 = vsel %vm2094_vm8, %v2079_v47, -inf  ;;  %v2349_v37 = vmax.f32 %v2347_v59, %v2348_v35  ;;  %v2164_v1 = vmax.f32 %v2162_v22, %v2163_v36 }
 0x5a3   :  { %v2223_v25 = vmax.f32 %v2221_v13, %v2222_v18  ;;  %v9538_v13 = vld [vmem:[#allocation43_spill] sm:$0xff]  ;;  %v2204_v60 = vmax.f32 %v2202_v5, %v2203_v17  ;;  %v2143_v5 = vmax.f32 %v2141_v21, %v2142_v30  ;;  %v2308_v17 = vrot.slane %v2307_v48, 2  ;;  %v9544_v30 = vld [vmem:[#allocation49_spill] sm:$0xff] }
 0x5a4   :  { %v2182_v43 = vrot.slane %v2181_v34, 2 }
 0x5a5   :  { %6019 = vmatpush1.bf16.msra.mxu0 %v9534_v41  ;;  %v2085_v41 = vld [vmem:[#allocation2 + $0x258] sm:$0xf0]  ;;  %v2224_v47 = vrot.slane %v2223_v25, 2  ;;  %v2205_v2 = vrot.slane %v2204_v60, 1  ;;  %v2309_v35 = vmax.f32 %v2307_v48, %v2308_v17  ;;  %v2479_v21 = vsel %vm1615_vm1, %v2143_v5, %v2101_v28  ;;  %v9546_v28 = vld [vmem:[#allocation51_spill] sm:$0xff]  ;;  %v9548_v17 = vld [vmem:[#allocation53_spill] sm:$0xff] }
 0x5a6   :  { %6021 = vmatprep.subr.bf16.mxu0 %v9535_v58  ;;  %v2285_v58 = vrot.slane %v2284_v63, 4  ;;  %v2368_v18 = vsel %vm2094_vm8, %v2085_v41, -inf  ;;  %v2183_v0 = vmax.f32 %v2181_v34, %v2182_v43  ;;  %v2121_v41 = vrot.slane %v2120_v53, 1  ;;  %v9541_v34 = vld [vmem:[#allocation46_spill] sm:$0xff] }
 0x5a7   :  { %v2369_v19 = vrot.slane %v2368_v18, 4 }
 0x5a8   :  { %v2184_v43 = vrot.slane %v2183_v0, 1  ;;  %v2122_v12 = vmax.f32 %v2120_v53, %v2121_v41 }
 0x5a9   :  { %6023 = vmatpush1.bf16.msra.mxu0 %v9536_v52  ;;  %v2327_v52 = vrot.slane %v2326_v15, 4  ;;  %v2370_v4 = vmax.f32 %v2368_v18, %v2369_v19 }
 0x5aa   :  { %6025 = vmatprep.subr.bf16.mxu0 %v9537_v9  ;;  %v2286_v9 = vmax.f32 %v2284_v63, %v2285_v58  ;;  %v2225_v58 = vmax.f32 %v2223_v25, %v2224_v47  ;;  %v2390_v63 = vrot.slane %v2389_v50, 4  ;;  %v9543_v47 = vld [vmem:[#allocation48_spill] sm:$0xff]  ;;  %v2500_v22 = vsel %vm1615_vm1, %v2164_v1, %v2122_v12 }
 0x5ab   :  { %v2328_v57 = vmax.f32 %v2326_v15, %v2327_v52  ;;  %v9542_v15 = vld [vmem:[#allocation47_spill] sm:$0xff]  ;;  %v2371_v18 = vrot.slane %v2370_v4, 2 }
 0x5ac   :  { %v2287_v7 = vrot.slane %v2286_v9, 2  ;;  %v2226_v24 = vrot.slane %v2225_v58, 1  ;;  %v2391_v31 = vmax.f32 %v2389_v50, %v2390_v63  ;;  %v9547_v63 = vld [vmem:[#allocation52_spill] sm:$0xff] }
 0x5ad   :  { %6027 = vmatpush1.bf16.msra.mxu0 %v9538_v13  ;;  %v9540_v13 = vld [vmem:[#allocation45_spill] sm:$0xff]  ;;  %v2329_v52 = vrot.slane %v2328_v57, 2  ;;  %v2372_v36 = vmax.f32 %v2370_v4, %v2371_v18 }
 0x5ae   :  { %6029 = vmatprep.subr.bf16.mxu0 %v9539_v32  ;;  %v2246_v32 = vmax.f32 %v2244_v42, %v2245_v14  ;;  %v2288_v25 = vmax.f32 %v2286_v9, %v2287_v7  ;;  %v2412_v42 = vmax.f32 %v2410_v8, %v2411_v61  ;;  %v2206_v14 = vmax.f32 %v2204_v60, %v2205_v2 }
 0x5af   :  { %v2330_v53 = vmax.f32 %v2328_v57, %v2329_v52  ;;  %v2227_v19 = vmax.f32 %v2225_v58, %v2226_v24  ;;  %v2392_v50 = vrot.slane %v2391_v31, 2  ;;  %v2310_v8 = vrot.slane %v2309_v35, 1  ;;  %v9549_v52 = vld [vmem:[#allocation54_spill] sm:$0xff] }
 0x5b0   :  { %v2247_v59 = vrot.slane %v2246_v32, 1  ;;  %v2289_v9 = vrot.slane %v2288_v25, 1  ;;  %v2413_v48 = vrot.slane %v2412_v42, 2  ;;  %v2501_v2 = vsel %vm1617_vm2, %v2206_v14, %v2500_v22  ;;  %v9551_v14 = vld [vmem:[#allocation56_spill] sm:$0xff]  ;;  %v9552_v22 = vld [vmem:[#allocation57_spill] sm:$0xff] }
 0x5b1   :  { %6031 = vmatpush1.bf16.msra.mxu0 %v9540_v13  ;;  %v2350_v13 = vrot.slane %v2349_v37, 2  ;;  %v2269_v60 = vmax.f32 %v2267_v29, %v2268_v26  ;;  %v2331_v57 = vrot.slane %v2330_v53, 1  ;;  %v2393_v1 = vmax.f32 %v2391_v31, %v2392_v50  ;;  %v9553_v50 = vld [vmem:[#allocation58_spill] sm:$0xff] }
 0x5b2   :  { %6033 = vmatprep.subr.bf16.mxu0 %v9541_v34  ;;  %v2185_v34 = vmax.f32 %v2183_v0, %v2184_v43  ;;  %v2248_v61 = vmax.f32 %v2246_v32, %v2247_v59  ;;  %v2290_v58 = vmax.f32 %v2288_v25, %v2289_v9  ;;  %v2311_v32 = vmax.f32 %v2309_v35, %v2310_v8  ;;  %v9558_v8 = vld [vmem:[#allocation63_spill] sm:$0xff] }
 0x5b3   :  { %v2351_v0 = vmax.f32 %v2349_v37, %v2350_v13  ;;  %v2414_v13 = vmax.f32 %v2412_v42, %v2413_v48  ;;  %v2373_v43 = vrot.slane %v2372_v36, 1  ;;  %v2332_v5 = vmax.f32 %v2330_v53, %v2331_v57  ;;  %v9557_v48 = vld [vmem:[#allocation62_spill] sm:$0xff]  ;;  %v2054_v57 = vld [vmem:[#allocation2 + $0x70] sm:$0xf0] }
 0x5b4   :  { %v2480_v41 = vsel %vm1617_vm2, %v2185_v34, %v2479_v21  ;;  %v2502_v34 = vsel %vm1619_vm3, %v2248_v61, %v2501_v2  ;;  %v2394_v29 = vrot.slane %v2393_v1, 1  ;;  %v9550_v21 = vld [vmem:[#allocation55_spill] sm:$0xff]  ;;  %v9556_v61 = vld [vmem:[#allocation61_spill] sm:$0xff] }
 0x5b5   :  { %6035 = vmatpush1.bf16.msra.mxu0 %v9542_v15  ;;  %v2481_v12 = vsel %vm1619_vm3, %v2227_v19, %v2480_v41  ;;  %v2352_v7 = vrot.slane %v2351_v0, 1  ;;  %v2503_v4 = vsel %vm1621_vm4, %v2290_v58, %v2502_v34  ;;  %v2415_v31 = vrot.slane %v2414_v13, 1  ;;  %v9555_v41 = vld [vmem:[#allocation60_spill] sm:$0xff]  ;;  %v2048_v2 = vld [vmem:[#allocation2 + $0x10] sm:$0xf0] }
 0x5b6   :  { %6037 = vmatprep.subr.bf16.mxu0 %v9543_v47  ;;  %v2482_v37 = vsel %vm1621_vm4, %v2269_v60, %v2481_v12  ;;  %v2374_v59 = vmax.f32 %v2372_v36, %v2373_v43  ;;  %v2504_v42 = vsel %vm1623_vm5, %v2332_v5, %v2503_v4  ;;  %v2395_v35 = vmax.f32 %v2393_v1, %v2394_v29  ;;  %v9559_v36 = vld [vmem:[#allocation64_spill] sm:$0xff]  ;;  %v9560_v60 = vld [vmem:[#allocation65_spill] sm:$0xff]  ;;  %v9561_v1 = vld [vmem:[#allocation66_spill] sm:$0xff] }
 0x5b7   :  { %v2353_v24 = vmax.f32 %v2351_v0, %v2352_v7  ;;  %v2483_v25 = vsel %vm1623_vm5, %v2311_v32, %v2482_v37  ;;  %v2416_v26 = vmax.f32 %v2414_v13, %v2415_v31  ;;  %v9554_v0 = vld [vmem:[#allocation59_spill] sm:$0xff]  ;;  %v2109_v12 = vsel %vm2094_vm8, %v2048_v2, -inf  ;;  %v2051_v58 = vld [vmem:[#allocation2 + $0x28] sm:$0xf0]  ;;  %v9563_v4 = vld [vmem:[#allocation68_spill] sm:$0xff] }
 0x5b8   :  { %v2505_v53 = vsel %vm1625_vm6, %v2374_v59, %v2504_v42  ;;  %v2057_v7 = vld [vmem:[#allocation2 + $0x88] sm:$0xf0]  ;;  %v2060_v13 = vld [vmem:[#allocation2 + $0xd0] sm:$0xf0]  ;;  %v2151_v34 = vsel %vm2094_vm8, %v2054_v57, -inf  ;;  %v2110_v43 = vrot.slane %v2109_v12, 4 }
 0x5b9   :  { %6039 = vmatpush1.bf16.msra.mxu0 %v9544_v30  ;;  %v2484_v18 = vsel %vm1625_vm6, %v2353_v24, %v2483_v25  ;;  %v2506_v9 = vsel %vm1627_vm7, %v2416_v26, %v2505_v53  ;;  %v9562_v32 = vld [vmem:[#allocation67_spill] sm:$0xff]  ;;  %v2063_v37 = vld [vmem:[#allocation2 + $0xe8] sm:$0xf0]  ;;  %v2130_v5 = vsel %vm2094_vm8, %v2051_v58, -inf  ;;  %v2172_v29 = vsel %vm2094_vm8, %v2057_v7, -inf  ;;  %v9564_v26 = vld [vmem:[#allocation69_spill] sm:$0xff] }
 0x5ba   :  { %6041 = vmatprep.subr.bf16.mxu0 %v9545_v40  ;;  %v2485_v19 = vsel %vm1627_vm7, %v2395_v35, %v2484_v18  ;;  %v2066_v24 = vld [vmem:[#allocation2 + $0x130] sm:$0xf0]  ;;  %v2152_v31 = vrot.slane %v2151_v34, 4  ;;  %v2193_v25 = vsel %vm2094_vm8, %v2060_v13, -inf  ;;  %v2069_v59 = vld [vmem:[#allocation2 + $0x148] sm:$0xf0] }
 0x5bb   :  { %v2131_v42 = vrot.slane %v2130_v5, 4  ;;  %v2173_v35 = vrot.slane %v2172_v29, 4  ;;  %v2214_v18 = vsel %vm2094_vm8, %v2063_v37, -inf  ;;  %v2072_v53 = vld [vmem:[#allocation2 + $0x190] sm:$0xf0]  ;;  %v2194_v2 = vrot.slane %v2193_v25, 4 }
 0x5bc   :  { %v2235_v57 = vsel %vm2094_vm8, %v2066_v24, -inf  ;;  %v2153_v58 = vmax.f32 %v2151_v34, %v2152_v31  ;;  %v2075_v7 = vld [vmem:[#allocation2 + $0x1a8] sm:$0xf0]  ;;  %v2078_v13 = vld [vmem:[#allocation2 + $0x1f0] sm:$0xf0] }
 0x5bd   :  { %6043 = vmatpush1.bf16.msra.mxu0 %v9546_v28  ;;  %v9566_v37 = vld [vmem:[#allocation71_spill] sm:$0xff]  ;;  %v2298_v34 = vsel %vm2094_vm8, %v2075_v7, -inf }
 0x5be   :  { %6045 = vmatprep.subr.bf16.mxu0 %v9547_v63  ;;  %v2154_v24 = vrot.slane %v2153_v58, 2  ;;  %v9571_v63 = vld [vmem:[#allocation76_spill] sm:$0xff] }
 0x5c1   :  { %6047 = vmatpush1.bf16.msra.mxu0 %v9548_v17 }
 0x5c2   :  { %6049 = vmatprep.subr.bf16.mxu0 %v9549_v52 }
 0x5c5   :  { %6051 = vmatpush1.bf16.msra.mxu0 %v9550_v21  ;;  %v2093_v21 = vld [vmem:[#allocation2 + $0x2c8] sm:$0xf0] }
 0x5c6   :  { %6053 = vmatprep.subr.bf16.mxu0 %v9551_v14  ;;  %v2155_v14 = vmax.f32 %v2153_v58, %v2154_v24 }
 0x5c8   :  { %v2156_v58 = vrot.slane %v2155_v14, 1 }
 0x5c9   :  { %6055 = vmatpush1.bf16.msra.mxu0 %v9552_v22 }
 0x5ca   :  { %6057 = vmatprep.subr.bf16.mxu0 %v9553_v50 }
 0x5cc   :  { %2592 = vmatmul.mubr.f32.vlgmr.msra.gmra.mrb[8].mxu0 %v2485_v19  ;;  %v2111_v19 = vmax.f32 %v2109_v12, %v2110_v43  ;;  %v9567_v12 = vld [vmem:[#allocation72_spill] sm:$0xff]  ;;  %v2195_v43 = vmax.f32 %v2193_v25, %v2194_v2  ;;  %v9569_v2 = vld [vmem:[#allocation74_spill] sm:$0xff] }
 0x5cd   :  { %6059 = vmatpush1.bf16.msra.mxu0 %v9554_v0  ;;  %2662 = vmatprep.mubr.f32.mxu0 %v2506_v9  ;;  %v9565_v9 = vld [vmem:[#allocation70_spill] sm:$0xff]  ;;  %v2299_v0 = vrot.slane %v2298_v34, 4 }
 0x5ce   :  { %6061 = vmatprep.subr.bf16.mxu0 %v9555_v41  ;;  %v2084_v41 = vld [vmem:[#allocation2 + $0x250] sm:$0xf0]  ;;  %v2196_v7 = vrot.slane %v2195_v43, 2 }
 0x5cf   :  { %v2300_v17 = vmax.f32 %v2298_v34, %v2299_v0 }
 0x5d1   :  { %6063 = vmatpush1.bf16.msra.mxu0 %v9556_v61  ;;  %v2301_v34 = vrot.slane %v2300_v17, 2 }
 0x5d2   :  { %6065 = vmatprep.subr.bf16.mxu0 %v9557_v48 }
 0x5d5   :  { %6067 = vmatpush1.bf16.msra.mxu0 %v9558_v8  ;;  %v2236_v8 = vrot.slane %v2235_v57, 4 }
 0x5d6   :  { %6069 = vmatprep.subr.bf16.mxu0 %v9559_v36  ;;  %v2174_v36 = vmax.f32 %v2172_v29, %v2173_v35  ;;  %v9568_v29 = vld [vmem:[#allocation73_spill] sm:$0xff] }
 0x5d7   :  { %v2237_v35 = vmax.f32 %v2235_v57, %v2236_v8 }
 0x5d9   :  { %6071 = vmatpush1.bf16.msra.mxu0 %v9560_v60  ;;  %v2132_v60 = vmax.f32 %v2130_v5, %v2131_v42  ;;  %v2175_v5 = vrot.slane %v2174_v36, 2  ;;  %v2238_v57 = vrot.slane %v2237_v35, 2 }
 0x5da   :  { %6073 = vmatprep.subr.bf16.mxu0 %v9561_v1  ;;  %v2277_v1 = vsel %vm2094_vm8, %v2072_v53, -inf }
 0x5db   :  { %v2278_v31 = vrot.slane %v2277_v1, 4  ;;  %v2133_v53 = vrot.slane %v2132_v60, 2 }
 0x5dd   :  { %6075 = vmatpush1.bf16.msra.mxu0 %v9562_v32  ;;  %v2256_v32 = vsel %vm2094_vm8, %v2069_v59, -inf  ;;  %v2319_v59 = vsel %vm2094_vm8, %v2078_v13, -inf  ;;  %v2279_v13 = vmax.f32 %v2277_v1, %v2278_v31  ;;  %v2134_v52 = vmax.f32 %v2132_v60, %v2133_v53 }
 0x5de   :  { %6077 = vmatprep.subr.bf16.mxu0 %v9563_v4  ;;  %v2215_v4 = vrot.slane %v2214_v18, 4  ;;  %v2257_v48 = vrot.slane %v2256_v32, 4  ;;  %v2320_v50 = vrot.slane %v2319_v59, 4 }
 0x5df   :  { %v2280_v31 = vrot.slane %v2279_v13, 2 }
 0x5e0   :  { %v2216_v61 = vmax.f32 %v2214_v18, %v2215_v4  ;;  %v2258_v22 = vmax.f32 %v2256_v32, %v2257_v48  ;;  %v2361_v4 = vsel %vm2094_vm8, %v2084_v41, -inf  ;;  %v2197_v48 = vmax.f32 %v2195_v43, %v2196_v7 }
 0x5e1   :  { %6079 = vmatpush1.bf16.msra.mxu0 %v9564_v26  ;;  %v2112_v26 = vrot.slane %v2111_v19, 2  ;;  %v2321_v1 = vmax.f32 %v2319_v59, %v2320_v50  ;;  %v2362_v32 = vrot.slane %v2361_v4, 4  ;;  %v2281_v30 = vmax.f32 %v2279_v13, %v2280_v31  ;;  %v9577_v31 = vld [vmem:[#allocation86_spill] sm:$0xff] }
 0x5e2   :  { %6081 = vmatprep.subr.bf16.mxu0 %v9565_v9  ;;  %v2081_v9 = vld [vmem:[#allocation2 + $0x208] sm:$0xf0]  ;;  %v2217_v18 = vrot.slane %v2216_v61, 2  ;;  %v2259_v41 = vrot.slane %v2258_v22, 2  ;;  %v2198_v50 = vrot.slane %v2197_v48, 1 }
 0x5e3   :  { %v2113_v42 = vmax.f32 %v2111_v19, %v2112_v26  ;;  %v2340_v25 = vsel %vm2094_vm8, %v2081_v9, -inf  ;;  %v9570_v19 = vld [vmem:[#allocation75_spill] sm:$0xff]  ;;  %v2363_v43 = vmax.f32 %v2361_v4, %v2362_v32  ;;  %v2282_v13 = vrot.slane %v2281_v30, 1 }
 0x5e4   :  { %v2341_v26 = vrot.slane %v2340_v25, 4  ;;  %v2218_v24 = vmax.f32 %v2216_v61, %v2217_v18  ;;  %v2260_v59 = vmax.f32 %v2258_v22, %v2259_v41  ;;  %v2157_v61 = vmax.f32 %v2155_v14, %v2156_v58  ;;  %v9576_v58 = vld [vmem:[#allocation84_spill] sm:$0xff] }
 0x5e5   :  { %6083 = vmatpush1.bf16.msra.mxu0 %v9566_v37  ;;  %v2087_v37 = vld [vmem:[#allocation2 + $0x268] sm:$0xf0]  ;;  %v2114_v9 = vrot.slane %v2113_v42, 1  ;;  %v2322_v18 = vrot.slane %v2321_v1, 2 }
 0x5e6   :  { %6085 = vmatprep.subr.bf16.mxu0 %v9567_v12  ;;  %v2090_v12 = vld [vmem:[#allocation2 + $0x2b0] sm:$0xf0]  ;;  %v2382_v8 = vsel %vm2094_vm8, %v2087_v37, -inf  ;;  %v2135_v37 = vrot.slane %v2134_v52, 1  ;;  %v2219_v40 = vrot.slane %v2218_v24, 1  ;;  %v2261_v4 = vrot.slane %v2260_v59, 1 }
 0x5e7   :  { %v2383_v60 = vrot.slane %v2382_v8, 4  ;;  %v2115_v28 = vmax.f32 %v2113_v42, %v2114_v9  ;;  %v2302_v9 = vmax.f32 %v2300_v17, %v2301_v34  ;;  %v2323_v32 = vmax.f32 %v2321_v1, %v2322_v18  ;;  %v9579_v34 = vld [vmem:[#allocation97_spill] sm:$0xff]  ;;  %v9580_v18 = vld [vmem:[#allocation100_spill] sm:$0xff] }
 0x5e8   :  { %v2136_v47 = vmax.f32 %v2134_v52, %v2135_v37  ;;  %v2220_v41 = vmax.f32 %v2218_v24, %v2219_v40  ;;  %v2283_v24 = vmax.f32 %v2281_v30, %v2282_v13 }
 0x5e9   :  { %6087 = vmatpush1.bf16.msra.mxu0 %v9568_v29  ;;  %v2176_v29 = vmax.f32 %v2174_v36, %v2175_v5  ;;  %v2424_v36 = vsel %vm2094_vm8, %v2093_v21, -inf  ;;  %v2342_v5 = vmax.f32 %v2340_v25, %v2341_v26  ;;  %v2384_v21 = vmax.f32 %v2382_v8, %v2383_v60  ;;  %v9574_v26 = vld [vmem:[#allocation79_spill] sm:$0xff] }
 0x5ea   :  { %6089 = vmatprep.subr.bf16.mxu0 %v9569_v2  ;;  %v2403_v2 = vsel %vm2094_vm8, %v2090_v12, -inf  ;;  %v2239_v12 = vmax.f32 %v2237_v35, %v2238_v57  ;;  %v2425_v7 = vrot.slane %v2424_v36, 4  ;;  %v9575_v57 = vld [vmem:[#allocation83_spill] sm:$0xff]  ;;  %v2493_v14 = vsel %vm1615_vm1, %v2157_v61, %v2115_v28 }
 0x5eb   :  { %v2177_v53 = vrot.slane %v2176_v29, 1  ;;  %v2404_v0 = vrot.slane %v2403_v2, 4  ;;  %v2343_v25 = vrot.slane %v2342_v5, 2  ;;  %v2385_v8 = vrot.slane %v2384_v21, 2 }
 0x5ec   :  { %v2240_v42 = vrot.slane %v2239_v12, 1  ;;  %v2426_v22 = vmax.f32 %v2424_v36, %v2425_v7  ;;  %v2303_v17 = vrot.slane %v2302_v9, 1  ;;  %v2262_v36 = vmax.f32 %v2260_v59, %v2261_v4 }
 0x5ed   :  { %6091 = vmatpush1.bf16.msra.mxu0 %v9570_v19  ;;  %v9572_v19 = vld [vmem:[#allocation77_spill] sm:$0xff]  ;;  %v2178_v15 = vmax.f32 %v2176_v29, %v2177_v53  ;;  %v2405_v35 = vmax.f32 %v2403_v2, %v2404_v0  ;;  %v2344_v52 = vmax.f32 %v2342_v5, %v2343_v25  ;;  %v2324_v53 = vrot.slane %v2323_v32, 1  ;;  %v9578_v0 = vld [vmem:[#allocation88_spill] sm:$0xff] }
 0x5ee   :  { %6093 = vmatprep.subr.bf16.mxu0 %v9571_v63  ;;  %v9573_v63 = vld [vmem:[#allocation78_spill] sm:$0xff]  ;;  %v2241_v60 = vmax.f32 %v2239_v12, %v2240_v42  ;;  %v2427_v1 = vrot.slane %v2426_v22, 2  ;;  %v2386_v28 = vmax.f32 %v2384_v21, %v2385_v8  ;;  %v2304_v12 = vmax.f32 %v2302_v9, %v2303_v17  ;;  %v9581_v25 = vld [vmem:[#allocation101_spill] sm:$0xff] }
 0x5ef   :  { %v2514_v29 = vsel %vm1615_vm1, %v2178_v15, %v2136_v47  ;;  %v2406_v2 = vrot.slane %v2405_v35, 2  ;;  %v2345_v5 = vrot.slane %v2344_v52, 1 }
 0x5f0   :  { %v2515_v40 = vsel %vm1617_vm2, %v2220_v41, %v2514_v29  ;;  %v2387_v59 = vrot.slane %v2386_v28, 1  ;;  %v9583_v41 = vld [vmem:[#allocation106_spill] sm:$0xff]  ;;  %v9584_v29 = vld [vmem:[#allocation108_spill] sm:$0xff] }
 0x5f1   :  { %6095 = vmatpush1.bf16.msra.mxu0 %v9572_v19  ;;  %v2364_v19 = vrot.slane %v2363_v43, 2  ;;  %v2407_v15 = vmax.f32 %v2405_v35, %v2406_v2  ;;  %v2346_v61 = vmax.f32 %v2344_v52, %v2345_v5  ;;  %v9585_v2 = vld [vmem:[#allocation109_spill] sm:$0xff] }
 0x5f2   :  { %6097 = vmatprep.subr.bf16.mxu0 %v9573_v63  ;;  %v2199_v63 = vmax.f32 %v2197_v48, %v2198_v50  ;;  %v2388_v4 = vmax.f32 %v2386_v28, %v2387_v59  ;;  %v9591_v28 = vld [vmem:[#allocation121_spill] sm:$0xff] }
 0x5f3   :  { %v2365_v48 = vmax.f32 %v2363_v43, %v2364_v19  ;;  %v2428_v19 = vmax.f32 %v2426_v22, %v2427_v1  ;;  %v2325_v43 = vmax.f32 %v2323_v32, %v2324_v53  ;;  %v2408_v30 = vrot.slane %v2407_v15, 1  ;;  %v9589_v1 = vld [vmem:[#allocation117_spill] sm:$0xff]  ;;  %v9590_v53 = vld [vmem:[#allocation120_spill] sm:$0xff] }
 0x5f4   :  { %v2494_v37 = vsel %vm1617_vm2, %v2199_v63, %v2493_v14  ;;  %v2516_v63 = vsel %vm1619_vm3, %v2262_v36, %v2515_v40  ;;  %v9582_v14 = vld [vmem:[#allocation104_spill] sm:$0xff]  ;;  %v2056_v5 = vld [vmem:[#allocation2 + $0x80] sm:$0xf0] }
 0x5f5   :  { %6099 = vmatpush1.bf16.msra.mxu0 %v9574_v26  ;;  %v2495_v47 = vsel %vm1619_vm3, %v2241_v60, %v2494_v37  ;;  %v2366_v50 = vrot.slane %v2365_v48, 1  ;;  %v2517_v21 = vsel %vm1621_vm4, %v2304_v12, %v2516_v63  ;;  %v2429_v35 = vrot.slane %v2428_v19, 1  ;;  %v9587_v37 = vld [vmem:[#allocation113_spill] sm:$0xff]  ;;  %v9588_v36 = vld [vmem:[#allocation116_spill] sm:$0xff] }
 0x5f6   :  { %6101 = vmatprep.subr.bf16.mxu0 %v9575_v57  ;;  %v2496_v7 = vsel %vm1621_vm4, %v2283_v24, %v2495_v47  ;;  %v2518_v22 = vsel %vm1623_vm5, %v2346_v61, %v2517_v21  ;;  %v2409_v32 = vmax.f32 %v2407_v15, %v2408_v30  ;;  %v9592_v40 = vld [vmem:[#allocation124_spill] sm:$0xff]  ;;  %v2050_v24 = vld [vmem:[#allocation2 + $0x20] sm:$0xf0]  ;;  %v9596_v30 = vld [vmem:[#allocation130_spill] sm:$0xff] }
 0x5f7   :  { %v2367_v42 = vmax.f32 %v2365_v48, %v2366_v50  ;;  %v2497_v9 = vsel %vm1623_vm5, %v2325_v43, %v2496_v7  ;;  %v2430_v13 = vmax.f32 %v2428_v19, %v2429_v35  ;;  %v2519_v52 = vsel %vm1625_vm6, %v2388_v4, %v2518_v22  ;;  %v9586_v48 = vld [vmem:[#allocation112_spill] sm:$0xff]  ;;  %v9593_v15 = vld [vmem:[#allocation125_spill] sm:$0xff]  ;;  %v9597_v21 = vld [vmem:[#allocation131_spill] sm:$0xff] }
 0x5f8   :  { %v2062_v47 = vld [vmem:[#allocation2 + $0xe0] sm:$0xf0]  ;;  %v2123_v12 = vsel %vm2094_vm8, %v2050_v24, -inf  ;;  %v2165_v50 = vsel %vm2094_vm8, %v2056_v5, -inf  ;;  %v9594_v19 = vld [vmem:[#allocation128_spill] sm:$0xff] }
 0x5f9   :  { %6103 = vmatpush1.bf16.msra.mxu0 %v9576_v58  ;;  %v2498_v8 = vsel %vm1625_vm6, %v2367_v42, %v2497_v9  ;;  %v2520_v17 = vsel %vm1627_vm7, %v2430_v13, %v2519_v52  ;;  %v9595_v63 = vld [vmem:[#allocation129_spill] sm:$0xff]  ;;  %v2124_v59 = vrot.slane %v2123_v12, 4  ;;  %v2166_v7 = vrot.slane %v2165_v50, 4 }
 0x5fa   :  { %6105 = vmatprep.subr.bf16.mxu0 %v9577_v31  ;;  %v2499_v60 = vsel %vm1627_vm7, %v2409_v32, %v2498_v8  ;;  %v2068_v43 = vld [vmem:[#allocation2 + $0x140] sm:$0xf0]  ;;  %v2207_v61 = vsel %vm2094_vm8, %v2062_v47, -inf  ;;  %v9598_v32 = vld [vmem:[#allocation132_spill] sm:$0xff] }
 0x5fb   :  { %v2074_v42 = vld [vmem:[#allocation2 + $0x1a0] sm:$0xf0]  ;;  %v2208_v35 = vrot.slane %v2207_v61, 4  ;;  %v2249_v9 = vsel %vm2094_vm8, %v2068_v43, -inf  ;;  %v2125_v4 = vmax.f32 %v2123_v12, %v2124_v59  ;;  %v2167_v22 = vmax.f32 %v2165_v50, %v2166_v7  ;;  %v9601_v12 = vld [vmem:[#allocation135_spill] sm:$0xff] }
 0x5fc   :  { %v2080_v8 = vld [vmem:[#allocation2 + $0x200] sm:$0xf0]  ;;  %v2250_v13 = vrot.slane %v2249_v9, 4  ;;  %v2291_v52 = vsel %vm2094_vm8, %v2074_v42, -inf }
 0x5fd   :  { %6107 = vmatpush1.bf16.msra.mxu0 %v9578_v0  ;;  %v2126_v24 = vrot.slane %v2125_v4, 2  ;;  %v2168_v5 = vrot.slane %v2167_v22, 2  ;;  %v2086_v47 = vld [vmem:[#allocation2 + $0x260] sm:$0xf0] }
 0x5fe   :  { %6109 = vmatprep.subr.bf16.mxu0 %v9579_v34  ;;  %v2251_v43 = vmax.f32 %v2249_v9, %v2250_v13  ;;  %v2092_v59 = vld [vmem:[#allocation2 + $0x2c0] sm:$0xf0]  ;;  %v2375_v42 = vsel %vm2094_vm8, %v2086_v47, -inf }
 0x5ff   :  { %v2127_v7 = vmax.f32 %v2125_v4, %v2126_v24  ;;  %v9605_v24 = vld [vmem:[#allocation139_spill] sm:$0xff] }
 0x601   :  { %6111 = vmatpush1.bf16.msra.mxu0 %v9580_v18  ;;  %v2128_v9 = vrot.slane %v2127_v7, 1 }
 0x602   :  { %6113 = vmatprep.subr.bf16.mxu0 %v9581_v25 }
 0x605   :  { %6115 = vmatpush1.bf16.msra.mxu0 %v9582_v14 }
 0x606   :  { %6117 = vmatprep.subr.bf16.mxu0 %v9583_v41 }
 0x609   :  { %6119 = vmatpush1.bf16.msra.mxu0 %v9584_v29 }
 0x60a   :  { %6121 = vmatprep.subr.bf16.mxu0 %v9585_v2 }
 0x60c   :  { %2663 = vmatmul.mubr.f32.vlgmr.msra.gmra.mrb[8].mxu0 %v2499_v60  ;;  %v9599_v60 = vld [vmem:[#allocation133_spill] sm:$0xff] }
 0x60d   :  { %6123 = vmatpush1.bf16.msra.mxu0 %v9586_v48  ;;  %2733 = vmatprep.mubr.f32.mxu0 %v2520_v17  ;;  %v2209_v17 = vmax.f32 %v2207_v61, %v2208_v35  ;;  %v9602_v61 = vld [vmem:[#allocation136_spill] sm:$0xff]  ;;  %v2252_v35 = vrot.slane %v2251_v43, 2 }
 0x60e   :  { %6125 = vmatprep.subr.bf16.mxu0 %v9587_v37 }
 0x60f   :  { %v2210_v50 = vrot.slane %v2209_v17, 2  ;;  %v2253_v4 = vmax.f32 %v2251_v43, %v2252_v35 }
 0x611   :  { %6127 = vmatpush1.bf16.msra.mxu0 %v9588_v36 }
 0x612   :  { %6129 = vmatprep.subr.bf16.mxu0 %v9589_v1 }
 0x615   :  { %6131 = vmatpush1.bf16.msra.mxu0 %v9590_v53  ;;  %v9604_v53 = vld [vmem:[#allocation138_spill] sm:$0xff] }
 0x616   :  { %6133 = vmatprep.subr.bf16.mxu0 %v9591_v28 }
 0x619   :  { %6135 = vmatpush1.bf16.msra.mxu0 %v9592_v40  ;;  %v2211_v40 = vmax.f32 %v2209_v17, %v2210_v50  ;;  %v2254_v17 = vrot.slane %v2253_v4, 1 }
 0x61a   :  { %6137 = vmatprep.subr.bf16.mxu0 %v9593_v15  ;;  %v9603_v15 = vld [vmem:[#allocation137_spill] sm:$0xff] }
 0x61d   :  { %6139 = vmatpush1.bf16.msra.mxu0 %v9594_v19 }
 0x61e   :  { %6141 = vmatprep.subr.bf16.mxu0 %v9595_v63  ;;  %v9600_v63 = vld [vmem:[#allocation134_spill] sm:$0xff] }
 0x621   :  { %6143 = vmatpush1.bf16.msra.mxu0 %v9596_v30  ;;  %v2292_v30 = vrot.slane %v2291_v52, 4 }
 0x622   :  { %6145 = vmatprep.subr.bf16.mxu0 %v9597_v21  ;;  %v2333_v21 = vsel %vm2094_vm8, %v2080_v8, -inf  ;;  %v2376_v8 = vrot.slane %v2375_v42, 4 }
 0x623   :  { %v2334_v19 = vrot.slane %v2333_v21, 4 }
 0x625   :  { %6147 = vmatpush1.bf16.msra.mxu0 %v9598_v32  ;;  %v2169_v32 = vmax.f32 %v2167_v22, %v2168_v5  ;;  %v2129_v5 = vmax.f32 %v2127_v7, %v2128_v9 }
 0x626   :  { %6149 = vmatprep.subr.bf16.mxu0 %v9599_v60  ;;  %v2293_v60 = vmax.f32 %v2291_v52, %v2292_v30  ;;  %v2212_v30 = vrot.slane %v2211_v40, 1  ;;  %v2377_v52 = vmax.f32 %v2375_v42, %v2376_v8 }
 0x627   :  { %v2170_v13 = vrot.slane %v2169_v32, 1 }
 0x628   :  { %v2294_v28 = vrot.slane %v2293_v60, 2 }
 0x629   :  { %6151 = vmatpush1.bf16.msra.mxu0 %v9600_v63  ;;  %v2417_v63 = vsel %vm2094_vm8, %v2092_v59, -inf  ;;  %v2171_v47 = vmax.f32 %v2169_v32, %v2170_v13 }
 0x62a   :  { %6153 = vmatprep.subr.bf16.mxu0 %v9601_v12  ;;  %v2335_v12 = vmax.f32 %v2333_v21, %v2334_v19  ;;  %v2418_v22 = vrot.slane %v2417_v63, 4  ;;  %v2213_v19 = vmax.f32 %v2211_v40, %v2212_v30  ;;  %v2378_v21 = vrot.slane %v2377_v52, 2  ;;  %v9606_v30 = vld [vmem:[#allocation93_spill] sm:$0xff] }
 0x62b   :  { %v2507_v43 = vsel %vm1615_vm1, %v2171_v47, %v2129_v5  ;;  %v5208_v47 = vld [vmem:[%s9067_s14] ss:$0 sm:$0xff] }
 0x62c   :  { %v2419_v50 = vmax.f32 %v2417_v63, %v2418_v22  ;;  %v2379_v32 = vmax.f32 %v2377_v52, %v2378_v21  ;;  %v9607_v52 = vld [vmem:[#allocation94_spill] sm:$0xff]  ;;  %v9609_v21 = vld [vmem:[#allocation96_spill] sm:$0xff] }
 0x62d   :  { %6155 = vmatpush1.bf16.msra.mxu0 %v9602_v61  ;;  %v2336_v61 = vrot.slane %v2335_v12, 2 }
 0x62e   :  { %6157 = vmatprep.subr.bf16.mxu0 %v9603_v15  ;;  %v2295_v15 = vmax.f32 %v2293_v60, %v2294_v28  ;;  %v2420_v42 = vrot.slane %v2419_v50, 2  ;;  %v2508_v28 = vsel %vm1617_vm2, %v2213_v19, %v2507_v43  ;;  %v9608_v19 = vld [vmem:[#allocation95_spill] sm:$0xff]  ;;  %v9610_v43 = vld [vmem:[#allocation98_spill] sm:$0xff] }
 0x62f   :  { %v2337_v59 = vmax.f32 %v2335_v12, %v2336_v61  ;;  %v2380_v12 = vrot.slane %v2379_v32, 1 }
 0x630   :  { %v2296_v35 = vrot.slane %v2295_v15, 1  ;;  %v2421_v63 = vmax.f32 %v2419_v50, %v2420_v42  ;;  %v9612_v42 = vld [vmem:[#allocation102_spill] sm:$0xff] }
 0x631   :  { %6159 = vmatpush1.bf16.msra.mxu0 %v9604_v53  ;;  %v2338_v60 = vrot.slane %v2337_v59, 1  ;;  %v2381_v13 = vmax.f32 %v2379_v32, %v2380_v12  ;;  %v9613_v32 = vld [vmem:[#allocation103_spill] sm:$0xff] }
 0x632   :  { %6161 = vmatprep.subr.bf16.mxu0 %v9605_v24  ;;  %v2255_v24 = vmax.f32 %v2253_v4, %v2254_v17  ;;  %v2297_v7 = vmax.f32 %v2295_v15, %v2296_v35  ;;  %v2422_v9 = vrot.slane %v2421_v63, 1  ;;  %v9611_v35 = vld [vmem:[#allocation99_spill] sm:$0xff] }
 0x633   :  { %v2339_v61 = vmax.f32 %v2337_v59, %v2338_v60  ;;  %v9615_v60 = vld [vmem:[#allocation107_spill] sm:$0xff] }
 0x634   :  { %v2509_v40 = vsel %vm1619_vm3, %v2255_v24, %v2508_v28  ;;  %v2423_v15 = vmax.f32 %v2421_v63, %v2422_v9  ;;  %v9614_v28 = vld [vmem:[#allocation105_spill] sm:$0xff]  ;;  %v9617_v63 = vld [vmem:[#allocation111_spill] sm:$0xff]  ;;  %v9622_v9 = vld [vmem:[#allocation122_spill] sm:$0xff] }
 0x635   :  { %6163 = vmatpush1.bf16.msra.mxu0 %v8114_v45  ;;  %v2510_v8 = vsel %vm1621_vm4, %v2297_v7, %v2509_v40  ;;  %v9616_v7 = vld [vmem:[#allocation110_spill] sm:$0xff]  ;;  %v9619_v12 = vld [vmem:[#allocation115_spill] sm:$0xff] }
 0x636   :  { %6165 = vmatprep.subr.bf16.mxu0 %v8117_v39  ;;  %v2511_v4 = vsel %vm1623_vm5, %v2339_v61, %v2510_v8  ;;  %v9618_v40 = vld [vmem:[#allocation114_spill] sm:$0xff]  ;;  %v9621_v8 = vld [vmem:[#allocation119_spill] sm:$0xff] }
 0x637   :  { %v2512_v22 = vsel %vm1625_vm6, %v2381_v13, %v2511_v4  ;;  %v9620_v61 = vld [vmem:[#allocation118_spill] sm:$0xff]  ;;  %v9623_v13 = vld [vmem:[#allocation123_spill] sm:$0xff] }
 0x638   :  { %v2513_v24 = vsel %vm1627_vm7, %v2423_v15, %v2512_v22  ;;  %v9624_v4 = vld [vmem:[#allocation126_spill] sm:$0xff]  ;;  %v9625_v15 = vld [vmem:[#allocation127_spill] sm:$0xff] }
 0x639   :  { %6167 = vmatpush1.bf16.msra.mxu0 %v8120_v20  ;;  %v9626_v22 = vld [vmem:[#allocation151_spill] sm:$0xff] }
 0x63a   :  { %6169 = vmatprep.subr.bf16.mxu0 %v8123_v33 }
 0x63d   :  { %6171 = vmatpush1.bf16.msra.mxu0 %v8127_v23 }
 0x63e   :  { %6173 = vmatprep.subr.bf16.mxu0 %v8130_v6 }
 0x641   :  { %6175 = vmatpush1.bf16.msra.mxu0 %v8134_v11 }
 0x642   :  { %6177 = vmatprep.subr.bf16.mxu0 %v8138_v62 }
 0x645   :  { %6179 = vmatpush1.bf16.msra.mxu0 %v8142_v44  ;;  %v9669_v44 = vld [vmem:[#allocation44_spill] sm:$0xff] }
 0x646   :  { %6181 = vmatprep.subr.bf16.mxu0 %v8145_v38 }
 0x649   :  { %6183 = vmatpush1.bf16.msra.mxu0 %v8149_v56 }
 0x64a   :  { %6473 = vmatprep.subr.bf16.mxu0 %v7880_v51 }
 0x64c   :  { %2734 = vmatmul.mubr.f32.vlgmr.msra.gmra.mrb[8].mxu0 %v2513_v24  ;;  %v9627_v24 = vld [vmem:[#allocation152_spill] sm:$0xff] }
 0x64d   :  { %6475 = vmatpush1.bf16.msra.mxu0 %v7883_v3 }
 0x64e   :  { %6477 = vmatprep.subr.bf16.mxu0 %v7885_v10 }
 0x651   :  { %6479 = vmatpush1.bf16.msra.mxu0 %v7895_v54 }
 0x652   :  { %6481 = vmatprep.subr.bf16.mxu0 %v7902_v16 }
 0x655   :  { %6483 = vmatpush1.bf16.msra.mxu0 %v7916_v46 }
 0x656   :  { %6485 = vmatprep.subr.bf16.mxu0 %v7922_v27 }
 0x659   :  { %6487 = vmatpush1.bf16.msra.mxu0 %v7930_v49 }
 0x65a   :  { %6489 = vmatprep.subr.bf16.mxu0 %v7935_v55 }
 0x65d   :  { %6491 = vmatpush1.bf16.msra.mxu0 %v9606_v30 }
 0x65e   :  { %6493 = vmatprep.subr.bf16.mxu0 %v9607_v52 }
 0x65f   :  { %v5241_v5 = vpop.f32.mrb[6].mxu0 }
 0x660   :  { %v5242_v17 = vpop.f32.mrb[7].mxu0 }
 0x661   :  { %v5243_v50 = vadd.f32 %v5242_v17, %v5241_v5  ;;  %6495 = vmatpush1.bf16.msra.mxu0 %v9608_v19  ;;  %v9628_v5 = vld [vmem:[#allocation153_spill] sm:$0xff] }
 0x662   :  { %6497 = vmatprep.subr.bf16.mxu0 %v9609_v21 }
 0x663   :  { %v2042_v59 = vadd.f32 %v5243_v50, %v5208_v47  ;;  %v9629_v47 = vld [vmem:[#allocation154_spill] sm:$0xff]  ;;  %v9630_v50 = vld [vmem:[#allocation155_spill] sm:$0xff] }
 0x665   :  { %2045 = vst [vmem:[#allocation17] sm:$0xff] %v2042_v59  ;;  %6499 = vmatpush1.bf16.msra.mxu0 %v9610_v43 }
 0x666   :  { %6501 = vmatprep.subr.bf16.mxu0 %v9611_v35 }
 0x669   :  { %6503 = vmatpush1.bf16.msra.mxu0 %v9612_v42 }
 0x66a   :  { %6505 = vmatprep.subr.bf16.mxu0 %v9613_v32  ;;  %v2923_v32 = vld [vmem:[#allocation2 + $0x278] sm:$0xf] }
 0x66d   :  { %6507 = vmatpush1.bf16.msra.mxu0 %v9614_v28 }
 0x66e   :  { %6509 = vmatprep.subr.bf16.mxu0 %v9615_v60 }
 0x671   :  { %6511 = vmatpush1.bf16.msra.mxu0 %v9616_v7 }
 0x672   :  { %6513 = vmatprep.subr.bf16.mxu0 %v9617_v63  ;;  %v2917_v63 = vld [vmem:[#allocation2 + $0x218] sm:$0xf] }
 0x673   :  { %v3151_v42 = vsel %vm1230_vm0, %v2917_v63, -inf }
 0x674   :  { %v3152_v52 = vrot.slane %v3151_v42, 4 }
 0x675   :  { %6515 = vmatpush1.bf16.msra.mxu0 %v9618_v40 }
 0x676   :  { %6517 = vmatprep.subr.bf16.mxu0 %v9619_v12  ;;  %v3153_v30 = vmax.f32 %v3151_v42, %v3152_v52 }
 0x679   :  { %6519 = vmatpush1.bf16.msra.mxu0 %v9620_v61  ;;  %v9631_v61 = vld [vmem:[#allocation156_spill] sm:$0xff] }
 0x67a   :  { %6521 = vmatprep.subr.bf16.mxu0 %v9621_v8 }
 0x67d   :  { %6523 = vmatpush1.bf16.msra.mxu0 %v9622_v9 }
 0x67e   :  { %6525 = vmatprep.subr.bf16.mxu0 %v9623_v13 }
 0x681   :  { %6527 = vmatpush1.bf16.msra.mxu0 %v9624_v4  ;;  %v9632_v4 = vld [vmem:[#allocation157_spill] sm:$0xff] }
 0x682   :  { %6529 = vmatprep.subr.bf16.mxu0 %v9625_v15  ;;  %v9633_v15 = vld [vmem:[#allocation158_spill] sm:$0xff] }
 0x685   :  { %6531 = vmatpush1.bf16.msra.mxu0 %v9626_v22  ;;  %v9634_v22 = vld [vmem:[#allocation159_spill] sm:$0xff] }
 0x686   :  { %6533 = vmatprep.subr.bf16.mxu0 %v9627_v24  ;;  %v9635_v24 = vld [vmem:[#allocation160_spill] sm:$0xff] }
 0x689   :  { %6535 = vmatpush1.bf16.msra.mxu0 %v9628_v5  ;;  %v9636_v5 = vld [vmem:[#allocation161_spill] sm:$0xff] }
 0x68a   :  { %6537 = vmatprep.subr.bf16.mxu0 %v9629_v47  ;;  %v9637_v47 = vld [vmem:[#allocation162_spill] sm:$0xff] }
 0x71f   :  { %v2735_v17 = vpop.f32.mrb[8].mxu0 }
 0x720   :  { %v7148_v59 = vadd.f32 %v2735_v17, %v9630_v50  ;;  %v2737_v8 = vpop.f32.mrb[9].mxu0  ;;  %v9638_v17 = vld [vmem:[#allocation163_spill] sm:$0xff]  ;;  %v9639_v50 = vld [vmem:[#allocation164_spill] sm:$0xff] }
 0x721   :  { %v7149_v9 = vadd.f32 %v2737_v8, %v9631_v61  ;;  %v9640_v8 = vld [vmem:[#allocation165_spill] sm:$0xff]  ;;  %v2911_v61 = vld [vmem:[#allocation2 + $0x1b8] sm:$0xf] }
 0x722   :  { %v2740_v13 = vmax.f32 %v7148_v59, 0.0  ;;  %v9644_v59 = vld [vmem:[#allocation169_spill] sm:$0xff]  ;;  %v3109_v7 = vsel %vm1230_vm0, %v2911_v61, -inf }
 0x723   :  { %v2741_v12 = vmax.f32 %v7149_v9, 0.0  ;;  %v9642_v9 = vld [vmem:[#allocation167_spill] sm:$0xff] }
 0x725   :  { %2806 = vmatprep.mubr.f32.mxu1 %v2741_v12  ;;  %v9641_v12 = vld [vmem:[#allocation166_spill] sm:$0xff] }
 0x726   :  { %2807 = vmatmul.mubr.f32.vlgmr.msra.gmra.mrb[4].mxu1 %v2740_v13  ;;  %v9643_v13 = vld [vmem:[#allocation168_spill] sm:$0xff] }
 0x727   :  { %6251 = vmatpush3.bf16.msra.mxu1 %v9632_v4 }
 0x728   :  { %6253 = vmatprep.subr.bf16.mxu1 %v9633_v15  ;;  %v2899_v15 = vld [vmem:[#allocation2 + $0xf8] sm:$0xf] }
 0x72b   :  { %6255 = vmatpush3.bf16.msra.mxu1 %v9634_v22  ;;  %v9645_v22 = vld [vmem:[#allocation170_spill] sm:$0xff] }
 0x72c   :  { %6257 = vmatprep.subr.bf16.mxu1 %v9635_v24  ;;  %v9646_v24 = vld [vmem:[#allocation171_spill] sm:$0xff] }
 0x72f   :  { %6259 = vmatpush3.bf16.msra.mxu1 %v9636_v5  ;;  %v9647_v5 = vld [vmem:[#allocation26_spill] sm:$0xff] }
 0x730   :  { %6261 = vmatprep.subr.bf16.mxu1 %v9637_v47  ;;  %v2887_v47 = vld [vmem:[#allocation2 + $0x38] sm:$0xf] }
 0x733   :  { %6263 = vmatpush3.bf16.msra.mxu1 %v9638_v17  ;;  %v2893_v17 = vld [vmem:[#allocation2 + $0x98] sm:$0xf] }
 0x734   :  { %6265 = vmatprep.subr.bf16.mxu1 %v9639_v50  ;;  %v2941_v50 = vsel %vm1230_vm0, %v2887_v47, -inf }
 0x735   :  { %v2942_v4 = vrot.slane %v2941_v50, 4 }
 0x737   :  { %6267 = vmatpush3.bf16.msra.mxu1 %v9640_v8  ;;  %v2983_v8 = vsel %vm1230_vm0, %v2893_v17, -inf  ;;  %v2943_v40 = vmax.f32 %v2941_v50, %v2942_v4  ;;  %v3110_v17 = vrot.slane %v3109_v7, 4  ;;  %v3193_v4 = vsel %vm1230_vm0, %v2923_v32, -inf }
 0x738   :  { %6269 = vmatprep.subr.bf16.mxu1 %v9641_v12  ;;  %v2905_v12 = vld [vmem:[#allocation2 + $0x158] sm:$0xf] }
 0x739   :  { %v2944_v28 = vrot.slane %v2943_v40, 2  ;;  %v3111_v50 = vmax.f32 %v3109_v7, %v3110_v17 }
 0x73b   :  { %6271 = vmatpush3.bf16.msra.mxu1 %v9642_v9  ;;  %v2984_v9 = vrot.slane %v2983_v8, 4  ;;  %v2945_v21 = vmax.f32 %v2943_v40, %v2944_v28  ;;  %v3112_v55 = vrot.slane %v3111_v50, 2  ;;  %v3154_v40 = vrot.slane %v3153_v30, 2 }
 0x73c   :  { %6273 = vmatprep.subr.bf16.mxu1 %v9643_v13  ;;  %v3025_v13 = vsel %vm1230_vm0, %v2899_v15, -inf  ;;  %v2929_v15 = vld [vmem:[#allocation2 + $0x2d8] sm:$0xf] }
 0x73d   :  { %v3235_v61 = vsel %vm1230_vm0, %v2929_v15, -inf }
 0x73e   :  { %v3236_v63 = vrot.slane %v3235_v61, 4 }
 0x73f   :  { %6275 = vmatpush3.bf16.msra.mxu1 %v9644_v59  ;;  %v3026_v59 = vrot.slane %v3025_v13, 4 }
 0x740   :  { %6277 = vmatprep.subr.bf16.mxu1 %v9645_v22  ;;  %v3067_v22 = vsel %vm1230_vm0, %v2905_v12, -inf  ;;  %v3237_v32 = vmax.f32 %v3235_v61, %v3236_v63  ;;  %v9648_v61 = vld [vmem:[#allocation172_spill] sm:$0xff]  ;;  %v9650_v63 = vld [vmem:[#allocation173_spill] sm:$0xff] }
 0x741   :  { %v3027_v60 = vmax.f32 %v3025_v13, %v3026_v59  ;;  %v2946_v13 = vrot.slane %v2945_v21, 1 }
 0x742   :  { %v3238_v16 = vrot.slane %v3237_v32, 2 }
 0x743   :  { %6279 = vmatpush3.bf16.msra.mxu1 %v9646_v24  ;;  %v2985_v24 = vmax.f32 %v2983_v8, %v2984_v9  ;;  %v3028_v43 = vrot.slane %v3027_v60, 2  ;;  %v3194_v9 = vrot.slane %v3193_v4, 4  ;;  %v2947_v27 = vmax.f32 %v2945_v21, %v2946_v13 }
 0x744   :  { %6281 = vmatprep.subr.bf16.mxu1 %v9647_v5  ;;  %v3068_v5 = vrot.slane %v3067_v22, 4 }
 0x745   :  { %v2986_v47 = vrot.slane %v2985_v24, 2  ;;  %v3029_v12 = vmax.f32 %v3027_v60, %v3028_v43  ;;  %v3155_v43 = vmax.f32 %v3153_v30, %v3154_v40  ;;  %v9652_v40 = vld [vmem:[#allocation27_spill] sm:$0xff] }
 0x746   :  { %v3069_v35 = vmax.f32 %v3067_v22, %v3068_v5  ;;  %v3195_v5 = vmax.f32 %v3193_v4, %v3194_v9  ;;  %v3239_v4 = vmax.f32 %v3237_v32, %v3238_v16  ;;  %v9655_v32 = vld [vmem:[#allocation30_spill] sm:$0xff] }
 0x747   :  { %v2987_v19 = vmax.f32 %v2985_v24, %v2986_v47  ;;  %v3030_v22 = vrot.slane %v3029_v12, 1  ;;  %v3113_v24 = vmax.f32 %v3111_v50, %v3112_v55  ;;  %v3156_v42 = vrot.slane %v3155_v43, 1 }
 0x748   :  { %v3070_v8 = vrot.slane %v3069_v35, 2  ;;  %v3196_v17 = vrot.slane %v3195_v5, 2 }
 0x749   :  { %v2988_v59 = vrot.slane %v2987_v19, 1  ;;  %v3031_v7 = vmax.f32 %v3029_v12, %v3030_v22  ;;  %v3114_v15 = vrot.slane %v3113_v24, 1  ;;  %v3157_v55 = vmax.f32 %v3155_v43, %v3156_v42  ;;  %v2886_v43 = vld [vmem:[#allocation2 + $0x30] sm:$0xf]  ;;  %v2889_v42 = vld [vmem:[#allocation2 + $0x48] sm:$0xf] }
 0x74a   :  { %v3071_v49 = vmax.f32 %v3069_v35, %v3070_v8  ;;  %v3197_v52 = vmax.f32 %v3195_v5, %v3196_v17  ;;  %v3240_v12 = vrot.slane %v3239_v4, 1  ;;  %v9657_v17 = vld [vmem:[#allocation32_spill] sm:$0xff] }
 0x74b   :  { %v2989_v28 = vmax.f32 %v2987_v19, %v2988_v59  ;;  %v3115_v8 = vmax.f32 %v3113_v24, %v3114_v15  ;;  %v9653_v24 = vld [vmem:[#allocation28_spill] sm:$0xff]  ;;  %v2892_v15 = vld [vmem:[#allocation2 + $0x90] sm:$0xf] }
 0x74c   :  { %v3072_v47 = vrot.slane %v3071_v49, 1  ;;  %v3198_v21 = vrot.slane %v3197_v52, 1  ;;  %v3241_v59 = vmax.f32 %v3239_v4, %v3240_v12  ;;  %v2898_v4 = vld [vmem:[#allocation2 + $0xf0] sm:$0xf]  ;;  %v2955_v12 = vsel %vm1230_vm0, %v2889_v42, -inf }
 0x74d   :  { %v3325_v60 = vsel %vm1615_vm1, %v2989_v28, %v2947_v27 }
 0x74e   :  { %v3073_v46 = vmax.f32 %v3071_v49, %v3072_v47  ;;  %v3326_v35 = vsel %vm1617_vm2, %v3031_v7, %v3325_v60  ;;  %v3199_v9 = vmax.f32 %v3197_v52, %v3198_v21  ;;  %v9654_v47 = vld [vmem:[#allocation29_spill] sm:$0xff]  ;;  %v9656_v7 = vld [vmem:[#allocation31_spill] sm:$0xff]  ;;  %v2934_v52 = vsel %vm1230_vm0, %v2886_v43, -inf }
 0x74f   :  { %v9658_v60 = vld [vmem:[#allocation33_spill] sm:$0xff]  ;;  %v2976_v21 = vsel %vm1230_vm0, %v2892_v15, -inf  ;;  %v2956_v43 = vrot.slane %v2955_v12, 4 }
 0x750   :  { %v3327_v19 = vsel %vm1619_vm3, %v3073_v46, %v3326_v35  ;;  %v9659_v35 = vld [vmem:[#allocation34_spill] sm:$0xff]  ;;  %v9662_v15 = vld [vmem:[#allocation37_spill] sm:$0xff] }
 0x751   :  { %v3328_v50 = vsel %vm1621_vm4, %v3115_v8, %v3327_v19  ;;  %v2895_v8 = vld [vmem:[#allocation2 + $0xa8] sm:$0xf]  ;;  %v2935_v19 = vrot.slane %v2934_v52, 4 }
 0x752   :  { %v3329_v30 = vsel %vm1623_vm5, %v3157_v55, %v3328_v50  ;;  %v9660_v55 = vld [vmem:[#allocation35_spill] sm:$0xff]  ;;  %v2901_v50 = vld [vmem:[#allocation2 + $0x108] sm:$0xf] }
 0x753   :  { %v3330_v16 = vsel %vm1625_vm6, %v3199_v9, %v3329_v30  ;;  %v2997_v9 = vsel %vm1230_vm0, %v2895_v8, -inf  ;;  %v9661_v30 = vld [vmem:[#allocation36_spill] sm:$0xff] }
 0x754   :  { %v3331_v28 = vsel %vm1627_vm7, %v3241_v59, %v3330_v16  ;;  %v3018_v59 = vsel %vm1230_vm0, %v2898_v4, -inf  ;;  %v2936_v16 = vmax.f32 %v2934_v52, %v2935_v19 }
 0x755   :  { %v3019_v42 = vrot.slane %v3018_v59, 4 }
 0x756   :  { %v2937_v52 = vrot.slane %v2936_v16, 2 }
 0x7f9   :  { %v2808_v27 = vpop.f32.mrb[4].mxu1 }
 0x7fa   :  { %v8531_v49 = vadd.f32 %v2808_v27, %v9648_v61  ;;  %v2810_v13 = vpop.f32.mrb[5].mxu1  ;;  %v2904_v27 = vld [vmem:[#allocation2 + $0x150] sm:$0xf]  ;;  %v2938_v61 = vmax.f32 %v2936_v16, %v2937_v52  ;;  %v2931_v16 = vld [vmem:[#allocation2 + $0x2e8] sm:$0xf] }
 0x7fb   :  { %v8534_v22 = vadd.f32 %v2810_v13, %v9650_v63  ;;  %v2977_v13 = vrot.slane %v2976_v21, 4  ;;  %v3060_v8 = vsel %vm1230_vm0, %v2904_v27, -inf  ;;  %v2919_v27 = vld [vmem:[#allocation2 + $0x228] sm:$0xf]  ;;  %v2922_v63 = vld [vmem:[#allocation2 + $0x270] sm:$0xf] }
 0x7fc   :  { %9649 = vst [vmem:[#allocation79_spill] sm:$0xff] %v8531_v49  ;;  %v9336_v5 = vmax.f32 %v8531_v49, 0.0  ;;  %v2910_v49 = vld [vmem:[#allocation2 + $0x1b0] sm:$0xf]  ;;  %v2939_v56 = vrot.slane %v2938_v61, 1 }
 0x7fd   :  { %9651 = vst [vmem:[#allocation83_spill] sm:$0xff] %v8534_v22  ;;  %v9337_v46 = vmax.f32 %v8534_v22, 0.0  ;;  %v9663_v22 = vld [vmem:[#allocation38_spill] sm:$0xff]  ;;  %v3102_v19 = vsel %vm1230_vm0, %v2910_v49, -inf }
 0x7ff   :  { %2879 = vmatprep.mubr.f32.mxu1 %v9337_v46  ;;  %v3039_v46 = vsel %vm1230_vm0, %v2901_v50, -inf  ;;  %v9664_v50 = vld [vmem:[#allocation39_spill] sm:$0xff] }
 0x800   :  { %2880 = vmatmul.mubr.f32.vlgmr.msra.gmra.mrb[6].mxu1 %v9336_v5  ;;  %v2998_v5 = vrot.slane %v2997_v9, 4 }
 0x801   :  { %6283 = vmatpush1.bf16.msra.mxu1 %v9652_v40  ;;  %3430 = vmatprep.mubr.f32.mxu1 %v3331_v28  ;;  %v2907_v28 = vld [vmem:[#allocation2 + $0x168] sm:$0xf]  ;;  %v3103_v40 = vrot.slane %v3102_v19, 4 }
 0x802   :  { %6285 = vmatprep.subr.bf16.mxu1 %v9653_v24  ;;  %v3081_v4 = vsel %vm1230_vm0, %v2907_v28, -inf }
 0x803   :  { %v3082_v24 = vrot.slane %v3081_v4, 4  ;;  %v3104_v3 = vmax.f32 %v3102_v19, %v3103_v40 }
 0x805   :  { %6287 = vmatpush1.bf16.msra.mxu1 %v9654_v47  ;;  %v3083_v54 = vmax.f32 %v3081_v4, %v3082_v24 }
 0x806   :  { %6289 = vmatprep.subr.bf16.mxu1 %v9655_v32  ;;  %v9665_v32 = vld [vmem:[#allocation40_spill] sm:$0xff] }
 0x809   :  { %6291 = vmatpush1.bf16.msra.mxu1 %v9656_v7  ;;  %v2999_v7 = vmax.f32 %v2997_v9, %v2998_v5  ;;  %v9666_v5 = vld [vmem:[#allocation41_spill] sm:$0xff] }
 0x80a   :  { %6293 = vmatprep.subr.bf16.mxu1 %v9657_v17  ;;  %v2957_v17 = vmax.f32 %v2955_v12, %v2956_v43 }
 0x80b   :  { %v3000_v12 = vrot.slane %v2999_v7, 2 }
 0x80c   :  { %v2958_v49 = vrot.slane %v2957_v17, 2 }
 0x80d   :  { %6295 = vmatpush1.bf16.msra.mxu1 %v9658_v60  ;;  %v3040_v60 = vrot.slane %v3039_v46, 4  ;;  %v3001_v51 = vmax.f32 %v2999_v7, %v3000_v12  ;;  %v3249_v7 = vsel %vm1230_vm0, %v2931_v16, -inf }
 0x80e   :  { %6297 = vmatprep.subr.bf16.mxu1 %v9659_v35  ;;  %v2913_v35 = vld [vmem:[#allocation2 + $0x1c8] sm:$0xf]  ;;  %v2959_v52 = vmax.f32 %v2957_v17, %v2958_v49  ;;  %v3250_v62 = vrot.slane %v3249_v7, 4 }
 0x80f   :  { %v3041_v28 = vmax.f32 %v3039_v46, %v3040_v60  ;;  %v3186_v46 = vsel %vm1230_vm0, %v2922_v63, -inf  ;;  %v3084_v63 = vrot.slane %v3083_v54, 2  ;;  %v3002_v49 = vrot.slane %v3001_v51, 1 }
 0x811   :  { %6299 = vmatpush1.bf16.msra.mxu1 %v9660_v55  ;;  %v2916_v55 = vld [vmem:[#allocation2 + $0x210] sm:$0xf]  ;;  %v3042_v60 = vrot.slane %v3041_v28, 2  ;;  %v3003_v33 = vmax.f32 %v3001_v51, %v3002_v49 }
 0x812   :  { %6301 = vmatprep.subr.bf16.mxu1 %v9661_v30  ;;  %v2978_v30 = vmax.f32 %v2976_v21, %v2977_v13  ;;  %v3144_v47 = vsel %vm1230_vm0, %v2916_v55, -inf  ;;  %v3123_v21 = vsel %vm1230_vm0, %v2913_v35, -inf  ;;  %v9667_v55 = vld [vmem:[#allocation42_spill] sm:$0xff]  ;;  %v2928_v35 = vld [vmem:[#allocation2 + $0x2d0] sm:$0xf] }
 0x813   :  { %v3145_v43 = vrot.slane %v3144_v47, 4  ;;  %v3228_v40 = vsel %vm1230_vm0, %v2928_v35, -inf  ;;  %v3043_v19 = vmax.f32 %v3041_v28, %v3042_v60 }
 0x814   :  { %v2979_v13 = vrot.slane %v2978_v30, 2 }
 0x815   :  { %6303 = vmatpush1.bf16.msra.mxu1 %v9662_v15  ;;  %v3061_v15 = vrot.slane %v3060_v8, 4  ;;  %v3146_v38 = vmax.f32 %v3144_v47, %v3145_v43  ;;  %v2940_v47 = vmax.f32 %v2938_v61, %v2939_v56  ;;  %v3044_v11 = vrot.slane %v3043_v19, 1 }
 0x816   :  { %6305 = vmatprep.subr.bf16.mxu1 %v9663_v22  ;;  %v3020_v22 = vmax.f32 %v3018_v59, %v3019_v42  ;;  %v3165_v59 = vsel %vm1230_vm0, %v2919_v27, -inf  ;;  %v2980_v10 = vmax.f32 %v2978_v30, %v2979_v13  ;;  %v3187_v30 = vrot.slane %v3186_v46, 4 }
 0x817   :  { %v3062_v9 = vmax.f32 %v3060_v8, %v3061_v15  ;;  %v9668_v8 = vld [vmem:[#allocation43_spill] sm:$0xff]  ;;  %v3105_v13 = vrot.slane %v3104_v3, 2  ;;  %v3147_v60 = vrot.slane %v3146_v38, 2 }
 0x818   :  { %v3021_v42 = vrot.slane %v3020_v22, 2  ;;  %v2981_v4 = vrot.slane %v2980_v10, 1  ;;  %v3188_v35 = vmax.f32 %v3186_v46, %v3187_v30 }
 0x819   :  { %6307 = vmatpush1.bf16.msra.mxu1 %v9664_v50  ;;  %v2925_v50 = vld [vmem:[#allocation2 + $0x288] sm:$0xf]  ;;  %v3063_v27 = vrot.slane %v3062_v9, 2  ;;  %v3106_v6 = vmax.f32 %v3104_v3, %v3105_v13  ;;  %v3148_v30 = vmax.f32 %v3146_v38, %v3147_v60  ;;  %v9678_v60 = vld [vmem:[#allocation53_spill] sm:$0xff] }
 0x81a   :  { %6309 = vmatprep.subr.bf16.mxu1 %v9665_v32  ;;  %v3124_v32 = vrot.slane %v3123_v21, 4  ;;  %v3207_v15 = vsel %vm1230_vm0, %v2925_v50, -inf  ;;  %v3022_v24 = vmax.f32 %v3020_v22, %v3021_v42  ;;  %v2960_v50 = vrot.slane %v2959_v52, 1  ;;  %v9671_v22 = vld [vmem:[#allocation46_spill] sm:$0xff] }
 0x81b   :  { %v3208_v17 = vrot.slane %v3207_v15, 4  ;;  %v2982_v28 = vmax.f32 %v2980_v10, %v2981_v4  ;;  %v3107_v3 = vrot.slane %v3106_v6, 1  ;;  %v9674_v4 = vld [vmem:[#allocation49_spill] sm:$0xff]  ;;  %v9675_v13 = vld [vmem:[#allocation50_spill] sm:$0xff] }
 0x81c   :  { %v3023_v42 = vrot.slane %v3022_v24, 1  ;;  %v2961_v23 = vmax.f32 %v2959_v52, %v2960_v50 }
 0x81d   :  { %6311 = vmatpush1.bf16.msra.mxu1 %v9666_v5  ;;  %v3166_v5 = vrot.slane %v3165_v59, 4  ;;  %v3209_v16 = vmax.f32 %v3207_v15, %v3208_v17  ;;  %v3318_v10 = vsel %vm1615_vm1, %v2982_v28, %v2940_v47  ;;  %v9676_v47 = vld [vmem:[#allocation51_spill] sm:$0xff] }
 0x81e   :  { %6313 = vmatprep.subr.bf16.mxu1 %v9667_v55  ;;  %v3125_v55 = vmax.f32 %v3123_v21, %v3124_v32  ;;  %v3064_v32 = vmax.f32 %v3062_v9, %v3063_v27  ;;  %v3229_v21 = vrot.slane %v3228_v40, 4  ;;  %v9673_v27 = vld [vmem:[#allocation48_spill] sm:$0xff]  ;;  %v3339_v51 = vsel %vm1615_vm1, %v3003_v33, %v2961_v23 }
 0x81f   :  { %v3167_v12 = vmax.f32 %v3165_v59, %v3166_v5  ;;  %v9672_v59 = vld [vmem:[#allocation47_spill] sm:$0xff]  ;;  %v3210_v15 = vrot.slane %v3209_v16, 2 }
 0x820   :  { %v3126_v43 = vrot.slane %v3125_v55, 2  ;;  %v3065_v56 = vrot.slane %v3064_v32, 1  ;;  %v3230_v61 = vmax.f32 %v3228_v40, %v3229_v21  ;;  %v9677_v21 = vld [vmem:[#allocation52_spill] sm:$0xff] }
 0x821   :  { %6315 = vmatpush1.bf16.msra.mxu1 %v9668_v8  ;;  %v9670_v8 = vld [vmem:[#allocation45_spill] sm:$0xff]  ;;  %v3168_v5 = vrot.slane %v3167_v12, 2  ;;  %v3211_v49 = vmax.f32 %v3209_v16, %v3210_v15 }
 0x822   :  { %6317 = vmatprep.subr.bf16.mxu1 %v9669_v44  ;;  %v3085_v44 = vmax.f32 %v3083_v54, %v3084_v63  ;;  %v3127_v9 = vmax.f32 %v3125_v55, %v3126_v43  ;;  %v3251_v54 = vmax.f32 %v3249_v7, %v3250_v62  ;;  %v3045_v63 = vmax.f32 %v3043_v19, %v3044_v11 }
 0x823   :  { %v3169_v52 = vmax.f32 %v3167_v12, %v3168_v5  ;;  %v3066_v17 = vmax.f32 %v3064_v32, %v3065_v56  ;;  %v3231_v40 = vrot.slane %v3230_v61, 2  ;;  %v3149_v7 = vrot.slane %v3148_v30, 1  ;;  %v9679_v5 = vld [vmem:[#allocation54_spill] sm:$0xff] }
 0x824   :  { %v3086_v46 = vrot.slane %v3085_v44, 1  ;;  %v3128_v55 = vrot.slane %v3127_v9, 1  ;;  %v3252_v38 = vrot.slane %v3251_v54, 2  ;;  %v3340_v11 = vsel %vm1617_vm2, %v3045_v63, %v3339_v51  ;;  %v9681_v63 = vld [vmem:[#allocation56_spill] sm:$0xff]  ;;  %v9682_v51 = vld [vmem:[#allocation57_spill] sm:$0xff] }
 0x825   :  { %6319 = vmatpush1.bf16.msra.mxu1 %v9670_v8  ;;  %v3189_v8 = vrot.slane %v3188_v35, 2  ;;  %v3108_v19 = vmax.f32 %v3106_v6, %v3107_v3  ;;  %v3170_v12 = vrot.slane %v3169_v52, 1  ;;  %v3232_v33 = vmax.f32 %v3230_v61, %v3231_v40  ;;  %v9683_v40 = vld [vmem:[#allocation58_spill] sm:$0xff] }
 0x826   :  { %6321 = vmatprep.subr.bf16.mxu1 %v9671_v22  ;;  %v3024_v22 = vmax.f32 %v3022_v24, %v3023_v42  ;;  %v3087_v62 = vmax.f32 %v3085_v44, %v3086_v46  ;;  %v3129_v32 = vmax.f32 %v3127_v9, %v3128_v55  ;;  %v3150_v44 = vmax.f32 %v3148_v30, %v3149_v7  ;;  %v9688_v7 = vld [vmem:[#allocation63_spill] sm:$0xff] }
 0x827   :  { %v3190_v24 = vmax.f32 %v3188_v35, %v3189_v8  ;;  %v3253_v8 = vmax.f32 %v3251_v54, %v3252_v38  ;;  %v3212_v42 = vrot.slane %v3211_v49, 1  ;;  %v3171_v28 = vmax.f32 %v3169_v52, %v3170_v12  ;;  %v9687_v38 = vld [vmem:[#allocation62_spill] sm:$0xff]  ;;  %v2894_v12 = vld [vmem:[#allocation2 + $0xa0] sm:$0xf] }
 0x828   :  { %v3319_v50 = vsel %vm1617_vm2, %v3024_v22, %v3318_v10  ;;  %v3341_v22 = vsel %vm1619_vm3, %v3087_v62, %v3340_v11  ;;  %v3233_v6 = vrot.slane %v3232_v33, 1  ;;  %v9680_v10 = vld [vmem:[#allocation55_spill] sm:$0xff]  ;;  %v9686_v62 = vld [vmem:[#allocation61_spill] sm:$0xff] }
 0x829   :  { %6323 = vmatpush1.bf16.msra.mxu1 %v9672_v59  ;;  %v3320_v23 = vsel %vm1619_vm3, %v3066_v17, %v3319_v50  ;;  %v3191_v43 = vrot.slane %v3190_v24, 1  ;;  %v3342_v16 = vsel %vm1621_vm4, %v3129_v32, %v3341_v22  ;;  %v3254_v61 = vrot.slane %v3253_v8, 1  ;;  %v9685_v50 = vld [vmem:[#allocation60_spill] sm:$0xff]  ;;  %v2888_v11 = vld [vmem:[#allocation2 + $0x40] sm:$0xf] }
 0x82a   :  { %6325 = vmatprep.subr.bf16.mxu1 %v9673_v27  ;;  %v3321_v35 = vsel %vm1621_vm4, %v3108_v19, %v3320_v23  ;;  %v3213_v46 = vmax.f32 %v3211_v49, %v3212_v42  ;;  %v3343_v54 = vsel %vm1623_vm5, %v3171_v28, %v3342_v16  ;;  %v3234_v30 = vmax.f32 %v3232_v33, %v3233_v6  ;;  %v9689_v49 = vld [vmem:[#allocation64_spill] sm:$0xff]  ;;  %v9690_v19 = vld [vmem:[#allocation65_spill] sm:$0xff]  ;;  %v9691_v33 = vld [vmem:[#allocation66_spill] sm:$0xff] }
 0x82b   :  { %v3192_v56 = vmax.f32 %v3190_v24, %v3191_v43  ;;  %v3322_v9 = vsel %vm1623_vm5, %v3150_v44, %v3321_v35  ;;  %v3255_v3 = vmax.f32 %v3253_v8, %v3254_v61  ;;  %v9684_v24 = vld [vmem:[#allocation59_spill] sm:$0xff]  ;;  %v2948_v23 = vsel %vm1230_vm0, %v2888_v11, -inf  ;;  %v2891_v32 = vld [vmem:[#allocation2 + $0x58] sm:$0xf]  ;;  %v2900_v8 = vld [vmem:[#allocation2 + $0x100] sm:$0xf] }
 0x82c   :  { %v3344_v52 = vsel %vm1625_vm6, %v3213_v46, %v3343_v54  ;;  %v2897_v43 = vld [vmem:[#allocation2 + $0xb8] sm:$0xf]  ;;  %v2990_v22 = vsel %vm1230_vm0, %v2894_v12, -inf  ;;  %v9692_v44 = vld [vmem:[#allocation67_spill] sm:$0xff]  ;;  %v2949_v42 = vrot.slane %v2948_v23, 4  ;;  %v2969_v28 = vsel %vm1230_vm0, %v2891_v32, -inf }
 0x82d   :  { %6327 = vmatpush1.bf16.msra.mxu1 %v9674_v4  ;;  %v3323_v15 = vsel %vm1625_vm6, %v3192_v56, %v3322_v9  ;;  %v3345_v55 = vsel %vm1627_vm7, %v3255_v3, %v3344_v52  ;;  %v2903_v35 = vld [vmem:[#allocation2 + $0x118] sm:$0xf]  ;;  %v3011_v6 = vsel %vm1230_vm0, %v2897_v43, -inf  ;;  %v2906_v56 = vld [vmem:[#allocation2 + $0x160] sm:$0xf]  ;;  %v2991_v61 = vrot.slane %v2990_v22, 4 }
 0x82e   :  { %6329 = vmatprep.subr.bf16.mxu1 %v9675_v13  ;;  %v3324_v17 = vsel %vm1627_vm7, %v3234_v30, %v3323_v15  ;;  %v9693_v16 = vld [vmem:[#allocation68_spill] sm:$0xff]  ;;  %v3032_v9 = vsel %vm1230_vm0, %v2900_v8, -inf  ;;  %v2970_v54 = vrot.slane %v2969_v28, 4  ;;  %v3012_v30 = vrot.slane %v3011_v6, 4  ;;  %v9694_v3 = vld [vmem:[#allocation69_spill] sm:$0xff] }
 0x82f   :  { %v2909_v46 = vld [vmem:[#allocation2 + $0x178] sm:$0xf]  ;;  %v3053_v15 = vsel %vm1230_vm0, %v2903_v35, -inf  ;;  %v2912_v52 = vld [vmem:[#allocation2 + $0x1c0] sm:$0xf]  ;;  %v3033_v11 = vrot.slane %v3032_v9, 4  ;;  %v2992_v32 = vmax.f32 %v2990_v22, %v2991_v61 }
 0x830   :  { %v3074_v12 = vsel %vm1230_vm0, %v2906_v56, -inf  ;;  %v2915_v43 = vld [vmem:[#allocation2 + $0x1d8] sm:$0xf]  ;;  %v2918_v8 = vld [vmem:[#allocation2 + $0x220] sm:$0xf]  ;;  %v9696_v35 = vld [vmem:[#allocation71_spill] sm:$0xff] }
 0x831   :  { %6331 = vmatpush1.bf16.msra.mxu1 %v9676_v47  ;;  %v3137_v22 = vsel %vm1230_vm0, %v2915_v43, -inf  ;;  %v2993_v56 = vrot.slane %v2992_v32, 2 }
 0x832   :  { %6333 = vmatprep.subr.bf16.mxu1 %v9677_v21  ;;  %v9701_v21 = vld [vmem:[#allocation76_spill] sm:$0xff] }
 0x835   :  { %6335 = vmatpush1.bf16.msra.mxu1 %v9678_v60 }
 0x836   :  { %6337 = vmatprep.subr.bf16.mxu1 %v9679_v5 }
 0x839   :  { %6339 = vmatpush1.bf16.msra.mxu1 %v9680_v10  ;;  %v2933_v10 = vld [vmem:[#allocation2 + $0x2f8] sm:$0xf] }
 0x83a   :  { %6341 = vmatprep.subr.bf16.mxu1 %v9681_v63  ;;  %v2994_v63 = vmax.f32 %v2992_v32, %v2993_v56 }
 0x83c   :  { %v2995_v32 = vrot.slane %v2994_v63, 1 }
 0x83d   :  { %6343 = vmatpush1.bf16.msra.mxu1 %v9682_v51 }
 0x83e   :  { %6345 = vmatprep.subr.bf16.mxu1 %v9683_v40 }
 0x840   :  { %3431 = vmatmul.mubr.f32.vlgmr.msra.gmra.mrb[8].mxu1 %v3324_v17  ;;  %v2950_v17 = vmax.f32 %v2948_v23, %v2949_v42  ;;  %v9697_v23 = vld [vmem:[#allocation72_spill] sm:$0xff]  ;;  %v3034_v42 = vmax.f32 %v3032_v9, %v3033_v11  ;;  %v9699_v11 = vld [vmem:[#allocation74_spill] sm:$0xff] }
 0x841   :  { %6347 = vmatpush1.bf16.msra.mxu1 %v9684_v24  ;;  %3501 = vmatprep.mubr.f32.mxu1 %v3345_v55  ;;  %v9695_v55 = vld [vmem:[#allocation70_spill] sm:$0xff]  ;;  %v3138_v24 = vrot.slane %v3137_v22, 4 }
 0x842   :  { %6349 = vmatprep.subr.bf16.mxu1 %v9685_v50  ;;  %v2924_v50 = vld [vmem:[#allocation2 + $0x280] sm:$0xf]  ;;  %v3035_v43 = vrot.slane %v3034_v42, 2 }
 0x843   :  { %v3139_v60 = vmax.f32 %v3137_v22, %v3138_v24 }
 0x845   :  { %6351 = vmatpush1.bf16.msra.mxu1 %v9686_v62  ;;  %v3140_v22 = vrot.slane %v3139_v60, 2 }
 0x846   :  { %6353 = vmatprep.subr.bf16.mxu1 %v9687_v38 }
 0x849   :  { %6355 = vmatpush1.bf16.msra.mxu1 %v9688_v7  ;;  %v3075_v7 = vrot.slane %v3074_v12, 4 }
 0x84a   :  { %6357 = vmatprep.subr.bf16.mxu1 %v9689_v49  ;;  %v3013_v49 = vmax.f32 %v3011_v6, %v3012_v30  ;;  %v9698_v6 = vld [vmem:[#allocation73_spill] sm:$0xff] }
 0x84b   :  { %v3076_v30 = vmax.f32 %v3074_v12, %v3075_v7 }
 0x84d   :  { %6359 = vmatpush1.bf16.msra.mxu1 %v9690_v19  ;;  %v2971_v19 = vmax.f32 %v2969_v28, %v2970_v54  ;;  %v3014_v28 = vrot.slane %v3013_v49, 2  ;;  %v3077_v12 = vrot.slane %v3076_v30, 2 }
 0x84e   :  { %6361 = vmatprep.subr.bf16.mxu1 %v9691_v33  ;;  %v3116_v33 = vsel %vm1230_vm0, %v2912_v52, -inf }
 0x84f   :  { %v3117_v61 = vrot.slane %v3116_v33, 4  ;;  %v2972_v52 = vrot.slane %v2971_v19, 2 }
 0x851   :  { %6363 = vmatpush1.bf16.msra.mxu1 %v9692_v44  ;;  %v3095_v44 = vsel %vm1230_vm0, %v2909_v46, -inf  ;;  %v3158_v46 = vsel %vm1230_vm0, %v2918_v8, -inf  ;;  %v3118_v8 = vmax.f32 %v3116_v33, %v3117_v61  ;;  %v2973_v5 = vmax.f32 %v2971_v19, %v2972_v52 }
 0x852   :  { %6365 = vmatprep.subr.bf16.mxu1 %v9693_v16  ;;  %v3054_v16 = vrot.slane %v3053_v15, 4  ;;  %v3096_v38 = vrot.slane %v3095_v44, 4  ;;  %v3159_v40 = vrot.slane %v3158_v46, 4 }
 0x853   :  { %v3119_v61 = vrot.slane %v3118_v8, 2 }
 0x854   :  { %v3055_v62 = vmax.f32 %v3053_v15, %v3054_v16  ;;  %v3097_v51 = vmax.f32 %v3095_v44, %v3096_v38  ;;  %v3200_v16 = vsel %vm1230_vm0, %v2924_v50, -inf  ;;  %v3036_v38 = vmax.f32 %v3034_v42, %v3035_v43 }
 0x855   :  { %6367 = vmatpush1.bf16.msra.mxu1 %v9694_v3  ;;  %v2951_v3 = vrot.slane %v2950_v17, 2  ;;  %v3160_v33 = vmax.f32 %v3158_v46, %v3159_v40  ;;  %v3201_v44 = vrot.slane %v3200_v16, 4  ;;  %v3120_v4 = vmax.f32 %v3118_v8, %v3119_v61 }
 0x856   :  { %6369 = vmatprep.subr.bf16.mxu1 %v9695_v55  ;;  %v2921_v55 = vld [vmem:[#allocation2 + $0x238] sm:$0xf]  ;;  %v3056_v15 = vrot.slane %v3055_v62, 2  ;;  %v3098_v50 = vrot.slane %v3097_v51, 2  ;;  %v3037_v40 = vrot.slane %v3036_v38, 1 }
 0x857   :  { %v2952_v54 = vmax.f32 %v2950_v17, %v2951_v3  ;;  %v3179_v9 = vsel %vm1230_vm0, %v2921_v55, -inf  ;;  %v9700_v17 = vld [vmem:[#allocation75_spill] sm:$0xff]  ;;  %v3202_v42 = vmax.f32 %v3200_v16, %v3201_v44  ;;  %v3121_v8 = vrot.slane %v3120_v4, 1 }
 0x858   :  { %v3180_v3 = vrot.slane %v3179_v9, 4  ;;  %v3057_v56 = vmax.f32 %v3055_v62, %v3056_v15  ;;  %v3099_v46 = vmax.f32 %v3097_v51, %v3098_v50  ;;  %v2996_v62 = vmax.f32 %v2994_v63, %v2995_v32 }
 0x859   :  { %6371 = vmatpush1.bf16.msra.mxu1 %v9696_v35  ;;  %v2927_v35 = vld [vmem:[#allocation2 + $0x298] sm:$0xf]  ;;  %v2953_v55 = vrot.slane %v2952_v54, 1  ;;  %v3161_v15 = vrot.slane %v3160_v33, 2 }
 0x85a   :  { %6373 = vmatprep.subr.bf16.mxu1 %v9697_v23  ;;  %v2930_v23 = vld [vmem:[#allocation2 + $0x2e0] sm:$0xf]  ;;  %v3221_v7 = vsel %vm1230_vm0, %v2927_v35, -inf  ;;  %v2974_v35 = vrot.slane %v2973_v5, 1  ;;  %v3058_v13 = vrot.slane %v3057_v56, 1  ;;  %v3100_v16 = vrot.slane %v3099_v46, 1 }
 0x85b   :  { %v3222_v19 = vrot.slane %v3221_v7, 4  ;;  %v2954_v47 = vmax.f32 %v2952_v54, %v2953_v55  ;;  %v3038_v55 = vmax.f32 %v3036_v38, %v3037_v40  ;;  %v3162_v44 = vmax.f32 %v3160_v33, %v3161_v15 }
 0x85c   :  { %v2975_v27 = vmax.f32 %v2973_v5, %v2974_v35  ;;  %v3059_v50 = vmax.f32 %v3057_v56, %v3058_v13  ;;  %v3122_v56 = vmax.f32 %v3120_v4, %v3121_v8  ;;  %v2896_v8 = vld [vmem:[#allocation2 + $0xb0] sm:$0xf] }
 0x85d   :  { %6375 = vmatpush1.bf16.msra.mxu1 %v9698_v6  ;;  %v3015_v6 = vmax.f32 %v3013_v49, %v3014_v28  ;;  %v3263_v49 = vsel %vm1230_vm0, %v2933_v10, -inf  ;;  %v3181_v28 = vmax.f32 %v3179_v9, %v3180_v3  ;;  %v3223_v10 = vmax.f32 %v3221_v7, %v3222_v19 }
 0x85e   :  { %6377 = vmatprep.subr.bf16.mxu1 %v9699_v11  ;;  %v3242_v11 = vsel %vm1230_vm0, %v2930_v23, -inf  ;;  %v3078_v23 = vmax.f32 %v3076_v30, %v3077_v12  ;;  %v3264_v43 = vrot.slane %v3263_v49, 4  ;;  %v3141_v3 = vmax.f32 %v3139_v60, %v3140_v22 }
 0x85f   :  { %v3016_v52 = vrot.slane %v3015_v6, 1  ;;  %v3243_v24 = vrot.slane %v3242_v11, 4  ;;  %v3182_v9 = vrot.slane %v3181_v28, 2  ;;  %v3203_v12 = vrot.slane %v3202_v42, 2 }
 0x860   :  { %v3079_v54 = vrot.slane %v3078_v23, 1  ;;  %v3265_v51 = vmax.f32 %v3263_v49, %v3264_v43  ;;  %v3332_v63 = vsel %vm1615_vm1, %v2996_v62, %v2954_v47  ;;  %v3224_v7 = vrot.slane %v3223_v10, 2 }
 0x861   :  { %6379 = vmatpush1.bf16.msra.mxu1 %v9700_v17  ;;  %v9702_v17 = vld [vmem:[#allocation77_spill] sm:$0xff]  ;;  %v3017_v59 = vmax.f32 %v3015_v6, %v3016_v52  ;;  %v3244_v30 = vmax.f32 %v3242_v11, %v3243_v24  ;;  %v3183_v5 = vmax.f32 %v3181_v28, %v3182_v9  ;;  %v3142_v60 = vrot.slane %v3141_v3, 1 }
 0x862   :  { %6381 = vmatprep.subr.bf16.mxu1 %v9701_v21  ;;  %v9703_v21 = vld [vmem:[#allocation78_spill] sm:$0xff]  ;;  %v3080_v32 = vmax.f32 %v3078_v23, %v3079_v54  ;;  %v3204_v38 = vmax.f32 %v3202_v42, %v3203_v12  ;;  %v3333_v19 = vsel %vm1617_vm2, %v3038_v55, %v3332_v63  ;;  %v3101_v49 = vmax.f32 %v3099_v46, %v3100_v16  ;;  %v9705_v63 = vld [vmem:[#allocation121_spill] sm:$0xff] }
 0x863   :  { %v3353_v6 = vsel %vm1615_vm1, %v3017_v59, %v2975_v27  ;;  %v3245_v11 = vrot.slane %v3244_v30, 2  ;;  %v3266_v33 = vrot.slane %v3265_v51, 2  ;;  %v3163_v61 = vrot.slane %v3162_v44, 1 }
 0x864   :  { %v3225_v47 = vmax.f32 %v3223_v10, %v3224_v7  ;;  %v3354_v13 = vsel %vm1617_vm2, %v3059_v50, %v3353_v6  ;;  %v3184_v35 = vrot.slane %v3183_v5, 1  ;;  %v3334_v27 = vsel %vm1619_vm3, %v3080_v32, %v3333_v19  ;;  %v9706_v50 = vld [vmem:[#allocation124_spill] sm:$0xff]  ;;  %v2890_v7 = vld [vmem:[#allocation2 + $0x50] sm:$0xf] }
 0x865   :  { %6383 = vmatpush1.bf16.msra.mxu1 %v9702_v17  ;;  %v3246_v59 = vmax.f32 %v3244_v30, %v3245_v11  ;;  %v3143_v52 = vmax.f32 %v3141_v3, %v3142_v60  ;;  %v3205_v28 = vrot.slane %v3204_v38, 1  ;;  %v3267_v23 = vmax.f32 %v3265_v51, %v3266_v33  ;;  %v2902_v6 = vld [vmem:[#allocation2 + $0x110] sm:$0xf]  ;;  %v9708_v60 = vld [vmem:[#allocation128_spill] sm:$0xff] }
 0x866   :  { %6385 = vmatprep.subr.bf16.mxu1 %v9703_v21  ;;  %v3355_v24 = vsel %vm1619_vm3, %v3101_v49, %v3354_v13  ;;  %v3164_v22 = vmax.f32 %v3162_v44, %v3163_v61  ;;  %v3226_v40 = vrot.slane %v3225_v47, 1  ;;  %v3335_v42 = vsel %vm1621_vm4, %v3122_v56, %v3334_v27  ;;  %v9704_v44 = vld [vmem:[#allocation120_spill] sm:$0xff]  ;;  %v2908_v19 = vld [vmem:[#allocation2 + $0x170] sm:$0xf] }
 0x867   :  { %v3185_v46 = vmax.f32 %v3183_v5, %v3184_v35  ;;  %v3247_v4 = vrot.slane %v3246_v59, 1  ;;  %v3356_v43 = vsel %vm1621_vm4, %v3143_v52, %v3355_v24  ;;  %v3206_v62 = vmax.f32 %v3204_v38, %v3205_v28  ;;  %v9707_v5 = vld [vmem:[#allocation125_spill] sm:$0xff]  ;;  %v9711_v13 = vld [vmem:[#allocation131_spill] sm:$0xff]  ;;  %v9712_v28 = vld [vmem:[#allocation132_spill] sm:$0xff] }
 0x868   :  { %v3268_v15 = vrot.slane %v3267_v23, 1  ;;  %v3336_v10 = vsel %vm1623_vm5, %v3164_v22, %v3335_v42  ;;  %v3227_v9 = vmax.f32 %v3225_v47, %v3226_v40  ;;  %v2962_v32 = vsel %vm1230_vm0, %v2890_v7, -inf  ;;  %v9709_v38 = vld [vmem:[#allocation129_spill] sm:$0xff]  ;;  %v9710_v47 = vld [vmem:[#allocation130_spill] sm:$0xff]  ;;  %v2914_v56 = vld [vmem:[#allocation2 + $0x1d0] sm:$0xf] }
 0x869   :  { %6387 = vmatpush1.bf16.msra.mxu1 %v9574_v26  ;;  %v3357_v54 = vsel %vm1623_vm5, %v3185_v46, %v3356_v43  ;;  %v3248_v30 = vmax.f32 %v3246_v59, %v3247_v4  ;;  %v3337_v3 = vsel %vm1625_vm6, %v3206_v62, %v3336_v10  ;;  %v3004_v11 = vsel %vm1230_vm0, %v2896_v8, -inf  ;;  %v9713_v40 = vld [vmem:[#allocation133_spill] sm:$0xff]  ;;  %v2926_v43 = vld [vmem:[#allocation2 + $0x290] sm:$0xf]  ;;  %v9714_v10 = vld [vmem:[#allocation134_spill] sm:$0xff] }
 0x86a   :  { %6389 = vmatprep.subr.bf16.mxu1 %v9575_v57  ;;  %v3269_v55 = vmax.f32 %v3267_v23, %v3268_v15  ;;  %v3358_v12 = vsel %vm1625_vm6, %v3227_v9, %v3357_v54  ;;  %v2963_v49 = vrot.slane %v2962_v32, 4  ;;  %v3005_v33 = vrot.slane %v3004_v11, 4  ;;  %v2920_v23 = vld [vmem:[#allocation2 + $0x230] sm:$0xf]  ;;  %v9716_v8 = vld [vmem:[#allocation136_spill] sm:$0xff] }
 0x86b   :  { %v3338_v16 = vsel %vm1627_vm7, %v3248_v30, %v3337_v3  ;;  %v3046_v61 = vsel %vm1230_vm0, %v2902_v6, -inf  ;;  %v3088_v59 = vsel %vm1230_vm0, %v2908_v19, -inf  ;;  %v3130_v22 = vsel %vm1230_vm0, %v2914_v56, -inf  ;;  %v9715_v54 = vld [vmem:[#allocation135_spill] sm:$0xff] }
 0x86c   :  { %v3359_v51 = vsel %vm1627_vm7, %v3269_v55, %v3358_v12  ;;  %v3047_v35 = vrot.slane %v3046_v61, 4  ;;  %v2964_v27 = vmax.f32 %v2962_v32, %v2963_v49  ;;  %v3006_v52 = vmax.f32 %v3004_v11, %v3005_v33  ;;  %v2932_v3 = vld [vmem:[#allocation2 + $0x2f0] sm:$0xf]  ;;  %v9717_v32 = vld [vmem:[#allocation137_spill] sm:$0xff] }
 0x86d   :  { %6391 = vmatpush1.bf16.msra.mxu1 %v9576_v58  ;;  %v3089_v24 = vrot.slane %v3088_v59, 4  ;;  %v3131_v62 = vrot.slane %v3130_v22, 4  ;;  %v3172_v15 = vsel %vm1230_vm0, %v2920_v23, -inf  ;;  %v3256_v49 = vsel %vm1230_vm0, %v2932_v3, -inf }
 0x86e   :  { %6393 = vmatprep.subr.bf16.mxu1 %v9577_v31  ;;  %v3048_v42 = vmax.f32 %v3046_v61, %v3047_v35  ;;  %v2965_v46 = vrot.slane %v2964_v27, 2  ;;  %v3007_v4 = vrot.slane %v3006_v52, 2 }
 0x86f   :  { %v3090_v9 = vmax.f32 %v3088_v59, %v3089_v24  ;;  %v3132_v7 = vmax.f32 %v3130_v22, %v3131_v62 }
 0x870   :  { %v3049_v30 = vrot.slane %v3048_v42, 2  ;;  %v2966_v55 = vmax.f32 %v2964_v27, %v2965_v46  ;;  %v3008_v12 = vmax.f32 %v3006_v52, %v3007_v4  ;;  %v3257_v27 = vrot.slane %v3256_v49, 4  ;;  %v9718_v52 = vld [vmem:[#allocation139_spill] sm:$0xff] }
 0x871   :  { %6395 = vmatpush1.bf16.msra.mxu1 %v9578_v0  ;;  %v3091_v6 = vrot.slane %v3090_v9, 2  ;;  %v3133_v35 = vrot.slane %v3132_v7, 2 }
 0x872   :  { %6397 = vmatprep.subr.bf16.mxu1 %v9579_v34  ;;  %v3050_v11 = vmax.f32 %v3048_v42, %v3049_v30  ;;  %v2967_v33 = vrot.slane %v2966_v55, 1  ;;  %v3009_v61 = vrot.slane %v3008_v12, 1  ;;  %v3258_v62 = vmax.f32 %v3256_v49, %v3257_v27  ;;  %v9720_v49 = vld [vmem:[#allocation144_spill] sm:$0xff] }
 0x873   :  { %v3092_v59 = vmax.f32 %v3090_v9, %v3091_v6 }
 0x874   :  { %v3051_v23 = vrot.slane %v3050_v11, 1  ;;  %v2968_v22 = vmax.f32 %v2966_v55, %v2967_v33  ;;  %v3010_v46 = vmax.f32 %v3008_v12, %v3009_v61  ;;  %v9719_v55 = vld [vmem:[#allocation143_spill] sm:$0xff] }
 0x875   :  { %6399 = vmatpush1.bf16.msra.mxu1 %v9580_v18  ;;  %v3093_v42 = vrot.slane %v3092_v59, 1 }
 0x876   :  { %6401 = vmatprep.subr.bf16.mxu1 %v9581_v25  ;;  %v3346_v9 = vsel %vm1615_vm1, %v3010_v46, %v2968_v22  ;;  %v9723_v46 = vld [vmem:[#allocation147_spill] sm:$0xff] }
 0x877   :  { %v3094_v6 = vmax.f32 %v3092_v59, %v3093_v42  ;;  %v9722_v59 = vld [vmem:[#allocation146_spill] sm:$0xff] }
 0x879   :  { %6403 = vmatpush1.bf16.msra.mxu1 %v9582_v14 }
 0x87a   :  { %6405 = vmatprep.subr.bf16.mxu1 %v9583_v41 }
 0x87d   :  { %6407 = vmatpush1.bf16.msra.mxu1 %v9584_v29 }
 0x87e   :  { %6409 = vmatprep.subr.bf16.mxu1 %v9585_v2 }
 0x880   :  { %3502 = vmatmul.mubr.f32.vlgmr.msra.gmra.mrb[8].mxu1 %v3338_v16  ;;  %v3173_v16 = vrot.slane %v3172_v15, 4 }
 0x881   :  { %6411 = vmatpush1.bf16.msra.mxu1 %v9586_v48  ;;  %3572 = vmatprep.mubr.f32.mxu1 %v3359_v51  ;;  %v3214_v51 = vsel %vm1230_vm0, %v2926_v43, -inf  ;;  %v3134_v43 = vmax.f32 %v3132_v7, %v3133_v35 }
 0x882   :  { %6413 = vmatprep.subr.bf16.mxu1 %v9587_v37  ;;  %v3215_v19 = vrot.slane %v3214_v51, 4  ;;  %v3174_v56 = vmax.f32 %v3172_v15, %v3173_v16  ;;  %v3052_v15 = vmax.f32 %v3050_v11, %v3051_v23 }
 0x883   :  { %v3135_v16 = vrot.slane %v3134_v43, 1 }
 0x884   :  { %v3216_v24 = vmax.f32 %v3214_v51, %v3215_v19  ;;  %v3175_v4 = vrot.slane %v3174_v56, 2  ;;  %v3259_v51 = vrot.slane %v3258_v62, 2  ;;  %v3347_v7 = vsel %vm1617_vm2, %v3052_v15, %v3346_v9  ;;  %v9727_v9 = vld [vmem:[#allocation80_spill] sm:$0xff] }
 0x885   :  { %6415 = vmatpush1.bf16.msra.mxu1 %v9588_v36  ;;  %v3136_v33 = vmax.f32 %v3134_v43, %v3135_v16  ;;  %v3348_v11 = vsel %vm1619_vm3, %v3094_v6, %v3347_v7  ;;  %v9724_v43 = vld [vmem:[#allocation148_spill] sm:$0xff]  ;;  %v9728_v16 = vld [vmem:[#allocation81_spill] sm:$0xff]  ;;  %v9729_v6 = vld [vmem:[#allocation82_spill] sm:$0xff] }
 0x886   :  { %6417 = vmatprep.subr.bf16.mxu1 %v9589_v1  ;;  %v3217_v30 = vrot.slane %v3216_v24, 2  ;;  %v3176_v3 = vmax.f32 %v3174_v56, %v3175_v4  ;;  %v3260_v61 = vmax.f32 %v3258_v62, %v3259_v51  ;;  %v9721_v56 = vld [vmem:[#allocation145_spill] sm:$0xff] }
 0x887   :  { %v3349_v23 = vsel %vm1621_vm4, %v3136_v33, %v3348_v11  ;;  %v9725_v62 = vld [vmem:[#allocation149_spill] sm:$0xff]  ;;  %v9734_v33 = vld [vmem:[#allocation91_spill] sm:$0xff] }
 0x888   :  { %v3218_v12 = vmax.f32 %v3216_v24, %v3217_v30  ;;  %v3177_v19 = vrot.slane %v3176_v3, 1  ;;  %v3261_v22 = vrot.slane %v3260_v61, 1  ;;  %v9726_v30 = vld [vmem:[#allocation150_spill] sm:$0xff]  ;;  %v9730_v51 = vld [vmem:[#allocation85_spill] sm:$0xff] }
 0x889   :  { %6419 = vmatpush1.bf16.msra.mxu1 %v9704_v44  ;;  %v9732_v7 = vld [vmem:[#allocation89_spill] sm:$0xff] }
 0x88a   :  { %6421 = vmatprep.subr.bf16.mxu1 %v9705_v63  ;;  %v3219_v35 = vrot.slane %v3218_v12, 1  ;;  %v3178_v27 = vmax.f32 %v3176_v3, %v3177_v19  ;;  %v3262_v42 = vmax.f32 %v3260_v61, %v3261_v22  ;;  %v9733_v19 = vld [vmem:[#allocation90_spill] sm:$0xff]  ;;  %v9735_v61 = vld [vmem:[#allocation92_spill] sm:$0xff]  ;;  %v9736_v11 = vld [vmem:[#allocation93_spill] sm:$0xff] }
 0x88c   :  { %v3220_v24 = vmax.f32 %v3218_v12, %v3219_v35  ;;  %v3350_v4 = vsel %vm1623_vm5, %v3178_v27, %v3349_v23  ;;  %v9731_v12 = vld [vmem:[#allocation87_spill] sm:$0xff]  ;;  %v9737_v35 = vld [vmem:[#allocation94_spill] sm:$0xff] }
 0x88d   :  { %6423 = vmatpush1.bf16.msra.mxu1 %v9706_v50 }
 0x88e   :  { %6425 = vmatprep.subr.bf16.mxu1 %v9707_v5  ;;  %v3351_v15 = vsel %vm1625_vm6, %v3220_v24, %v3350_v4  ;;  %v9738_v24 = vld [vmem:[#allocation95_spill] sm:$0xff]  ;;  %v9739_v4 = vld [vmem:[#allocation96_spill] sm:$0xff] }
 0x88f   :  { %v3352_v3 = vsel %vm1627_vm7, %v3262_v42, %v3351_v15  ;;  %v7198_v42 = vld [vmem:[%s9067_s14] ss:$0 sm:$0xff] }
 0x891   :  { %6427 = vmatpush1.bf16.msra.mxu1 %v9708_v60 }
 0x892   :  { %6429 = vmatprep.subr.bf16.mxu1 %v9709_v38 }
 0x895   :  { %6431 = vmatpush1.bf16.msra.mxu1 %v9710_v47 }
 0x896   :  { %6433 = vmatprep.subr.bf16.mxu1 %v9711_v13  ;;  %v9799_v13 = vld [vmem:[#allocation44_spill] sm:$0xff] }
 0x899   :  { %6435 = vmatpush1.bf16.msra.mxu1 %v9712_v28 }
 0x89a   :  { %6437 = vmatprep.subr.bf16.mxu1 %v9713_v40 }
 0x89d   :  { %6439 = vmatpush1.bf16.msra.mxu1 %v9714_v10 }
 0x89e   :  { %6441 = vmatprep.subr.bf16.mxu1 %v9715_v54 }
 0x8a1   :  { %6443 = vmatpush1.bf16.msra.mxu1 %v9716_v8 }
 0x8a2   :  { %6445 = vmatprep.subr.bf16.mxu1 %v9717_v32 }
 0x8a5   :  { %6447 = vmatpush1.bf16.msra.mxu1 %v9604_v53 }
 0x8a6   :  { %6449 = vmatprep.subr.bf16.mxu1 %v9718_v52 }
 0x8a9   :  { %6451 = vmatpush1.bf16.msra.mxu1 %v8114_v45 }
 0x8aa   :  { %6453 = vmatprep.subr.bf16.mxu1 %v8117_v39 }
 0x8ad   :  { %6455 = vmatpush1.bf16.msra.mxu1 %v8120_v20 }
 0x8ae   :  { %6457 = vmatprep.subr.bf16.mxu1 %v9719_v55 }
 0x8b1   :  { %6459 = vmatpush1.bf16.msra.mxu1 %v9720_v49 }
 0x8b2   :  { %6461 = vmatprep.subr.bf16.mxu1 %v9721_v56 }
 0x8b5   :  { %6463 = vmatpush1.bf16.msra.mxu1 %v9722_v59 }
 0x8b6   :  { %6465 = vmatprep.subr.bf16.mxu1 %v9723_v46 }
 0x8b9   :  { %6467 = vmatpush1.bf16.msra.mxu1 %v9724_v43 }
 0x8ba   :  { %6469 = vmatprep.subr.bf16.mxu1 %v9725_v62 }
 0x8bd   :  { %6471 = vmatpush1.bf16.msra.mxu1 %v9726_v30  ;;  %v3762_v30 = vld [vmem:[#allocation2 + $0x278] sm:$0xf0] }
 0x8be   :  { %6761 = vmatprep.subr.bf16.mxu1 %v9727_v9  ;;  %v9741_v9 = vld [vmem:[#allocation99_spill] sm:$0xff] }
 0x8c0   :  { %3573 = vmatmul.mubr.f32.vlgmr.msra.gmra.mrb[8].mxu1 %v3352_v3  ;;  %v9740_v3 = vld [vmem:[#allocation98_spill] sm:$0xff] }
 0x8c1   :  { %6763 = vmatpush1.bf16.msra.mxu1 %v9728_v16  ;;  %v9742_v16 = vld [vmem:[#allocation102_spill] sm:$0xff] }
 0x8c2   :  { %6765 = vmatprep.subr.bf16.mxu1 %v9729_v6  ;;  %v9743_v6 = vld [vmem:[#allocation103_spill] sm:$0xff] }
 0x8c5   :  { %6767 = vmatpush1.bf16.msra.mxu1 %v9730_v51  ;;  %v9744_v51 = vld [vmem:[#allocation105_spill] sm:$0xff] }
 0x8c6   :  { %6769 = vmatprep.subr.bf16.mxu1 %v9731_v12  ;;  %v9745_v12 = vld [vmem:[#allocation107_spill] sm:$0xff] }
 0x8c9   :  { %6771 = vmatpush1.bf16.msra.mxu1 %v9732_v7  ;;  %v9746_v7 = vld [vmem:[#allocation110_spill] sm:$0xff] }
 0x8ca   :  { %6773 = vmatprep.subr.bf16.mxu1 %v9733_v19  ;;  %v9747_v19 = vld [vmem:[#allocation111_spill] sm:$0xff] }
 0x8cd   :  { %6775 = vmatpush1.bf16.msra.mxu1 %v9734_v33  ;;  %v9748_v33 = vld [vmem:[#allocation114_spill] sm:$0xff] }
 0x8ce   :  { %6777 = vmatprep.subr.bf16.mxu1 %v9735_v61  ;;  %v9749_v61 = vld [vmem:[#allocation115_spill] sm:$0xff] }
 0x8d1   :  { %6779 = vmatpush1.bf16.msra.mxu1 %v9736_v11  ;;  %v9750_v11 = vld [vmem:[#allocation118_spill] sm:$0xff] }
 0x8d2   :  { %6781 = vmatprep.subr.bf16.mxu1 %v9737_v35  ;;  %v9751_v35 = vld [vmem:[#allocation119_spill] sm:$0xff] }
 0x8d3   :  { %v5276_v27 = vpop.f32.mrb[6].mxu1 }
 0x8d4   :  { %v5277_v23 = vpop.f32.mrb[7].mxu1 }
 0x8d5   :  { %v5278_v22 = vadd.f32 %v5277_v23, %v5276_v27  ;;  %6783 = vmatpush1.bf16.msra.mxu1 %v9738_v24  ;;  %v9752_v27 = vld [vmem:[#allocation122_spill] sm:$0xff]  ;;  %v9753_v23 = vld [vmem:[#allocation123_spill] sm:$0xff] }
 0x8d6   :  { %6785 = vmatprep.subr.bf16.mxu1 %v9739_v4  ;;  %v9755_v24 = vld [vmem:[#allocation127_spill] sm:$0xff] }
 0x8d7   :  { %v2882_v15 = vadd.f32 %v7198_v42, %v5278_v22  ;;  %v9754_v22 = vld [vmem:[#allocation126_spill] sm:$0xff]  ;;  %v9756_v4 = vld [vmem:[#allocation151_spill] sm:$0xff]  ;;  %v9757_v42 = vld [vmem:[#allocation152_spill] sm:$0xff] }
 0x8d9   :  { %2885 = vst [vmem:[#allocation17 + $0x8] sm:$0xff] %v2882_v15  ;;  %6787 = vmatpush1.bf16.msra.mxu1 %v9740_v3  ;;  %v9758_v15 = vld [vmem:[#allocation153_spill] sm:$0xff]  ;;  %v9759_v3 = vld [vmem:[#allocation154_spill] sm:$0xff] }
 0x8da   :  { %6789 = vmatprep.subr.bf16.mxu1 %v9741_v9 }
 0x8dd   :  { %6791 = vmatpush1.bf16.msra.mxu1 %v9742_v16  ;;  %v9760_v16 = vld [vmem:[#allocation155_spill] sm:$0xff] }
 0x8de   :  { %6793 = vmatprep.subr.bf16.mxu1 %v9743_v6 }
 0x8e1   :  { %6795 = vmatpush1.bf16.msra.mxu1 %v9744_v51 }
 0x8e2   :  { %6797 = vmatprep.subr.bf16.mxu1 %v9745_v12  ;;  %v9761_v12 = vld [vmem:[#allocation156_spill] sm:$0xff] }
 0x8e5   :  { %6799 = vmatpush1.bf16.msra.mxu1 %v9746_v7 }
 0x8e6   :  { %6801 = vmatprep.subr.bf16.mxu1 %v9747_v19 }
 0x8e9   :  { %6803 = vmatpush1.bf16.msra.mxu1 %v9748_v33 }
 0x8ea   :  { %6805 = vmatprep.subr.bf16.mxu1 %v9749_v61  ;;  %v9762_v61 = vld [vmem:[#allocation157_spill] sm:$0xff] }
 0x8ed   :  { %6807 = vmatpush1.bf16.msra.mxu1 %v9750_v11  ;;  %v9763_v11 = vld [vmem:[#allocation158_spill] sm:$0xff] }
 0x8ee   :  { %6809 = vmatprep.subr.bf16.mxu1 %v9751_v35  ;;  %v9764_v35 = vld [vmem:[#allocation159_spill] sm:$0xff] }
 0x8f1   :  { %6811 = vmatpush1.bf16.msra.mxu1 %v9752_v27  ;;  %v9765_v27 = vld [vmem:[#allocation160_spill] sm:$0xff] }
 0x8f2   :  { %6813 = vmatprep.subr.bf16.mxu1 %v9753_v23  ;;  %v9766_v23 = vld [vmem:[#allocation161_spill] sm:$0xff] }
 0x8f5   :  { %6815 = vmatpush1.bf16.msra.mxu1 %v9754_v22  ;;  %v9767_v22 = vld [vmem:[#allocation162_spill] sm:$0xff] }
 0x8f6   :  { %6817 = vmatprep.subr.bf16.mxu1 %v9755_v24  ;;  %v9768_v24 = vld [vmem:[#allocation163_spill] sm:$0xff] }
 0x8f9   :  { %6819 = vmatpush1.bf16.msra.mxu1 %v9756_v4  ;;  %v9769_v4 = vld [vmem:[#allocation164_spill] sm:$0xff] }
 0x8fa   :  { %6821 = vmatprep.subr.bf16.mxu1 %v9757_v42  ;;  %v9770_v42 = vld [vmem:[#allocation165_spill] sm:$0xff] }
 0x8fd   :  { %6823 = vmatpush1.bf16.msra.mxu1 %v9758_v15  ;;  %v9771_v15 = vld [vmem:[#allocation166_spill] sm:$0xff] }
 0x8fe   :  { %6825 = vmatprep.subr.bf16.mxu1 %v9759_v3 }
 0x993   :  { %v3574_v9 = vpop.f32.mrb[8].mxu1 }
 0x994   :  { %v7150_v6 = vadd.f32 %v3574_v9, %v9760_v16  ;;  %v3576_v51 = vpop.f32.mrb[9].mxu1  ;;  %v9772_v9 = vld [vmem:[#allocation167_spill] sm:$0xff]  ;;  %v3732_v16 = vld [vmem:[#allocation2 + $0x98] sm:$0xf0] }
 0x995   :  { %v7151_v7 = vadd.f32 %v3576_v51, %v9761_v12  ;;  %v9774_v51 = vld [vmem:[#allocation169_spill] sm:$0xff]  ;;  %v3726_v12 = vld [vmem:[#allocation2 + $0x38] sm:$0xf0] }
 0x996   :  { %v3579_v33 = vmax.f32 %v7150_v6, 0.0  ;;  %v9773_v6 = vld [vmem:[#allocation168_spill] sm:$0xff] }
 0x997   :  { %v3580_v19 = vmax.f32 %v7151_v7, 0.0  ;;  %v9775_v7 = vld [vmem:[#allocation170_spill] sm:$0xff] }
 0x999   :  { %3645 = vmatprep.mubr.f32.mxu0 %v3580_v19  ;;  %v9776_v19 = vld [vmem:[#allocation171_spill] sm:$0xff] }
 0x99a   :  { %3646 = vmatmul.mubr.f32.vlgmr.msra.gmra.mrb[10].mxu0 %v3579_v33  ;;  %v9777_v33 = vld [vmem:[#allocation26_spill] sm:$0xff] }
 0x99b   :  { %6539 = vmatpush3.bf16.msra.mxu0 %v9762_v61 }
 0x99c   :  { %6541 = vmatprep.subr.bf16.mxu0 %v9763_v11 }
 0x99f   :  { %6543 = vmatpush3.bf16.msra.mxu0 %v9764_v35  ;;  %v3756_v35 = vld [vmem:[#allocation2 + $0x218] sm:$0xf0] }
 0x9a0   :  { %6545 = vmatprep.subr.bf16.mxu0 %v9765_v27  ;;  %v3990_v62 = vsel %vm2094_vm8, %v3756_v35, -inf }
 0x9a1   :  { %v3991_v49 = vrot.slane %v3990_v62, 4 }
 0x9a3   :  { %6547 = vmatpush3.bf16.msra.mxu0 %v9766_v23  ;;  %v3750_v23 = vld [vmem:[#allocation2 + $0x1b8] sm:$0xf0]  ;;  %v3992_v55 = vmax.f32 %v3990_v62, %v3991_v49 }
 0x9a4   :  { %6549 = vmatprep.subr.bf16.mxu0 %v9767_v22  ;;  %v3948_v11 = vsel %vm2094_vm8, %v3750_v23, -inf }
 0x9a7   :  { %6551 = vmatpush3.bf16.msra.mxu0 %v9768_v24  ;;  %v3738_v24 = vld [vmem:[#allocation2 + $0xf8] sm:$0xf0] }
 0x9a8   :  { %6553 = vmatprep.subr.bf16.mxu0 %v9769_v4  ;;  %v3780_v4 = vsel %vm2094_vm8, %v3726_v12, -inf }
 0x9a9   :  { %v3781_v22 = vrot.slane %v3780_v4, 4 }
 0x9ab   :  { %6555 = vmatpush3.bf16.msra.mxu0 %v9770_v42  ;;  %v3822_v42 = vsel %vm2094_vm8, %v3732_v16, -inf  ;;  %v3782_v27 = vmax.f32 %v3780_v4, %v3781_v22  ;;  %v3949_v16 = vrot.slane %v3948_v11, 4  ;;  %v4032_v22 = vsel %vm2094_vm8, %v3762_v30, -inf }
 0x9ac   :  { %6557 = vmatprep.subr.bf16.mxu0 %v9771_v15  ;;  %v3744_v15 = vld [vmem:[#allocation2 + $0x158] sm:$0xf0] }
 0x9ad   :  { %v3783_v3 = vrot.slane %v3782_v27, 2  ;;  %v3950_v4 = vmax.f32 %v3948_v11, %v3949_v16 }
 0x9af   :  { %6559 = vmatpush3.bf16.msra.mxu0 %v9772_v9  ;;  %v3823_v9 = vrot.slane %v3822_v42, 4  ;;  %v3784_v59 = vmax.f32 %v3782_v27, %v3783_v3  ;;  %v3951_v20 = vrot.slane %v3950_v4, 2  ;;  %v3993_v27 = vrot.slane %v3992_v55, 2 }
 0x9b0   :  { %6561 = vmatprep.subr.bf16.mxu0 %v9773_v6  ;;  %v3864_v6 = vsel %vm2094_vm8, %v3738_v24, -inf  ;;  %v3768_v24 = vld [vmem:[#allocation2 + $0x2d8] sm:$0xf0] }
 0x9b1   :  { %v4074_v23 = vsel %vm2094_vm8, %v3768_v24, -inf }
 0x9b2   :  { %v4075_v35 = vrot.slane %v4074_v23, 4 }
 0x9b3   :  { %6563 = vmatpush3.bf16.msra.mxu0 %v9774_v51  ;;  %v3865_v51 = vrot.slane %v3864_v6, 4 }
 0x9b4   :  { %6565 = vmatprep.subr.bf16.mxu0 %v9775_v7  ;;  %v3906_v7 = vsel %vm2094_vm8, %v3744_v15, -inf  ;;  %v4076_v30 = vmax.f32 %v4074_v23, %v4075_v35  ;;  %v9778_v23 = vld [vmem:[#allocation172_spill] sm:$0xff]  ;;  %v9780_v35 = vld [vmem:[#allocation173_spill] sm:$0xff] }
 0x9b5   :  { %v3866_v61 = vmax.f32 %v3864_v6, %v3865_v51  ;;  %v3785_v6 = vrot.slane %v3784_v59, 1 }
 0x9b6   :  { %v4077_v53 = vrot.slane %v4076_v30, 2 }
 0x9b7   :  { %6567 = vmatpush3.bf16.msra.mxu0 %v9776_v19  ;;  %v3824_v19 = vmax.f32 %v3822_v42, %v3823_v9  ;;  %v3867_v46 = vrot.slane %v3866_v61, 2  ;;  %v4033_v9 = vrot.slane %v4032_v22, 4  ;;  %v3786_v45 = vmax.f32 %v3784_v59, %v3785_v6 }
 0x9b8   :  { %6569 = vmatprep.subr.bf16.mxu0 %v9777_v33  ;;  %v3907_v33 = vrot.slane %v3906_v7, 4 }
 0x9b9   :  { %v3825_v12 = vrot.slane %v3824_v19, 2  ;;  %v3868_v15 = vmax.f32 %v3866_v61, %v3867_v46  ;;  %v3994_v46 = vmax.f32 %v3992_v55, %v3993_v27  ;;  %v9782_v27 = vld [vmem:[#allocation27_spill] sm:$0xff] }
 0x9ba   :  { %v3908_v43 = vmax.f32 %v3906_v7, %v3907_v33  ;;  %v4034_v33 = vmax.f32 %v4032_v22, %v4033_v9  ;;  %v4078_v22 = vmax.f32 %v4076_v30, %v4077_v53  ;;  %v9785_v30 = vld [vmem:[#allocation30_spill] sm:$0xff] }
 0x9bb   :  { %v3826_v56 = vmax.f32 %v3824_v19, %v3825_v12  ;;  %v3869_v7 = vrot.slane %v3868_v15, 1  ;;  %v3952_v19 = vmax.f32 %v3950_v4, %v3951_v20  ;;  %v3995_v62 = vrot.slane %v3994_v46, 1 }
 0x9bc   :  { %v3909_v42 = vrot.slane %v3908_v43, 2  ;;  %v4035_v16 = vrot.slane %v4034_v33, 2 }
 0x9bd   :  { %v3827_v51 = vrot.slane %v3826_v56, 1  ;;  %v3870_v11 = vmax.f32 %v3868_v15, %v3869_v7  ;;  %v3953_v24 = vrot.slane %v3952_v19, 1  ;;  %v3996_v20 = vmax.f32 %v3994_v46, %v3995_v62  ;;  %v3725_v46 = vld [vmem:[#allocation2 + $0x30] sm:$0xf0]  ;;  %v3728_v62 = vld [vmem:[#allocation2 + $0x48] sm:$0xf0] }
 0x9be   :  { %v3910_v39 = vmax.f32 %v3908_v43, %v3909_v42  ;;  %v4036_v49 = vmax.f32 %v4034_v33, %v4035_v16  ;;  %v4079_v15 = vrot.slane %v4078_v22, 1  ;;  %v9787_v16 = vld [vmem:[#allocation32_spill] sm:$0xff] }
 0x9bf   :  { %v3828_v3 = vmax.f32 %v3826_v56, %v3827_v51  ;;  %v3954_v42 = vmax.f32 %v3952_v19, %v3953_v24  ;;  %v9783_v19 = vld [vmem:[#allocation28_spill] sm:$0xff]  ;;  %v3731_v24 = vld [vmem:[#allocation2 + $0x90] sm:$0xf0] }
 0x9c0   :  { %v3911_v12 = vrot.slane %v3910_v39, 1  ;;  %v4037_v59 = vrot.slane %v4036_v49, 1  ;;  %v4080_v51 = vmax.f32 %v4078_v22, %v4079_v15  ;;  %v3737_v22 = vld [vmem:[#allocation2 + $0xf0] sm:$0xf0]  ;;  %v3794_v15 = vsel %vm2094_vm8, %v3728_v62, -inf }
 0x9c1   :  { %v4164_v61 = vsel %vm1615_vm1, %v3828_v3, %v3786_v45  ;;  %v3752_v62 = vld [vmem:[#allocation2 + $0x1c8] sm:$0xf0] }
 0x9c2   :  { %v3912_v52 = vmax.f32 %v3910_v39, %v3911_v12  ;;  %v4165_v43 = vsel %vm1617_vm2, %v3870_v11, %v4164_v61  ;;  %v4038_v9 = vmax.f32 %v4036_v49, %v4037_v59  ;;  %v9784_v12 = vld [vmem:[#allocation29_spill] sm:$0xff]  ;;  %v9786_v11 = vld [vmem:[#allocation31_spill] sm:$0xff]  ;;  %v3773_v49 = vsel %vm2094_vm8, %v3725_v46, -inf }
 0x9c3   :  { %v9788_v61 = vld [vmem:[#allocation33_spill] sm:$0xff]  ;;  %v3815_v59 = vsel %vm2094_vm8, %v3731_v24, -inf  ;;  %v3755_v24 = vld [vmem:[#allocation2 + $0x210] sm:$0xf0] }
 0x9c4   :  { %v4166_v56 = vsel %vm1619_vm3, %v3912_v52, %v4165_v43  ;;  %v9789_v43 = vld [vmem:[#allocation34_spill] sm:$0xff] }
 0x9c5   :  { %v4167_v4 = vsel %vm1621_vm4, %v3954_v42, %v4166_v56  ;;  %v3734_v42 = vld [vmem:[#allocation2 + $0xa8] sm:$0xf0]  ;;  %v3774_v56 = vrot.slane %v3773_v49, 4 }
 0x9c6   :  { %v4168_v55 = vsel %vm1623_vm5, %v3996_v20, %v4167_v4  ;;  %v9790_v20 = vld [vmem:[#allocation35_spill] sm:$0xff]  ;;  %v3740_v4 = vld [vmem:[#allocation2 + $0x108] sm:$0xf0] }
 0x9c7   :  { %v4169_v53 = vsel %vm1625_vm6, %v4038_v9, %v4168_v55  ;;  %v3836_v9 = vsel %vm2094_vm8, %v3734_v42, -inf  ;;  %v9791_v55 = vld [vmem:[#allocation36_spill] sm:$0xff] }
 0x9c8   :  { %v4170_v3 = vsel %vm1627_vm7, %v4080_v51, %v4169_v53  ;;  %v3857_v51 = vsel %vm2094_vm8, %v3737_v22, -inf  ;;  %v3775_v53 = vmax.f32 %v3773_v49, %v3774_v56 }
 0x9c9   :  { %v3858_v46 = vrot.slane %v3857_v51, 4 }
 0x9ca   :  { %v3776_v49 = vrot.slane %v3775_v53, 2 }
 0xa6d   :  { %v3647_v45 = vpop.f32.mrb[10].mxu0 }
 0xa6e   :  { %v8782_v39 = vadd.f32 %v3647_v45, %v9778_v23  ;;  %v3649_v6 = vpop.f32.mrb[11].mxu0  ;;  %v3743_v45 = vld [vmem:[#allocation2 + $0x150] sm:$0xf0]  ;;  %v3777_v23 = vmax.f32 %v3775_v53, %v3776_v49 }
 0xa6f   :  { %v8785_v7 = vadd.f32 %v3649_v6, %v9780_v35  ;;  %v3816_v6 = vrot.slane %v3815_v59, 4  ;;  %v3761_v35 = vld [vmem:[#allocation2 + $0x270] sm:$0xf0] }
 0xa70   :  { %9779 = vst [vmem:[#allocation84_spill] sm:$0xff] %v8782_v39  ;;  %v9364_v33 = vmax.f32 %v8782_v39, 0.0  ;;  %v3778_v40 = vrot.slane %v3777_v23, 1 }
 0xa71   :  { %9781 = vst [vmem:[#allocation86_spill] sm:$0xff] %v8785_v7  ;;  %v9365_v52 = vmax.f32 %v8785_v7, 0.0 }
 0xa73   :  { %3718 = vmatprep.mubr.f32.mxu0 %v9365_v52  ;;  %v3983_v52 = vsel %vm2094_vm8, %v3755_v24, -inf }
 0xa74   :  { %3719 = vmatmul.mubr.f32.vlgmr.msra.gmra.mrb[12].mxu0 %v9364_v33  ;;  %v9795_v33 = vld [vmem:[#allocation40_spill] sm:$0xff] }
 0xa75   :  { %6571 = vmatpush1.bf16.msra.mxu0 %v9782_v27  ;;  %4269 = vmatprep.mubr.f32.mxu0 %v4170_v3  ;;  %v3746_v3 = vld [vmem:[#allocation2 + $0x168] sm:$0xf0]  ;;  %v3795_v27 = vrot.slane %v3794_v15, 4 }
 0xa76   :  { %6573 = vmatprep.subr.bf16.mxu0 %v9783_v19  ;;  %v3837_v19 = vrot.slane %v3836_v9, 4  ;;  %v3920_v22 = vsel %vm2094_vm8, %v3746_v3, -inf }
 0xa77   :  { %v3921_v39 = vrot.slane %v3920_v22, 4 }
 0xa79   :  { %6575 = vmatpush1.bf16.msra.mxu0 %v9784_v12  ;;  %v3878_v12 = vsel %vm2094_vm8, %v3740_v4, -inf  ;;  %v9794_v4 = vld [vmem:[#allocation39_spill] sm:$0xff]  ;;  %v3922_v32 = vmax.f32 %v3920_v22, %v3921_v39 }
 0xa7a   :  { %6577 = vmatprep.subr.bf16.mxu0 %v9785_v30  ;;  %v9792_v30 = vld [vmem:[#allocation37_spill] sm:$0xff]  ;;  %v3879_v42 = vrot.slane %v3878_v12, 4 }
 0xa7c   :  { %v3880_v3 = vmax.f32 %v3878_v12, %v3879_v42  ;;  %v4025_v12 = vsel %vm2094_vm8, %v3761_v35, -inf  ;;  %v3770_v42 = vld [vmem:[#allocation2 + $0x2e8] sm:$0xf0]  ;;  %v3923_v35 = vrot.slane %v3922_v32, 2 }
 0xa7d   :  { %6579 = vmatpush1.bf16.msra.mxu0 %v9786_v11  ;;  %v3749_v11 = vld [vmem:[#allocation2 + $0x1b0] sm:$0xf0] }
 0xa7e   :  { %6581 = vmatprep.subr.bf16.mxu0 %v9787_v16  ;;  %v9793_v16 = vld [vmem:[#allocation38_spill] sm:$0xff]  ;;  %v3941_v56 = vsel %vm2094_vm8, %v3749_v11, -inf  ;;  %v3881_v53 = vrot.slane %v3880_v3, 2 }
 0xa7f   :  { %v3942_v7 = vrot.slane %v3941_v56, 4 }
 0xa81   :  { %6583 = vmatpush1.bf16.msra.mxu0 %v9788_v61  ;;  %v3899_v61 = vsel %vm2094_vm8, %v3743_v45, -inf  ;;  %v3758_v45 = vld [vmem:[#allocation2 + $0x228] sm:$0xf0]  ;;  %v3943_v54 = vmax.f32 %v3941_v56, %v3942_v7  ;;  %v3882_v56 = vmax.f32 %v3880_v3, %v3881_v53 }
 0xa82   :  { %6585 = vmatprep.subr.bf16.mxu0 %v9789_v43  ;;  %v3817_v43 = vmax.f32 %v3815_v59, %v3816_v6  ;;  %v3962_v59 = vsel %vm2094_vm8, %v3752_v62, -inf  ;;  %v3767_v62 = vld [vmem:[#allocation2 + $0x2d0] sm:$0xf0] }
 0xa83   :  { %v4067_v7 = vsel %vm2094_vm8, %v3767_v62, -inf  ;;  %v3924_v62 = vmax.f32 %v3922_v32, %v3923_v35  ;;  %v3883_v38 = vrot.slane %v3882_v56, 1 }
 0xa84   :  { %v3818_v6 = vrot.slane %v3817_v43, 2 }
 0xa85   :  { %6587 = vmatpush1.bf16.msra.mxu0 %v9790_v20  ;;  %v3796_v20 = vmax.f32 %v3794_v15, %v3795_v27  ;;  %v3884_v35 = vmax.f32 %v3882_v56, %v3883_v38 }
 0xa86   :  { %6589 = vmatprep.subr.bf16.mxu0 %v9791_v55  ;;  %v3838_v55 = vmax.f32 %v3836_v9, %v3837_v19  ;;  %v9796_v9 = vld [vmem:[#allocation41_spill] sm:$0xff]  ;;  %v3984_v19 = vrot.slane %v3983_v52, 4  ;;  %v3819_v8 = vmax.f32 %v3817_v43, %v3818_v6  ;;  %v4026_v43 = vrot.slane %v4025_v12, 4 }
 0xa87   :  { %v3797_v11 = vrot.slane %v3796_v20, 2  ;;  %v3944_v6 = vrot.slane %v3943_v54, 2 }
 0xa88   :  { %v3839_v15 = vrot.slane %v3838_v55, 2  ;;  %v3985_v28 = vmax.f32 %v3983_v52, %v3984_v19  ;;  %v3820_v22 = vrot.slane %v3819_v8, 1  ;;  %v3779_v52 = vmax.f32 %v3777_v23, %v3778_v40 }
 0xa89   :  { %6591 = vmatpush1.bf16.msra.mxu0 %v9792_v30  ;;  %v3900_v30 = vrot.slane %v3899_v61, 4  ;;  %v3798_v49 = vmax.f32 %v3796_v20, %v3797_v11  ;;  %v4068_v19 = vrot.slane %v4067_v7, 4  ;;  %v3945_v60 = vmax.f32 %v3943_v54, %v3944_v6  ;;  %v9805_v6 = vld [vmem:[#allocation50_spill] sm:$0xff] }
 0xa8a   :  { %6593 = vmatprep.subr.bf16.mxu0 %v9793_v16  ;;  %v3859_v16 = vmax.f32 %v3857_v51, %v3858_v46  ;;  %v4004_v51 = vsel %vm2094_vm8, %v3758_v45, -inf  ;;  %v9797_v46 = vld [vmem:[#allocation42_spill] sm:$0xff]  ;;  %v3840_v10 = vmax.f32 %v3838_v55, %v3839_v15  ;;  %v4088_v55 = vsel %vm2094_vm8, %v3770_v42, -inf }
 0xa8b   :  { %v3901_v27 = vmax.f32 %v3899_v61, %v3900_v30  ;;  %v9798_v30 = vld [vmem:[#allocation43_spill] sm:$0xff]  ;;  %v3799_v11 = vrot.slane %v3798_v49, 1  ;;  %v4089_v47 = vrot.slane %v4088_v55, 4  ;;  %v3821_v3 = vmax.f32 %v3819_v8, %v3820_v22  ;;  %v9804_v22 = vld [vmem:[#allocation49_spill] sm:$0xff] }
 0xa8c   :  { %v3860_v24 = vrot.slane %v3859_v16, 2  ;;  %v3841_v15 = vrot.slane %v3840_v10, 1  ;;  %v3986_v53 = vrot.slane %v3985_v28, 2  ;;  %v4069_v23 = vmax.f32 %v4067_v7, %v4068_v19  ;;  %v9807_v19 = vld [vmem:[#allocation52_spill] sm:$0xff] }
 0xa8d   :  { %6595 = vmatpush1.bf16.msra.mxu0 %v9794_v4  ;;  %v3764_v4 = vld [vmem:[#allocation2 + $0x288] sm:$0xf0]  ;;  %v3902_v45 = vrot.slane %v3901_v27, 2  ;;  %v3800_v5 = vmax.f32 %v3798_v49, %v3799_v11  ;;  %v4090_v32 = vmax.f32 %v4088_v55, %v4089_v47  ;;  %v4157_v8 = vsel %vm1615_vm1, %v3821_v3, %v3779_v52  ;;  %v9806_v52 = vld [vmem:[#allocation51_spill] sm:$0xff] }
 0xa8e   :  { %6597 = vmatprep.subr.bf16.mxu0 %v9795_v33  ;;  %v3963_v33 = vrot.slane %v3962_v59, 4  ;;  %v4046_v61 = vsel %vm2094_vm8, %v3764_v4, -inf  ;;  %v3861_v39 = vmax.f32 %v3859_v16, %v3860_v24  ;;  %v9801_v16 = vld [vmem:[#allocation46_spill] sm:$0xff]  ;;  %v4027_v24 = vmax.f32 %v4025_v12, %v4026_v43 }
 0xa8f   :  { %v4047_v20 = vrot.slane %v4046_v61, 4  ;;  %v3842_v50 = vmax.f32 %v3840_v10, %v3841_v15  ;;  %v3925_v12 = vrot.slane %v3924_v62, 1  ;;  %v3987_v43 = vmax.f32 %v3985_v28, %v3986_v53 }
 0xa90   :  { %v3946_v54 = vrot.slane %v3945_v60, 1  ;;  %v4070_v7 = vrot.slane %v4069_v23, 2  ;;  %v4091_v28 = vrot.slane %v4090_v32, 2 }
 0xa91   :  { %6599 = vmatpush1.bf16.msra.mxu0 %v9796_v9  ;;  %v4005_v9 = vrot.slane %v4004_v51, 4  ;;  %v4048_v42 = vmax.f32 %v4046_v61, %v4047_v20  ;;  %v4178_v10 = vsel %vm1615_vm1, %v3842_v50, %v3800_v5  ;;  %v3926_v47 = vmax.f32 %v3924_v62, %v3925_v12  ;;  %v9810_v12 = vld [vmem:[#allocation55_spill] sm:$0xff] }
 0xa92   :  { %6601 = vmatprep.subr.bf16.mxu0 %v9797_v46  ;;  %v3964_v46 = vmax.f32 %v3962_v59, %v3963_v33  ;;  %v3903_v59 = vmax.f32 %v3901_v27, %v3902_v45  ;;  %v3862_v33 = vrot.slane %v3861_v39, 1  ;;  %v9803_v45 = vld [vmem:[#allocation48_spill] sm:$0xff]  ;;  %v3988_v55 = vrot.slane %v3987_v43, 1 }
 0xa93   :  { %v4006_v4 = vmax.f32 %v4004_v51, %v4005_v9  ;;  %v9802_v9 = vld [vmem:[#allocation47_spill] sm:$0xff]  ;;  %v4049_v61 = vrot.slane %v4048_v42, 2  ;;  %v4179_v38 = vsel %vm1617_vm2, %v3884_v35, %v4178_v10  ;;  %v3947_v56 = vmax.f32 %v3945_v60, %v3946_v54  ;;  %v9812_v54 = vld [vmem:[#allocation57_spill] sm:$0xff]  ;;  %v9813_v10 = vld [vmem:[#allocation58_spill] sm:$0xff] }
 0xa94   :  { %v3904_v40 = vrot.slane %v3903_v59, 1  ;;  %v4071_v50 = vmax.f32 %v4069_v23, %v4070_v7  ;;  %v3989_v62 = vmax.f32 %v3987_v43, %v3988_v55  ;;  %v9811_v43 = vld [vmem:[#allocation56_spill] sm:$0xff]  ;;  %v3733_v55 = vld [vmem:[#allocation2 + $0xa0] sm:$0xf0] }
 0xa95   :  { %6603 = vmatpush1.bf16.msra.mxu0 %v9798_v30  ;;  %v9800_v30 = vld [vmem:[#allocation45_spill] sm:$0xff]  ;;  %v4007_v51 = vrot.slane %v4006_v4, 2  ;;  %v4050_v15 = vmax.f32 %v4048_v42, %v4049_v61  ;;  %v9815_v7 = vld [vmem:[#allocation60_spill] sm:$0xff] }
 0xa96   :  { %6605 = vmatprep.subr.bf16.mxu0 %v9799_v13  ;;  %v3965_v13 = vrot.slane %v3964_v46, 2  ;;  %v3905_v20 = vmax.f32 %v3903_v59, %v3904_v40  ;;  %v4072_v60 = vrot.slane %v4071_v50, 1  ;;  %v9809_v40 = vld [vmem:[#allocation54_spill] sm:$0xff] }
 0xa97   :  { %v4008_v49 = vmax.f32 %v4006_v4, %v4007_v51  ;;  %v4051_v3 = vrot.slane %v4050_v15, 1  ;;  %v9808_v51 = vld [vmem:[#allocation53_spill] sm:$0xff] }
 0xa98   :  { %v3966_v27 = vmax.f32 %v3964_v46, %v3965_v13 }
 0xa99   :  { %6607 = vmatpush1.bf16.msra.mxu0 %v9800_v30  ;;  %v3863_v30 = vmax.f32 %v3861_v39, %v3862_v33  ;;  %v4009_v4 = vrot.slane %v4008_v49, 1  ;;  %v4092_v33 = vmax.f32 %v4090_v32, %v4091_v28  ;;  %v4073_v32 = vmax.f32 %v4071_v50, %v4072_v60  ;;  %v9820_v28 = vld [vmem:[#allocation65_spill] sm:$0xff] }
 0xa9a   :  { %6609 = vmatprep.subr.bf16.mxu0 %v9801_v16  ;;  %v4028_v16 = vrot.slane %v4027_v24, 2  ;;  %v3967_v46 = vrot.slane %v3966_v27, 1  ;;  %v3829_v50 = vsel %vm2094_vm8, %v3733_v55, -inf }
 0xa9b   :  { %v4158_v11 = vsel %vm1617_vm2, %v3863_v30, %v4157_v8  ;;  %v4010_v42 = vmax.f32 %v4008_v49, %v4009_v4  ;;  %v4052_v30 = vmax.f32 %v4050_v15, %v4051_v3  ;;  %v9821_v15 = vld [vmem:[#allocation66_spill] sm:$0xff]  ;;  %v3736_v4 = vld [vmem:[#allocation2 + $0xb8] sm:$0xf0]  ;;  %v3830_v3 = vrot.slane %v3829_v50, 4 }
 0xa9c   :  { %v4029_v39 = vmax.f32 %v4027_v24, %v4028_v16  ;;  %v4159_v5 = vsel %vm1619_vm3, %v3905_v20, %v4158_v11  ;;  %v3968_v59 = vmax.f32 %v3966_v27, %v3967_v46  ;;  %v4180_v24 = vsel %vm1619_vm3, %v3926_v47, %v4179_v38  ;;  %v9814_v20 = vld [vmem:[#allocation59_spill] sm:$0xff]  ;;  %v9816_v46 = vld [vmem:[#allocation61_spill] sm:$0xff]  ;;  %v9819_v11 = vld [vmem:[#allocation64_spill] sm:$0xff] }
 0xa9d   :  { %6611 = vmatpush1.bf16.msra.mxu0 %v9802_v9  ;;  %v4160_v53 = vsel %vm1621_vm4, %v3947_v56, %v4159_v5  ;;  %v4093_v27 = vrot.slane %v4092_v33, 1  ;;  %v3727_v47 = vld [vmem:[#allocation2 + $0x40] sm:$0xf0]  ;;  %v3730_v56 = vld [vmem:[#allocation2 + $0x58] sm:$0xf0]  ;;  %v9822_v5 = vld [vmem:[#allocation67_spill] sm:$0xff] }
 0xa9e   :  { %6613 = vmatprep.subr.bf16.mxu0 %v9803_v45  ;;  %v4030_v13 = vrot.slane %v4029_v39, 1  ;;  %v4181_v9 = vsel %vm1621_vm4, %v3968_v59, %v4180_v24  ;;  %v4161_v45 = vsel %vm1623_vm5, %v3989_v62, %v4160_v53  ;;  %v3787_v38 = vsel %vm2094_vm8, %v3727_v47, -inf  ;;  %v9823_v24 = vld [vmem:[#allocation68_spill] sm:$0xff]  ;;  %v3745_v62 = vld [vmem:[#allocation2 + $0x160] sm:$0xf0] }
 0xa9f   :  { %v4182_v16 = vsel %vm1623_vm5, %v4010_v42, %v4181_v9  ;;  %v4094_v35 = vmax.f32 %v4092_v33, %v4093_v27  ;;  %v3788_v59 = vrot.slane %v3787_v38, 4  ;;  %v3850_v33 = vsel %vm2094_vm8, %v3736_v4, -inf  ;;  %v3748_v42 = vld [vmem:[#allocation2 + $0x178] sm:$0xf0] }
 0xaa0   :  { %v4031_v23 = vmax.f32 %v4029_v39, %v4030_v13  ;;  %v4183_v61 = vsel %vm1625_vm6, %v4052_v30, %v4182_v16  ;;  %v9818_v39 = vld [vmem:[#allocation63_spill] sm:$0xff]  ;;  %v3808_v13 = vsel %vm2094_vm8, %v3730_v56, -inf  ;;  %v3851_v60 = vrot.slane %v3850_v33, 4 }
 0xaa1   :  { %6615 = vmatpush1.bf16.msra.mxu0 %v9804_v22  ;;  %v4184_v22 = vsel %vm1627_vm7, %v4094_v35, %v4183_v61  ;;  %v3789_v27 = vmax.f32 %v3787_v38, %v3788_v59  ;;  %v3913_v16 = vsel %vm2094_vm8, %v3745_v62, -inf  ;;  %v3757_v35 = vld [vmem:[#allocation2 + $0x220] sm:$0xf0]  ;;  %v3766_v59 = vld [vmem:[#allocation2 + $0x298] sm:$0xf0] }
 0xaa2   :  { %6617 = vmatprep.subr.bf16.mxu0 %v9805_v6  ;;  %v4162_v8 = vsel %vm1625_vm6, %v4031_v23, %v4161_v45  ;;  %v9817_v6 = vld [vmem:[#allocation62_spill] sm:$0xff]  ;;  %v3751_v23 = vld [vmem:[#allocation2 + $0x1c0] sm:$0xf0]  ;;  %v3997_v55 = vsel %vm2094_vm8, %v3757_v35, -inf }
 0xaa3   :  { %v4163_v49 = vsel %vm1627_vm7, %v4073_v32, %v4162_v8  ;;  %v9825_v45 = vld [vmem:[#allocation70_spill] sm:$0xff]  ;;  %v3754_v32 = vld [vmem:[#allocation2 + $0x1d8] sm:$0xf0]  ;;  %v3934_v8 = vsel %vm2094_vm8, %v3748_v42, -inf  ;;  %v3955_v61 = vsel %vm2094_vm8, %v3751_v23, -inf }
 0xaa4   :  { %v3763_v38 = vld [vmem:[#allocation2 + $0x280] sm:$0xf0] }
 0xaa5   :  { %6619 = vmatpush1.bf16.msra.mxu0 %v9806_v52  ;;  %v3739_v52 = vld [vmem:[#allocation2 + $0x100] sm:$0xf0] }
 0xaa6   :  { %6621 = vmatprep.subr.bf16.mxu0 %v9807_v19  ;;  %v3742_v19 = vld [vmem:[#allocation2 + $0x118] sm:$0xf0]  ;;  %v3871_v53 = vsel %vm2094_vm8, %v3739_v52, -inf  ;;  %v9828_v52 = vld [vmem:[#allocation73_spill] sm:$0xff] }
 0xaa7   :  { %v3892_v9 = vsel %vm2094_vm8, %v3742_v19, -inf  ;;  %v3872_v30 = vrot.slane %v3871_v53, 4 }
 0xaa9   :  { %6623 = vmatpush1.bf16.msra.mxu0 %v9808_v51  ;;  %v3809_v51 = vrot.slane %v3808_v13, 4 }
 0xaaa   :  { %6625 = vmatprep.subr.bf16.mxu0 %v9809_v40  ;;  %v9824_v40 = vld [vmem:[#allocation69_spill] sm:$0xff] }
 0xaad   :  { %6627 = vmatpush1.bf16.msra.mxu0 %v9810_v12  ;;  %v3831_v12 = vmax.f32 %v3829_v50, %v3830_v3  ;;  %v3998_v3 = vrot.slane %v3997_v55, 4 }
 0xaae   :  { %6629 = vmatprep.subr.bf16.mxu0 %v9811_v43  ;;  %v3893_v43 = vrot.slane %v3892_v9, 4 }
 0xaaf   :  { %v3832_v47 = vrot.slane %v3831_v12, 2 }
 0xab1   :  { %6631 = vmatpush1.bf16.msra.mxu0 %v9812_v54  ;;  %v3810_v54 = vmax.f32 %v3808_v13, %v3809_v51  ;;  %v3833_v42 = vmax.f32 %v3831_v12, %v3832_v47 }
 0xab2   :  { %6633 = vmatprep.subr.bf16.mxu0 %v9813_v10  ;;  %v9826_v10 = vld [vmem:[#allocation71_spill] sm:$0xff] }
 0xab3   :  { %v3811_v56 = vrot.slane %v3810_v54, 2 }
 0xab4   :  { %4270 = vmatmul.mubr.f32.vlgmr.msra.gmra.mrb[14].mxu0 %v4163_v49  ;;  %v3852_v49 = vmax.f32 %v3850_v33, %v3851_v60  ;;  %v9829_v33 = vld [vmem:[#allocation74_spill] sm:$0xff]  ;;  %v4039_v60 = vsel %vm2094_vm8, %v3763_v38, -inf }
 0xab5   :  { %6635 = vmatpush1.bf16.msra.mxu0 %v9814_v20  ;;  %4340 = vmatprep.mubr.f32.mxu0 %v4184_v22  ;;  %v3790_v22 = vrot.slane %v3789_v27, 2  ;;  %v3914_v20 = vrot.slane %v3913_v16, 4  ;;  %v3812_v23 = vmax.f32 %v3810_v54, %v3811_v56 }
 0xab6   :  { %6637 = vmatprep.subr.bf16.mxu0 %v9815_v7  ;;  %v9827_v7 = vld [vmem:[#allocation72_spill] sm:$0xff]  ;;  %v3853_v4 = vrot.slane %v3852_v49, 2 }
 0xab7   :  { %v3791_v50 = vmax.f32 %v3789_v27, %v3790_v22  ;;  %v9831_v22 = vld [vmem:[#allocation76_spill] sm:$0xff]  ;;  %v3813_v47 = vrot.slane %v3812_v23, 1 }
 0xab9   :  { %6639 = vmatpush1.bf16.msra.mxu0 %v9816_v46  ;;  %v3873_v46 = vmax.f32 %v3871_v53, %v3872_v30  ;;  %v4060_v30 = vsel %vm2094_vm8, %v3766_v59, -inf }
 0xaba   :  { %6641 = vmatprep.subr.bf16.mxu0 %v9817_v6  ;;  %v3760_v6 = vld [vmem:[#allocation2 + $0x238] sm:$0xf0]  ;;  %v4061_v54 = vrot.slane %v4060_v30, 4 }
 0xabb   :  { %v4018_v13 = vsel %vm2094_vm8, %v3760_v6, -inf  ;;  %v3874_v62 = vrot.slane %v3873_v46, 2 }
 0xabc   :  { %v4019_v27 = vrot.slane %v4018_v13, 4 }
 0xabd   :  { %6643 = vmatpush1.bf16.msra.mxu0 %v9818_v39  ;;  %v3935_v39 = vrot.slane %v3934_v8, 4  ;;  %v3875_v12 = vmax.f32 %v3873_v46, %v3874_v62  ;;  %v4062_v62 = vmax.f32 %v4060_v30, %v4061_v54 }
 0xabe   :  { %6645 = vmatprep.subr.bf16.mxu0 %v9819_v11  ;;  %v3976_v11 = vsel %vm2094_vm8, %v3754_v32, -inf  ;;  %v3792_v32 = vrot.slane %v3791_v50, 1  ;;  %v4020_v38 = vmax.f32 %v4018_v13, %v4019_v27 }
 0xabf   :  { %v3977_v19 = vrot.slane %v3976_v11, 4  ;;  %v3936_v53 = vmax.f32 %v3934_v8, %v3935_v39  ;;  %v3999_v8 = vmax.f32 %v3997_v55, %v3998_v3  ;;  %v3876_v46 = vrot.slane %v3875_v12, 1 }
 0xac0   :  { %v3793_v56 = vmax.f32 %v3791_v50, %v3792_v32  ;;  %v4021_v13 = vrot.slane %v4020_v38, 2  ;;  %v4063_v30 = vrot.slane %v4062_v62, 2 }
 0xac1   :  { %6647 = vmatpush1.bf16.msra.mxu0 %v9820_v28  ;;  %v3956_v28 = vrot.slane %v3955_v61, 4 }
 0xac2   :  { %6649 = vmatprep.subr.bf16.mxu0 %v9821_v15  ;;  %v3894_v15 = vmax.f32 %v3892_v9, %v3893_v43 }
 0xac3   :  { %v3957_v51 = vmax.f32 %v3955_v61, %v3956_v28  ;;  %v4040_v61 = vrot.slane %v4039_v60, 4 }
 0xac4   :  { %v3895_v9 = vrot.slane %v3894_v15, 2 }
 0xac5   :  { %6651 = vmatpush1.bf16.msra.mxu0 %v9822_v5  ;;  %v3915_v5 = vmax.f32 %v3913_v16, %v3914_v20  ;;  %v9830_v16 = vld [vmem:[#allocation75_spill] sm:$0xff]  ;;  %v3937_v20 = vrot.slane %v3936_v53, 2  ;;  %v3958_v39 = vrot.slane %v3957_v51, 2  ;;  %v4041_v55 = vmax.f32 %v4039_v60, %v4040_v61 }
 0xac6   :  { %6653 = vmatprep.subr.bf16.mxu0 %v9823_v24  ;;  %v3769_v24 = vld [vmem:[#allocation2 + $0x2e0] sm:$0xf0]  ;;  %v3896_v6 = vmax.f32 %v3894_v15, %v3895_v9  ;;  %v3814_v9 = vmax.f32 %v3812_v23, %v3813_v47  ;;  %v4022_v23 = vmax.f32 %v4020_v38, %v4021_v13  ;;  %v4064_v61 = vmax.f32 %v4062_v62, %v4063_v30  ;;  %v3741_v62 = vld [vmem:[#allocation2 + $0x110] sm:$0xf0] }
 0xac7   :  { %v3916_v43 = vrot.slane %v3915_v5, 2  ;;  %v4081_v35 = vsel %vm2094_vm8, %v3769_v24, -inf  ;;  %v3938_v59 = vmax.f32 %v3936_v53, %v3937_v20  ;;  %v3959_v3 = vmax.f32 %v3957_v51, %v3958_v39  ;;  %v9837_v13 = vld [vmem:[#allocation131_spill] sm:$0xff] }
 0xac8   :  { %v3897_v24 = vrot.slane %v3896_v6, 1  ;;  %v4042_v27 = vrot.slane %v4041_v55, 2  ;;  %v4065_v38 = vrot.slane %v4064_v61, 1 }
 0xac9   :  { %6655 = vmatpush1.bf16.msra.mxu0 %v9824_v40  ;;  %v3772_v40 = vld [vmem:[#allocation2 + $0x2f8] sm:$0xf0]  ;;  %v3939_v60 = vrot.slane %v3938_v59, 1  ;;  %v3960_v51 = vrot.slane %v3959_v3, 1 }
 0xaca   :  { %6657 = vmatprep.subr.bf16.mxu0 %v9825_v45  ;;  %v3854_v45 = vmax.f32 %v3852_v49, %v3853_v4  ;;  %v4102_v49 = vsel %vm2094_vm8, %v3772_v40, -inf  ;;  %v3917_v4 = vmax.f32 %v3915_v5, %v3916_v43  ;;  %v3898_v32 = vmax.f32 %v3896_v6, %v3897_v24 }
 0xacb   :  { %v4023_v6 = vrot.slane %v4022_v23, 1 }
 0xacc   :  { %v3855_v28 = vrot.slane %v3854_v45, 1 }
 0xacd   :  { %6659 = vmatpush1.bf16.msra.mxu0 %v9826_v10  ;;  %v3978_v10 = vmax.f32 %v3976_v11, %v3977_v19  ;;  %v4082_v11 = vrot.slane %v4081_v35, 4  ;;  %v4103_v19 = vrot.slane %v4102_v49, 4 }
 0xace   :  { %6661 = vmatprep.subr.bf16.mxu0 %v9827_v7  ;;  %v3834_v7 = vrot.slane %v3833_v42, 1  ;;  %v3856_v40 = vmax.f32 %v3854_v45, %v3855_v28 }
 0xacf   :  { %v4083_v50 = vmax.f32 %v4081_v35, %v4082_v11  ;;  %v4104_v53 = vmax.f32 %v4102_v49, %v4103_v19 }
 0xad0   :  { %v3835_v15 = vmax.f32 %v3833_v42, %v3834_v7  ;;  %v4192_v45 = vsel %vm1615_vm1, %v3856_v40, %v3814_v9  ;;  %v3961_v7 = vmax.f32 %v3959_v3, %v3960_v51  ;;  %v9836_v40 = vld [vmem:[#allocation130_spill] sm:$0xff] }
 0xad1   :  { %6663 = vmatpush1.bf16.msra.mxu0 %v9828_v52  ;;  %v3979_v52 = vrot.slane %v3978_v10, 2  ;;  %v4084_v43 = vrot.slane %v4083_v50, 2  ;;  %v4193_v20 = vsel %vm1617_vm2, %v3898_v32, %v4192_v45  ;;  %v9839_v32 = vld [vmem:[#allocation133_spill] sm:$0xff]  ;;  %v3765_v45 = vld [vmem:[#allocation2 + $0x290] sm:$0xf0] }
 0xad2   :  { %6665 = vmatprep.subr.bf16.mxu0 %v9829_v33  ;;  %v4000_v33 = vrot.slane %v3999_v8, 2  ;;  %v4171_v42 = vsel %vm1615_vm1, %v3835_v15, %v3793_v56 }
 0xad3   :  { %v3980_v5 = vmax.f32 %v3978_v10, %v3979_v52  ;;  %v4085_v54 = vmax.f32 %v4083_v50, %v4084_v43 }
 0xad5   :  { %6667 = vmatpush1.bf16.msra.mxu0 %v9830_v16  ;;  %v4001_v16 = vmax.f32 %v3999_v8, %v4000_v33  ;;  %v3981_v35 = vrot.slane %v3980_v5, 1  ;;  %v4086_v11 = vrot.slane %v4085_v54, 1 }
 0xad6   :  { %6669 = vmatprep.subr.bf16.mxu0 %v9831_v22  ;;  %v3940_v22 = vmax.f32 %v3938_v59, %v3939_v60  ;;  %v9838_v60 = vld [vmem:[#allocation132_spill] sm:$0xff] }
 0xad7   :  { %v4002_v8 = vrot.slane %v4001_v16, 1  ;;  %v3982_v49 = vmax.f32 %v3980_v5, %v3981_v35  ;;  %v4087_v19 = vmax.f32 %v4085_v54, %v4086_v11  ;;  %v9840_v35 = vld [vmem:[#allocation134_spill] sm:$0xff]  ;;  %v9842_v54 = vld [vmem:[#allocation136_spill] sm:$0xff] }
 0xad8   :  { %v4194_v47 = vsel %vm1619_vm3, %v3940_v22, %v4193_v20  ;;  %v9844_v11 = vld [vmem:[#allocation138_spill] sm:$0xff] }
 0xad9   :  { %6671 = vmatpush1.bf16.msra.mxu0 %v9702_v17  ;;  %v3918_v17 = vrot.slane %v3917_v4, 1  ;;  %v4003_v28 = vmax.f32 %v4001_v16, %v4002_v8 }
 0xada   :  { %6673 = vmatprep.subr.bf16.mxu0 %v9703_v21  ;;  %v3877_v21 = vmax.f32 %v3875_v12, %v3876_v46  ;;  %v4105_v12 = vrot.slane %v4104_v53, 2 }
 0xadc   :  { %v4172_v10 = vsel %vm1617_vm2, %v3877_v21, %v4171_v42  ;;  %v4106_v39 = vmax.f32 %v4104_v53, %v4105_v12  ;;  %v3759_v53 = vld [vmem:[#allocation2 + $0x230] sm:$0xf0] }
 0xadd   :  { %6675 = vmatpush1.bf16.msra.mxu0 %v9574_v26  ;;  %v3919_v26 = vmax.f32 %v3917_v4, %v3918_v17  ;;  %v4024_v4 = vmax.f32 %v4022_v23, %v4023_v6  ;;  %v3753_v17 = vld [vmem:[#allocation2 + $0x1d0] sm:$0xf0]  ;;  %v4011_v43 = vsel %vm2094_vm8, %v3759_v53, -inf  ;;  %v9852_v53 = vld [vmem:[#allocation146_spill] sm:$0xff] }
 0xade   :  { %6677 = vmatprep.subr.bf16.mxu0 %v9575_v57  ;;  %v4043_v57 = vmax.f32 %v4041_v55, %v4042_v27  ;;  %v4107_v46 = vrot.slane %v4106_v39, 1  ;;  %v4066_v55 = vmax.f32 %v4064_v61, %v4065_v38  ;;  %v3969_v42 = vsel %vm2094_vm8, %v3753_v17, -inf  ;;  %v3771_v12 = vld [vmem:[#allocation2 + $0x2f0] sm:$0xf0] }
 0xadf   :  { %v4012_v20 = vrot.slane %v4011_v43, 4 }
 0xae1   :  { %6679 = vmatpush1.bf16.msra.mxu0 %v9576_v58  ;;  %v4173_v58 = vsel %vm1619_vm3, %v3919_v26, %v4172_v10  ;;  %v3970_v26 = vrot.slane %v3969_v42, 4  ;;  %v9841_v10 = vld [vmem:[#allocation135_spill] sm:$0xff] }
 0xae2   :  { %6681 = vmatprep.subr.bf16.mxu0 %v9577_v31  ;;  %v4044_v31 = vrot.slane %v4043_v57, 1  ;;  %v4174_v56 = vsel %vm1621_vm4, %v3961_v7, %v4173_v58  ;;  %v4053_v7 = vsel %vm2094_vm8, %v3765_v45, -inf  ;;  %v9855_v45 = vld [vmem:[#allocation149_spill] sm:$0xff] }
 0xae3   :  { %v3971_v6 = vmax.f32 %v3969_v42, %v3970_v26  ;;  %v9853_v42 = vld [vmem:[#allocation147_spill] sm:$0xff] }
 0xae4   :  { %v4045_v52 = vmax.f32 %v4043_v57, %v4044_v31 }
 0xae5   :  { %6683 = vmatpush1.bf16.msra.mxu0 %v9578_v0  ;;  %v4195_v0 = vsel %vm1621_vm4, %v3982_v49, %v4194_v47  ;;  %v9843_v49 = vld [vmem:[#allocation137_spill] sm:$0xff]  ;;  %v4095_v47 = vsel %vm2094_vm8, %v3771_v12, -inf  ;;  %v9860_v12 = vld [vmem:[#allocation159_spill] sm:$0xff] }
 0xae6   :  { %6685 = vmatprep.subr.bf16.mxu0 %v9579_v34  ;;  %v4175_v34 = vsel %vm1623_vm5, %v4003_v28, %v4174_v56  ;;  %v4196_v59 = vsel %vm1623_vm5, %v4024_v4, %v4195_v0  ;;  %v4013_v56 = vmax.f32 %v4011_v43, %v4012_v20  ;;  %v3972_v4 = vrot.slane %v3971_v6, 2  ;;  %v9856_v43 = vld [vmem:[#allocation150_spill] sm:$0xff] }
 0xae7   :  { %v4176_v15 = vsel %vm1625_vm6, %v4045_v52, %v4175_v34  ;;  %v4197_v33 = vsel %vm1625_vm6, %v4066_v55, %v4196_v59  ;;  %v4096_v52 = vrot.slane %v4095_v47, 4  ;;  %v9863_v20 = vld [vmem:[#allocation162_spill] sm:$0xff] }
 0xae9   :  { %6687 = vmatpush1.bf16.msra.mxu0 %v9580_v18  ;;  %v4108_v18 = vmax.f32 %v4106_v39, %v4107_v46  ;;  %v4054_v39 = vrot.slane %v4053_v7, 4  ;;  %v9845_v46 = vld [vmem:[#allocation139_spill] sm:$0xff] }
 0xaea   :  { %6689 = vmatprep.subr.bf16.mxu0 %v9581_v25  ;;  %v4177_v25 = vsel %vm1627_vm7, %v4087_v19, %v4176_v15  ;;  %v4014_v15 = vrot.slane %v4013_v56, 2 }
 0xaeb   :  { %v4198_v24 = vsel %vm1627_vm7, %v4108_v18, %v4197_v33  ;;  %v4055_v55 = vmax.f32 %v4053_v7, %v4054_v39  ;;  %v3973_v18 = vmax.f32 %v3971_v6, %v3972_v4  ;;  %v9846_v33 = vld [vmem:[#allocation140_spill] sm:$0xff]  ;;  %v9864_v7 = vld [vmem:[#allocation163_spill] sm:$0xff]  ;;  %v9870_v4 = vld [vmem:[#allocation169_spill] sm:$0xff] }
 0xaec   :  { %v9865_v6 = vld [vmem:[#allocation164_spill] sm:$0xff] }
 0xaed   :  { %6691 = vmatpush1.bf16.msra.mxu0 %v9582_v14  ;;  %v9832_v14 = vld [vmem:[#allocation124_spill] sm:$0xff] }
 0xaee   :  { %6693 = vmatprep.subr.bf16.mxu0 %v9583_v41  ;;  %v3729_v41 = vld [vmem:[#allocation2 + $0x50] sm:$0xf0] }
 0xaf1   :  { %6695 = vmatpush1.bf16.msra.mxu0 %v9584_v29  ;;  %v3735_v29 = vld [vmem:[#allocation2 + $0xb0] sm:$0xf0] }
 0xaf2   :  { %6697 = vmatprep.subr.bf16.mxu0 %v9585_v2  ;;  %v9833_v2 = vld [vmem:[#allocation125_spill] sm:$0xff]  ;;  %v3843_v3 = vsel %vm2094_vm8, %v3735_v29, -inf  ;;  %v4056_v29 = vrot.slane %v4055_v55, 2 }
 0xaf4   :  { %4341 = vmatmul.mubr.f32.vlgmr.msra.gmra.mrb[14].mxu0 %v4177_v25 }
 0xaf5   :  { %6699 = vmatpush1.bf16.msra.mxu0 %v9586_v48  ;;  %4411 = vmatprep.mubr.f32.mxu0 %v4198_v24  ;;  %v3801_v48 = vsel %vm2094_vm8, %v3729_v41, -inf  ;;  %v4097_v24 = vmax.f32 %v4095_v47, %v4096_v52  ;;  %v9868_v47 = vld [vmem:[#allocation167_spill] sm:$0xff] }
 0xaf6   :  { %6701 = vmatprep.subr.bf16.mxu0 %v9587_v37  ;;  %v9834_v37 = vld [vmem:[#allocation128_spill] sm:$0xff]  ;;  %v3802_v9 = vrot.slane %v3801_v48, 4 }
 0xaf8   :  { %v3803_v21 = vmax.f32 %v3801_v48, %v3802_v9  ;;  %v3974_v48 = vrot.slane %v3973_v18, 1  ;;  %v4057_v9 = vmax.f32 %v4055_v55, %v4056_v29 }
 0xaf9   :  { %6703 = vmatpush1.bf16.msra.mxu0 %v9588_v36  ;;  %v9835_v36 = vld [vmem:[#allocation129_spill] sm:$0xff] }
 0xafa   :  { %6705 = vmatprep.subr.bf16.mxu0 %v9589_v1  ;;  %v3747_v1 = vld [vmem:[#allocation2 + $0x170] sm:$0xf0]  ;;  %v3804_v51 = vrot.slane %v3803_v21, 2 }
 0xafb   :  { %v3927_v5 = vsel %vm2094_vm8, %v3747_v1, -inf  ;;  %v9849_v1 = vld [vmem:[#allocation143_spill] sm:$0xff] }
 0xafc   :  { %v3928_v16 = vrot.slane %v3927_v5, 4  ;;  %v3805_v8 = vmax.f32 %v3803_v21, %v3804_v51  ;;  %v4058_v21 = vrot.slane %v4057_v9, 1  ;;  %v9854_v51 = vld [vmem:[#allocation148_spill] sm:$0xff] }
 0xafd   :  { %6707 = vmatpush1.bf16.msra.mxu0 %v9704_v44  ;;  %v3844_v44 = vrot.slane %v3843_v3, 4 }
 0xafe   :  { %6709 = vmatprep.subr.bf16.mxu0 %v9705_v63  ;;  %v3885_v63 = vsel %vm2094_vm8, %v3741_v62, -inf  ;;  %v3929_v57 = vmax.f32 %v3927_v5, %v3928_v16  ;;  %v3806_v28 = vrot.slane %v3805_v8, 1  ;;  %v9851_v5 = vld [vmem:[#allocation145_spill] sm:$0xff] }
 0xaff   :  { %v3886_v50 = vrot.slane %v3885_v63, 4  ;;  %v3845_v27 = vmax.f32 %v3843_v3, %v3844_v44  ;;  %v9848_v3 = vld [vmem:[#allocation142_spill] sm:$0xff] }
 0xb00   :  { %v3930_v58 = vrot.slane %v3929_v57, 2  ;;  %v3807_v59 = vmax.f32 %v3805_v8, %v3806_v28  ;;  %v9861_v8 = vld [vmem:[#allocation160_spill] sm:$0xff] }
 0xb01   :  { %6711 = vmatpush1.bf16.msra.mxu0 %v9832_v14  ;;  %v3887_v30 = vmax.f32 %v3885_v63, %v3886_v50  ;;  %v3846_v23 = vrot.slane %v3845_v27, 2  ;;  %v9847_v14 = vld [vmem:[#allocation141_spill] sm:$0xff]  ;;  %v9869_v28 = vld [vmem:[#allocation168_spill] sm:$0xff] }
 0xb02   :  { %6713 = vmatprep.subr.bf16.mxu0 %v9833_v2  ;;  %v3931_v0 = vmax.f32 %v3929_v57, %v3930_v58  ;;  %v4015_v2 = vmax.f32 %v4013_v56, %v4014_v15  ;;  %v9857_v57 = vld [vmem:[#allocation154_spill] sm:$0xff] }
 0xb03   :  { %v3888_v22 = vrot.slane %v3887_v30, 2  ;;  %v3847_v61 = vmax.f32 %v3845_v27, %v3846_v23  ;;  %v9867_v58 = vld [vmem:[#allocation166_spill] sm:$0xff] }
 0xb04   :  { %v3932_v25 = vrot.slane %v3931_v0, 1  ;;  %v4016_v63 = vrot.slane %v4015_v2, 1 }
 0xb05   :  { %6715 = vmatpush1.bf16.msra.mxu0 %v9834_v37  ;;  %v3889_v31 = vmax.f32 %v3887_v30, %v3888_v22  ;;  %v3848_v38 = vrot.slane %v3847_v61, 1  ;;  %v9859_v22 = vld [vmem:[#allocation158_spill] sm:$0xff] }
 0xb06   :  { %6717 = vmatprep.subr.bf16.mxu0 %v9835_v36  ;;  %v3933_v37 = vmax.f32 %v3931_v0, %v3932_v25  ;;  %v4098_v36 = vrot.slane %v4097_v24, 2  ;;  %v4017_v27 = vmax.f32 %v4015_v2, %v4016_v63  ;;  %v9872_v0 = vld [vmem:[#allocation171_spill] sm:$0xff]  ;;  %v4567_v25 = vld [vmem:[#allocation14 + $0x18] sm:$0xff] }
 0xb07   :  { %v3890_v34 = vrot.slane %v3889_v31, 1  ;;  %v3849_v19 = vmax.f32 %v3847_v61, %v3848_v38  ;;  %v9862_v61 = vld [vmem:[#allocation161_spill] sm:$0xff] }
 0xb08   :  { %v4099_v17 = vmax.f32 %v4097_v24, %v4098_v36  ;;  %v8981_v38 = vld [vmem:[%s9067_s14] ss:$0 sm:$0xff]  ;;  %v4569_v36 = vld [vmem:[#allocation14 + $0x28] sm:$0xff] }
 0xb09   :  { %6719 = vmatpush1.bf16.msra.mxu0 %v9836_v40  ;;  %v3891_v41 = vmax.f32 %v3889_v31, %v3890_v34  ;;  %v4185_v62 = vsel %vm1615_vm1, %v3849_v19, %v3807_v59  ;;  %v3975_v40 = vmax.f32 %v3973_v18, %v3974_v48  ;;  %v9874_v59 = vld [vmem:[#allocation156_spill] sm:$0xff]  ;;  %v4566_v48 = vld [vmem:[#allocation14 + $0x10] sm:$0xff] }
 0xb0a   :  { %6721 = vmatprep.subr.bf16.mxu0 %v9837_v13  ;;  %v9850_v13 = vld [vmem:[#allocation144_spill] sm:$0xff]  ;;  %v4100_v16 = vrot.slane %v4099_v17, 1 }
 0xb0b   :  { %v4186_v44 = vsel %vm1617_vm2, %v3891_v41, %v4185_v62  ;;  %v9875_v41 = vld [vmem:[#allocation172_spill] sm:$0xff]  ;;  %v4564_v62 = vld [vmem:[#allocation14] sm:$0xff] }
 0xb0c   :  { %v4187_v50 = vsel %vm1619_vm3, %v3933_v37, %v4186_v44  ;;  %v4101_v23 = vmax.f32 %v4099_v17, %v4100_v16  ;;  %v6858_v44 = vpack.c.bf16 %v4566_v48, %v4564_v62  ;;  %v4570_v17 = vld [vmem:[#allocation14 + $0x30] sm:$0xff]  ;;  %v4572_v16 = vld [vmem:[#allocation14 + $0x40] sm:$0xff]  ;;  %v4605_v62 = vld [vmem:[#allocation14 + $0x148] sm:$0xff] }
 0xb0d   :  { %6723 = vmatpush1.bf16.msra.mxu0 %v9838_v60  ;;  %v4188_v60 = vsel %vm1621_vm4, %v3975_v40, %v4187_v50  ;;  %v4573_v50 = vld [vmem:[#allocation14 + $0x48] sm:$0xff]  ;;  %v4607_v48 = vld [vmem:[#allocation14 + $0x158] sm:$0xff] }
 0xb0e   :  { %6725 = vmatprep.subr.bf16.mxu0 %v9839_v32  ;;  %v4059_v32 = vmax.f32 %v4057_v9, %v4058_v21  ;;  %v4189_v30 = vsel %vm1623_vm5, %v4017_v27, %v4188_v60  ;;  %v9877_v21 = vld [vmem:[#allocation175_spill] sm:$0xff] }
 0xb0f   :  { %v9878_v27 = vmax.f32 %v9877_v21, 0.0  ;;  %v4610_v21 = vld [vmem:[#allocation14 + $0x170] sm:$0xff] }
 0xb10   :  { %v4190_v26 = vsel %vm1625_vm6, %v4059_v32, %v4189_v30  ;;  %v4577_v32 = vld [vmem:[#allocation14 + $0x68] sm:$0xff]  ;;  %v4579_v30 = vld [vmem:[#allocation14 + $0x78] sm:$0xff] }
 0xb11   :  { %6727 = vmatpush1.bf16.msra.mxu0 %v9840_v35  ;;  %v4191_v35 = vsel %vm1627_vm7, %v4101_v23, %v4190_v26  ;;  %v6868_v23 = vpack.c.bf16 %v4579_v30, %v4577_v32  ;;  %v4578_v26 = vld [vmem:[#allocation14 + $0x70] sm:$0xff]  ;;  %v4617_v30 = vld [vmem:[#allocation14 + $0x1a8] sm:$0xff] }
 0xb12   :  { %6729 = vmatprep.subr.bf16.mxu0 %v9841_v10  ;;  %v9858_v10 = vld [vmem:[#allocation157_spill] sm:$0xff] }
 0xb13   :  { %v4614_v32 = vld [vmem:[#allocation14 + $0x190] sm:$0xff] }
 0xb15   :  { %6731 = vmatpush1.bf16.msra.mxu0 %v9842_v54  ;;  %v9866_v54 = vld [vmem:[#allocation165_spill] sm:$0xff] }
 0xb16   :  { %6733 = vmatprep.subr.bf16.mxu0 %v9843_v49 }
 0xb19   :  { %6735 = vmatpush1.bf16.msra.mxu0 %v9844_v11  ;;  %v9871_v11 = vld [vmem:[#allocation170_spill] sm:$0xff] }
 0xb1a   :  { %6737 = vmatprep.subr.bf16.mxu0 %v9845_v46  ;;  %v9873_v46 = vld [vmem:[#allocation155_spill] sm:$0xff] }
 0xb1d   :  { %6739 = vmatpush1.bf16.msra.mxu0 %v9846_v33  ;;  %v4565_v33 = vld [vmem:[#allocation14 + $0x8] sm:$0xff] }
 0xb1e   :  { %6741 = vmatprep.subr.bf16.mxu0 %v9847_v14  ;;  %v6856_v24 = vpack.c.bf16 %v4567_v25, %v4565_v33  ;;  %v4601_v33 = vld [vmem:[#allocation14 + $0x128] sm:$0xff]  ;;  %v4603_v25 = vld [vmem:[#allocation14 + $0x138] sm:$0xff] }
 0xb21   :  { %6743 = vmatpush1.bf16.msra.mxu0 %v9848_v3  ;;  %v9876_v3 = vld [vmem:[#allocation173_spill] sm:$0xff] }
 0xb22   :  { %6745 = vmatprep.subr.bf16.mxu0 %v9849_v1  ;;  %v4571_v1 = vld [vmem:[#allocation14 + $0x38] sm:$0xff] }
 0xb23   :  { %v6860_v40 = vpack.c.bf16 %v4571_v1, %v4569_v36  ;;  %v6896_v36 = vpack.c.bf16 %v4607_v48, %v4605_v62  ;;  %v4604_v1 = vld [vmem:[#allocation14 + $0x140] sm:$0xff]  ;;  %v4643_v62 = vld [vmem:[#allocation14 + $0x278] sm:$0xff] }
 0xb25   :  { %6747 = vmatpush1.bf16.msra.mxu0 %v9850_v13  ;;  %v4568_v13 = vld [vmem:[#allocation14 + $0x20] sm:$0xff] }
 0xb26   :  { %6749 = vmatprep.subr.bf16.mxu0 %v9851_v5  ;;  %v4575_v5 = vld [vmem:[#allocation14 + $0x58] sm:$0xff]  ;;  %v6862_v60 = vpack.c.bf16 %v4570_v17, %v4568_v13 }
 0xb27   :  { %v4611_v13 = vld [vmem:[#allocation14 + $0x178] sm:$0xff] }
 0xb29   :  { %6751 = vmatpush1.bf16.msra.mxu0 %v9852_v53  ;;  %v6864_v53 = vpack.c.bf16 %v4575_v5, %v4573_v50  ;;  %v4608_v5 = vld [vmem:[#allocation14 + $0x160] sm:$0xff] }
 0xb2a   :  { %6753 = vmatprep.subr.bf16.mxu0 %v9853_v42  ;;  %v4574_v42 = vld [vmem:[#allocation14 + $0x50] sm:$0xff] }
 0xb2d   :  { %6755 = vmatpush1.bf16.msra.mxu0 %v9854_v51  ;;  %v6866_v51 = vpack.c.bf16 %v4574_v42, %v4572_v16  ;;  %v4612_v42 = vld [vmem:[#allocation14 + $0x180] sm:$0xff] }
 0xb2e   :  { %6757 = vmatprep.subr.bf16.mxu0 %v9855_v45  ;;  %v4576_v45 = vld [vmem:[#allocation14 + $0x60] sm:$0xff] }
 0xb31   :  { %6759 = vmatpush1.bf16.msra.mxu0 %v9856_v43  ;;  %v4581_v43 = vld [vmem:[#allocation14 + $0x88] sm:$0xff] }
 0xb32   :  { %7113 = vmatprep.subr.bf16.mxu0 %v9857_v57  ;;  %v6870_v57 = vpack.c.bf16 %v4578_v26, %v4576_v45  ;;  %v4616_v26 = vld [vmem:[#allocation14 + $0x1a0] sm:$0xff] }
 0xb34   :  { %4412 = vmatmul.mubr.f32.vlgmr.msra.gmra.mrb[14].mxu0 %v4191_v35  ;;  %v4583_v35 = vld [vmem:[#allocation14 + $0x98] sm:$0xff] }
 0xb35   :  { %7115 = vmatpush3.bf16.msra.mxu0 %v9858_v10 }
 0xb36   :  { %7117 = vmatprep.subr.bf16.mxu0 %v9859_v22 }
 0xb39   :  { %7119 = vmatpush3.bf16.msra.mxu0 %v9860_v12 }
 0xb3a   :  { %7121 = vmatprep.subr.bf16.mxu0 %v9861_v8 }
 0xb3d   :  { %7123 = vmatpush3.bf16.msra.mxu0 %v9862_v61 }
 0xb3e   :  { %7125 = vmatprep.subr.bf16.mxu0 %v9863_v20 }
 0xb41   :  { %7127 = vmatpush3.bf16.msra.mxu0 %v9864_v7 }
 0xb42   :  { %7129 = vmatprep.subr.bf16.mxu0 %v9865_v6 }
 0xb45   :  { %7131 = vmatpush3.bf16.msra.mxu0 %v9866_v54 }
 0xb46   :  { %7133 = vmatprep.subr.bf16.mxu0 %v9867_v58 }
 0xb47   :  { %v5311_v49 = vpop.f32.mrb[12].mxu0 }
 0xb48   :  { %v5312_v31 = vpop.f32.mrb[13].mxu0 }
 0xb49   :  { %v5313_v39 = vadd.f32 %v5312_v31, %v5311_v49  ;;  %7135 = vmatpush3.bf16.msra.mxu0 %v9868_v47  ;;  %v4591_v49 = vld [vmem:[#allocation14 + $0xd8] sm:$0xff] }
 0xb4a   :  { %7137 = vmatprep.subr.bf16.mxu0 %v9869_v28 }
 0xb4b   :  { %v3721_v56 = vadd.f32 %v8981_v38, %v5313_v39 }
 0xb4d   :  { %3724 = vst [vmem:[#allocation17 + $0x10] sm:$0xff] %v3721_v56  ;;  %7139 = vmatpush3.bf16.msra.mxu0 %v9870_v4  ;;  %v4593_v56 = vld [vmem:[#allocation14 + $0xe8] sm:$0xff] }
 0xb4e   :  { %7141 = vmatprep.subr.bf16.mxu0 %v9871_v11 }
 0xb51   :  { %7143 = vmatpush3.bf16.msra.mxu0 %v9872_v0 }
 0xc07   :  { %v4413_v52 = vpop.f32.mrb[14].mxu0 }
 0xc08   :  { %v7152_v34 = vadd.f32 %v4413_v52, %v9873_v46  ;;  %v4415_v55 = vpop.f32.mrb[15].mxu0  ;;  %v4592_v52 = vld [vmem:[#allocation14 + $0xe0] sm:$0xff]  ;;  %v4594_v46 = vld [vmem:[#allocation14 + $0xf0] sm:$0xff] }
 0xc09   :  { %v7153_v19 = vadd.f32 %v4415_v55, %v9874_v59  ;;  %v4599_v55 = vld [vmem:[#allocation14 + $0x118] sm:$0xff]  ;;  %v6886_v59 = vpack.c.bf16 %v4594_v46, %v4592_v52  ;;  %v4632_v46 = vld [vmem:[#allocation14 + $0x220] sm:$0xff] }
 0xc0a   :  { %v4418_v18 = vmax.f32 %v7152_v34, 0.0  ;;  %v4597_v34 = vld [vmem:[#allocation14 + $0x108] sm:$0xff] }
 0xc0b   :  { %v4419_v15 = vmax.f32 %v7153_v19, 0.0  ;;  %v6888_v19 = vpack.c.bf16 %v4599_v55, %v4597_v34  ;;  %v4634_v34 = vld [vmem:[#allocation14 + $0x230] sm:$0xff]  ;;  %v4637_v55 = vld [vmem:[#allocation14 + $0x248] sm:$0xff] }
 0xc0d   :  { %4484 = vmatprep.mubr.f32.mxu1 %v4419_v15  ;;  %v4596_v15 = vld [vmem:[#allocation14 + $0x100] sm:$0xff] }
 0xc0e   :  { %4485 = vmatmul.mubr.f32.vlgmr.msra.gmra.mrb[10].mxu1 %v4418_v18  ;;  %v4598_v18 = vld [vmem:[#allocation14 + $0x110] sm:$0xff] }
 0xc0f   :  { %6827 = vmatpush3.bf16.msra.mxu1 %v9858_v10  ;;  %v6872_v10 = vpack.c.bf16 %v4583_v35, %v4581_v43  ;;  %v4618_v43 = vld [vmem:[#allocation14 + $0x1b0] sm:$0xff]  ;;  %v4621_v35 = vld [vmem:[#allocation14 + $0x1c8] sm:$0xff] }
 0xc10   :  { %6829 = vmatprep.subr.bf16.mxu1 %v9859_v22  ;;  %v4580_v22 = vld [vmem:[#allocation14 + $0x80] sm:$0xff] }
 0xc13   :  { %6831 = vmatpush3.bf16.msra.mxu1 %v9860_v12  ;;  %v4582_v12 = vld [vmem:[#allocation14 + $0x90] sm:$0xff] }
 0xc14   :  { %6833 = vmatprep.subr.bf16.mxu1 %v9861_v8  ;;  %v4585_v8 = vld [vmem:[#allocation14 + $0xa8] sm:$0xff] }
 0xc17   :  { %6835 = vmatpush3.bf16.msra.mxu1 %v9862_v61  ;;  %v4587_v61 = vld [vmem:[#allocation14 + $0xb8] sm:$0xff] }
 0xc18   :  { %6837 = vmatprep.subr.bf16.mxu1 %v9863_v20  ;;  %v6874_v20 = vpack.c.bf16 %v4582_v12, %v4580_v22  ;;  %v4620_v12 = vld [vmem:[#allocation14 + $0x1c0] sm:$0xff] }
 0xc1b   :  { %6839 = vmatpush3.bf16.msra.mxu1 %v9864_v7  ;;  %v6876_v7 = vpack.c.bf16 %v4587_v61, %v4585_v8  ;;  %v4622_v8 = vld [vmem:[#allocation14 + $0x1d0] sm:$0xff]  ;;  %v4625_v61 = vld [vmem:[#allocation14 + $0x1e8] sm:$0xff] }
 0xc1c   :  { %6841 = vmatprep.subr.bf16.mxu1 %v9865_v6  ;;  %v4584_v6 = vld [vmem:[#allocation14 + $0xa0] sm:$0xff] }
 0xc1f   :  { %6843 = vmatpush3.bf16.msra.mxu1 %v9866_v54  ;;  %v4586_v54 = vld [vmem:[#allocation14 + $0xb0] sm:$0xff] }
 0xc20   :  { %6845 = vmatprep.subr.bf16.mxu1 %v9867_v58  ;;  %v4589_v58 = vld [vmem:[#allocation14 + $0xc8] sm:$0xff]  ;;  %v6878_v31 = vpack.c.bf16 %v4586_v54, %v4584_v6  ;;  %v4624_v54 = vld [vmem:[#allocation14 + $0x1e0] sm:$0xff] }
 0xc21   :  { %v6880_v39 = vpack.c.bf16 %v4591_v49, %v4589_v58  ;;  %v4626_v58 = vld [vmem:[#allocation14 + $0x1f0] sm:$0xff]  ;;  %v4629_v49 = vld [vmem:[#allocation14 + $0x208] sm:$0xff] }
 0xc23   :  { %6847 = vmatpush3.bf16.msra.mxu1 %v9868_v47  ;;  %v4588_v47 = vld [vmem:[#allocation14 + $0xc0] sm:$0xff] }
 0xc24   :  { %6849 = vmatprep.subr.bf16.mxu1 %v9869_v28  ;;  %v4590_v28 = vld [vmem:[#allocation14 + $0xd0] sm:$0xff] }
 0xc27   :  { %6851 = vmatpush3.bf16.msra.mxu1 %v9870_v4  ;;  %v4595_v4 = vld [vmem:[#allocation14 + $0xf8] sm:$0xff] }
 0xc28   :  { %6853 = vmatprep.subr.bf16.mxu1 %v9871_v11  ;;  %v6882_v11 = vpack.c.bf16 %v4590_v28, %v4588_v47  ;;  %v4628_v28 = vld [vmem:[#allocation14 + $0x200] sm:$0xff] }
 0xc2b   :  { %6855 = vmatpush3.bf16.msra.mxu1 %v9872_v0  ;;  %v6884_v0 = vpack.c.bf16 %v4595_v4, %v4593_v56  ;;  %v4630_v56 = vld [vmem:[#allocation14 + $0x210] sm:$0xff]  ;;  %v4633_v4 = vld [vmem:[#allocation14 + $0x228] sm:$0xff] }
 0xc2c   :  { %6857 = vmatprep.subr.bf16.mxu1 %v6856_v24  ;;  %v6890_v24 = vpack.c.bf16 %v4598_v18, %v4596_v15  ;;  %v9881_v18 = vld [vmem:[#allocation83_spill] sm:$0xff] }
 0xce1   :  { %v4486_v14 = vpop.f32.mrb[10].mxu1 }
 0xce2   :  { %v9005_v29 = vadd.f32 %v4486_v14, %v9875_v41  ;;  %v4488_v2 = vpop.f32.mrb[11].mxu1  ;;  %v6892_v14 = vpack.c.bf16 %v4603_v25, %v4601_v33  ;;  %v4600_v41 = vld [vmem:[#allocation14 + $0x120] sm:$0xff]  ;;  %v9882_v33 = vmax.f32 %v9881_v18, 0.0  ;;  %v6926_v25 = vpack.c.bf16 %v4634_v34, %v4632_v46  ;;  %v4670_v46 = vld [vmem:[#allocation14 + $0x350] sm:$0xff]  ;;  %v4673_v34 = vld [vmem:[#allocation14 + $0x368] sm:$0xff] }
 0xce3   :  { %v9008_v37 = vadd.f32 %v4488_v2, %v9876_v3  ;;  %v4602_v2 = vld [vmem:[#allocation14 + $0x130] sm:$0xff] }
 0xce4   :  { %v4491_v63 = vmax.f32 %v9005_v29, 0.0  ;;  %v6894_v3 = vpack.c.bf16 %v4602_v2, %v4600_v41  ;;  %v4638_v41 = vld [vmem:[#allocation14 + $0x250] sm:$0xff]  ;;  %v4641_v2 = vld [vmem:[#allocation14 + $0x268] sm:$0xff] }
 0xce5   :  { %v4492_v9 = vmax.f32 %v9008_v37, 0.0  ;;  %v4674_v18 = vld [vmem:[#allocation14 + $0x370] sm:$0xff] }
 0xce7   :  { %4557 = vmatprep.mubr.f32.mxu1 %v4492_v9 }
 0xce8   :  { %4558 = vmatmul.mubr.f32.vlgmr.msra.gmra.mrb[12].mxu1 %v4491_v63 }
 0xce9   :  { %6859 = vmatpush1.bf16.msra.mxu1 %v6858_v44  ;;  %4896 = vmatprep.mubr.f32.mxu1 %v9878_v27  ;;  %v4606_v44 = vld [vmem:[#allocation14 + $0x150] sm:$0xff]  ;;  %v4613_v27 = vld [vmem:[#allocation14 + $0x188] sm:$0xff] }
 0xcea   :  { %6861 = vmatprep.subr.bf16.mxu1 %v6860_v40  ;;  %v4609_v40 = vld [vmem:[#allocation14 + $0x168] sm:$0xff]  ;;  %v6898_v17 = vpack.c.bf16 %v4606_v44, %v4604_v1  ;;  %v4642_v1 = vld [vmem:[#allocation14 + $0x270] sm:$0xff] }
 0xceb   :  { %v6900_v50 = vpack.c.bf16 %v4611_v13, %v4609_v40  ;;  %v4645_v44 = vld [vmem:[#allocation14 + $0x288] sm:$0xff]  ;;  %v4647_v40 = vld [vmem:[#allocation14 + $0x298] sm:$0xff] }
 0xced   :  { %6863 = vmatpush1.bf16.msra.mxu1 %v6862_v60  ;;  %v4615_v60 = vld [vmem:[#allocation14 + $0x198] sm:$0xff] }
 0xcee   :  { %6865 = vmatprep.subr.bf16.mxu1 %v6864_v53  ;;  %v6902_v53 = vpack.c.bf16 %v4610_v21, %v4608_v5  ;;  %v6904_v16 = vpack.c.bf16 %v4615_v60, %v4613_v27  ;;  %v4646_v5 = vld [vmem:[#allocation14 + $0x290] sm:$0xff]  ;;  %v4649_v21 = vld [vmem:[#allocation14 + $0x2a8] sm:$0xff]  ;;  %v4651_v27 = vld [vmem:[#allocation14 + $0x2b8] sm:$0xff] }
 0xcf1   :  { %6867 = vmatpush1.bf16.msra.mxu1 %v6866_v51  ;;  %v4619_v51 = vld [vmem:[#allocation14 + $0x1b8] sm:$0xff] }
 0xcf2   :  { %6869 = vmatprep.subr.bf16.mxu1 %v6868_v23  ;;  %v6906_v23 = vpack.c.bf16 %v4614_v32, %v4612_v42  ;;  %v6908_v45 = vpack.c.bf16 %v4619_v51, %v4617_v30  ;;  %v4650_v42 = vld [vmem:[#allocation14 + $0x2b0] sm:$0xff]  ;;  %v4653_v32 = vld [vmem:[#allocation14 + $0x2c8] sm:$0xff]  ;;  %v4655_v30 = vld [vmem:[#allocation14 + $0x2d8] sm:$0xff] }
 0xcf5   :  { %6871 = vmatpush1.bf16.msra.mxu1 %v6870_v57  ;;  %v4623_v57 = vld [vmem:[#allocation14 + $0x1d8] sm:$0xff] }
 0xcf6   :  { %6873 = vmatprep.subr.bf16.mxu1 %v6872_v10  ;;  %v6910_v10 = vpack.c.bf16 %v4618_v43, %v4616_v26  ;;  %v6912_v22 = vpack.c.bf16 %v4623_v57, %v4621_v35  ;;  %v4654_v26 = vld [vmem:[#allocation14 + $0x2d0] sm:$0xff]  ;;  %v4657_v43 = vld [vmem:[#allocation14 + $0x2e8] sm:$0xff]  ;;  %v4659_v35 = vld [vmem:[#allocation14 + $0x2f8] sm:$0xff] }
 0xcf9   :  { %6875 = vmatpush1.bf16.msra.mxu1 %v6874_v20  ;;  %v4627_v20 = vld [vmem:[#allocation14 + $0x1f8] sm:$0xff] }
 0xcfa   :  { %6877 = vmatprep.subr.bf16.mxu1 %v6876_v7  ;;  %v6914_v7 = vpack.c.bf16 %v4622_v8, %v4620_v12  ;;  %v6916_v6 = vpack.c.bf16 %v4627_v20, %v4625_v61  ;;  %v4658_v12 = vld [vmem:[#allocation14 + $0x2f0] sm:$0xff]  ;;  %v4661_v8 = vld [vmem:[#allocation14 + $0x308] sm:$0xff]  ;;  %v4663_v61 = vld [vmem:[#allocation14 + $0x318] sm:$0xff] }
 0xcfd   :  { %6879 = vmatpush1.bf16.msra.mxu1 %v6878_v31  ;;  %v4631_v31 = vld [vmem:[#allocation14 + $0x218] sm:$0xff] }
 0xcfe   :  { %6881 = vmatprep.subr.bf16.mxu1 %v6880_v39  ;;  %v6918_v39 = vpack.c.bf16 %v4626_v58, %v4624_v54  ;;  %v6920_v47 = vpack.c.bf16 %v4631_v31, %v4629_v49  ;;  %v4662_v54 = vld [vmem:[#allocation14 + $0x310] sm:$0xff]  ;;  %v4665_v58 = vld [vmem:[#allocation14 + $0x328] sm:$0xff]  ;;  %v4667_v49 = vld [vmem:[#allocation14 + $0x338] sm:$0xff] }
 0xd01   :  { %6883 = vmatpush1.bf16.msra.mxu1 %v6882_v11  ;;  %v4635_v11 = vld [vmem:[#allocation14 + $0x238] sm:$0xff] }
 0xd02   :  { %6885 = vmatprep.subr.bf16.mxu1 %v6884_v0  ;;  %v6922_v0 = vpack.c.bf16 %v4630_v56, %v4628_v28  ;;  %v6924_v52 = vpack.c.bf16 %v4635_v11, %v4633_v4  ;;  %v4666_v28 = vld [vmem:[#allocation14 + $0x330] sm:$0xff]  ;;  %v4669_v56 = vld [vmem:[#allocation14 + $0x348] sm:$0xff]  ;;  %v4671_v4 = vld [vmem:[#allocation14 + $0x358] sm:$0xff] }
 0xd05   :  { %6887 = vmatpush1.bf16.msra.mxu1 %v6886_v59  ;;  %v4639_v59 = vld [vmem:[#allocation14 + $0x258] sm:$0xff] }
 0xd06   :  { %6889 = vmatprep.subr.bf16.mxu1 %v6888_v19  ;;  %v9879_v19 = vld [vmem:[#allocation174_spill] sm:$0xff] }
 0xd07   :  { %v9880_v15 = vmax.f32 %v9879_v19, 0.0 }
 0xd09   :  { %6891 = vmatpush1.bf16.msra.mxu1 %v6890_v24  ;;  %v6928_v24 = vpack.c.bf16 %v4639_v59, %v4637_v55  ;;  %v4675_v55 = vld [vmem:[#allocation14 + $0x378] sm:$0xff] }
 0xd0a   :  { %6893 = vmatprep.subr.bf16.mxu1 %v6892_v14  ;;  %v4636_v14 = vld [vmem:[#allocation14 + $0x240] sm:$0xff]  ;;  %v6964_v19 = vpack.c.bf16 %v4675_v55, %v4673_v34  ;;  %v4711_v34 = vld [vmem:[#allocation14 + $0x498] sm:$0xff] }
 0xd0b   :  { %v6930_v48 = vpack.c.bf16 %v4638_v41, %v4636_v14  ;;  %v4676_v41 = vld [vmem:[#allocation14 + $0x380] sm:$0xff] }
 0xd0d   :  { %6895 = vmatpush1.bf16.msra.mxu1 %v6894_v3  ;;  %v6932_v3 = vpack.c.bf16 %v4643_v62, %v4641_v2  ;;  %v4678_v2 = vld [vmem:[#allocation14 + $0x390] sm:$0xff]  ;;  %v4681_v62 = vld [vmem:[#allocation14 + $0x3a8] sm:$0xff] }
 0xd0e   :  { %6897 = vmatprep.subr.bf16.mxu1 %v6896_v36  ;;  %v4640_v36 = vld [vmem:[#allocation14 + $0x260] sm:$0xff] }
 0xd0f   :  { %v6934_v13 = vpack.c.bf16 %v4642_v1, %v4640_v36  ;;  %v4680_v1 = vld [vmem:[#allocation14 + $0x3a0] sm:$0xff] }
 0xd11   :  { %6899 = vmatpush1.bf16.msra.mxu1 %v6898_v17  ;;  %v6936_v17 = vpack.c.bf16 %v4647_v40, %v4645_v44  ;;  %v4682_v44 = vld [vmem:[#allocation14 + $0x3b0] sm:$0xff]  ;;  %v4685_v40 = vld [vmem:[#allocation14 + $0x3c8] sm:$0xff] }
 0xd12   :  { %6901 = vmatprep.subr.bf16.mxu1 %v6900_v50  ;;  %v4644_v50 = vld [vmem:[#allocation14 + $0x280] sm:$0xff] }
 0xd13   :  { %v6938_v60 = vpack.c.bf16 %v4646_v5, %v4644_v50  ;;  %v4684_v5 = vld [vmem:[#allocation14 + $0x3c0] sm:$0xff] }
 0xd15   :  { %6903 = vmatpush1.bf16.msra.mxu1 %v6902_v53  ;;  %v6940_v53 = vpack.c.bf16 %v4651_v27, %v4649_v21  ;;  %v4686_v21 = vld [vmem:[#allocation14 + $0x3d0] sm:$0xff]  ;;  %v4689_v27 = vld [vmem:[#allocation14 + $0x3e8] sm:$0xff] }
 0xd16   :  { %6905 = vmatprep.subr.bf16.mxu1 %v6904_v16  ;;  %v4648_v16 = vld [vmem:[#allocation14 + $0x2a0] sm:$0xff] }
 0xd17   :  { %v6942_v51 = vpack.c.bf16 %v4650_v42, %v4648_v16  ;;  %v4688_v42 = vld [vmem:[#allocation14 + $0x3e0] sm:$0xff] }
 0xd19   :  { %6907 = vmatpush1.bf16.msra.mxu1 %v6906_v23  ;;  %v6944_v23 = vpack.c.bf16 %v4655_v30, %v4653_v32  ;;  %v4690_v32 = vld [vmem:[#allocation14 + $0x3f0] sm:$0xff]  ;;  %v4693_v30 = vld [vmem:[#allocation14 + $0x408] sm:$0xff] }
 0xd1a   :  { %6909 = vmatprep.subr.bf16.mxu1 %v6908_v45  ;;  %v4652_v45 = vld [vmem:[#allocation14 + $0x2c0] sm:$0xff] }
 0xd1b   :  { %v6946_v57 = vpack.c.bf16 %v4654_v26, %v4652_v45  ;;  %v4692_v26 = vld [vmem:[#allocation14 + $0x400] sm:$0xff] }
 0xd1d   :  { %6911 = vmatpush1.bf16.msra.mxu1 %v6910_v10  ;;  %v6948_v10 = vpack.c.bf16 %v4659_v35, %v4657_v43  ;;  %v4694_v43 = vld [vmem:[#allocation14 + $0x410] sm:$0xff]  ;;  %v4697_v35 = vld [vmem:[#allocation14 + $0x428] sm:$0xff] }
 0xd1e   :  { %6913 = vmatprep.subr.bf16.mxu1 %v6912_v22  ;;  %v4656_v22 = vld [vmem:[#allocation14 + $0x2e0] sm:$0xff] }
 0xd1f   :  { %v6950_v20 = vpack.c.bf16 %v4658_v12, %v4656_v22  ;;  %v4696_v12 = vld [vmem:[#allocation14 + $0x420] sm:$0xff] }
 0xd21   :  { %6915 = vmatpush1.bf16.msra.mxu1 %v6914_v7  ;;  %v6952_v7 = vpack.c.bf16 %v4663_v61, %v4661_v8  ;;  %v4698_v8 = vld [vmem:[#allocation14 + $0x430] sm:$0xff]  ;;  %v4701_v61 = vld [vmem:[#allocation14 + $0x448] sm:$0xff] }
 0xd22   :  { %6917 = vmatprep.subr.bf16.mxu1 %v6916_v6  ;;  %v4660_v6 = vld [vmem:[#allocation14 + $0x300] sm:$0xff] }
 0xd23   :  { %v6954_v31 = vpack.c.bf16 %v4662_v54, %v4660_v6  ;;  %v9885_v54 = vld [vmem:[#allocation86_spill] sm:$0xff] }
 0xd25   :  { %6919 = vmatpush1.bf16.msra.mxu1 %v6918_v39  ;;  %v6956_v39 = vpack.c.bf16 %v4667_v49, %v4665_v58  ;;  %v9886_v58 = vmax.f32 %v9885_v54, 0.0  ;;  %v6990_v49 = vpack.c.bf16 %v4698_v8, %v4696_v12  ;;  %v4734_v12 = vld [vmem:[#allocation14 + $0x550] sm:$0xff]  ;;  %v4737_v8 = vld [vmem:[#allocation14 + $0x568] sm:$0xff] }
 0xd26   :  { %6921 = vmatprep.subr.bf16.mxu1 %v6920_v47  ;;  %v4664_v47 = vld [vmem:[#allocation14 + $0x320] sm:$0xff]  ;;  %v4738_v54 = vld [vmem:[#allocation14 + $0x570] sm:$0xff] }
 0xd27   :  { %v6958_v11 = vpack.c.bf16 %v4666_v28, %v4664_v47  ;;  %v4702_v47 = vld [vmem:[#allocation14 + $0x450] sm:$0xff]  ;;  %v4705_v28 = vld [vmem:[#allocation14 + $0x468] sm:$0xff] }
 0xd28   :  { %4897 = vmatmul.mubr.f32.vlgmr.msra.gmra.mrb[14].mxu1 %v9880_v15  ;;  %v4672_v15 = vld [vmem:[#allocation14 + $0x360] sm:$0xff] }
 0xd29   :  { %6923 = vmatpush1.bf16.msra.mxu1 %v6922_v0  ;;  %4967 = vmatprep.mubr.f32.mxu1 %v9882_v33  ;;  %v6960_v0 = vpack.c.bf16 %v4671_v4, %v4669_v56  ;;  %v4677_v33 = vld [vmem:[#allocation14 + $0x388] sm:$0xff]  ;;  %v4707_v56 = vld [vmem:[#allocation14 + $0x478] sm:$0xff] }
 0xd2a   :  { %6925 = vmatprep.subr.bf16.mxu1 %v6924_v52  ;;  %v4668_v52 = vld [vmem:[#allocation14 + $0x340] sm:$0xff] }
 0xd2b   :  { %v6962_v59 = vpack.c.bf16 %v4670_v46, %v4668_v52  ;;  %v4706_v52 = vld [vmem:[#allocation14 + $0x470] sm:$0xff]  ;;  %v4709_v46 = vld [vmem:[#allocation14 + $0x488] sm:$0xff] }
 0xd2d   :  { %6927 = vmatpush1.bf16.msra.mxu1 %v6926_v25  ;;  %v4679_v25 = vld [vmem:[#allocation14 + $0x398] sm:$0xff] }
 0xd2e   :  { %6929 = vmatprep.subr.bf16.mxu1 %v6928_v24  ;;  %v6966_v24 = vpack.c.bf16 %v4674_v18, %v4672_v15  ;;  %v6968_v14 = vpack.c.bf16 %v4679_v25, %v4677_v33  ;;  %v4710_v15 = vld [vmem:[#allocation14 + $0x490] sm:$0xff]  ;;  %v4713_v18 = vld [vmem:[#allocation14 + $0x4a8] sm:$0xff]  ;;  %v4715_v33 = vld [vmem:[#allocation14 + $0x4b8] sm:$0xff] }
 0xd31   :  { %6931 = vmatpush1.bf16.msra.mxu1 %v6930_v48  ;;  %v4683_v48 = vld [vmem:[#allocation14 + $0x3b8] sm:$0xff] }
 0xd32   :  { %6933 = vmatprep.subr.bf16.mxu1 %v6932_v3  ;;  %v6970_v3 = vpack.c.bf16 %v4678_v2, %v4676_v41  ;;  %v6972_v36 = vpack.c.bf16 %v4683_v48, %v4681_v62  ;;  %v4714_v41 = vld [vmem:[#allocation14 + $0x4b0] sm:$0xff]  ;;  %v4717_v2 = vld [vmem:[#allocation14 + $0x4c8] sm:$0xff]  ;;  %v4719_v62 = vld [vmem:[#allocation14 + $0x4d8] sm:$0xff] }
 0xd35   :  { %6935 = vmatpush1.bf16.msra.mxu1 %v6934_v13  ;;  %v4687_v13 = vld [vmem:[#allocation14 + $0x3d8] sm:$0xff] }
 0xd36   :  { %6937 = vmatprep.subr.bf16.mxu1 %v6936_v17  ;;  %v6974_v17 = vpack.c.bf16 %v4682_v44, %v4680_v1  ;;  %v6976_v50 = vpack.c.bf16 %v4687_v13, %v4685_v40  ;;  %v4718_v1 = vld [vmem:[#allocation14 + $0x4d0] sm:$0xff]  ;;  %v4721_v44 = vld [vmem:[#allocation14 + $0x4e8] sm:$0xff]  ;;  %v4723_v40 = vld [vmem:[#allocation14 + $0x4f8] sm:$0xff] }
 0xd39   :  { %6939 = vmatpush1.bf16.msra.mxu1 %v6938_v60  ;;  %v4691_v60 = vld [vmem:[#allocation14 + $0x3f8] sm:$0xff] }
 0xd3a   :  { %6941 = vmatprep.subr.bf16.mxu1 %v6940_v53  ;;  %v6978_v53 = vpack.c.bf16 %v4686_v21, %v4684_v5  ;;  %v6980_v16 = vpack.c.bf16 %v4691_v60, %v4689_v27  ;;  %v4722_v5 = vld [vmem:[#allocation14 + $0x4f0] sm:$0xff]  ;;  %v4725_v21 = vld [vmem:[#allocation14 + $0x508] sm:$0xff]  ;;  %v4727_v27 = vld [vmem:[#allocation14 + $0x518] sm:$0xff] }
 0xd3d   :  { %6943 = vmatpush1.bf16.msra.mxu1 %v6942_v51  ;;  %v4695_v51 = vld [vmem:[#allocation14 + $0x418] sm:$0xff] }
 0xd3e   :  { %6945 = vmatprep.subr.bf16.mxu1 %v6944_v23  ;;  %v6982_v23 = vpack.c.bf16 %v4690_v32, %v4688_v42  ;;  %v6984_v45 = vpack.c.bf16 %v4695_v51, %v4693_v30  ;;  %v4726_v42 = vld [vmem:[#allocation14 + $0x510] sm:$0xff]  ;;  %v4729_v32 = vld [vmem:[#allocation14 + $0x528] sm:$0xff]  ;;  %v4731_v30 = vld [vmem:[#allocation14 + $0x538] sm:$0xff] }
 0xd41   :  { %6947 = vmatpush1.bf16.msra.mxu1 %v6946_v57  ;;  %v4699_v57 = vld [vmem:[#allocation14 + $0x438] sm:$0xff] }
 0xd42   :  { %6949 = vmatprep.subr.bf16.mxu1 %v6948_v10  ;;  %v6986_v10 = vpack.c.bf16 %v4694_v43, %v4692_v26  ;;  %v6988_v22 = vpack.c.bf16 %v4699_v57, %v4697_v35  ;;  %v4730_v26 = vld [vmem:[#allocation14 + $0x530] sm:$0xff]  ;;  %v4733_v43 = vld [vmem:[#allocation14 + $0x548] sm:$0xff]  ;;  %v4735_v35 = vld [vmem:[#allocation14 + $0x558] sm:$0xff] }
 0xd45   :  { %6951 = vmatpush1.bf16.msra.mxu1 %v6950_v20  ;;  %v4703_v20 = vld [vmem:[#allocation14 + $0x458] sm:$0xff] }
 0xd46   :  { %6953 = vmatprep.subr.bf16.mxu1 %v6952_v7  ;;  %v9883_v7 = vld [vmem:[#allocation79_spill] sm:$0xff] }
 0xd47   :  { %v9884_v6 = vmax.f32 %v9883_v7, 0.0 }
 0xd49   :  { %6955 = vmatpush1.bf16.msra.mxu1 %v6954_v31  ;;  %v6992_v31 = vpack.c.bf16 %v4703_v20, %v4701_v61  ;;  %v4739_v61 = vld [vmem:[#allocation14 + $0x578] sm:$0xff] }
 0xd4a   :  { %6957 = vmatprep.subr.bf16.mxu1 %v6956_v39  ;;  %v4700_v39 = vld [vmem:[#allocation14 + $0x440] sm:$0xff]  ;;  %v7028_v7 = vpack.c.bf16 %v4739_v61, %v4737_v8  ;;  %v4774_v8 = vld [vmem:[#allocation14 + $0x690] sm:$0xff]  ;;  %v4777_v61 = vld [vmem:[#allocation14 + $0x6a8] sm:$0xff] }
 0xd4b   :  { %v6994_v4 = vpack.c.bf16 %v4702_v47, %v4700_v39  ;;  %v4740_v47 = vld [vmem:[#allocation14 + $0x580] sm:$0xff] }
 0xd4d   :  { %6959 = vmatpush1.bf16.msra.mxu1 %v6958_v11  ;;  %v6996_v11 = vpack.c.bf16 %v4707_v56, %v4705_v28  ;;  %v4742_v28 = vld [vmem:[#allocation14 + $0x590] sm:$0xff]  ;;  %v4745_v56 = vld [vmem:[#allocation14 + $0x5a8] sm:$0xff] }
 0xd4e   :  { %6961 = vmatprep.subr.bf16.mxu1 %v6960_v0  ;;  %v4704_v0 = vld [vmem:[#allocation14 + $0x460] sm:$0xff] }
 0xd4f   :  { %v6998_v55 = vpack.c.bf16 %v4706_v52, %v4704_v0  ;;  %v4744_v52 = vld [vmem:[#allocation14 + $0x5a0] sm:$0xff] }
 0xd51   :  { %6963 = vmatpush1.bf16.msra.mxu1 %v6962_v59  ;;  %v7000_v59 = vpack.c.bf16 %v4711_v34, %v4709_v46  ;;  %v4746_v46 = vld [vmem:[#allocation14 + $0x5b0] sm:$0xff]  ;;  %v4749_v34 = vld [vmem:[#allocation14 + $0x5c8] sm:$0xff] }
 0xd52   :  { %6965 = vmatprep.subr.bf16.mxu1 %v6964_v19  ;;  %v4708_v19 = vld [vmem:[#allocation14 + $0x480] sm:$0xff] }
 0xd53   :  { %v7002_v25 = vpack.c.bf16 %v4710_v15, %v4708_v19  ;;  %v4748_v15 = vld [vmem:[#allocation14 + $0x5c0] sm:$0xff] }
 0xd55   :  { %6967 = vmatpush1.bf16.msra.mxu1 %v6966_v24  ;;  %v7004_v24 = vpack.c.bf16 %v4715_v33, %v4713_v18  ;;  %v4750_v18 = vld [vmem:[#allocation14 + $0x5d0] sm:$0xff]  ;;  %v4753_v33 = vld [vmem:[#allocation14 + $0x5e8] sm:$0xff] }
 0xd56   :  { %6969 = vmatprep.subr.bf16.mxu1 %v6968_v14  ;;  %v4712_v14 = vld [vmem:[#allocation14 + $0x4a0] sm:$0xff] }
 0xd57   :  { %v7006_v48 = vpack.c.bf16 %v4714_v41, %v4712_v14  ;;  %v4752_v41 = vld [vmem:[#allocation14 + $0x5e0] sm:$0xff] }
 0xd59   :  { %6971 = vmatpush1.bf16.msra.mxu1 %v6970_v3  ;;  %v7008_v3 = vpack.c.bf16 %v4719_v62, %v4717_v2  ;;  %v4754_v2 = vld [vmem:[#allocation14 + $0x5f0] sm:$0xff]  ;;  %v4757_v62 = vld [vmem:[#allocation14 + $0x608] sm:$0xff] }
 0xd5a   :  { %6973 = vmatprep.subr.bf16.mxu1 %v6972_v36  ;;  %v4716_v36 = vld [vmem:[#allocation14 + $0x4c0] sm:$0xff] }
 0xd5b   :  { %v7010_v13 = vpack.c.bf16 %v4718_v1, %v4716_v36  ;;  %v4756_v1 = vld [vmem:[#allocation14 + $0x600] sm:$0xff] }
 0xd5d   :  { %6975 = vmatpush1.bf16.msra.mxu1 %v6974_v17  ;;  %v7012_v17 = vpack.c.bf16 %v4723_v40, %v4721_v44  ;;  %v4758_v44 = vld [vmem:[#allocation14 + $0x610] sm:$0xff]  ;;  %v4761_v40 = vld [vmem:[#allocation14 + $0x628] sm:$0xff] }
 0xd5e   :  { %6977 = vmatprep.subr.bf16.mxu1 %v6976_v50  ;;  %v4720_v50 = vld [vmem:[#allocation14 + $0x4e0] sm:$0xff] }
 0xd5f   :  { %v7014_v60 = vpack.c.bf16 %v4722_v5, %v4720_v50  ;;  %v4760_v5 = vld [vmem:[#allocation14 + $0x620] sm:$0xff] }
 0xd61   :  { %6979 = vmatpush1.bf16.msra.mxu1 %v6978_v53  ;;  %v7016_v53 = vpack.c.bf16 %v4727_v27, %v4725_v21  ;;  %v4762_v21 = vld [vmem:[#allocation14 + $0x630] sm:$0xff]  ;;  %v4765_v27 = vld [vmem:[#allocation14 + $0x648] sm:$0xff] }
 0xd62   :  { %6981 = vmatprep.subr.bf16.mxu1 %v6980_v16  ;;  %v4724_v16 = vld [vmem:[#allocation14 + $0x500] sm:$0xff] }
 0xd63   :  { %v7018_v51 = vpack.c.bf16 %v4726_v42, %v4724_v16  ;;  %v7054_v42 = vpack.c.bf16 %v4762_v21, %v4760_v5  ;;  %v4801_v5 = vld [vmem:[#allocation14 + $0x768] sm:$0xff]  ;;  %v4803_v21 = vld [vmem:[#allocation14 + $0x778] sm:$0xff] }
 0xd65   :  { %6983 = vmatpush1.bf16.msra.mxu1 %v6982_v23  ;;  %v7020_v23 = vpack.c.bf16 %v4731_v30, %v4729_v32  ;;  %v4764_v30 = vld [vmem:[#allocation14 + $0x640] sm:$0xff] }
 0xd66   :  { %6985 = vmatprep.subr.bf16.mxu1 %v6984_v45  ;;  %v4728_v45 = vld [vmem:[#allocation14 + $0x520] sm:$0xff] }
 0xd67   :  { %v7022_v57 = vpack.c.bf16 %v4730_v26, %v4728_v45  ;;  %v4771_v45 = vld [vmem:[#allocation14 + $0x678] sm:$0xff] }
 0xd68   :  { %4968 = vmatmul.mubr.f32.vlgmr.msra.gmra.mrb[14].mxu1 %v9884_v6  ;;  %v4736_v6 = vld [vmem:[#allocation14 + $0x560] sm:$0xff] }
 0xd69   :  { %6987 = vmatpush1.bf16.msra.mxu1 %v6986_v10  ;;  %5038 = vmatprep.mubr.f32.mxu1 %v9886_v58  ;;  %v7024_v10 = vpack.c.bf16 %v4735_v35, %v4733_v43  ;;  %v4741_v58 = vld [vmem:[#allocation14 + $0x588] sm:$0xff]  ;;  %v4768_v35 = vld [vmem:[#allocation14 + $0x660] sm:$0xff] }
 0xd6a   :  { %6989 = vmatprep.subr.bf16.mxu1 %v6988_v22  ;;  %v4732_v22 = vld [vmem:[#allocation14 + $0x540] sm:$0xff] }
 0xd6b   :  { %v7026_v20 = vpack.c.bf16 %v4734_v12, %v4732_v22  ;;  %v4775_v22 = vld [vmem:[#allocation14 + $0x698] sm:$0xff] }
 0xd6d   :  { %6991 = vmatpush1.bf16.msra.mxu1 %v6990_v49  ;;  %v4743_v49 = vld [vmem:[#allocation14 + $0x598] sm:$0xff] }
 0xd6e   :  { %6993 = vmatprep.subr.bf16.mxu1 %v6992_v31  ;;  %v7030_v31 = vpack.c.bf16 %v4738_v54, %v4736_v6  ;;  %v7032_v39 = vpack.c.bf16 %v4743_v49, %v4741_v58  ;;  %v4776_v54 = vld [vmem:[#allocation14 + $0x6a0] sm:$0xff]  ;;  %v4778_v58 = vld [vmem:[#allocation14 + $0x6b0] sm:$0xff]  ;;  %v4781_v49 = vld [vmem:[#allocation14 + $0x6c8] sm:$0xff] }
 0xd71   :  { %6995 = vmatpush1.bf16.msra.mxu1 %v6994_v4  ;;  %v4747_v4 = vld [vmem:[#allocation14 + $0x5b8] sm:$0xff] }
 0xd72   :  { %6997 = vmatprep.subr.bf16.mxu1 %v6996_v11  ;;  %v7034_v11 = vpack.c.bf16 %v4742_v28, %v4740_v47  ;;  %v7036_v0 = vpack.c.bf16 %v4747_v4, %v4745_v56  ;;  %v4780_v28 = vld [vmem:[#allocation14 + $0x6c0] sm:$0xff]  ;;  %v4782_v56 = vld [vmem:[#allocation14 + $0x6d0] sm:$0xff] }
 0xd75   :  { %6999 = vmatpush1.bf16.msra.mxu1 %v6998_v55  ;;  %v4751_v55 = vld [vmem:[#allocation14 + $0x5d8] sm:$0xff] }
 0xd76   :  { %7001 = vmatprep.subr.bf16.mxu1 %v7000_v59  ;;  %v7038_v59 = vpack.c.bf16 %v4746_v46, %v4744_v52  ;;  %v7040_v19 = vpack.c.bf16 %v4751_v55, %v4749_v34  ;;  %v7074_v34 = vpack.c.bf16 %v4782_v56, %v4780_v28  ;;  %v9889_v28 = vld [vmem:[#allocation24_spill] sm:$0xff] }
 0xd79   :  { %7003 = vmatpush1.bf16.msra.mxu1 %v7002_v25  ;;  %v4755_v25 = vld [vmem:[#allocation14 + $0x5f8] sm:$0xff] }
 0xd7a   :  { %7005 = vmatprep.subr.bf16.mxu1 %v7004_v24  ;;  %v7042_v24 = vpack.c.bf16 %v4750_v18, %v4748_v15  ;;  %v7044_v14 = vpack.c.bf16 %v4755_v25, %v4753_v33  ;;  %v4789_v18 = vld [vmem:[#allocation14 + $0x708] sm:$0xff]  ;;  %v4791_v33 = vld [vmem:[#allocation14 + $0x718] sm:$0xff] }
 0xd7d   :  { %7007 = vmatpush1.bf16.msra.mxu1 %v7006_v48  ;;  %v4759_v48 = vld [vmem:[#allocation14 + $0x618] sm:$0xff] }
 0xd7e   :  { %7009 = vmatprep.subr.bf16.mxu1 %v7008_v3  ;;  %v7046_v3 = vpack.c.bf16 %v4754_v2, %v4752_v41  ;;  %v7048_v36 = vpack.c.bf16 %v4759_v48, %v4757_v62  ;;  %v4790_v41 = vld [vmem:[#allocation14 + $0x710] sm:$0xff]  ;;  %v4793_v2 = vld [vmem:[#allocation14 + $0x728] sm:$0xff]  ;;  %v4795_v62 = vld [vmem:[#allocation14 + $0x738] sm:$0xff] }
 0xd81   :  { %7011 = vmatpush1.bf16.msra.mxu1 %v7010_v13  ;;  %v4763_v13 = vld [vmem:[#allocation14 + $0x638] sm:$0xff] }
 0xd82   :  { %7013 = vmatprep.subr.bf16.mxu1 %v7012_v17  ;;  %v7050_v17 = vpack.c.bf16 %v4758_v44, %v4756_v1  ;;  %v7052_v50 = vpack.c.bf16 %v4763_v13, %v4761_v40  ;;  %v4794_v1 = vld [vmem:[#allocation14 + $0x730] sm:$0xff]  ;;  %v4797_v44 = vld [vmem:[#allocation14 + $0x748] sm:$0xff]  ;;  %v4799_v40 = vld [vmem:[#allocation14 + $0x758] sm:$0xff] }
 0xd83   :  { %v7088_v13 = vpack.c.bf16 %v4799_v40, %v4797_v44 }
 0xd85   :  { %7015 = vmatpush1.bf16.msra.mxu1 %v7014_v60  ;;  %v4767_v60 = vld [vmem:[#allocation14 + $0x658] sm:$0xff] }
 0xd86   :  { %7017 = vmatprep.subr.bf16.mxu1 %v7016_v53  ;;  %v9887_v53 = vld [vmem:[#allocation84_spill] sm:$0xff]  ;;  %v7056_v32 = vpack.c.bf16 %v4767_v60, %v4765_v27  ;;  %v7092_v60 = vpack.c.bf16 %v4803_v21, %v4801_v5 }
 0xd87   :  { %v9888_v16 = vmax.f32 %v9887_v53, 0.0  ;;  %v4800_v53 = vld [vmem:[#allocation14 + $0x760] sm:$0xff] }
 0xd89   :  { %7019 = vmatpush1.bf16.msra.mxu1 %v7018_v51  ;;  %v4766_v51 = vld [vmem:[#allocation14 + $0x650] sm:$0xff] }
 0xd8a   :  { %7021 = vmatprep.subr.bf16.mxu1 %v7020_v23  ;;  %v4769_v23 = vld [vmem:[#allocation14 + $0x668] sm:$0xff]  ;;  %v7058_v26 = vpack.c.bf16 %v4766_v51, %v4764_v30 }
 0xd8b   :  { %v7060_v43 = vpack.c.bf16 %v4771_v45, %v4769_v23  ;;  %v4804_v23 = vld [vmem:[#allocation14 + $0x780] sm:$0xff]  ;;  %v4806_v45 = vld [vmem:[#allocation14 + $0x790] sm:$0xff] }
 0xd8d   :  { %7023 = vmatpush1.bf16.msra.mxu1 %v7022_v57  ;;  %v4770_v57 = vld [vmem:[#allocation14 + $0x670] sm:$0xff] }
 0xd8e   :  { %7025 = vmatprep.subr.bf16.mxu1 %v7024_v10  ;;  %v4773_v10 = vld [vmem:[#allocation14 + $0x688] sm:$0xff]  ;;  %v7062_v12 = vpack.c.bf16 %v4770_v57, %v4768_v35  ;;  %v7098_v35 = vpack.c.bf16 %v4806_v45, %v4804_v23 }
 0xd8f   :  { %v7064_v37 = vpack.c.bf16 %v4775_v22, %v4773_v10  ;;  %v4808_v10 = vld [vmem:[#allocation14 + $0x7a0] sm:$0xff]  ;;  %v4810_v22 = vld [vmem:[#allocation14 + $0x7b0] sm:$0xff] }
 0xd91   :  { %7027 = vmatpush1.bf16.msra.mxu1 %v7026_v20  ;;  %v4779_v20 = vld [vmem:[#allocation14 + $0x6b8] sm:$0xff] }
 0xd92   :  { %7029 = vmatprep.subr.bf16.mxu1 %v7028_v7  ;;  %v7068_v6 = vpack.c.bf16 %v4779_v20, %v4777_v61  ;;  %v4812_v61 = vld [vmem:[#allocation14 + $0x7c0] sm:$0xff]  ;;  %v4814_v20 = vld [vmem:[#allocation14 + $0x7d0] sm:$0xff] }
 0xd95   :  { %7031 = vmatpush1.bf16.msra.mxu1 %v7030_v31  ;;  %v4783_v31 = vld [vmem:[#allocation14 + $0x6d8] sm:$0xff] }
 0xd96   :  { %7033 = vmatprep.subr.bf16.mxu1 %v7032_v39  ;;  %v7070_v39 = vpack.c.bf16 %v4778_v58, %v4776_v54  ;;  %v7072_v47 = vpack.c.bf16 %v4783_v31, %v4781_v49  ;;  %v7106_v54 = vpack.c.bf16 %v4814_v20, %v4812_v61  ;;  %v4816_v49 = vld [vmem:[#allocation14 + $0x7e0] sm:$0xff]  ;;  %v4818_v31 = vld [vmem:[#allocation14 + $0x7f0] sm:$0xff] }
 0xd99   :  { %7035 = vmatpush1.bf16.msra.mxu1 %v7034_v11  ;;  %v4785_v11 = vld [vmem:[#allocation14 + $0x6e8] sm:$0xff] }
 0xd9a   :  { %7037 = vmatprep.subr.bf16.mxu1 %v7036_v0  ;;  %v4787_v0 = vld [vmem:[#allocation14 + $0x6f8] sm:$0xff] }
 0xd9b   :  { %v7076_v55 = vpack.c.bf16 %v4787_v0, %v4785_v11 }
 0xd9d   :  { %7039 = vmatpush1.bf16.msra.mxu1 %v7038_v59  ;;  %v4784_v59 = vld [vmem:[#allocation14 + $0x6e0] sm:$0xff] }
 0xd9e   :  { %7041 = vmatprep.subr.bf16.mxu1 %v7040_v19  ;;  %v4786_v19 = vld [vmem:[#allocation14 + $0x6f0] sm:$0xff] }
 0xd9f   :  { %v7078_v25 = vpack.c.bf16 %v4786_v19, %v4784_v59 }
 0xda1   :  { %7043 = vmatpush1.bf16.msra.mxu1 %v7042_v24  ;;  %v7080_v24 = vpack.c.bf16 %v4791_v33, %v4789_v18 }
 0xda2   :  { %7045 = vmatprep.subr.bf16.mxu1 %v7044_v14  ;;  %v4788_v14 = vld [vmem:[#allocation14 + $0x700] sm:$0xff] }
 0xda3   :  { %v7082_v48 = vpack.c.bf16 %v4790_v41, %v4788_v14 }
 0xda5   :  { %7047 = vmatpush1.bf16.msra.mxu1 %v7046_v3  ;;  %v7084_v3 = vpack.c.bf16 %v4795_v62, %v4793_v2 }
 0xda6   :  { %7049 = vmatprep.subr.bf16.mxu1 %v7048_v36  ;;  %v4792_v36 = vld [vmem:[#allocation14 + $0x720] sm:$0xff] }
 0xda8   :  { %5039 = vmatmul.mubr.f32.vlgmr.msra.gmra.mrb[14].mxu1 %v9888_v16  ;;  %v4802_v16 = vld [vmem:[#allocation14 + $0x770] sm:$0xff] }
 0xda9   :  { %7051 = vmatpush1.bf16.msra.mxu1 %v7050_v17  ;;  %5109 = vmatprep.mubr.f32.mxu1 %v4492_v9  ;;  %v4772_v9 = vld [vmem:[#allocation14 + $0x680] sm:$0xff]  ;;  %v7094_v30 = vpack.c.bf16 %v4802_v16, %v4800_v53 }
 0xdaa   :  { %7053 = vmatprep.subr.bf16.mxu1 %v7052_v50  ;;  %v7066_v7 = vpack.c.bf16 %v4774_v8, %v4772_v9  ;;  %v4796_v17 = vld [vmem:[#allocation14 + $0x740] sm:$0xff]  ;;  %v4798_v50 = vld [vmem:[#allocation14 + $0x750] sm:$0xff]  ;;  %v7102_v9 = vpack.c.bf16 %v4810_v22, %v4808_v10 }
 0xdab   :  { %v7090_v27 = vpack.c.bf16 %v4798_v50, %v4796_v17 }
 0xdad   :  { %7055 = vmatpush1.bf16.msra.mxu1 %v7054_v42  ;;  %v4805_v42 = vld [vmem:[#allocation14 + $0x788] sm:$0xff] }
 0xdae   :  { %7057 = vmatprep.subr.bf16.mxu1 %v7056_v32  ;;  %v4807_v32 = vld [vmem:[#allocation14 + $0x798] sm:$0xff] }
 0xdaf   :  { %v7096_v51 = vpack.c.bf16 %v4807_v32, %v4805_v42 }
 0xdb1   :  { %7059 = vmatpush1.bf16.msra.mxu1 %v7058_v26  ;;  %v4809_v26 = vld [vmem:[#allocation14 + $0x7a8] sm:$0xff] }
 0xdb2   :  { %7061 = vmatprep.subr.bf16.mxu1 %v7060_v43  ;;  %v4811_v43 = vld [vmem:[#allocation14 + $0x7b8] sm:$0xff] }
 0xdb3   :  { %v7100_v57 = vpack.c.bf16 %v4811_v43, %v4809_v26 }
 0xdb5   :  { %7063 = vmatpush1.bf16.msra.mxu1 %v7062_v12  ;;  %v4813_v12 = vld [vmem:[#allocation14 + $0x7c8] sm:$0xff] }
 0xdb6   :  { %7065 = vmatprep.subr.bf16.mxu1 %v7064_v37  ;;  %v4815_v37 = vld [vmem:[#allocation14 + $0x7d8] sm:$0xff] }
 0xdb7   :  { %v7104_v8 = vpack.c.bf16 %v4815_v37, %v4813_v12 }
 0xdb9   :  { %7067 = vmatpush1.bf16.msra.mxu1 %v7066_v7  ;;  %v4817_v7 = vld [vmem:[#allocation14 + $0x7e8] sm:$0xff] }
 0xdba   :  { %7069 = vmatprep.subr.bf16.mxu1 %v7068_v6  ;;  %v4819_v6 = vld [vmem:[#allocation14 + $0x7f8] sm:$0xff] }
 0xdbb   :  { %v5346_v4 = vpop.f32.mrb[12].mxu1  ;;  %v7108_v58 = vpack.c.bf16 %v4819_v6, %v4817_v7 }
 0xdbc   :  { %v5347_v52 = vpop.f32.mrb[13].mxu1 }
 0xdbd   :  { %v5348_v46 = vadd.f32 %v5347_v52, %v5346_v4  ;;  %7071 = vmatpush1.bf16.msra.mxu1 %v7070_v39  ;;  %v7110_v39 = vpack.c.bf16 %v4818_v31, %v4816_v49  ;;  %v9890_v4 = vld [vmem:[#allocation25_spill] sm:$0xff] }
 0xdbe   :  { %7073 = vmatprep.subr.bf16.mxu1 %v7072_v47  ;;  %v4820_v47 = vld [vmem:[%s9065_s12] sm:$0x3]  ;;  %s7399_s12 = scalar_lea.vmem %s5196_s18, 640 }
 0xdbf   :  { %v4560_v15 = vadd.f32 %v8981_v38, %v5348_v46  ;;  %v7086_v38 = vpack.c.bf16 %v4794_v1, %v4792_v36  ;;  %v4825_v56 = vrot.slane %v4820_v47, %v9889_v28  ;;  %v4829_v11 = vrot.slane %v4820_v47, %v9890_v4  ;;  %p7400_p2 = scmp.ne.s32.totalorder %s5196_s18, %s7399_s12  ;;  %p7405_p4 = scmp.lt.s32.totalorder %s7399_s12, %s7399_s12 }
 0xdc1   :  { %4563 = vst [vmem:[#allocation17 + $0x18] sm:$0xff] %v4560_v15  ;;  %7075 = vmatpush1.bf16.msra.mxu1 %v7074_v34  ;;  %p7406_p5 = por %p7405_p4, %p7404_p3 }
 0xdc2   :  { %7077 = vmatprep.subr.bf16.mxu1 %v7076_v55 }
 0xdc3   :  { %p7407_p6 = pnand %p7406_p5, %p7400_p2 }
 0xdc5   :  { %7079 = vmatpush1.bf16.msra.mxu1 %v7078_v25 }
 0xdc6   :  { %7081 = vmatprep.subr.bf16.mxu1 %v7080_v24 }
 0xdc9   :  { %7083 = vmatpush1.bf16.msra.mxu1 %v7082_v48 }
 0xdca   :  { %7085 = vmatprep.subr.bf16.mxu1 %v7084_v3 }
 0xdcd   :  { %7087 = vmatpush1.bf16.msra.mxu1 %v7086_v38 }
 0xdce   :  { %7089 = vmatprep.subr.bf16.mxu1 %v7088_v13 }
 0xdd1   :  { %7091 = vmatpush1.bf16.msra.mxu1 %v7090_v27 }
 0xdd2   :  { %7093 = vmatprep.subr.bf16.mxu1 %v7092_v60 }
 0xdd5   :  { %7095 = vmatpush1.bf16.msra.mxu1 %v7094_v30 }
 0xdd6   :  { %7097 = vmatprep.subr.bf16.mxu1 %v7096_v51 }
 0xdd9   :  { %7099 = vmatpush1.bf16.msra.mxu1 %v7098_v35 }
 0xdda   :  { %7101 = vmatprep.subr.bf16.mxu1 %v7100_v57 }
 0xddd   :  { %7103 = vmatpush1.bf16.msra.mxu1 %v7102_v9 }
 0xdde   :  { %7105 = vmatprep.subr.bf16.mxu1 %v7104_v8 }
 0xde1   :  { %7107 = vmatpush1.bf16.msra.mxu1 %v7106_v54 }
 0xde2   :  { %7109 = vmatprep.subr.bf16.mxu1 %v7108_v58 }
 0xde5   :  { %7111 = vmatpush1.bf16.msra.mxu1 %v7110_v39 }
 0xde8   :  { %5110 = vmatmul.mubr.f32.vlgmr.msra.gmra.mrb[14].mxu1 %v4491_v63  ;;  %v7200_v63 = vld [vmem:[%s9067_s14] ss:$0 sm:$0xff] }
 0xebb   :  { %v5111_v0 = vpop.f32.mrb[14].mxu1 }
 0xebc   :  { %v7154_v52 = vadd.f32 %v5111_v0, %v4825_v56  ;;  %v5113_v46 = vpop.f32.mrb[15].mxu1 }
 0xebd   :  { %v7155_v34 = vadd.f32 %v5113_v46, %v4829_v11 }
 0xebe   :  { %v5116_v59 = vmax.f32 %v7154_v52, 0.0 }
 0xebf   :  { %v5117_v55 = vmax.f32 %v7155_v34, 0.0 }
 0xec1   :  { %5182 = vmatprep.mubr.f32.mxu0 %v5117_v55 }
 0xec2   :  { %5183 = vmatmul.mubr.f32.vlgmr.msra.gmra.mrb[16].mxu0 %v5116_v59 }
 0xf95   :  { %v5381_v19 = vpop.f32.mrb[16].mxu0 }
 0xf96   :  { %v5382_v15 = vpop.f32.mrb[17].mxu0 }
 0xf97   :  { %v5383_v29 = vadd.f32 %v5382_v15, %v5381_v19 }
 0xf99   :  { %v5185_v18 = vadd.f32 %v7200_v63, %v5383_v29 }
 0xf9b   :  { %5188 = vst [vmem:[#allocation17 + $0x20] sm:$0xff] %v5185_v18 }
 0xf9c   :  { %7410 = shalt.err (!%p7407_p6)
}
 0xf9d   :  { %s7411_s26 = scalar_lea.hbm %s9068_s15, 640 }
 0xf9e   :  { %p7412_p7 = scmp.ne.s32.totalorder %s9068_s15, %s7411_s26  ;;  %p7415_p8 = scmp.lt.u32.totalorder %s7411_s26, %s9068_s15 }
 0xfa0   :  { %p7417_p9 = pnand %p7415_p8, %p7412_p7 }
 0xfa2   :  { %7420 = shalt.err (!%p7417_p9)
}
 0xfa3   :  { %5198 = dma.vmem_to_hbm [thread:$0]  %s5196_s18, 640, %s9068_s15, [#allocation4]  }
 0xfa4   :  { %7431 = dma.done.wait [#allocation4], 640  }
 0xfa5   :  { %7432 = vsyncadd [#allocation4], 4294966656 }
 0xfa6   :  { %5202 = vsyncpa [#allocation3], 1 }
 0xfa7   :  { %5203 = vsyncpa [#allocation6], 1 }
 0xfa8   :  { %5204 = vsyncpa [#allocation9], 1 }
 0xfa9   :  { %5205 = vsyncpa [#allocation12], 1 }
 0xfaa   :  { %5206 = vsyncpa [#allocation15], 1 }
 0xfab   :  { %5207 = vsyncpa [#allocation4], 1 }

</bundles_post_ra>
